<compile_context>
chip_gen: v7x
topology: tpu7x:2x2x1
jax: 0.10.0
libtpu: 0.0.40
codegen_flags: <defaults>
</compile_context>

<pallas_src>
import functools

import jax
import jax.numpy as jnp
from jax.experimental import pallas as pl
from jax.experimental.pallas import tpu as pltpu

THRESHOLD = 1.0  # snn.Leaky default threshold
_LANES = 128
_VMEM_LIMIT = 48 * 1024 * 1024  # explicit scoped-VMEM cap; safe on v5e/v6e/v7x


def _round_up(n, m):
    return (n + m - 1) // m * m


# ----------------------------------------------------------------------------
# LIF (snn.Leaky, init_hidden=True, reset='subtract'):
#   reset_t = (mem_{t-1} > thr); mem_t = beta*mem_{t-1} + in_t - reset_t*thr
#   spk_t   = (mem_t > thr)
# ----------------------------------------------------------------------------


def _conv_bn_lif_kernel(x_ref, w_ref, b_ref, o_ref, mem_ref, *, beta, H, W):
    """conv3x3 (in-kernel im2col) + folded tdBN + LIF for one batch element."""
    t = pl.program_id(1)
    ci = x_ref.shape[-1]
    co = w_ref.shape[-1]
    m = H * W

    @pl.when(t == 0)
    def _():
        mem_ref[...] = jnp.zeros_like(mem_ref)

    # 9 shifted-window bf16 matmuls accumulated in f32 (in-kernel im2col).
    acc = jnp.zeros((m, co), jnp.float32)
    for kh in range(3):
        for kw in range(3):
            patch = x_ref[0, 0, kh:kh + H, kw:kw + W, :].reshape(m, ci)
            acc = acc + jnp.dot(patch, w_ref[kh * 3 + kw],
                                preferred_element_type=jnp.float32)
    acc = acc + b_ref[...]

    mem_prev = mem_ref[...]
    reset = (mem_prev > THRESHOLD).astype(jnp.float32)
    mem = beta * mem_prev + acc - reset * THRESHOLD
    mem_ref[...] = mem
    o_ref[...] = (mem > THRESHOLD).astype(o_ref.dtype).reshape(1, 1, H, W, co)


def _conv_bn_lif_res_lif_kernel(s_ref, xid_ref, w_ref, b_ref, o_ref,
                                mem2_ref, mem3_ref, *, beta, H, W):
    """conv3x3 + folded tdBN + LIF2, then residual (identity) add + LIF3."""
    t = pl.program_id(1)
    ci = s_ref.shape[-1]
    co = w_ref.shape[-1]
    m = H * W

    @pl.when(t == 0)
    def _():
        mem2_ref[...] = jnp.zeros_like(mem2_ref)
        mem3_ref[...] = jnp.zeros_like(mem3_ref)

    acc = jnp.zeros((m, co), jnp.float32)
    for kh in range(3):
        for kw in range(3):
            patch = s_ref[0, 0, kh:kh + H, kw:kw + W, :].reshape(m, ci)
            acc = acc + jnp.dot(patch, w_ref[kh * 3 + kw],
                                preferred_element_type=jnp.float32)
    acc = acc + b_ref[...]

    # LIF2
    m2_prev = mem2_ref[...]
    r2 = (m2_prev > THRESHOLD).astype(jnp.float32)
    m2 = beta * m2_prev + acc - r2 * THRESHOLD
    mem2_ref[...] = m2
    s2 = (m2 > THRESHOLD).astype(jnp.float32)

    # Residual add (identity shortcut: interior of the padded original input) + LIF3
    ident = xid_ref[0, 0, 1:H + 1, 1:W + 1, :].reshape(m, ci).astype(jnp.float32)
    m3_prev = mem3_ref[...]
    r3 = (m3_prev > THRESHOLD).astype(jnp.float32)
    m3 = beta * m3_prev + (s2 + ident) - r3 * THRESHOLD
    mem3_ref[...] = m3
    o_ref[...] = (m3 > THRESHOLD).astype(o_ref.dtype).reshape(1, 1, H, W, co)


# ----------------------------------------------------------------------------
# pallas_call wrappers
# ----------------------------------------------------------------------------
def conv_bn_lif(xp, w, b, beta):
    """xp: [T, B, H+2, W+2, Ci] bf16 (zero halo, zero-padded channels)
       w : [9, Ci, Co] bf16 (BN folded), b: [1, Co] f32
       -> spikes [T, B, H, W, Co] bf16."""
    T, B, Hp, Wp, Ci = xp.shape
    H, W = Hp - 2, Wp - 2
    Co = w.shape[-1]
    kernel = functools.partial(_conv_bn_lif_kernel, beta=beta, H=H, W=W)
    return pl.pallas_call(
        kernel,
        out_shape=jax.ShapeDtypeStruct((T, B, H, W, Co), jnp.bfloat16),
        grid=(B, T),  # time innermost: membrane carry across T in VMEM scratch
        in_specs=[
            pl.BlockSpec((1, 1, Hp, Wp, Ci), lambda i, t: (t, i, 0, 0, 0)),
            pl.BlockSpec((9, Ci, Co), lambda i, t: (0, 0, 0)),
            pl.BlockSpec((1, Co), lambda i, t: (0, 0)),
        ],
        out_specs=pl.BlockSpec((1, 1, H, W, Co), lambda i, t: (t, i, 0, 0, 0)),
        scratch_shapes=[pltpu.VMEM((H * W, Co), jnp.float32)],
        compiler_params=pltpu.CompilerParams(
            dimension_semantics=("parallel", "arbitrary"),
            vmem_limit_bytes=_VMEM_LIMIT,
        ),
    )(xp, w, b)


def conv_bn_lif_res_lif(s1p, xp, w, b, beta):
    """s1p: [T, B, H+2, W+2, Ci] bf16 padded spikes from stage 1
       xp : [T, B, H+2, W+2, Ci] bf16 padded original input (identity shortcut)
       -> final spikes [T, B, H, W, Co] bf16."""
    T, B, Hp, Wp, Ci = s1p.shape
    H, W = Hp - 2, Wp - 2
    Co = w.shape[-1]
    kernel = functools.partial(_conv_bn_lif_res_lif_kernel, beta=beta, H=H, W=W)
    return pl.pallas_call(
        kernel,
        out_shape=jax.ShapeDtypeStruct((T, B, H, W, Co), jnp.bfloat16),
        grid=(B, T),
        in_specs=[
            pl.BlockSpec((1, 1, Hp, Wp, Ci), lambda i, t: (t, i, 0, 0, 0)),
            pl.BlockSpec((1, 1, Hp, Wp, Ci), lambda i, t: (t, i, 0, 0, 0)),
            pl.BlockSpec((9, Ci, Co), lambda i, t: (0, 0, 0)),
            pl.BlockSpec((1, Co), lambda i, t: (0, 0)),
        ],
        out_specs=pl.BlockSpec((1, 1, H, W, Co), lambda i, t: (t, i, 0, 0, 0)),
        scratch_shapes=[pltpu.VMEM((H * W, Co), jnp.float32),
                        pltpu.VMEM((H * W, Co), jnp.float32)],
        compiler_params=pltpu.CompilerParams(
            dimension_semantics=("parallel", "arbitrary"),
            vmem_limit_bytes=_VMEM_LIMIT,
        ),
    )(s1p, xp, w, b)


# ----------------------------------------------------------------------------
# Parameter setup glue
# ----------------------------------------------------------------------------
def fold_conv_bn(w_oihw, gamma, bn_bias, running_mean, running_var, alpha, eps=1e-5):
    """Fold eval-mode tdBN (scale alpha*gamma/sqrt(var+eps)) into conv weights.

    Returns w [9, Cin_pad, Cout_pad] bf16 (channels zero-padded to 128 lanes,
    taps ordered (kh, kw)) and bias [1, Cout_pad] f32.
    """
    cout, cin = w_oihw.shape[0], w_oihw.shape[1]
    cin_p, cout_p = _round_up(cin, _LANES), _round_up(cout, _LANES)
    scale = alpha * gamma / jnp.sqrt(running_var + eps)              # [Cout]
    w = jnp.transpose(w_oihw, (2, 3, 1, 0)) * scale                  # [3,3,Cin,Cout]
    w = jnp.pad(w, ((0, 0), (0, 0), (0, cin_p - cin), (0, cout_p - cout)))
    b = jnp.pad(bn_bias - running_mean * scale, (0, cout_p - cout))
    return (w.reshape(9, cin_p, cout_p).astype(jnp.bfloat16),
            b.reshape(1, cout_p).astype(jnp.float32))


def sresnet_block_forward(x_tbchw, params, beta):
    T, B, C, H, W = x_tbchw.shape
    cpad = _round_up(C, _LANES)

    # Channels-last, bf16 activations, spatial halo + lane padding (single pad).
    x_nhwc = jnp.transpose(x_tbchw, (0, 1, 3, 4, 2)).astype(jnp.bfloat16)
    xp = jnp.pad(x_nhwc, ((0, 0), (0, 0), (1, 1), (1, 1), (0, cpad - C)))

    # conv1 + tdBN1 + lif1 (fused)
    s1 = conv_bn_lif(xp, params["w1"], params["b1"], beta)          # [T,B,H,W,cpad]
    # TODO(synk): the spatial halo re-pad between the two convs is a separate XLA
    # pass; it could be folded into kernel 1's output window to save one HBM trip.
    s1p = jnp.pad(s1, ((0, 0), (0, 0), (1, 1), (1, 1), (0, 0)))

    # conv2 + tdBN2 + lif2 + identity shortcut + lif3 (fused)
    s3 = conv_bn_lif_res_lif(s1p, xp, params["w2"], params["b2"], beta)

    out = s3[..., :C].astype(jnp.float32)                           # [T,B,H,W,C]
    return jnp.transpose(out, (0, 1, 4, 2, 3))                      # [T,B,C,H,W]


if __name__ == "__main__":
    T, B, C, H, W = 4, 2, 8, 16, 16
    in_channels = out_channels = C
    stride = 1
    beta = 0.9

    key = jax.random.PRNGKey(0)
    kx, k1, k2 = jax.random.split(key, 3)
    x = jax.random.normal(kx, (T, B, C, H, W), jnp.float32)

    # Deterministic parameter init (synthetic, not a checkpoint load).
    w1 = jax.random.normal(k1, (out_channels, in_channels, 3, 3), jnp.float32) * 0.2
    w2 = jax.random.normal(k2, (out_channels, out_channels, 3, 3), jnp.float32) * 0.2
    gamma = jnp.ones((out_channels,), jnp.float32)
    bn_bias = jnp.zeros((out_channels,), jnp.float32)
    running_mean = jnp.zeros((out_channels,), jnp.float32)
    running_var = jnp.ones((out_channels,), jnp.float32)

    w1f, b1f = fold_conv_bn(w1, gamma, bn_bias, running_mean, running_var, alpha=1.0)
    w2f, b2f = fold_conv_bn(w2, gamma, bn_bias, running_mean, running_var,
                            alpha=1.0 / 2 ** 0.5)
    params = dict(w1=w1f, b1=b1f, w2=w2f, b2=b2f)

    fwd = jax.jit(functools.partial(sresnet_block_forward, beta=beta))
    out = jax.block_until_ready(fwd(x, params))

    assert out.shape == (T, B, C, H, W), out.shape
    assert bool(jnp.all((out == 0.0) | (out == 1.0))), "LIF output must be binary spikes"
    print("KERNEL_OK")
</pallas_src>

<mosaic_0001>
module attributes {stable_mosaic.version = 11 : i64} {
  func.func @_conv_bn_lif_kernel(%arg0: i32, %arg1: i32, %arg2: memref<1x1x18x18x128xbf16, #tpu.memory_space<vmem>>, %arg3: memref<9x128x128xbf16, #tpu.memory_space<vmem>>, %arg4: memref<1x128xf32, #tpu.memory_space<vmem>>, %arg5: memref<1x1x16x16x128xbf16, #tpu.memory_space<vmem>>, %arg6: memref<256x128xf32, #tpu.memory_space<vmem>>) attributes {dimension_semantics = [#tpu.dimension_semantics<parallel>, #tpu.dimension_semantics<arbitrary>], iteration_bounds = array<i64: 2, 4>, scalar_prefetch = 0 : i64, scratch_operands = 1 : i64, tpu.core_type = #tpu.core_type<tc>, window_params = [{transform_indices = @transform_0, window_bounds = array<i64: 1, 1, 18, 18, 128>}, {pipeline_mode = #tpu.pipeline_mode<synchronous>, transform_indices = @transform_1, window_bounds = array<i64: 9, 128, 128>}, {pipeline_mode = #tpu.pipeline_mode<synchronous>, transform_indices = @transform_2, window_bounds = array<i64: 1, 128>}, {transform_indices = @transform_3, window_bounds = array<i64: 1, 1, 16, 16, 128>}]} {
    %c0_i32 = arith.constant 0 : i32
    %0 = arith.cmpi eq, %arg1, %c0_i32 : i32
    %1 = arith.extui %0 : i1 to i32
    %c0_i32_0 = arith.constant 0 : i32
    %2 = arith.cmpi ne, %1, %c0_i32_0 : i32
    scf.if %2 {
      %cst_88 = arith.constant 0.000000e+00 : f32
      %89 = vector.broadcast %cst_88 : f32 to vector<256x128xf32>
      %c0_89 = arith.constant 0 : index
      %c0_90 = arith.constant 0 : index
      %90 = vector.load %arg6[%c0_89, %c0_90] : memref<256x128xf32, #tpu.memory_space<vmem>>, vector<256x128xf32>
      tpu.vector_store %arg6[%c0_89, %c0_90], %89 {strides = array<i32>} : memref<256x128xf32, #tpu.memory_space<vmem>>, vector<256x128xf32>,
    } else {
    }
    %cst = arith.constant 0.000000e+00 : f32
    %3 = vector.broadcast %cst : f32 to vector<256x128xf32>
    %c0 = arith.constant 0 : index
    %c0_1 = arith.constant 0 : index
    %c0_2 = arith.constant 0 : index
    %c0_3 = arith.constant 0 : index
    %c0_4 = arith.constant 0 : index
    %4 = vector.load %arg2[%c0, %c0_1, %c0_2, %c0_3, %c0_4] : memref<1x1x18x18x128xbf16, #tpu.memory_space<vmem>>, vector<1x1x16x16x128xbf16>
    %5 = vector.shape_cast %4 : vector<1x1x16x16x128xbf16> to vector<16x16x128xbf16>
    %6 = vector.shape_cast %5 : vector<16x16x128xbf16> to vector<256x128xbf16>
    %c0_5 = arith.constant 0 : index
    %c0_6 = arith.constant 0 : index
    %c0_7 = arith.constant 0 : index
    %7 = vector.load %arg3[%c0_5, %c0_6, %c0_7] : memref<9x128x128xbf16, #tpu.memory_space<vmem>>, vector<1x128x128xbf16>
    %8 = vector.shape_cast %7 : vector<1x128x128xbf16> to vector<128x128xbf16>
    %cst_8 = arith.constant dense<0.000000e+00> : vector<256x128xf32>
    %9 = tpu.matmul %6, %8, %cst_8 {dimension_numbers = #tpu.dot_dimension_numbers<[1], [0], [0], [1], [0, 0, 1, 1], [], []>} : vector<256x128xbf16>, vector<128x128xbf16>, vector<256x128xf32> -> vector<256x128xf32>
    %10 = arith.addf %3, %9 : vector<256x128xf32>
    %c0_9 = arith.constant 0 : index
    %c0_10 = arith.constant 0 : index
    %c0_11 = arith.constant 0 : index
    %c1 = arith.constant 1 : index
    %c0_12 = arith.constant 0 : index
    %11 = vector.load %arg2[%c0_9, %c0_10, %c0_11, %c1, %c0_12] : memref<1x1x18x18x128xbf16, #tpu.memory_space<vmem>>, vector<1x1x16x16x128xbf16>
    %12 = vector.shape_cast %11 : vector<1x1x16x16x128xbf16> to vector<16x16x128xbf16>
    %13 = vector.shape_cast %12 : vector<16x16x128xbf16> to vector<256x128xbf16>
    %c1_13 = arith.constant 1 : index
    %c0_14 = arith.constant 0 : index
    %c0_15 = arith.constant 0 : index
    %14 = vector.load %arg3[%c1_13, %c0_14, %c0_15] : memref<9x128x128xbf16, #tpu.memory_space<vmem>>, vector<1x128x128xbf16>
    %15 = vector.shape_cast %14 : vector<1x128x128xbf16> to vector<128x128xbf16>
    %cst_16 = arith.constant dense<0.000000e+00> : vector<256x128xf32>
    %16 = tpu.matmul %13, %15, %cst_16 {dimension_numbers = #tpu.dot_dimension_numbers<[1], [0], [0], [1], [0, 0, 1, 1], [], []>} : vector<256x128xbf16>, vector<128x128xbf16>, vector<256x128xf32> -> vector<256x128xf32>
    %17 = arith.addf %10, %16 : vector<256x128xf32>
    %c0_17 = arith.constant 0 : index
    %c0_18 = arith.constant 0 : index
    %c0_19 = arith.constant 0 : index
    %c2 = arith.constant 2 : index
    %c0_20 = arith.constant 0 : index
    %18 = vector.load %arg2[%c0_17, %c0_18, %c0_19, %c2, %c0_20] : memref<1x1x18x18x128xbf16, #tpu.memory_space<vmem>>, vector<1x1x16x16x128xbf16>
    %19 = vector.shape_cast %18 : vector<1x1x16x16x128xbf16> to vector<16x16x128xbf16>
    %20 = vector.shape_cast %19 : vector<16x16x128xbf16> to vector<256x128xbf16>
    %c2_21 = arith.constant 2 : index
    %c0_22 = arith.constant 0 : index
    %c0_23 = arith.constant 0 : index
    %21 = vector.load %arg3[%c2_21, %c0_22, %c0_23] : memref<9x128x128xbf16, #tpu.memory_space<vmem>>, vector<1x128x128xbf16>
    %22 = vector.shape_cast %21 : vector<1x128x128xbf16> to vector<128x128xbf16>
    %cst_24 = arith.constant dense<0.000000e+00> : vector<256x128xf32>
    %23 = tpu.matmul %20, %22, %cst_24 {dimension_numbers = #tpu.dot_dimension_numbers<[1], [0], [0], [1], [0, 0, 1, 1], [], []>} : vector<256x128xbf16>, vector<128x128xbf16>, vector<256x128xf32> -> vector<256x128xf32>
    %24 = arith.addf %17, %23 : vector<256x128xf32>
    %c0_25 = arith.constant 0 : index
    %c0_26 = arith.constant 0 : index
    %c1_27 = arith.constant 1 : index
    %c0_28 = arith.constant 0 : index
    %c0_29 = arith.constant 0 : index
    %25 = vector.load %arg2[%c0_25, %c0_26, %c1_27, %c0_28, %c0_29] : memref<1x1x18x18x128xbf16, #tpu.memory_space<vmem>>, vector<1x1x16x16x128xbf16>
    %26 = vector.shape_cast %25 : vector<1x1x16x16x128xbf16> to vector<16x16x128xbf16>
    %27 = vector.shape_cast %26 : vector<16x16x128xbf16> to vector<256x128xbf16>
    %c3 = arith.constant 3 : index
    %c0_30 = arith.constant 0 : index
    %c0_31 = arith.constant 0 : index
    %28 = vector.load %arg3[%c3, %c0_30, %c0_31] : memref<9x128x128xbf16, #tpu.memory_space<vmem>>, vector<1x128x128xbf16>
    %29 = vector.shape_cast %28 : vector<1x128x128xbf16> to vector<128x128xbf16>
    %cst_32 = arith.constant dense<0.000000e+00> : vector<256x128xf32>
    %30 = tpu.matmul %27, %29, %cst_32 {dimension_numbers = #tpu.dot_dimension_numbers<[1], [0], [0], [1], [0, 0, 1, 1], [], []>} : vector<256x128xbf16>, vector<128x128xbf16>, vector<256x128xf32> -> vector<256x128xf32>
    %31 = arith.addf %24, %30 : vector<256x128xf32>
    %c0_33 = arith.constant 0 : index
    %c0_34 = arith.constant 0 : index
    %c1_35 = arith.constant 1 : index
    %c1_36 = arith.constant 1 : index
    %c0_37 = arith.constant 0 : index
    %32 = vector.load %arg2[%c0_33, %c0_34, %c1_35, %c1_36, %c0_37] : memref<1x1x18x18x128xbf16, #tpu.memory_space<vmem>>, vector<1x1x16x16x128xbf16>
    %33 = vector.shape_cast %32 : vector<1x1x16x16x128xbf16> to vector<16x16x128xbf16>
    %34 = vector.shape_cast %33 : vector<16x16x128xbf16> to vector<256x128xbf16>
    %c4 = arith.constant 4 : index
    %c0_38 = arith.constant 0 : index
    %c0_39 = arith.constant 0 : index
    %35 = vector.load %arg3[%c4, %c0_38, %c0_39] : memref<9x128x128xbf16, #tpu.memory_space<vmem>>, vector<1x128x128xbf16>
    %36 = vector.shape_cast %35 : vector<1x128x128xbf16> to vector<128x128xbf16>
    %cst_40 = arith.constant dense<0.000000e+00> : vector<256x128xf32>
    %37 = tpu.matmul %34, %36, %cst_40 {dimension_numbers = #tpu.dot_dimension_numbers<[1], [0], [0], [1], [0, 0, 1, 1], [], []>} : vector<256x128xbf16>, vector<128x128xbf16>, vector<256x128xf32> -> vector<256x128xf32>
    %38 = arith.addf %31, %37 : vector<256x128xf32>
    %c0_41 = arith.constant 0 : index
    %c0_42 = arith.constant 0 : index
    %c1_43 = arith.constant 1 : index
    %c2_44 = arith.constant 2 : index
    %c0_45 = arith.constant 0 : index
    %39 = vector.load %arg2[%c0_41, %c0_42, %c1_43, %c2_44, %c0_45] : memref<1x1x18x18x128xbf16, #tpu.memory_space<vmem>>, vector<1x1x16x16x128xbf16>
    %40 = vector.shape_cast %39 : vector<1x1x16x16x128xbf16> to vector<16x16x128xbf16>
    %41 = vector.shape_cast %40 : vector<16x16x128xbf16> to vector<256x128xbf16>
    %c5 = arith.constant 5 : index
    %c0_46 = arith.constant 0 : index
    %c0_47 = arith.constant 0 : index
    %42 = vector.load %arg3[%c5, %c0_46, %c0_47] : memref<9x128x128xbf16, #tpu.memory_space<vmem>>, vector<1x128x128xbf16>
    %43 = vector.shape_cast %42 : vector<1x128x128xbf16> to vector<128x128xbf16>
    %cst_48 = arith.constant dense<0.000000e+00> : vector<256x128xf32>
    %44 = tpu.matmul %41, %43, %cst_48 {dimension_numbers = #tpu.dot_dimension_numbers<[1], [0], [0], [1], [0, 0, 1, 1], [], []>} : vector<256x128xbf16>, vector<128x128xbf16>, vector<256x128xf32> -> vector<256x128xf32>
    %45 = arith.addf %38, %44 : vector<256x128xf32>
    %c0_49 = arith.constant 0 : index
    %c0_50 = arith.constant 0 : index
    %c2_51 = arith.constant 2 : index
    %c0_52 = arith.constant 0 : index
    %c0_53 = arith.constant 0 : index
    %46 = vector.load %arg2[%c0_49, %c0_50, %c2_51, %c0_52, %c0_53] : memref<1x1x18x18x128xbf16, #tpu.memory_space<vmem>>, vector<1x1x16x16x128xbf16>
    %47 = vector.shape_cast %46 : vector<1x1x16x16x128xbf16> to vector<16x16x128xbf16>
    %48 = vector.shape_cast %47 : vector<16x16x128xbf16> to vector<256x128xbf16>
    %c6 = arith.constant 6 : index
    %c0_54 = arith.constant 0 : index
    %c0_55 = arith.constant 0 : index
    %49 = vector.load %arg3[%c6, %c0_54, %c0_55] : memref<9x128x128xbf16, #tpu.memory_space<vmem>>, vector<1x128x128xbf16>
    %50 = vector.shape_cast %49 : vector<1x128x128xbf16> to vector<128x128xbf16>
    %cst_56 = arith.constant dense<0.000000e+00> : vector<256x128xf32>
    %51 = tpu.matmul %48, %50, %cst_56 {dimension_numbers = #tpu.dot_dimension_numbers<[1], [0], [0], [1], [0, 0, 1, 1], [], []>} : vector<256x128xbf16>, vector<128x128xbf16>, vector<256x128xf32> -> vector<256x128xf32>
    %52 = arith.addf %45, %51 : vector<256x128xf32>
    %c0_57 = arith.constant 0 : index
    %c0_58 = arith.constant 0 : index
    %c2_59 = arith.constant 2 : index
    %c1_60 = arith.constant 1 : index
    %c0_61 = arith.constant 0 : index
    %53 = vector.load %arg2[%c0_57, %c0_58, %c2_59, %c1_60, %c0_61] : memref<1x1x18x18x128xbf16, #tpu.memory_space<vmem>>, vector<1x1x16x16x128xbf16>
    %54 = vector.shape_cast %53 : vector<1x1x16x16x128xbf16> to vector<16x16x128xbf16>
    %55 = vector.shape_cast %54 : vector<16x16x128xbf16> to vector<256x128xbf16>
    %c7 = arith.constant 7 : index
    %c0_62 = arith.constant 0 : index
    %c0_63 = arith.constant 0 : index
    %56 = vector.load %arg3[%c7, %c0_62, %c0_63] : memref<9x128x128xbf16, #tpu.memory_space<vmem>>, vector<1x128x128xbf16>
    %57 = vector.shape_cast %56 : vector<1x128x128xbf16> to vector<128x128xbf16>
    %cst_64 = arith.constant dense<0.000000e+00> : vector<256x128xf32>
    %58 = tpu.matmul %55, %57, %cst_64 {dimension_numbers = #tpu.dot_dimension_numbers<[1], [0], [0], [1], [0, 0, 1, 1], [], []>} : vector<256x128xbf16>, vector<128x128xbf16>, vector<256x128xf32> -> vector<256x128xf32>
    %59 = arith.addf %52, %58 : vector<256x128xf32>
    %c0_65 = arith.constant 0 : index
    %c0_66 = arith.constant 0 : index
    %c2_67 = arith.constant 2 : index
    %c2_68 = arith.constant 2 : index
    %c0_69 = arith.constant 0 : index
    %60 = vector.load %arg2[%c0_65, %c0_66, %c2_67, %c2_68, %c0_69] : memref<1x1x18x18x128xbf16, #tpu.memory_space<vmem>>, vector<1x1x16x16x128xbf16>
    %61 = vector.shape_cast %60 : vector<1x1x16x16x128xbf16> to vector<16x16x128xbf16>
    %62 = vector.shape_cast %61 : vector<16x16x128xbf16> to vector<256x128xbf16>
    %c8 = arith.constant 8 : index
    %c0_70 = arith.constant 0 : index
    %c0_71 = arith.constant 0 : index
    %63 = vector.load %arg3[%c8, %c0_70, %c0_71] : memref<9x128x128xbf16, #tpu.memory_space<vmem>>, vector<1x128x128xbf16>
    %64 = vector.shape_cast %63 : vector<1x128x128xbf16> to vector<128x128xbf16>
    %cst_72 = arith.constant dense<0.000000e+00> : vector<256x128xf32>
    %65 = tpu.matmul %62, %64, %cst_72 {dimension_numbers = #tpu.dot_dimension_numbers<[1], [0], [0], [1], [0, 0, 1, 1], [], []>} : vector<256x128xbf16>, vector<128x128xbf16>, vector<256x128xf32> -> vector<256x128xf32>
    %66 = arith.addf %59, %65 : vector<256x128xf32>
    %c0_73 = arith.constant 0 : index
    %c0_74 = arith.constant 0 : index
    %67 = vector.load %arg4[%c0_73, %c0_74] : memref<1x128xf32, #tpu.memory_space<vmem>>, vector<1x128xf32>
    %68 = vector.broadcast %67 : vector<1x128xf32> to vector<256x128xf32>
    %69 = arith.addf %66, %68 : vector<256x128xf32>
    %c0_75 = arith.constant 0 : index
    %c0_76 = arith.constant 0 : index
    %70 = vector.load %arg6[%c0_75, %c0_76] : memref<256x128xf32, #tpu.memory_space<vmem>>, vector<256x128xf32>
    %cst_77 = arith.constant 1.000000e+00 : f32
    %71 = vector.broadcast %cst_77 : f32 to vector<256x128xf32>
    %72 = arith.cmpf ogt, %70, %71 : vector<256x128xf32>
    %73 = arith.extui %72 : vector<256x128xi1> to vector<256x128xi32>
    %74 = arith.sitofp %73 : vector<256x128xi32> to vector<256x128xf32>
    %cst_78 = arith.constant 0.899999976 : f32
    %75 = vector.broadcast %cst_78 : f32 to vector<256x128xf32>
    %76 = arith.mulf %75, %70 : vector<256x128xf32>
    %77 = arith.addf %76, %69 : vector<256x128xf32>
    %cst_79 = arith.constant 1.000000e+00 : f32
    %78 = vector.broadcast %cst_79 : f32 to vector<256x128xf32>
    %79 = arith.mulf %74, %78 : vector<256x128xf32>
    %80 = arith.subf %77, %79 : vector<256x128xf32>
    %c0_80 = arith.constant 0 : index
    %c0_81 = arith.constant 0 : index
    %81 = vector.load %arg6[%c0_80, %c0_81] : memref<256x128xf32, #tpu.memory_space<vmem>>, vector<256x128xf32>
    tpu.vector_store %arg6[%c0_80, %c0_81], %80 {strides = array<i32>} : memref<256x128xf32, #tpu.memory_space<vmem>>, vector<256x128xf32>,
    %cst_82 = arith.constant 1.000000e+00 : f32
    %82 = vector.broadcast %cst_82 : f32 to vector<256x128xf32>
    %83 = arith.cmpf ogt, %80, %82 : vector<256x128xf32>
    %84 = arith.extui %83 : vector<256x128xi1> to vector<256x128xi32>
    %85 = arith.sitofp %84 : vector<256x128xi32> to vector<256x128xf32>
    %86 = arith.truncf %85 : vector<256x128xf32> to vector<256x128xbf16>
    %87 = vector.shape_cast %86 : vector<256x128xbf16> to vector<1x1x16x16x128xbf16>
    %c0_83 = arith.constant 0 : index
    %c0_84 = arith.constant 0 : index
    %c0_85 = arith.constant 0 : index
    %c0_86 = arith.constant 0 : index
    %c0_87 = arith.constant 0 : index
    %88 = vector.load %arg5[%c0_83, %c0_84, %c0_85, %c0_86, %c0_87] : memref<1x1x16x16x128xbf16, #tpu.memory_space<vmem>>, vector<1x1x16x16x128xbf16>
    tpu.vector_store %arg5[%c0_83, %c0_84, %c0_85, %c0_86, %c0_87], %87 {strides = array<i32>} : memref<1x1x16x16x128xbf16, #tpu.memory_space<vmem>>, vector<1x1x16x16x128xbf16>,
    return
  }
  func.func @transform_0(%arg0: i32, %arg1: i32) -> (i32, i32, i32, i32, i32) {
    %c0_i32 = arith.constant 0 : i32
    %c0_i32_0 = arith.constant 0 : i32
    %c0_i32_1 = arith.constant 0 : i32
    %c0_i32_2 = arith.constant 0 : i32
    return %arg1, %arg0, %c0_i32, %c0_i32_0, %c0_i32_1 : i32, i32, i32, i32, i32
  }
  func.func @transform_1(%arg0: i32, %arg1: i32) -> (i32, i32, i32) {
    %c0_i32 = arith.constant 0 : i32
    %c0_i32_0 = arith.constant 0 : i32
    %c0_i32_1 = arith.constant 0 : i32
    %c0_i32_2 = arith.constant 0 : i32
    return %c0_i32, %c0_i32_0, %c0_i32_1 : i32, i32, i32
  }
  func.func @transform_2(%arg0: i32, %arg1: i32) -> (i32, i32) {
    %c0_i32 = arith.constant 0 : i32
    %c0_i32_0 = arith.constant 0 : i32
    %c0_i32_1 = arith.constant 0 : i32
    return %c0_i32, %c0_i32_0 : i32, i32
  }
  func.func @transform_3(%arg0: i32, %arg1: i32) -> (i32, i32, i32, i32, i32) {
    %c0_i32 = arith.constant 0 : i32
    %c0_i32_0 = arith.constant 0 : i32
    %c0_i32_1 = arith.constant 0 : i32
    %c0_i32_2 = arith.constant 0 : i32
    return %arg1, %arg0, %c0_i32, %c0_i32_0, %c0_i32_1 : i32, i32, i32, i32, i32
  }
}

module attributes {stable_mosaic.version = 11 : i64} {
  func.func @_conv_bn_lif_res_lif_kernel(%arg0: i32, %arg1: i32, %arg2: memref<1x1x18x18x128xbf16, #tpu.memory_space<vmem>>, %arg3: memref<1x1x18x18x128xbf16, #tpu.memory_space<vmem>>, %arg4: memref<9x128x128xbf16, #tpu.memory_space<vmem>>, %arg5: memref<1x128xf32, #tpu.memory_space<vmem>>, %arg6: memref<1x1x16x16x128xbf16, #tpu.memory_space<vmem>>, %arg7: memref<256x128xf32, #tpu.memory_space<vmem>>, %arg8: memref<256x128xf32, #tpu.memory_space<vmem>>) attributes {dimension_semantics = [#tpu.dimension_semantics<parallel>, #tpu.dimension_semantics<arbitrary>], iteration_bounds = array<i64: 2, 4>, scalar_prefetch = 0 : i64, scratch_operands = 2 : i64, tpu.core_type = #tpu.core_type<tc>, window_params = [{transform_indices = @transform_0, window_bounds = array<i64: 1, 1, 18, 18, 128>}, {transform_indices = @transform_1, window_bounds = array<i64: 1, 1, 18, 18, 128>}, {pipeline_mode = #tpu.pipeline_mode<synchronous>, transform_indices = @transform_2, window_bounds = array<i64: 9, 128, 128>}, {pipeline_mode = #tpu.pipeline_mode<synchronous>, transform_indices = @transform_3, window_bounds = array<i64: 1, 128>}, {transform_indices = @transform_4, window_bounds = array<i64: 1, 1, 16, 16, 128>}]} {
    %c0_i32 = arith.constant 0 : i32
    %0 = arith.cmpi eq, %arg1, %c0_i32 : i32
    %1 = arith.extui %0 : i1 to i32
    %c0_i32_0 = arith.constant 0 : i32
    %2 = arith.cmpi ne, %1, %c0_i32_0 : i32
    scf.if %2 {
      %cst_101 = arith.constant 0.000000e+00 : f32
      %110 = vector.broadcast %cst_101 : f32 to vector<256x128xf32>
      %c0_102 = arith.constant 0 : index
      %c0_103 = arith.constant 0 : index
      %111 = vector.load %arg7[%c0_102, %c0_103] : memref<256x128xf32, #tpu.memory_space<vmem>>, vector<256x128xf32>
      tpu.vector_store %arg7[%c0_102, %c0_103], %110 {strides = array<i32>} : memref<256x128xf32, #tpu.memory_space<vmem>>, vector<256x128xf32>,
      %cst_104 = arith.constant 0.000000e+00 : f32
      %112 = vector.broadcast %cst_104 : f32 to vector<256x128xf32>
      %c0_105 = arith.constant 0 : index
      %c0_106 = arith.constant 0 : index
      %113 = vector.load %arg8[%c0_105, %c0_106] : memref<256x128xf32, #tpu.memory_space<vmem>>, vector<256x128xf32>
      tpu.vector_store %arg8[%c0_105, %c0_106], %112 {strides = array<i32>} : memref<256x128xf32, #tpu.memory_space<vmem>>, vector<256x128xf32>,
    } else {
    }
    %cst = arith.constant 0.000000e+00 : f32
    %3 = vector.broadcast %cst : f32 to vector<256x128xf32>
    %c0 = arith.constant 0 : index
    %c0_1 = arith.constant 0 : index
    %c0_2 = arith.constant 0 : index
    %c0_3 = arith.constant 0 : index
    %c0_4 = arith.constant 0 : index
    %4 = vector.load %arg2[%c0, %c0_1, %c0_2, %c0_3, %c0_4] : memref<1x1x18x18x128xbf16, #tpu.memory_space<vmem>>, vector<1x1x16x16x128xbf16>
    %5 = vector.shape_cast %4 : vector<1x1x16x16x128xbf16> to vector<16x16x128xbf16>
    %6 = vector.shape_cast %5 : vector<16x16x128xbf16> to vector<256x128xbf16>
    %c0_5 = arith.constant 0 : index
    %c0_6 = arith.constant 0 : index
    %c0_7 = arith.constant 0 : index
    %7 = vector.load %arg4[%c0_5, %c0_6, %c0_7] : memref<9x128x128xbf16, #tpu.memory_space<vmem>>, vector<1x128x128xbf16>
    %8 = vector.shape_cast %7 : vector<1x128x128xbf16> to vector<128x128xbf16>
    %cst_8 = arith.constant dense<0.000000e+00> : vector<256x128xf32>
    %9 = tpu.matmul %6, %8, %cst_8 {dimension_numbers = #tpu.dot_dimension_numbers<[1], [0], [0], [1], [0, 0, 1, 1], [], []>} : vector<256x128xbf16>, vector<128x128xbf16>, vector<256x128xf32> -> vector<256x128xf32>
    %10 = arith.addf %3, %9 : vector<256x128xf32>
    %c0_9 = arith.constant 0 : index
    %c0_10 = arith.constant 0 : index
    %c0_11 = arith.constant 0 : index
    %c1 = arith.constant 1 : index
    %c0_12 = arith.constant 0 : index
    %11 = vector.load %arg2[%c0_9, %c0_10, %c0_11, %c1, %c0_12] : memref<1x1x18x18x128xbf16, #tpu.memory_space<vmem>>, vector<1x1x16x16x128xbf16>
    %12 = vector.shape_cast %11 : vector<1x1x16x16x128xbf16> to vector<16x16x128xbf16>
    %13 = vector.shape_cast %12 : vector<16x16x128xbf16> to vector<256x128xbf16>
    %c1_13 = arith.constant 1 : index
    %c0_14 = arith.constant 0 : index
    %c0_15 = arith.constant 0 : index
    %14 = vector.load %arg4[%c1_13, %c0_14, %c0_15] : memref<9x128x128xbf16, #tpu.memory_space<vmem>>, vector<1x128x128xbf16>
    %15 = vector.shape_cast %14 : vector<1x128x128xbf16> to vector<128x128xbf16>
    %cst_16 = arith.constant dense<0.000000e+00> : vector<256x128xf32>
    %16 = tpu.matmul %13, %15, %cst_16 {dimension_numbers = #tpu.dot_dimension_numbers<[1], [0], [0], [1], [0, 0, 1, 1], [], []>} : vector<256x128xbf16>, vector<128x128xbf16>, vector<256x128xf32> -> vector<256x128xf32>
    %17 = arith.addf %10, %16 : vector<256x128xf32>
    %c0_17 = arith.constant 0 : index
    %c0_18 = arith.constant 0 : index
    %c0_19 = arith.constant 0 : index
    %c2 = arith.constant 2 : index
    %c0_20 = arith.constant 0 : index
    %18 = vector.load %arg2[%c0_17, %c0_18, %c0_19, %c2, %c0_20] : memref<1x1x18x18x128xbf16, #tpu.memory_space<vmem>>, vector<1x1x16x16x128xbf16>
    %19 = vector.shape_cast %18 : vector<1x1x16x16x128xbf16> to vector<16x16x128xbf16>
    %20 = vector.shape_cast %19 : vector<16x16x128xbf16> to vector<256x128xbf16>
    %c2_21 = arith.constant 2 : index
    %c0_22 = arith.constant 0 : index
    %c0_23 = arith.constant 0 : index
    %21 = vector.load %arg4[%c2_21, %c0_22, %c0_23] : memref<9x128x128xbf16, #tpu.memory_space<vmem>>, vector<1x128x128xbf16>
    %22 = vector.shape_cast %21 : vector<1x128x128xbf16> to vector<128x128xbf16>
    %cst_24 = arith.constant dense<0.000000e+00> : vector<256x128xf32>
    %23 = tpu.matmul %20, %22, %cst_24 {dimension_numbers = #tpu.dot_dimension_numbers<[1], [0], [0], [1], [0, 0, 1, 1], [], []>} : vector<256x128xbf16>, vector<128x128xbf16>, vector<256x128xf32> -> vector<256x128xf32>
    %24 = arith.addf %17, %23 : vector<256x128xf32>
    %c0_25 = arith.constant 0 : index
    %c0_26 = arith.constant 0 : index
    %c1_27 = arith.constant 1 : index
    %c0_28 = arith.constant 0 : index
    %c0_29 = arith.constant 0 : index
    %25 = vector.load %arg2[%c0_25, %c0_26, %c1_27, %c0_28, %c0_29] : memref<1x1x18x18x128xbf16, #tpu.memory_space<vmem>>, vector<1x1x16x16x128xbf16>
    %26 = vector.shape_cast %25 : vector<1x1x16x16x128xbf16> to vector<16x16x128xbf16>
    %27 = vector.shape_cast %26 : vector<16x16x128xbf16> to vector<256x128xbf16>
    %c3 = arith.constant 3 : index
    %c0_30 = arith.constant 0 : index
    %c0_31 = arith.constant 0 : index
    %28 = vector.load %arg4[%c3, %c0_30, %c0_31] : memref<9x128x128xbf16, #tpu.memory_space<vmem>>, vector<1x128x128xbf16>
    %29 = vector.shape_cast %28 : vector<1x128x128xbf16> to vector<128x128xbf16>
    %cst_32 = arith.constant dense<0.000000e+00> : vector<256x128xf32>
    %30 = tpu.matmul %27, %29, %cst_32 {dimension_numbers = #tpu.dot_dimension_numbers<[1], [0], [0], [1], [0, 0, 1, 1], [], []>} : vector<256x128xbf16>, vector<128x128xbf16>, vector<256x128xf32> -> vector<256x128xf32>
    %31 = arith.addf %24, %30 : vector<256x128xf32>
    %c0_33 = arith.constant 0 : index
    %c0_34 = arith.constant 0 : index
    %c1_35 = arith.constant 1 : index
    %c1_36 = arith.constant 1 : index
    %c0_37 = arith.constant 0 : index
    %32 = vector.load %arg2[%c0_33, %c0_34, %c1_35, %c1_36, %c0_37] : memref<1x1x18x18x128xbf16, #tpu.memory_space<vmem>>, vector<1x1x16x16x128xbf16>
    %33 = vector.shape_cast %32 : vector<1x1x16x16x128xbf16> to vector<16x16x128xbf16>
    %34 = vector.shape_cast %33 : vector<16x16x128xbf16> to vector<256x128xbf16>
    %c4 = arith.constant 4 : index
    %c0_38 = arith.constant 0 : index
    %c0_39 = arith.constant 0 : index
    %35 = vector.load %arg4[%c4, %c0_38, %c0_39] : memref<9x128x128xbf16, #tpu.memory_space<vmem>>, vector<1x128x128xbf16>
    %36 = vector.shape_cast %35 : vector<1x128x128xbf16> to vector<128x128xbf16>
    %cst_40 = arith.constant dense<0.000000e+00> : vector<256x128xf32>
    %37 = tpu.matmul %34, %36, %cst_40 {dimension_numbers = #tpu.dot_dimension_numbers<[1], [0], [0], [1], [0, 0, 1, 1], [], []>} : vector<256x128xbf16>, vector<128x128xbf16>, vector<256x128xf32> -> vector<256x128xf32>
    %38 = arith.addf %31, %37 : vector<256x128xf32>
    %c0_41 = arith.constant 0 : index
    %c0_42 = arith.constant 0 : index
    %c1_43 = arith.constant 1 : index
    %c2_44 = arith.constant 2 : index
    %c0_45 = arith.constant 0 : index
    %39 = vector.load %arg2[%c0_41, %c0_42, %c1_43, %c2_44, %c0_45] : memref<1x1x18x18x128xbf16, #tpu.memory_space<vmem>>, vector<1x1x16x16x128xbf16>
    %40 = vector.shape_cast %39 : vector<1x1x16x16x128xbf16> to vector<16x16x128xbf16>
    %41 = vector.shape_cast %40 : vector<16x16x128xbf16> to vector<256x128xbf16>
    %c5 = arith.constant 5 : index
    %c0_46 = arith.constant 0 : index
    %c0_47 = arith.constant 0 : index
    %42 = vector.load %arg4[%c5, %c0_46, %c0_47] : memref<9x128x128xbf16, #tpu.memory_space<vmem>>, vector<1x128x128xbf16>
    %43 = vector.shape_cast %42 : vector<1x128x128xbf16> to vector<128x128xbf16>
    %cst_48 = arith.constant dense<0.000000e+00> : vector<256x128xf32>
    %44 = tpu.matmul %41, %43, %cst_48 {dimension_numbers = #tpu.dot_dimension_numbers<[1], [0], [0], [1], [0, 0, 1, 1], [], []>} : vector<256x128xbf16>, vector<128x128xbf16>, vector<256x128xf32> -> vector<256x128xf32>
    %45 = arith.addf %38, %44 : vector<256x128xf32>
    %c0_49 = arith.constant 0 : index
    %c0_50 = arith.constant 0 : index
    %c2_51 = arith.constant 2 : index
    %c0_52 = arith.constant 0 : index
    %c0_53 = arith.constant 0 : index
    %46 = vector.load %arg2[%c0_49, %c0_50, %c2_51, %c0_52, %c0_53] : memref<1x1x18x18x128xbf16, #tpu.memory_space<vmem>>, vector<1x1x16x16x128xbf16>
    %47 = vector.shape_cast %46 : vector<1x1x16x16x128xbf16> to vector<16x16x128xbf16>
    %48 = vector.shape_cast %47 : vector<16x16x128xbf16> to vector<256x128xbf16>
    %c6 = arith.constant 6 : index
    %c0_54 = arith.constant 0 : index
    %c0_55 = arith.constant 0 : index
    %49 = vector.load %arg4[%c6, %c0_54, %c0_55] : memref<9x128x128xbf16, #tpu.memory_space<vmem>>, vector<1x128x128xbf16>
    %50 = vector.shape_cast %49 : vector<1x128x128xbf16> to vector<128x128xbf16>
    %cst_56 = arith.constant dense<0.000000e+00> : vector<256x128xf32>
    %51 = tpu.matmul %48, %50, %cst_56 {dimension_numbers = #tpu.dot_dimension_numbers<[1], [0], [0], [1], [0, 0, 1, 1], [], []>} : vector<256x128xbf16>, vector<128x128xbf16>, vector<256x128xf32> -> vector<256x128xf32>
    %52 = arith.addf %45, %51 : vector<256x128xf32>
    %c0_57 = arith.constant 0 : index
    %c0_58 = arith.constant 0 : index
    %c2_59 = arith.constant 2 : index
    %c1_60 = arith.constant 1 : index
    %c0_61 = arith.constant 0 : index
    %53 = vector.load %arg2[%c0_57, %c0_58, %c2_59, %c1_60, %c0_61] : memref<1x1x18x18x128xbf16, #tpu.memory_space<vmem>>, vector<1x1x16x16x128xbf16>
    %54 = vector.shape_cast %53 : vector<1x1x16x16x128xbf16> to vector<16x16x128xbf16>
    %55 = vector.shape_cast %54 : vector<16x16x128xbf16> to vector<256x128xbf16>
    %c7 = arith.constant 7 : index
    %c0_62 = arith.constant 0 : index
    %c0_63 = arith.constant 0 : index
    %56 = vector.load %arg4[%c7, %c0_62, %c0_63] : memref<9x128x128xbf16, #tpu.memory_space<vmem>>, vector<1x128x128xbf16>
    %57 = vector.shape_cast %56 : vector<1x128x128xbf16> to vector<128x128xbf16>
    %cst_64 = arith.constant dense<0.000000e+00> : vector<256x128xf32>
    %58 = tpu.matmul %55, %57, %cst_64 {dimension_numbers = #tpu.dot_dimension_numbers<[1], [0], [0], [1], [0, 0, 1, 1], [], []>} : vector<256x128xbf16>, vector<128x128xbf16>, vector<256x128xf32> -> vector<256x128xf32>
    %59 = arith.addf %52, %58 : vector<256x128xf32>
    %c0_65 = arith.constant 0 : index
    %c0_66 = arith.constant 0 : index
    %c2_67 = arith.constant 2 : index
    %c2_68 = arith.constant 2 : index
    %c0_69 = arith.constant 0 : index
    %60 = vector.load %arg2[%c0_65, %c0_66, %c2_67, %c2_68, %c0_69] : memref<1x1x18x18x128xbf16, #tpu.memory_space<vmem>>, vector<1x1x16x16x128xbf16>
    %61 = vector.shape_cast %60 : vector<1x1x16x16x128xbf16> to vector<16x16x128xbf16>
    %62 = vector.shape_cast %61 : vector<16x16x128xbf16> to vector<256x128xbf16>
    %c8 = arith.constant 8 : index
    %c0_70 = arith.constant 0 : index
    %c0_71 = arith.constant 0 : index
    %63 = vector.load %arg4[%c8, %c0_70, %c0_71] : memref<9x128x128xbf16, #tpu.memory_space<vmem>>, vector<1x128x128xbf16>
    %64 = vector.shape_cast %63 : vector<1x128x128xbf16> to vector<128x128xbf16>
    %cst_72 = arith.constant dense<0.000000e+00> : vector<256x128xf32>
    %65 = tpu.matmul %62, %64, %cst_72 {dimension_numbers = #tpu.dot_dimension_numbers<[1], [0], [0], [1], [0, 0, 1, 1], [], []>} : vector<256x128xbf16>, vector<128x128xbf16>, vector<256x128xf32> -> vector<256x128xf32>
    %66 = arith.addf %59, %65 : vector<256x128xf32>
    %c0_73 = arith.constant 0 : index
    %c0_74 = arith.constant 0 : index
    %67 = vector.load %arg5[%c0_73, %c0_74] : memref<1x128xf32, #tpu.memory_space<vmem>>, vector<1x128xf32>
    %68 = vector.broadcast %67 : vector<1x128xf32> to vector<256x128xf32>
    %69 = arith.addf %66, %68 : vector<256x128xf32>
    %c0_75 = arith.constant 0 : index
    %c0_76 = arith.constant 0 : index
    %70 = vector.load %arg7[%c0_75, %c0_76] : memref<256x128xf32, #tpu.memory_space<vmem>>, vector<256x128xf32>
    %cst_77 = arith.constant 1.000000e+00 : f32
    %71 = vector.broadcast %cst_77 : f32 to vector<256x128xf32>
    %72 = arith.cmpf ogt, %70, %71 : vector<256x128xf32>
    %73 = arith.extui %72 : vector<256x128xi1> to vector<256x128xi32>
    %74 = arith.sitofp %73 : vector<256x128xi32> to vector<256x128xf32>
    %cst_78 = arith.constant 0.899999976 : f32
    %75 = vector.broadcast %cst_78 : f32 to vector<256x128xf32>
    %76 = arith.mulf %75, %70 : vector<256x128xf32>
    %77 = arith.addf %76, %69 : vector<256x128xf32>
    %cst_79 = arith.constant 1.000000e+00 : f32
    %78 = vector.broadcast %cst_79 : f32 to vector<256x128xf32>
    %79 = arith.mulf %74, %78 : vector<256x128xf32>
    %80 = arith.subf %77, %79 : vector<256x128xf32>
    %c0_80 = arith.constant 0 : index
    %c0_81 = arith.constant 0 : index
    %81 = vector.load %arg7[%c0_80, %c0_81] : memref<256x128xf32, #tpu.memory_space<vmem>>, vector<256x128xf32>
    tpu.vector_store %arg7[%c0_80, %c0_81], %80 {strides = array<i32>} : memref<256x128xf32, #tpu.memory_space<vmem>>, vector<256x128xf32>,
    %cst_82 = arith.constant 1.000000e+00 : f32
    %82 = vector.broadcast %cst_82 : f32 to vector<256x128xf32>
    %83 = arith.cmpf ogt, %80, %82 : vector<256x128xf32>
    %84 = arith.extui %83 : vector<256x128xi1> to vector<256x128xi32>
    %85 = arith.sitofp %84 : vector<256x128xi32> to vector<256x128xf32>
    %c0_83 = arith.constant 0 : index
    %c0_84 = arith.constant 0 : index
    %c1_85 = arith.constant 1 : index
    %c1_86 = arith.constant 1 : index
    %c0_87 = arith.constant 0 : index
    %86 = vector.load %arg3[%c0_83, %c0_84, %c1_85, %c1_86, %c0_87] : memref<1x1x18x18x128xbf16, #tpu.memory_space<vmem>>, vector<1x1x16x16x128xbf16>
    %87 = vector.shape_cast %86 : vector<1x1x16x16x128xbf16> to vector<16x16x128xbf16>
    %88 = vector.shape_cast %87 : vector<16x16x128xbf16> to vector<256x128xbf16>
    %89 = arith.extf %88 : vector<256x128xbf16> to vector<256x128xf32>
    %c0_88 = arith.constant 0 : index
    %c0_89 = arith.constant 0 : index
    %90 = vector.load %arg8[%c0_88, %c0_89] : memref<256x128xf32, #tpu.memory_space<vmem>>, vector<256x128xf32>
    %cst_90 = arith.constant 1.000000e+00 : f32
    %91 = vector.broadcast %cst_90 : f32 to vector<256x128xf32>
    %92 = arith.cmpf ogt, %90, %91 : vector<256x128xf32>
    %93 = arith.extui %92 : vector<256x128xi1> to vector<256x128xi32>
    %94 = arith.sitofp %93 : vector<256x128xi32> to vector<256x128xf32>
    %cst_91 = arith.constant 0.899999976 : f32
    %95 = vector.broadcast %cst_91 : f32 to vector<256x128xf32>
    %96 = arith.mulf %95, %90 : vector<256x128xf32>
    %97 = arith.addf %85, %89 : vector<256x128xf32>
    %98 = arith.addf %96, %97 : vector<256x128xf32>
    %cst_92 = arith.constant 1.000000e+00 : f32
    %99 = vector.broadcast %cst_92 : f32 to vector<256x128xf32>
    %100 = arith.mulf %94, %99 : vector<256x128xf32>
    %101 = arith.subf %98, %100 : vector<256x128xf32>
    %c0_93 = arith.constant 0 : index
    %c0_94 = arith.constant 0 : index
    %102 = vector.load %arg8[%c0_93, %c0_94] : memref<256x128xf32, #tpu.memory_space<vmem>>, vector<256x128xf32>
    tpu.vector_store %arg8[%c0_93, %c0_94], %101 {strides = array<i32>} : memref<256x128xf32, #tpu.memory_space<vmem>>, vector<256x128xf32>,
    %cst_95 = arith.constant 1.000000e+00 : f32
    %103 = vector.broadcast %cst_95 : f32 to vector<256x128xf32>
    %104 = arith.cmpf ogt, %101, %103 : vector<256x128xf32>
    %105 = arith.extui %104 : vector<256x128xi1> to vector<256x128xi32>
    %106 = arith.sitofp %105 : vector<256x128xi32> to vector<256x128xf32>
    %107 = arith.truncf %106 : vector<256x128xf32> to vector<256x128xbf16>
    %108 = vector.shape_cast %107 : vector<256x128xbf16> to vector<1x1x16x16x128xbf16>
    %c0_96 = arith.constant 0 : index
    %c0_97 = arith.constant 0 : index
    %c0_98 = arith.constant 0 : index
    %c0_99 = arith.constant 0 : index
    %c0_100 = arith.constant 0 : index
    %109 = vector.load %arg6[%c0_96, %c0_97, %c0_98, %c0_99, %c0_100] : memref<1x1x16x16x128xbf16, #tpu.memory_space<vmem>>, vector<1x1x16x16x128xbf16>
    tpu.vector_store %arg6[%c0_96, %c0_97, %c0_98, %c0_99, %c0_100], %108 {strides = array<i32>} : memref<1x1x16x16x128xbf16, #tpu.memory_space<vmem>>, vector<1x1x16x16x128xbf16>,
    return
  }
  func.func @transform_0(%arg0: i32, %arg1: i32) -> (i32, i32, i32, i32, i32) {
    %c0_i32 = arith.constant 0 : i32
    %c0_i32_0 = arith.constant 0 : i32
    %c0_i32_1 = arith.constant 0 : i32
    %c0_i32_2 = arith.constant 0 : i32
    return %arg1, %arg0, %c0_i32, %c0_i32_0, %c0_i32_1 : i32, i32, i32, i32, i32
  }
  func.func @transform_1(%arg0: i32, %arg1: i32) -> (i32, i32, i32, i32, i32) {
    %c0_i32 = arith.constant 0 : i32
    %c0_i32_0 = arith.constant 0 : i32
    %c0_i32_1 = arith.constant 0 : i32
    %c0_i32_2 = arith.constant 0 : i32
    return %arg1, %arg0, %c0_i32, %c0_i32_0, %c0_i32_1 : i32, i32, i32, i32, i32
  }
  func.func @transform_2(%arg0: i32, %arg1: i32) -> (i32, i32, i32) {
    %c0_i32 = arith.constant 0 : i32
    %c0_i32_0 = arith.constant 0 : i32
    %c0_i32_1 = arith.constant 0 : i32
    %c0_i32_2 = arith.constant 0 : i32
    return %c0_i32, %c0_i32_0, %c0_i32_1 : i32, i32, i32
  }
  func.func @transform_3(%arg0: i32, %arg1: i32) -> (i32, i32) {
    %c0_i32 = arith.constant 0 : i32
    %c0_i32_0 = arith.constant 0 : i32
    %c0_i32_1 = arith.constant 0 : i32
    return %c0_i32, %c0_i32_0 : i32, i32
  }
  func.func @transform_4(%arg0: i32, %arg1: i32) -> (i32, i32, i32, i32, i32) {
    %c0_i32 = arith.constant 0 : i32
    %c0_i32_0 = arith.constant 0 : i32
    %c0_i32_1 = arith.constant 0 : i32
    %c0_i32_2 = arith.constant 0 : i32
    return %arg1, %arg0, %c0_i32, %c0_i32_0, %c0_i32_1 : i32, i32, i32, i32, i32
  }
}

</mosaic_0001>

<bundles_post_ra>
// kernel: sresnet_block_forward.2
= control target key start
LH: loop header
LB: loop body
LE: loop exit
PB: predicated region body
PF: predicated region fallthrough
CT: control target
= control target key end

     0   :  { %s7703_s12 = smov 0   ;;  %s7705_s13 = smov 0   ;;  %s9897_s0 = inlined_call_operand.vmem [shape: bf16[4,2,18,18,128], index: 0, kind: input, shape index: {}]   ;;  %s9898_s1 = inlined_call_operand.vmem [shape: bf16[9,128,128], index: 1, kind: input, shape index: {}]   ;;  %s9899_s2 = inlined_call_operand.vmem [shape: f32[1,128], index: 2, kind: input, shape index: {}]   ;;  %s9900_s3 = inlined_call_operand.vmem [shape: bf16[4,2,16,16,128], index: 3, kind: output, shape index: {}]  }
   0x1   :  { %s7707_s14 = smov 0   ;;  %s7709_s15 = smov 0  }
   0x2   :  { %s7711_s16 = smov 0  }
   0x3 LB: > { %s22_s17 = sadd.s32 1, %s7671_s14  ;;  %s25_s18 = sadd.s32 1, %s7675_s15  ;;  %s7679_s16 = sphi %s7711_s16, %s13_s16   ;;  %s7675_s15 = sphi %s7709_s15, %s9970_s15   ;;  %s7671_s14 = sphi %s7707_s14, %s9969_s14   ;;  %s7667_s13 = sphi %s7705_s13, %s9968_s13   ;;  %s7663_s12 = sphi %s7703_s12, %s9967_s12  }
   0x4   : > { %p23_p0 = scmp.ge.s32.totalorder %s22_s17, 4  ;;  %p5703_p1 = scmp.ge.s32.totalorder %s7679_s16, 1 }
   0x5   : > { %p157_p2 = scmp.lt.s32.totalorder %s7679_s16, 9 }
   0x6   : > { %s9972_s17 = smov (%p23_p0, %s22_s17), 0  ;;  %s9974_s18 = smov (!%p23_p0, %s25_s18), %s7675_s15 }
   0x7   : > { %p158_p3 = pnand %p5703_p1, %p157_p2  ;;  %p27_p4 = scmp.ge.s32.totalorder %s9974_s18, 2 }
   0x9   : > { %s9976_s18 = smov (%p27_p4, %s9974_s18), 0  ;;  %161 = sbr.rel (%p158_p3) target bundleno = 616 (0x268), region = 32 }
  0x10   : > { %p189_p5 = scmp.lt.s32.totalorder %s7663_s12, 3  ;;  %p191_p6 = scmp.lt.s32.totalorder %s7667_s13, 1 }
  0x11   : > { %p5708_p7 = scmp.ne.s32.totalorder %s7663_s12, 0 }
  0x12   : > { %s190_s19 = scalar_select %p189_p5, %s7663_s12, 3 }
  0x13   : > { %s9978_s13 = smov (!%p191_p6, %s7667_s13), 1  ;;  %211 = sbr.rel (%p5708_p7) target bundleno = 37 (0x25), region = 36 }
  0x14   : > { %s7408_s20 = smul.u32 108, %s190_s19  ;;  %s5706_s21 = sshll.u32 %s190_s19, 6  ;;  %v7681_v0 = vmov (!%p5708_p7), 0.0  }
  0x15   : > { %s7407_s22 = smul.u32 54, %s9978_s13  ;;  %s5705_s23 = sshll.u32 %s9978_s13, 5  ;;  %212 = vst [vmem:[#allocation2] sm:$0xff] (!%p5708_p7), %v7681_v0  ;;  %213 = vst [vmem:[#allocation2 + $0x8] sm:$0xff] (!%p5708_p7), %v7681_v0 }
  0x16   : > { %s204_s24 = sadd.s32 %s5706_s21, %s5705_s23  ;;  %214 = vst [vmem:[#allocation2 + $0x10] sm:$0xff] (!%p5708_p7), %v7681_v0  ;;  %215 = vst [vmem:[#allocation2 + $0x18] sm:$0xff] (!%p5708_p7), %v7681_v0 }
  0x17   : > { %s195_s25 = sadd.s32 %s7408_s20, %s7407_s22  ;;  %s5707_s26 = sshll.u32 %s204_s24, 2  ;;  %216 = vst [vmem:[#allocation2 + $0x20] sm:$0xff] (!%p5708_p7), %v7681_v0  ;;  %217 = vst [vmem:[#allocation2 + $0x28] sm:$0xff] (!%p5708_p7), %v7681_v0 }
  0x18   : > { %s5704_s27 = sshll.u32 %s195_s25, 2  ;;  %s7740_s30 = scalar_lea.vmem %s9900_s3, %s5707_s26  ;;  %218 = vst [vmem:[#allocation2 + $0x30] sm:$0xff] (!%p5708_p7), %v7681_v0  ;;  %219 = vst [vmem:[#allocation2 + $0x38] sm:$0xff] (!%p5708_p7), %v7681_v0 }
  0x19   : > { %s7745_s6 = scalar_lea.vmem %s9897_s0, %s5704_s27  ;;  %220 = vst [vmem:[#allocation2 + $0x40] sm:$0xff] (!%p5708_p7), %v7681_v0  ;;  %221 = vst [vmem:[#allocation2 + $0x48] sm:$0xff] (!%p5708_p7), %v7681_v0 }
  0x1a   : > { %222 = vst [vmem:[#allocation2 + $0x50] sm:$0xff] %v7681_v0  ;;  %223 = vst [vmem:[#allocation2 + $0x58] sm:$0xff] %v7681_v0 }
  0x1b   : > { %224 = vst [vmem:[#allocation2 + $0x60] sm:$0xff] %v7681_v0  ;;  %225 = vst [vmem:[#allocation2 + $0x68] sm:$0xff] %v7681_v0 }
  0x1c   : > { %226 = vst [vmem:[#allocation2 + $0x70] sm:$0xff] %v7681_v0  ;;  %227 = vst [vmem:[#allocation2 + $0x78] sm:$0xff] %v7681_v0 }
  0x1d   : > { %228 = vst [vmem:[#allocation2 + $0x80] sm:$0xff] %v7681_v0  ;;  %229 = vst [vmem:[#allocation2 + $0x88] sm:$0xff] %v7681_v0 }
  0x1e   : > { %230 = vst [vmem:[#allocation2 + $0x90] sm:$0xff] %v7681_v0  ;;  %231 = vst [vmem:[#allocation2 + $0x98] sm:$0xff] %v7681_v0 }
  0x1f   : > { %232 = vst [vmem:[#allocation2 + $0xa0] sm:$0xff] %v7681_v0  ;;  %233 = vst [vmem:[#allocation2 + $0xa8] sm:$0xff] %v7681_v0 }
  0x20   : > { %234 = vst [vmem:[#allocation2 + $0xb0] sm:$0xff] %v7681_v0  ;;  %235 = vst [vmem:[#allocation2 + $0xb8] sm:$0xff] %v7681_v0 }
  0x21   : > { %236 = vst [vmem:[#allocation2 + $0xc0] sm:$0xff] %v7681_v0  ;;  %237 = vst [vmem:[#allocation2 + $0xc8] sm:$0xff] %v7681_v0 }
  0x22   : > { %238 = vst [vmem:[#allocation2 + $0xd0] sm:$0xff] %v7681_v0  ;;  %239 = vst [vmem:[#allocation2 + $0xd8] sm:$0xff] %v7681_v0 }
  0x23   : > { %240 = vst [vmem:[#allocation2 + $0xe0] sm:$0xff] %v7681_v0  ;;  %241 = vst [vmem:[#allocation2 + $0xe8] sm:$0xff] %v7681_v0 }
  0x24   : > { %242 = vst [vmem:[#allocation2 + $0xf0] sm:$0xff] %v7681_v0  ;;  %243 = vst [vmem:[#allocation2 + $0xf8] sm:$0xff] %v7681_v0 }
  0x25 PF: > { %v7451_v1 = vld [vmem:[%s9898_s1 + $0x40] sm:$0xff]   ;;  %v7453_v3 = vld [vmem:[%s9898_s1 + $0x48] sm:$0xff]   ;;  %v7455_v5 = vld [vmem:[%s9898_s1 + $0x50] sm:$0xff]   ;;  %vm308_vm0 = vsmask.f32 3328  ;;  %vm1338_vm3 = vcmask 1042432  }
  0x26   : > { %v7452_v2 = vld [vmem:[%s9898_s1 + $0x100] sm:$0xff]   ;;  %6703 = vmatprep.subr.bf16.mxu1 %v7451_v1  ;;  %v7454_v4 = vld [vmem:[%s9898_s1 + $0x108] sm:$0xff]   ;;  %v7456_v6 = vld [vmem:[%s9898_s1 + $0x110] sm:$0xff]   ;;  %vm309_vm1 = vsmask.f32 7440  ;;  %vm1339_vm4 = vcmask 1046532  }
  0x27   : > { %6895 = vmatprep.subr.bf16.mxu0 %v7452_v2  ;;  %6704 = vmatpush3.bf16.msra.mxu1 %v7451_v1  ;;  %v7457_v7 = vld [vmem:[%s9898_s1 + $0x58] sm:$0xff]   ;;  %v7459_v9 = vld [vmem:[%s9898_s1 + $0x60] sm:$0xff]   ;;  %v7461_v11 = vld [vmem:[%s9898_s1 + $0x68] sm:$0xff]  }
  0x28   : > { %6896 = vmatpush3.bf16.msra.mxu0 %v7452_v2  ;;  %6705 = vmatprep.subr.bf16.mxu1 %v7453_v3  ;;  %v7458_v8 = vld [vmem:[%s9898_s1 + $0x118] sm:$0xff]   ;;  %v7460_v10 = vld [vmem:[%s9898_s1 + $0x120] sm:$0xff]   ;;  %v7462_v12 = vld [vmem:[%s9898_s1 + $0x128] sm:$0xff]  }
  0x29   : > { %6897 = vmatprep.subr.bf16.mxu0 %v7454_v4  ;;  %v244_v13 = vld [vmem:[%s7745_s6] sm:$0xf]  ;;  %v245_v14 = vld [vmem:[%s7745_s6 + $0x4] sm:$0xf]  ;;  %v292_v15 = vld [vmem:[%s7745_s6 + $0x8] sm:$0x1] }
  0x2a   : > { %v312_v16 = vshrl.u32 %v244_v13, 16  ;;  %v315_v17 = vshll.u32 %v244_v13, 16  ;;  %v321_v18 = vshll.u32 %v245_v14, 16  ;;  %v325_v19 = vshrl.u32 %v245_v14, 16  ;;  %v5901_v21 = vld [vmem:[%s7745_s6 + $0xc] sm:$0xf]  ;;  %vm7808_vm2 = vmor %vm308_vm0, %vm309_vm1 }
  0x2b   : > { %6706 = vmatpush3.bf16.msra.mxu1 %v7453_v3  ;;  %v331_v20 = vshll.u32 %v292_v15, 16  ;;  %v7789_v24 = vld [vmem:[%s7745_s6 + $0x10] sm:$0xf]  ;;  %v7792_v25 = vld [vmem:[%s7745_s6 + $0x14] sm:$0x1]  ;;  %v2211_v30 = vshrl.u32 %v5901_v21, 16  ;;  %vm8054_vm5 = vmor %vm1338_vm3, %vm1339_vm4 }
  0x2c   : > { %6898 = vmatpush3.bf16.msra.mxu0 %v7454_v4  ;;  %6707 = vmatprep.subr.bf16.mxu1 %v7455_v5  ;;  %v314_v22 = vrot.slane %v312_v16, 4  ;;  %v317_v23 = vrot.slane %v315_v17, 5  ;;  %v7463_v26 = vld [vmem:[%s9898_s1 + $0x70] sm:$0xff]   ;;  %v323_v27 = vrot.slane %v321_v18, 5  ;;  %v327_v28 = vrot.slane %v325_v19, 4  ;;  %v7465_v37 = vld [vmem:[%s9898_s1 + $0x78] sm:$0xff]  }
  0x2d   : > { %6899 = vmatprep.subr.bf16.mxu0 %v7456_v6  ;;  %v333_v29 = vrot.slane %v331_v20, 5  ;;  %v7464_v31 = vld [vmem:[%s9898_s1 + $0x130] sm:$0xff]   ;;  %v2214_v33 = vshll.u32 %v5901_v21, 16  ;;  %v2220_v34 = vshll.u32 %v7789_v24, 16  ;;  %v2224_v35 = vshrl.u32 %v7789_v24, 16  ;;  %v7466_v52 = vld [vmem:[%s9898_s1 + $0x138] sm:$0xff]  }
  0x2e   : > { %v318_v32 = vor.u32 %v317_v23, %v314_v22  ;;  %v246_v36 = vld [vmem:[%s7745_s6 + $0xc] sm:$0xf]  ;;  %v328_v39 = vor.u32 %v327_v28, %v323_v27  ;;  %v2213_v40 = vrot.slane %v2211_v30, 4  ;;  %v2230_v41 = vshll.u32 %v7792_v25, 16  ;;  %v247_v43 = vld [vmem:[%s7745_s6 + $0x10] sm:$0xf] }
  0x2f   : > { %6708 = vmatpush3.bf16.msra.mxu1 %v7455_v5  ;;  %v2985_v42 = vrot.slane %v7792_v25, 5  ;;  %v2216_v45 = vrot.slane %v2214_v33, 5  ;;  %v2222_v46 = vrot.slane %v2220_v34, 5  ;;  %v2226_v47 = vrot.slane %v2224_v35, 4  ;;  %v293_v56 = vld [vmem:[%s7745_s6 + $0x14] sm:$0x1] }
  0x30   : > { %6900 = vmatpush3.bf16.msra.mxu0 %v7456_v6  ;;  %6709 = vmatprep.subr.bf16.mxu1 %v7457_v7  ;;  %v319_v44 = vrot.slane %v318_v32, 4  ;;  %v329_v48 = vrot.slane %v328_v39, 4  ;;  %v2232_v49 = vrot.slane %v2230_v41, 5  ;;  %v336_v50 = vshrl.u32 %v246_v36, 16  ;;  %v5904_v58 = vld [vmem:[%s7745_s6 + $0x18] sm:$0xf] }
  0x31   : > { %6901 = vmatprep.subr.bf16.mxu0 %v7458_v8  ;;  %v339_v51 = vshll.u32 %v246_v36, 16  ;;  %v2217_v54 = vor.u32 %v2216_v45, %v2213_v40  ;;  %v2227_v55 = vor.u32 %v2226_v47, %v2222_v46  ;;  %v345_v57 = vshll.u32 %v247_v43, 16  ;;  %v7825_v63 = vld [vmem:[%s7745_s6 + $0x1c] sm:$0xf]  ;;  %v7467_v4 = vld [vmem:[%s9898_s1] sm:$0xff]   ;;  %v7470_v47 = vld [vmem:[%s9898_s1 + $0x8] sm:$0xff]  }
  0x32   : > { %v324_v53 = vsel %vm7808_vm2, %v319_v44, %v323_v27  ;;  %v334_v59 = vsel %vm7808_vm2, %v329_v48, %v333_v29  ;;  %v338_v60 = vrot.slane %v336_v50, 4  ;;  %v349_v62 = vshrl.u32 %v247_v43, 16  ;;  %v7833_v5 = vld [vmem:[%s9898_s1 + $0x140] sm:$0xff]   ;;  %v248_v22 = vld [vmem:[%s7745_s6 + $0x18] sm:$0xf] }
  0x33   : > { %6710 = vmatpush3.bf16.msra.mxu1 %v7457_v7  ;;  %v341_v61 = vrot.slane %v339_v51, 5  ;;  %v5725_v0 = vcombine.low %v324_v53, %v334_v59  ;;  %v2218_v1 = vrot.slane %v2217_v54, 4  ;;  %v2228_v2 = vrot.slane %v2227_v55, 4  ;;  %v249_v29 = vld [vmem:[%s7745_s6 + $0x1c] sm:$0xf] }
  0x34   : > { %6902 = vmatpush3.bf16.msra.mxu0 %v7458_v8  ;;  %6711 = vmatprep.subr.bf16.mxu1 %v7459_v9  ;;  %v347_v3 = vrot.slane %v345_v57, 5  ;;  %v351_v7 = vrot.slane %v349_v62, 4  ;;  %v355_v8 = vshll.u32 %v293_v56, 16  ;;  %v2238_v13 = vshll.u32 %v5904_v58, 16  ;;  %v294_v34 = vld [vmem:[%s7745_s6 + $0x20] sm:$0x1] }
  0x35   : > { %6903 = vmatprep.subr.bf16.mxu0 %v7460_v10  ;;  %v342_v6 = vor.u32 %v341_v61, %v338_v60  ;;  %6719 = vmatprep.mubr.bf16.mxu1 %v5725_v0  ;;  %v2244_v20 = vshll.u32 %v7825_v63, 16  ;;  %v2248_v21 = vshrl.u32 %v7825_v63, 16  ;;  %v2989_v28 = vrot.slane %v7825_v63, 5  ;;  %v5907_v40 = vld [vmem:[%s7745_s6 + $0x24] sm:$0xf]  ;;  %v7469_v0 = vld [vmem:[%s9898_s1 + $0x148] sm:$0xff]  }
  0x36   : > { %v352_v16 = vor.u32 %v351_v7, %v347_v3  ;;  %v357_v17 = vrot.slane %v355_v8, 5  ;;  %v2240_v19 = vrot.slane %v2238_v13, 5  ;;  %v360_v39 = vshrl.u32 %v248_v22, 16  ;;  %v250_v53 = vld [vmem:[%s7745_s6 + $0x24] sm:$0xf] }
  0x37   : > { %6712 = vmatpush3.bf16.msra.mxu1 %v7459_v9  ;;  %v7836_v9 = vld [vmem:[%s7745_s6 + $0x20] sm:$0x1]  ;;  %v343_v15 = vrot.slane %v342_v6, 4  ;;  %v2250_v32 = vrot.slane %v2248_v21, 4  ;;  %v363_v45 = vshll.u32 %v248_v22, 16  ;;  %v373_v50 = vshrl.u32 %v249_v29, 16 }
  0x38   : > { %6904 = vmatpush3.bf16.msra.mxu0 %v7460_v10  ;;  %6713 = vmatprep.subr.bf16.mxu1 %v7461_v11  ;;  %v2223_v10 = vsel %vm7808_vm2, %v2218_v1, %v2222_v46  ;;  %v2254_v27 = vshll.u32 %v7836_v9, 16  ;;  %v2992_v33 = vrot.slane %v7836_v9, 5  ;;  %v7861_v46 = vld [vmem:[%s7745_s6 + $0x28] sm:$0xf]  ;;  %v362_v48 = vrot.slane %v360_v39, 4 }
  0x39   : > { %6905 = vmatprep.subr.bf16.mxu0 %v7462_v12  ;;  %v348_v23 = vsel %vm7808_vm2, %v343_v15, %v347_v3  ;;  %v379_v51 = vshll.u32 %v294_v34, 16  ;;  %v365_v56 = vrot.slane %v363_v45, 5  ;;  %v2259_v57 = vshrl.u32 %v5907_v40, 16  ;;  %v251_v6 = vld [vmem:[%s7745_s6 + $0x28] sm:$0xf] }
  0x3a   : > { %v2256_v36 = vrot.slane %v2254_v27, 5  ;;  %v375_v59 = vrot.slane %v373_v50, 4  ;;  %v2262_v61 = vshll.u32 %v5907_v40, 16  ;;  %v2268_v3 = vshll.u32 %v7861_v46, 16  ;;  %v7892_v34 = vld [vmem:[%s7745_s6 + $0x34] sm:$0xf] }
  0x3b   : > { %6714 = vmatpush3.bf16.msra.mxu1 %v7461_v11  ;;  %v2233_v11 = vsel %vm7808_vm2, %v2228_v2, %v2232_v49  ;;  %v369_v49 = vshll.u32 %v249_v29, 16  ;;  %v381_v60 = vrot.slane %v379_v51, 5  ;;  %v366_v1 = vor.u32 %v365_v56, %v362_v48 }
  0x3c   : > { %6906 = vmatpush3.bf16.msra.mxu0 %v7462_v12  ;;  %6715 = vmatprep.subr.bf16.mxu1 %v7463_v26  ;;  %v2235_v12 = vshrl.u32 %v5904_v58, 16  ;;  %v5965_v14 = vcombine.low %v2223_v10, %v2233_v11  ;;  %v2261_v2 = vrot.slane %v2259_v57, 4  ;;  %v2264_v10 = vrot.slane %v2262_v61, 5  ;;  %v7479_v61 = vld [vmem:[%s9898_s1 + $0x20] sm:$0xff]  }
  0x3d   : > { %6907 = vmatprep.subr.bf16.mxu0 %v7464_v31  ;;  %v371_v58 = vrot.slane %v369_v49, 5  ;;  %v2272_v11 = vshrl.u32 %v7861_v46, 16  ;;  %v367_v13 = vrot.slane %v366_v1, 4  ;;  %v387_v21 = vshll.u32 %v250_v53, 16  ;;  %v7472_v49 = vld [vmem:[%s9898_s1 + $0x158] sm:$0xff]  }
  0x3e   : > { %v2237_v18 = vrot.slane %v2235_v12, 4  ;;  %6911 = vmatprep.mubr.bf16.mxu0 %v5965_v14  ;;  %v295_v12 = vld [vmem:[%s7745_s6 + $0x2c] sm:$0x1]  ;;  %v2270_v14 = vrot.slane %v2268_v3, 5  ;;  %v393_v27 = vshll.u32 %v251_v6, 16  ;;  %v397_v40 = vshrl.u32 %v251_v6, 16 }
  0x3f   : > { %6716 = vmatpush3.bf16.msra.mxu1 %v7463_v26  ;;  %v353_v26 = vrot.slane %v352_v16, 4  ;;  %v376_v8 = vor.u32 %v375_v59, %v371_v58  ;;  %v384_v16 = vshrl.u32 %v250_v53, 16  ;;  %v372_v22 = vsel %vm7808_vm2, %v367_v13, %v371_v58  ;;  %v296_v3 = vld [vmem:[%s7745_s6 + $0x38] sm:$0x1] }
  0x40   : > { %6908 = vmatpush3.bf16.msra.mxu0 %v7464_v31  ;;  %6717 = vmatprep.subr.bf16.mxu1 %v7465_v37  ;;  %v2241_v30 = vor.u32 %v2240_v19, %v2237_v18  ;;  %v2246_v31 = vrot.slane %v2244_v20, 5  ;;  %v2265_v19 = vor.u32 %v2264_v10, %v2261_v2  ;;  %v2274_v20 = vrot.slane %v2272_v11, 4  ;;  %v5913_v10 = vld [vmem:[%s7745_s6 + $0x3c] sm:$0xf] }
  0x41   : > { %6909 = vmatprep.subr.bf16.mxu0 %v7466_v52  ;;  %v358_v35 = vsel %vm7808_vm2, %v353_v26, %v357_v17  ;;  %v5910_v17 = vld [vmem:[%s7745_s6 + $0x30] sm:$0xf]  ;;  %v377_v18 = vrot.slane %v376_v8, 4  ;;  %v386_v26 = vrot.slane %v384_v16, 4  ;;  %v395_v39 = vrot.slane %v393_v27, 5 }
  0x42   : > { %v5726_v41 = vcombine.low %v348_v23, %v358_v35  ;;  %v2242_v43 = vrot.slane %v2241_v30, 4  ;;  %v2251_v44 = vor.u32 %v2250_v32, %v2246_v31  ;;  %v2266_v30 = vrot.slane %v2265_v19, 4  ;;  %v7476_v35 = vld [vmem:[%s9898_s1 + $0x18] sm:$0xff]  }
  0x43   : > { %6718 = vmatpush3.bf16.msra.mxu1 %v7465_v37  ;;  %v7857_v37 = vrot.slane %v2989_v28, 4  ;;  %v382_v29 = vsel %vm7808_vm2, %v377_v18, %v381_v60  ;;  %v389_v32 = vrot.slane %v387_v21, 5  ;;  %v2283_v48 = vshrl.u32 %v5910_v17, 16  ;;  %v253_v60 = vld [vmem:[%s7745_s6 + $0x34] sm:$0xf]  ;;  %v7474_v21 = vld [vmem:[%s9898_s1 + $0x160] sm:$0xff]  }
  0x44   : > { %6910 = vmatpush3.bf16.msra.mxu0 %v7466_v52  ;;  %6751 = vmatprep.subr.bf16.mxu1 %v7467_v4  ;;  %v7867_v52 = vld [vmem:[%s7745_s6 + $0x2c] sm:$0x1]  ;;  %v2247_v54 = vsel %vm7808_vm2, %v2242_v43, %v2246_v31  ;;  %v2252_v55 = vrot.slane %v2251_v44, 4  ;;  %v2275_v31 = vor.u32 %v2274_v20, %v2270_v14  ;;  %v2271_v43 = vsel %vm7808_vm2, %v2266_v30, %v2270_v14  ;;  %v7926_v20 = vld [vmem:[%s7745_s6 + $0x40] sm:$0xf] }
  0x45   : > { %6943 = vmatprep.subr.bf16.mxu0 %v7833_v5  ;;  %v2278_v15 = vshll.u32 %v7867_v52, 16  ;;  %v390_v45 = vor.u32 %v389_v32, %v386_v26  ;;  %v399_v50 = vrot.slane %v397_v40, 4  ;;  %v2286_v53 = vshll.u32 %v5910_v17, 16 }
  0x46   : > { %6720 = vmatmul.mubr.bf16.vlgmr.msra.gmra.mrb[0].mxu1 %v5726_v41  ;;  %v2257_v62 = vsel %vm7808_vm2, %v2252_v55, %v2256_v36  ;;  %v5727_v36 = vcombine.low %v372_v22, %v382_v29  ;;  %v403_v41 = vshll.u32 %v295_v12, 16  ;;  %v2276_v44 = vrot.slane %v2275_v31, 4  ;;  %v252_v55 = vld [vmem:[%s7745_s6 + $0x30] sm:$0xf]  ;;  %v7934_v29 = vld [vmem:[%s7745_s6 + $0x44] sm:$0x1] }
  0x47   : > { %6752 = vmatpush3.bf16.msra.mxu1 %v7467_v4  ;;  %v7473_v4 = vld [vmem:[%s9898_s1 + $0x10] sm:$0xff]   ;;  %v5966_v7 = vcombine.low %v2247_v54, %v2257_v62  ;;  %v2280_v23 = vrot.slane %v2278_v15, 5  ;;  %v2292_v54 = vshll.u32 %v7892_v34, 16  ;;  %v391_v57 = vrot.slane %v390_v45, 4  ;;  %v7481_v15 = vld [vmem:[%s9898_s1 + $0x28] sm:$0xff]  }
  0x48   : > { %6753 = vmatprep.subr.bf16.mxu1 %v7470_v47  ;;  %6723 = vmatprep.mubr.bf16.mxu1 %v5727_v36  ;;  %v405_v51 = vrot.slane %v403_v41, 5  ;;  %v2285_v58 = vrot.slane %v2283_v48, 4  ;;  %v2296_v59 = vshrl.u32 %v7892_v34, 16  ;;  %v2288_v1 = vrot.slane %v2286_v53, 5  ;;  %v7483_v36 = vld [vmem:[%s9898_s1 + $0x30] sm:$0xff]  }
  0x49   : > { %6912 = vmatmul.mubr.bf16.vlgmr.msra.gmra.mrb[0].mxu0 %v5966_v7  ;;  %v2281_v56 = vsel %vm7808_vm2, %v2276_v44, %v2280_v23  ;;  %v2294_v2 = vrot.slane %v2292_v54, 5  ;;  %v396_v6 = vsel %vm7808_vm2, %v391_v57, %v395_v39  ;;  %v408_v8 = vshrl.u32 %v252_v55, 16 }
  0x4a   : > { %6944 = vmatpush3.bf16.msra.mxu0 %v7833_v5  ;;  %v7471_v5 = vld [vmem:[%s9898_s1 + $0x150] sm:$0xff]   ;;  %v5967_v62 = vcombine.low %v2271_v43, %v2281_v56  ;;  %v2289_v12 = vor.u32 %v2288_v1, %v2285_v58  ;;  %v411_v13 = vshll.u32 %v252_v55, 16  ;;  %v417_v14 = vshll.u32 %v253_v60, 16  ;;  %v255_v56 = vld [vmem:[%s7745_s6 + $0x40] sm:$0xf] }
  0x4b   : > { %6754 = vmatpush3.bf16.msra.mxu1 %v7470_v47  ;;  %6945 = vmatprep.subr.bf16.mxu0 %v7469_v0  ;;  %v7903_v47 = vld [vmem:[%s7745_s6 + $0x38] sm:$0x1]  ;;  %v410_v18 = vrot.slane %v408_v8, 4  ;;  %v421_v19 = vshrl.u32 %v253_v60, 16  ;;  %v2307_v41 = vshrl.u32 %v5913_v10, 16  ;;  %v2310_v43 = vshll.u32 %v5913_v10, 16 }
  0x4c   : > { %6755 = vmatprep.subr.bf16.mxu1 %v7473_v4  ;;  %v2302_v7 = vshll.u32 %v7903_v47, 16  ;;  %6915 = vmatprep.mubr.bf16.mxu0 %v5967_v62  ;;  %v2290_v23 = vrot.slane %v2289_v12, 4  ;;  %v413_v26 = vrot.slane %v411_v13, 5  ;;  %v419_v27 = vrot.slane %v417_v14, 5  ;;  %v5916_v10 = vld [vmem:[%s7745_s6 + $0x48] sm:$0xf] }
  0x4d   : > { %v423_v32 = vrot.slane %v421_v19, 4  ;;  %v2309_v54 = vrot.slane %v2307_v41, 4  ;;  %v2312_v55 = vrot.slane %v2310_v43, 5  ;;  %v2326_v60 = vshll.u32 %v7934_v29, 16 }
  0x4e   : > { %6946 = vmatpush3.bf16.msra.mxu0 %v7469_v0  ;;  %v400_v0 = vor.u32 %v399_v50, %v395_v39  ;;  %v2304_v17 = vrot.slane %v2302_v7, 5  ;;  %v2295_v39 = vsel %vm7808_vm2, %v2290_v23, %v2294_v2  ;;  %v414_v40 = vor.u32 %v413_v26, %v410_v18  ;;  %v7967_v23 = vld [vmem:[%s7745_s6 + $0x50] sm:$0x1] }
  0x4f   : > { %6756 = vmatpush3.bf16.msra.mxu1 %v7473_v4  ;;  %6947 = vmatprep.subr.bf16.mxu0 %v7471_v5  ;;  %v2298_v4 = vrot.slane %v2296_v59, 4  ;;  %v424_v45 = vor.u32 %v423_v32, %v419_v27  ;;  %v2316_v50 = vshll.u32 %v7926_v20, 16  ;;  %v2320_v59 = vshrl.u32 %v7926_v20, 16  ;;  %v7478_v32 = vld [vmem:[%s9898_s1 + $0x178] sm:$0xff]  }
  0x50   : > { %6757 = vmatprep.subr.bf16.mxu1 %v7476_v35  ;;  %v401_v11 = vrot.slane %v400_v0, 4  ;;  %v415_v53 = vrot.slane %v414_v40, 4  ;;  %v2313_v62 = vor.u32 %v2312_v55, %v2309_v54  ;;  %v297_v0 = vld [vmem:[%s7745_s6 + $0x44] sm:$0x1]  ;;  %v2328_v7 = vrot.slane %v2326_v60, 5 }
  0x51   : > { %v2299_v16 = vor.u32 %v2298_v4, %v2294_v2  ;;  %v425_v57 = vrot.slane %v424_v45, 4  ;;  %v2318_v58 = vrot.slane %v2316_v50, 5  ;;  %v2322_v4 = vrot.slane %v2320_v59, 4  ;;  %v257_v54 = vld [vmem:[%s7745_s6 + $0x4c] sm:$0xf] }
  0x52   : > { %6948 = vmatpush3.bf16.msra.mxu0 %v7471_v5  ;;  %v406_v22 = vsel %vm7808_vm2, %v401_v11, %v405_v51  ;;  %v427_v5 = vshll.u32 %v296_v3, 16  ;;  %v7485_v3 = vld [vmem:[%s9898_s1 + $0x38] sm:$0xff]   ;;  %v441_v8 = vshll.u32 %v255_v56, 16  ;;  %v2314_v12 = vrot.slane %v2313_v62, 4  ;;  %v298_v55 = vld [vmem:[%s7745_s6 + $0x50] sm:$0x1] }
  0x53   : > { %6758 = vmatpush3.bf16.msra.mxu1 %v7476_v35  ;;  %6949 = vmatprep.subr.bf16.mxu0 %v7472_v49  ;;  %v5728_v30 = vcombine.low %v396_v6, %v406_v22  ;;  %v2300_v31 = vrot.slane %v2299_v16, 4  ;;  %v254_v35 = vld [vmem:[%s7745_s6 + $0x3c] sm:$0xf]  ;;  %v7477_v16 = vld [vmem:[%s9898_s1 + $0x170] sm:$0xff]   ;;  %v445_v19 = vshrl.u32 %v255_v56, 16  ;;  %v451_v22 = vshll.u32 %v297_v0, 16 }
  0x54   : > { %6759 = vmatprep.subr.bf16.mxu1 %v7479_v61  ;;  %v429_v48 = vrot.slane %v427_v5, 5  ;;  %v432_v1 = vshrl.u32 %v254_v35, 16  ;;  %v435_v2 = vshll.u32 %v254_v35, 16  ;;  %v443_v18 = vrot.slane %v441_v8, 5  ;;  %v7978_v5 = vld [vmem:[%s9898_s1 + $0x80] sm:$0xff]  }
  0x55   : > { %6724 = vmatmul.mubr.bf16.gmra.mrb[4].mxu1 %v5728_v30  ;;  %v2305_v44 = vsel %vm7808_vm2, %v2300_v31, %v2304_v17  ;;  %v2323_v17 = vor.u32 %v2322_v4, %v2318_v58  ;;  %v2334_v30 = vshll.u32 %v5916_v10, 16  ;;  %v256_v31 = vld [vmem:[%s7745_s6 + $0x48] sm:$0xf]  ;;  %v5919_v59 = vld [vmem:[%s7745_s6 + $0x54] sm:$0xf]  ;;  %v469_v4 = vshrl.u32 %v257_v54, 16 }
  0x56   : > { %6950 = vmatpush3.bf16.msra.mxu0 %v7472_v49  ;;  %v5968_v51 = vcombine.low %v2295_v39, %v2305_v44  ;;  %v7475_v49 = vld [vmem:[%s9898_s1 + $0x168] sm:$0xff]   ;;  %v430_v6 = vsel %vm7808_vm2, %v425_v57, %v429_v48  ;;  %v434_v13 = vrot.slane %v432_v1, 4  ;;  %v437_v14 = vrot.slane %v435_v2, 5  ;;  %v7992_v1 = vld [vmem:[%s7745_s6 + $0x58] sm:$0xf] }
  0x57   : > { %6760 = vmatpush3.bf16.msra.mxu1 %v7479_v61  ;;  %6951 = vmatprep.subr.bf16.mxu0 %v7474_v21  ;;  %v420_v61 = vsel %vm7808_vm2, %v415_v53, %v419_v27  ;;  %v2331_v27 = vshrl.u32 %v5916_v10, 16  ;;  %v2324_v35 = vrot.slane %v2323_v17, 4  ;;  %v453_v39 = vrot.slane %v451_v22, 5 }
  0x58   : > { %6761 = vmatprep.subr.bf16.mxu1 %v7481_v15  ;;  %6916 = vmatmul.mubr.bf16.gmra.mrb[4].mxu0 %v5968_v51  ;;  %v5729_v11 = vcombine.low %v420_v61, %v430_v6  ;;  %v438_v26 = vor.u32 %v437_v14, %v434_v13  ;;  %v2336_v44 = vrot.slane %v2334_v30, 5  ;;  %v2350_v53 = vshll.u32 %v7967_v23, 16 }
  0x59   : > { %v2333_v43 = vrot.slane %v2331_v27, 4  ;;  %v2329_v48 = vsel %vm7808_vm2, %v2324_v35, %v2328_v7  ;;  %v456_v62 = vshrl.u32 %v256_v31, 16  ;;  %v459_v0 = vshll.u32 %v256_v31, 16  ;;  %v7997_v7 = vld [vmem:[%s9898_s1 + $0x180] sm:$0xff]  }
  0x5a   : > { %6952 = vmatpush3.bf16.msra.mxu0 %v7474_v21  ;;  %6727 = vmatprep.mubr.bf16.mxu1 %v5729_v11  ;;  %v2319_v21 = vsel %vm7808_vm2, %v2314_v12, %v2318_v58  ;;  %v439_v41 = vrot.slane %v438_v26, 4  ;;  %v2352_v61 = vrot.slane %v2350_v53, 5  ;;  %v475_v12 = vshll.u32 %v298_v55, 16  ;;  %v5922_v53 = vld [vmem:[%s7745_s6 + $0x60] sm:$0xf] }
  0x5b   : > { %6762 = vmatpush3.bf16.msra.mxu1 %v7481_v15  ;;  %v7961_v15 = vld [vmem:[%s7745_s6 + $0x4c] sm:$0xf]  ;;  %6953 = vmatprep.subr.bf16.mxu0 %v7475_v49  ;;  %v5969_v56 = vcombine.low %v2319_v21, %v2329_v48  ;;  %v2337_v57 = vor.u32 %v2336_v44, %v2333_v43  ;;  %v458_v10 = vrot.slane %v456_v62, 4  ;;  %v461_v11 = vrot.slane %v459_v0, 5  ;;  %v8004_v21 = vld [vmem:[%s7745_s6 + $0x5c] sm:$0x1] }
  0x5c   : > { %6763 = vmatprep.subr.bf16.mxu1 %v7483_v36  ;;  %v2340_v40 = vshll.u32 %v7961_v15, 16  ;;  %v2344_v45 = vshrl.u32 %v7961_v15, 16  ;;  %v477_v22 = vrot.slane %v475_v12, 5  ;;  %v2355_v26 = vshrl.u32 %v5919_v59, 16  ;;  %v259_v44 = vld [vmem:[%s7745_s6 + $0x58] sm:$0xf] }
  0x5d   : > { %6919 = vmatprep.mubr.bf16.mxu0 %v5969_v56  ;;  %v2338_v2 = vrot.slane %v2337_v57, 4  ;;  %v2358_v30 = vshll.u32 %v5919_v59, 16  ;;  %v2364_v31 = vshll.u32 %v7992_v1, 16  ;;  %v2368_v35 = vshrl.u32 %v7992_v1, 16 }
  0x5e   : > { %6954 = vmatpush3.bf16.msra.mxu0 %v7475_v49  ;;  %v2342_v51 = vrot.slane %v2340_v40, 5  ;;  %v444_v49 = vsel %vm7808_vm2, %v439_v41, %v443_v18  ;;  %v2346_v58 = vrot.slane %v2344_v45, 4  ;;  %v2357_v43 = vrot.slane %v2355_v26, 4  ;;  %v8032_v26 = vld [vmem:[%s7745_s6 + $0x60] sm:$0xf] }
  0x5f   : > { %6764 = vmatpush3.bf16.msra.mxu1 %v7483_v36  ;;  %v447_v36 = vrot.slane %v445_v19, 4  ;;  %6955 = vmatprep.subr.bf16.mxu0 %v7477_v16  ;;  %v471_v19 = vrot.slane %v469_v4, 4  ;;  %v2366_v45 = vrot.slane %v2364_v31, 5  ;;  %v2370_v48 = vrot.slane %v2368_v35, 4 }
  0x60   : > { %6765 = vmatprep.subr.bf16.mxu1 %v7485_v3  ;;  %v2347_v6 = vor.u32 %v2346_v58, %v2342_v51  ;;  %v2343_v14 = vsel %vm7808_vm2, %v2338_v2, %v2342_v51  ;;  %v299_v51 = vld [vmem:[%s7745_s6 + $0x5c] sm:$0x1] }
  0x61   : > { %v448_v50 = vor.u32 %v447_v36, %v443_v18  ;;  %v462_v18 = vor.u32 %v461_v11, %v458_v10  ;;  %v258_v36 = vld [vmem:[%s7745_s6 + $0x54] sm:$0xf]  ;;  %v2371_v58 = vor.u32 %v2370_v48, %v2366_v45 }
  0x62   : > { %6956 = vmatpush3.bf16.msra.mxu0 %v7477_v16  ;;  %v2348_v16 = vrot.slane %v2347_v6, 4  ;;  %v480_v56 = vshrl.u32 %v258_v36, 16  ;;  %v493_v6 = vshrl.u32 %v259_v44, 16 }
  0x63   : > { %6766 = vmatpush3.bf16.msra.mxu1 %v7485_v3  ;;  %v449_v60 = vrot.slane %v448_v50, 4  ;;  %v465_v3 = vshll.u32 %v257_v54, 16  ;;  %6957 = vmatprep.subr.bf16.mxu0 %v7478_v32  ;;  %v463_v40 = vrot.slane %v462_v18, 4  ;;  %v2374_v50 = vshll.u32 %v8004_v21, 16  ;;  %v8028_v18 = vld [vmem:[%s7745_s6 + $0x68] sm:$0x1] }
  0x64   : > { %6799 = vmatprep.subr.bf16.mxu1 %v7978_v5  ;;  %v2353_v27 = vsel %vm7808_vm2, %v2348_v16, %v2352_v61  ;;  %v8019_v61 = vld [vmem:[%s7745_s6 + $0x64] sm:$0xf]  ;;  %v482_v0 = vrot.slane %v480_v56, 4  ;;  %v495_v12 = vrot.slane %v493_v6, 4  ;;  %v2398_v48 = vshll.u32 %v8028_v18, 16 }
  0x65   : > { %v454_v8 = vsel %vm7808_vm2, %v449_v60, %v453_v39  ;;  %v467_v17 = vrot.slane %v465_v3, 5  ;;  %v5970_v39 = vcombine.low %v2343_v14, %v2353_v27  ;;  %v2376_v59 = vrot.slane %v2374_v50, 5  ;;  %v8050_v6 = vld [vmem:[%s7745_s6 + $0x6c] sm:$0xf] }
  0x66   : > { %v5730_v13 = vcombine.low %v444_v49, %v454_v8  ;;  %6958 = vmatpush3.bf16.msra.mxu0 %v7478_v32  ;;  %v2360_v32 = vrot.slane %v2358_v30, 5  ;;  %v483_v49 = vshll.u32 %v258_v36, 16  ;;  %v489_v60 = vshll.u32 %v259_v44, 16  ;;  %v8035_v36 = vld [vmem:[%s7745_s6 + $0x64] sm:$0xf] }
  0x67   : > { %6991 = vmatprep.subr.bf16.mxu0 %v7997_v7  ;;  %v472_v41 = vor.u32 %v471_v19, %v467_v17  ;;  %6920 = vmatmul.mubr.bf16.gmra.mrb[8].mxu0 %v5970_v39  ;;  %v468_v54 = vsel %vm7808_vm2, %v463_v40, %v467_v17  ;;  %v2372_v8 = vrot.slane %v2371_v58, 4  ;;  %v2379_v14 = vshrl.u32 %v5922_v53, 16  ;;  %v300_v44 = vld [vmem:[%s7745_s6 + $0x68] sm:$0x1] }
  0x68   : > { %6728 = vmatmul.mubr.bf16.gmra.mrb[8].mxu1 %v5730_v13  ;;  %v2361_v57 = vor.u32 %v2360_v32, %v2357_v43  ;;  %v485_v2 = vrot.slane %v483_v49, 5  ;;  %v491_v10 = vrot.slane %v489_v60, 5  ;;  %v499_v13 = vshll.u32 %v299_v51, 16  ;;  %v5989_v51 = vld [vmem:[%s7745_s6 + $0xc] sm:$0xe] }
  0x69   : > { %v473_v55 = vrot.slane %v472_v41, 4  ;;  %v2377_v17 = vsel %vm7808_vm2, %v2372_v8, %v2376_v59  ;;  %v2382_v19 = vshll.u32 %v5922_v53, 16  ;;  %v2381_v39 = vrot.slane %v2379_v14, 4 }
  0x6a   : > { %v2362_v4 = vrot.slane %v2361_v57, 4  ;;  %v486_v11 = vor.u32 %v485_v2, %v482_v0  ;;  %v496_v31 = vor.u32 %v495_v12, %v491_v10  ;;  %v501_v35 = vrot.slane %v499_v13, 5 }
  0x6b   : > { %v478_v62 = vsel %vm7808_vm2, %v473_v55, %v477_v22  ;;  %v2388_v22 = vshll.u32 %v8019_v61, 16  ;;  %v2384_v40 = vrot.slane %v2382_v19, 5  ;;  %v2392_v43 = vshrl.u32 %v8019_v61, 16 }
  0x6c   : > { %v5731_v3 = vcombine.low %v468_v54, %v478_v62  ;;  %v2367_v16 = vsel %vm7808_vm2, %v2362_v4, %v2366_v45  ;;  %v487_v30 = vrot.slane %v486_v11, 4  ;;  %v497_v45 = vrot.slane %v496_v31, 4 }
  0x6d   : > { %v5971_v27 = vcombine.low %v2367_v16, %v2377_v17  ;;  %v2390_v41 = vrot.slane %v2388_v22, 5  ;;  %v504_v50 = vshrl.u32 %v8032_v26, 16  ;;  %v2385_v53 = vor.u32 %v2384_v40, %v2381_v39  ;;  %v8062_v22 = vld [vmem:[%s7745_s6 + $0x70] sm:$0xf] }
  0x6e   : > { %6731 = vmatprep.mubr.bf16.mxu1 %v5731_v3  ;;  %v492_v32 = vsel %vm7808_vm2, %v487_v30, %v491_v10  ;;  %v2394_v54 = vrot.slane %v2392_v43, 4  ;;  %v507_v55 = vshll.u32 %v8032_v26, 16  ;;  %v513_v56 = vshll.u32 %v8035_v36, 16  ;;  %v7569_v10 = vld [vmem:[%s7745_s6 + $0xb4] sm:$0xff]  }
  0x6f   : > { %6923 = vmatprep.mubr.bf16.mxu0 %v5971_v27  ;;  %v502_v49 = vsel %vm7808_vm2, %v497_v45, %v501_v35  ;;  %v2400_v57 = vrot.slane %v2398_v48, 5  ;;  %v506_v58 = vrot.slane %v504_v50, 4  ;;  %v517_v59 = vshrl.u32 %v8035_v36, 16  ;;  %v8073_v48 = vld [vmem:[%s7745_s6 + $0x78] sm:$0xf] }
  0x70   : > { %v5732_v60 = vcombine.low %v492_v32, %v502_v49  ;;  %v2386_v62 = vrot.slane %v2385_v53, 4  ;;  %v2395_v0 = vor.u32 %v2394_v54, %v2390_v41  ;;  %v509_v2 = vrot.slane %v507_v55, 5  ;;  %v8084_v55 = vld [vmem:[%s7745_s6 + $0x7c] sm:$0xf] }
  0x71   : > { %v515_v3 = vrot.slane %v513_v56, 5  ;;  %v519_v4 = vrot.slane %v517_v59, 4  ;;  %v523_v8 = vshll.u32 %v300_v44, 16  ;;  %v6005_v11 = vrot.slane %v5989_v51, 9  ;;  %v302_v59 = vld [vmem:[%s7745_s6 + $0x80] sm:$0x1] }
  0x72   : > { %6732 = vmatmul.mubr.bf16.gmra.mrb[12].mxu1 %v5732_v60  ;;  %v2391_v12 = vsel %vm7808_vm2, %v2386_v62, %v2390_v41  ;;  %v2396_v13 = vrot.slane %v2395_v0, 4  ;;  %v510_v14 = vor.u32 %v509_v2, %v506_v58  ;;  %v2982_v16 = vrot.slane %v7789_v24, 5  ;;  %v301_v41 = vld [vmem:[%s7745_s6 + $0x74] sm:$0x1]  ;;  %v5990_v24 = vld [vmem:[%s7745_s6 + $0x18] sm:$0xe] }
  0x73   : > { %v520_v17 = vor.u32 %v519_v4, %v515_v3  ;;  %v525_v19 = vrot.slane %v523_v8, 5  ;;  %v528_v27 = vshrl.u32 %v8050_v6, 16  ;;  %v531_v30 = vshll.u32 %v8050_v6, 16 }
  0x74   : > { %v2401_v31 = vsel %vm7808_vm2, %v2396_v13, %v2400_v57  ;;  %v511_v35 = vrot.slane %v510_v14, 4  ;;  %v2983_v39 = vsel %vm8054_vm5, %v6005_v11, %v2982_v16  ;;  %v2984_v40 = vrot.slane %v2982_v16, 4  ;;  %v5991_v14 = vld [vmem:[%s7745_s6 + $0x24] sm:$0xe] }
  0x75   : > { %v5972_v43 = vcombine.low %v2391_v12, %v2401_v31  ;;  %v521_v44 = vrot.slane %v520_v17, 4  ;;  %v530_v32 = vrot.slane %v528_v27, 4  ;;  %v533_v45 = vrot.slane %v531_v30, 5  ;;  %v8106_v17 = vld [vmem:[%s7745_s6 + $0x84] sm:$0xf]  ;;  %v7482_v30 = vld [vmem:[%s9898_s1 + $0x188] sm:$0xff]  }
  0x76   : > { %v516_v50 = vsel %vm7808_vm2, %v511_v35, %v515_v3  ;;  %v2986_v51 = vsel %vm8054_vm5, %v2984_v40, %v2985_v42  ;;  %v537_v53 = vshll.u32 %v8062_v22, 16  ;;  %v541_v54 = vshrl.u32 %v8062_v22, 16 }
  0x77   : > { %6924 = vmatmul.mubr.bf16.gmra.mrb[12].mxu0 %v5972_v43  ;;  %v526_v56 = vsel %vm7808_vm2, %v521_v44, %v525_v19  ;;  %v6037_v49 = vcombine.low %v2983_v39, %v2986_v51  ;;  %v534_v57 = vor.u32 %v533_v45, %v530_v32  ;;  %v547_v58 = vshll.u32 %v301_v41, 16  ;;  %v8114_v41 = vld [vmem:[%s7745_s6 + $0x88] sm:$0xf]  ;;  %v303_v32 = vld [vmem:[%s7745_s6 + $0x8c] sm:$0x1] }
  0x78   : > { %v5733_v60 = vcombine.low %v516_v50, %v526_v56  ;;  %v539_v25 = vrot.slane %v537_v53, 5  ;;  %v543_v62 = vrot.slane %v541_v54, 4  ;;  %v6006_v0 = vrot.slane %v5990_v24, 9 }
  0x79   : > { %6959 = vmatprep.mubr.bf16.mxu0 %v6037_v49  ;;  %v535_v42 = vrot.slane %v534_v57, 4  ;;  %v549_v2 = vrot.slane %v547_v58, 5  ;;  %v2993_v3 = vsel %vm8054_vm5, %v7857_v37, %v2992_v33  ;;  %v552_v4 = vshrl.u32 %v8073_v48, 16 }
  0x7a   : > { %6735 = vmatprep.mubr.bf16.mxu1 %v5733_v60  ;;  %v544_v8 = vor.u32 %v543_v62, %v539_v25  ;;  %v2990_v11 = vsel %vm8054_vm5, %v6006_v0, %v2989_v28  ;;  %v555_v12 = vshll.u32 %v8073_v48, 16  ;;  %v561_v13 = vshll.u32 %v8084_v55, 16 }
  0x7b   : > { %v540_v9 = vsel %vm7808_vm2, %v535_v42, %v539_v25  ;;  %v6038_v16 = vcombine.low %v2990_v11, %v2993_v3  ;;  %v554_v33 = vrot.slane %v552_v4, 4  ;;  %v565_v37 = vshrl.u32 %v8084_v55, 16  ;;  %v8135_v3 = vld [vmem:[%s7745_s6 + $0x90] sm:$0xf]  ;;  %v8138_v4 = vld [vmem:[%s7745_s6 + $0x94] sm:$0xf] }
  0x7c   : > { %v545_v63 = vrot.slane %v544_v8, 4  ;;  %v557_v19 = vrot.slane %v555_v12, 5  ;;  %v563_v27 = vrot.slane %v561_v13, 5  ;;  %v571_v28 = vshll.u32 %v302_v59, 16 }
  0x7d   : > { %v567_v31 = vrot.slane %v565_v37, 4  ;;  %v6007_v35 = vrot.slane %v5991_v14, 9  ;;  %v2996_v39 = vrot.slane %v7861_v46, 5  ;;  %v2999_v40 = vrot.slane %v7867_v52, 5  ;;  %v5992_v46 = vld [vmem:[%s7745_s6 + $0x30] sm:$0xe] }
  0x7e   : > { %v550_v24 = vsel %vm7808_vm2, %v545_v63, %v549_v2  ;;  %v558_v43 = vor.u32 %v557_v19, %v554_v33  ;;  %v573_v44 = vrot.slane %v571_v28, 5  ;;  %v576_v45 = vshrl.u32 %v8106_v17, 16  ;;  %v304_v63 = vld [vmem:[%s7745_s6 + $0x98] sm:$0x1] }
  0x7f   : > { %v5734_v50 = vcombine.low %v540_v9, %v550_v24  ;;  %6960 = vmatmul.mubr.bf16.vlgmr.msra.gmra.mrb[0].mxu0 %v6038_v16  ;;  %v568_v51 = vor.u32 %v567_v31, %v563_v27  ;;  %v2997_v53 = vsel %vm8054_vm5, %v6007_v35, %v2996_v39  ;;  %v2998_v54 = vrot.slane %v2996_v39, 4  ;;  %v7486_v31 = vld [vmem:[%s9898_s1 + $0x198] sm:$0xff]  }
  0x80   : > { %6992 = vmatpush3.bf16.msra.mxu0 %v7997_v7  ;;  %v559_v52 = vrot.slane %v558_v43, 4  ;;  %v578_v56 = vrot.slane %v576_v45, 4  ;;  %v579_v49 = vshll.u32 %v8106_v17, 16  ;;  %v585_v57 = vshll.u32 %v8114_v41, 16  ;;  %v7484_v7 = vld [vmem:[%s9898_s1 + $0x190] sm:$0xff]  }
  0x81   : > { %6736 = vmatmul.mubr.bf16.gmra.mrb[16].mxu1 %v5734_v50  ;;  %v569_v58 = vrot.slane %v568_v51, 4  ;;  %v3000_v59 = vsel %vm8054_vm5, %v2998_v54, %v2999_v40  ;;  %v589_v60 = vshrl.u32 %v8114_v41, 16  ;;  %v595_v25 = vshll.u32 %v303_v32, 16  ;;  %6993 = vmatprep.subr.bf16.mxu0 %v7482_v30  ;;  %v5993_v39 = vld [vmem:[%s7745_s6 + $0x3c] sm:$0xe] }
  0x82   : > { %v564_v62 = vsel %vm7808_vm2, %v559_v52, %v563_v27  ;;  %v6039_v0 = vcombine.low %v2997_v53, %v3000_v59  ;;  %v581_v42 = vrot.slane %v579_v49, 5  ;;  %v587_v2 = vrot.slane %v585_v57, 5  ;;  %v8156_v32 = vld [vmem:[%s7745_s6 + $0x9c] sm:$0xf]  ;;  %v8165_v49 = vld [vmem:[%s7745_s6 + $0xa0] sm:$0xf] }
  0x83   : > { %v574_v8 = vsel %vm7808_vm2, %v569_v58, %v573_v44  ;;  %v591_v11 = vrot.slane %v589_v60, 4  ;;  %v597_v12 = vrot.slane %v595_v25, 5  ;;  %v6008_v13 = vrot.slane %v5992_v46, 9  ;;  %v7490_v57 = vld [vmem:[%s9898_s1 + $0x1a0] sm:$0xff]  }
  0x84   : > { %v5735_v14 = vcombine.low %v564_v62, %v574_v8  ;;  %6963 = vmatprep.mubr.bf16.mxu0 %v6039_v0  ;;  %v582_v9 = vor.u32 %v581_v42, %v578_v56  ;;  %v3003_v16 = vrot.slane %v7892_v34, 5  ;;  %v3006_v33 = vrot.slane %v7903_v47, 5  ;;  %6994 = vmatpush3.bf16.msra.mxu0 %v7482_v30  ;;  %v305_v62 = vld [vmem:[%s7745_s6 + $0xa4] sm:$0x1] }
  0x85   : > { %v592_v37 = vor.u32 %v591_v11, %v587_v2  ;;  %v600_v19 = vshrl.u32 %v8135_v3, 16  ;;  %v603_v27 = vshll.u32 %v8135_v3, 16  ;;  %v609_v28 = vshll.u32 %v8138_v4, 16  ;;  %6995 = vmatprep.subr.bf16.mxu0 %v7484_v7 }
  0x86   : > { %6739 = vmatprep.mubr.bf16.mxu1 %v5735_v14  ;;  %v583_v35 = vrot.slane %v582_v9, 4  ;;  %v3004_v34 = vsel %vm8054_vm5, %v6008_v13, %v3003_v16  ;;  %v3005_v47 = vrot.slane %v3003_v16, 4  ;;  %v613_v30 = vshrl.u32 %v8138_v4, 16  ;;  %v5994_v16 = vld [vmem:[%s7745_s6 + $0x48] sm:$0xe] }
  0x87   : > { %v593_v40 = vrot.slane %v592_v37, 4  ;;  %v602_v24 = vrot.slane %v600_v19, 4  ;;  %v605_v43 = vrot.slane %v603_v27, 5  ;;  %v611_v44 = vrot.slane %v609_v28, 5  ;;  %v8190_v28 = vld [vmem:[%s7745_s6 + $0xa8] sm:$0xf] }
  0x88   : > { %v588_v45 = vsel %vm7808_vm2, %v583_v35, %v587_v2  ;;  %v3007_v50 = vsel %vm8054_vm5, %v3005_v47, %v3006_v33  ;;  %v615_v51 = vrot.slane %v613_v30, 4  ;;  %v619_v53 = vshll.u32 %v304_v63, 16  ;;  %6996 = vmatpush3.bf16.msra.mxu0 %v7484_v7  ;;  %v7494_v33 = vld [vmem:[%s9898_s1 + $0x1a8] sm:$0xff]  }
  0x89   : > { %v598_v54 = vsel %vm7808_vm2, %v593_v40, %v597_v12  ;;  %v6040_v46 = vcombine.low %v3004_v34, %v3007_v50  ;;  %v606_v52 = vor.u32 %v605_v43, %v602_v24  ;;  %v6009_v56 = vrot.slane %v5993_v39, 9  ;;  %6997 = vmatprep.subr.bf16.mxu0 %v7486_v31  ;;  %v8193_v30 = vld [vmem:[%s7745_s6 + $0xac] sm:$0xf] }
  0x8a   : > { %v5736_v58 = vcombine.low %v588_v45, %v598_v54  ;;  %v616_v59 = vor.u32 %v615_v51, %v611_v44  ;;  %v621_v60 = vrot.slane %v619_v53, 5  ;;  %v3010_v25 = vrot.slane %v7926_v20, 5  ;;  %v5995_v54 = vld [vmem:[%s7745_s6 + $0x54] sm:$0xe] }
  0x8b   : > { %6964 = vmatmul.mubr.bf16.gmra.mrb[4].mxu0 %v6040_v46  ;;  %v607_v7 = vrot.slane %v606_v52, 4  ;;  %v3013_v0 = vrot.slane %v7934_v29, 5  ;;  %v624_v42 = vshrl.u32 %v8156_v32, 16  ;;  %v627_v2 = vshll.u32 %v8156_v32, 16  ;;  %v7498_v46 = vld [vmem:[%s9898_s1 + $0x1b0] sm:$0xff]  }
  0x8c   : > { %6740 = vmatmul.mubr.bf16.gmra.mrb[20].mxu1 %v5736_v58  ;;  %v617_v8 = vrot.slane %v616_v59, 4  ;;  %v3011_v11 = vsel %vm8054_vm5, %v6009_v56, %v3010_v25  ;;  %v3012_v12 = vrot.slane %v3010_v25, 4  ;;  %v633_v13 = vshll.u32 %v8165_v49, 16  ;;  %6998 = vmatpush3.bf16.msra.mxu0 %v7486_v31 }
  0x8d   : > { %v612_v20 = vsel %vm7808_vm2, %v607_v7, %v611_v44  ;;  %v626_v14 = vrot.slane %v624_v42, 4  ;;  %v629_v29 = vrot.slane %v627_v2, 5  ;;  %v637_v9 = vshrl.u32 %v8165_v49, 16  ;;  %6999 = vmatprep.subr.bf16.mxu0 %v7490_v57  ;;  %v306_v44 = vld [vmem:[%s7745_s6 + $0xb0] sm:$0x1] }
  0x8e   : > { %v622_v37 = vsel %vm7808_vm2, %v617_v8, %v621_v60  ;;  %v3014_v63 = vsel %vm8054_vm5, %v3012_v12, %v3013_v0  ;;  %v635_v19 = vrot.slane %v633_v13, 5  ;;  %v643_v27 = vshll.u32 %v305_v62, 16  ;;  %v8213_v42 = vld [vmem:[%s7745_s6 + $0xb4] sm:$0xf]  ;;  %v8218_v13 = vld [vmem:[%s7745_s6 + $0xb8] sm:$0xf] }
  0x8f   : > { %v5737_v31 = vcombine.low %v612_v20, %v622_v37  ;;  %v6041_v35 = vcombine.low %v3011_v11, %v3014_v63  ;;  %v630_v34 = vor.u32 %v629_v29, %v626_v14  ;;  %v639_v47 = vrot.slane %v637_v9, 4  ;;  %v307_v20 = vld [vmem:[%s7745_s6 + $0xbc] sm:$0x1] }
  0x90   : > { %v645_v39 = vrot.slane %v643_v27, 5  ;;  %v6010_v40 = vrot.slane %v5994_v16, 9  ;;  %v3017_v24 = vrot.slane %v7961_v15, 5  ;;  %v3020_v43 = vrot.slane %v7967_v23, 5  ;;  %7000 = vmatpush3.bf16.msra.mxu0 %v7490_v57  ;;  %v7502_v14 = vld [vmem:[%s9898_s1 + $0x1b8] sm:$0xff]  }
  0x91   : > { %6743 = vmatprep.mubr.bf16.mxu1 %v5737_v31  ;;  %6967 = vmatprep.mubr.bf16.mxu0 %v6041_v35  ;;  %v631_v45 = vrot.slane %v630_v34, 4  ;;  %v640_v50 = vor.u32 %v639_v47, %v635_v19  ;;  %v648_v51 = vshrl.u32 %v8190_v28, 16  ;;  %v651_v53 = vshll.u32 %v8190_v28, 16  ;;  %v5996_v31 = vld [vmem:[%s7745_s6 + $0x60] sm:$0xe] }
  0x92   : > { %v3018_v15 = vsel %vm8054_vm5, %v6010_v40, %v3017_v24  ;;  %v3019_v23 = vrot.slane %v3017_v24, 4  ;;  %v657_v52 = vshll.u32 %v8193_v30, 16  ;;  %v661_v56 = vshrl.u32 %v8193_v30, 16  ;;  %7001 = vmatprep.subr.bf16.mxu0 %v7494_v33  ;;  %v5926_v40 = vld [vmem:[%s7745_s6 + $0x70] sm:$0xf] }
  0x93   : > { %v636_v57 = vsel %vm7808_vm2, %v631_v45, %v635_v19  ;;  %v641_v58 = vrot.slane %v640_v50, 4  ;;  %v650_v59 = vrot.slane %v648_v51, 4  ;;  %v653_v60 = vrot.slane %v651_v53, 5  ;;  %v8240_v45 = vld [vmem:[%s9898_s1 + $0x1c0] sm:$0xff]  }
  0x94   : > { %v3021_v25 = vsel %vm8054_vm5, %v3019_v23, %v3020_v43  ;;  %v659_v62 = vrot.slane %v657_v52, 5  ;;  %v663_v7 = vrot.slane %v661_v56, 4  ;;  %v667_v0 = vshll.u32 %v306_v44, 16  ;;  %7002 = vmatpush3.bf16.msra.mxu0 %v7494_v33  ;;  %v5997_v44 = vld [vmem:[%s7745_s6 + $0x6c] sm:$0xe] }
  0x95   : > { %v646_v2 = vsel %vm7808_vm2, %v641_v58, %v645_v39  ;;  %v6042_v8 = vcombine.low %v3018_v15, %v3021_v25  ;;  %v654_v11 = vor.u32 %v653_v60, %v650_v59  ;;  %v6011_v12 = vrot.slane %v5995_v54, 9  ;;  %7003 = vmatprep.subr.bf16.mxu0 %v7498_v46  ;;  %v5927_v56 = vld [vmem:[%s7745_s6 + $0x74] sm:$0x1]  ;;  %v5998_v25 = vld [vmem:[%s7745_s6 + $0x78] sm:$0xe] }
  0x96   : > { %v5738_v29 = vcombine.low %v636_v57, %v646_v2  ;;  %v664_v9 = vor.u32 %v663_v7, %v659_v62  ;;  %v669_v16 = vrot.slane %v667_v0, 5  ;;  %v3024_v33 = vrot.slane %v7992_v1, 5 }
  0x97   : > { %6968 = vmatmul.mubr.bf16.gmra.mrb[8].mxu0 %v6042_v8  ;;  %v655_v37 = vrot.slane %v654_v11, 4  ;;  %v3027_v63 = vrot.slane %v8004_v21, 5  ;;  %v672_v19 = vshrl.u32 %v8213_v42, 16  ;;  %v675_v27 = vshll.u32 %v8213_v42, 16 }
  0x98   : > { %6744 = vmatmul.mubr.bf16.gmra.mrb[24].mxu1 %v5738_v29  ;;  %v665_v35 = vrot.slane %v664_v9, 4  ;;  %v3025_v34 = vsel %vm8054_vm5, %v6011_v12, %v3024_v33  ;;  %v3026_v47 = vrot.slane %v3024_v33, 4  ;;  %v681_v39 = vshll.u32 %v8218_v13, 16  ;;  %7004 = vmatpush3.bf16.msra.mxu0 %v7498_v46  ;;  %v8253_v12 = vld [vmem:[%s7745_s6 + $0x7c] sm:$0xf] }
  0x99   : > { %v660_v1 = vsel %vm7808_vm2, %v655_v37, %v659_v62  ;;  %v674_v21 = vrot.slane %v672_v19, 4  ;;  %v677_v24 = vrot.slane %v675_v27, 5  ;;  %v685_v43 = vshrl.u32 %v8218_v13, 16  ;;  %7005 = vmatprep.subr.bf16.mxu0 %v7502_v14  ;;  %v7571_v37 = vld [vmem:[%s7745_s6] sm:$0xf] }
  0x9a   : > { %v670_v50 = vsel %vm7808_vm2, %v665_v35, %v669_v16  ;;  %v3028_v51 = vsel %vm8054_vm5, %v3026_v47, %v3027_v63  ;;  %v683_v53 = vrot.slane %v681_v39, 5  ;;  %v691_v54 = vshll.u32 %v307_v20, 16  ;;  %v5932_v16 = vld [vmem:[%s7745_s6 + $0x88] sm:$0xf]  ;;  %v8268_v63 = vld [vmem:[%s7745_s6 + $0x4] sm:$0xf] }
  0x9b   : > { %v5739_v46 = vcombine.low %v660_v1, %v670_v50  ;;  %v6043_v15 = vcombine.low %v3025_v34, %v3028_v51  ;;  %v678_v23 = vor.u32 %v677_v24, %v674_v21  ;;  %v687_v52 = vrot.slane %v685_v43, 4  ;;  %v5933_v27 = vld [vmem:[%s7745_s6 + $0x8c] sm:$0x1]  ;;  %v5936_v24 = vld [vmem:[%s7745_s6 + $0x98] sm:$0x1] }
  0x9c   : > { %v693_v57 = vrot.slane %v691_v54, 5  ;;  %v6012_v58 = vrot.slane %v5996_v31, 9  ;;  %v3031_v59 = vrot.slane %v8019_v61, 5  ;;  %v3034_v60 = vrot.slane %v8028_v18, 5  ;;  %7006 = vmatpush3.bf16.msra.mxu0 %v7502_v14  ;;  %v8256_v18 = vld [vmem:[%s7745_s6 + $0x80] sm:$0x1] }
  0x9d   : > { %6747 = vmatprep.mubr.bf16.mxu1 %v5739_v46  ;;  %6971 = vmatprep.mubr.bf16.mxu0 %v6043_v15  ;;  %v679_v62 = vrot.slane %v678_v23, 4  ;;  %v688_v7 = vor.u32 %v687_v52, %v683_v53  ;;  %v6013_v0 = vrot.slane %v5997_v44, 9  ;;  %v3038_v2 = vrot.slane %v5926_v40, 5  ;;  %v5999_v31 = vld [vmem:[%s7745_s6 + $0x84] sm:$0xe] }
  0x9e   : > { %v3032_v8 = vsel %vm8054_vm5, %v6012_v58, %v3031_v59  ;;  %v3033_v11 = vrot.slane %v3031_v59, 4  ;;  %v3041_v61 = vrot.slane %v5927_v56, 5  ;;  %7039 = vmatprep.subr.bf16.mxu0 %v8240_v45  ;;  %v5749_v19 = vcombine.low %v7571_v37, %v8268_v63  ;;  %v5935_v40 = vld [vmem:[%s7745_s6 + $0x94] sm:$0xf]  ;;  %v6000_v43 = vld [vmem:[%s7745_s6 + $0x90] sm:$0xe] }
  0x9f   : > { %v684_v20 = vsel %vm7808_vm2, %v679_v62, %v683_v53  ;;  %v689_v14 = vrot.slane %v688_v7, 4  ;;  %v3039_v29 = vsel %vm8054_vm5, %v6013_v0, %v3038_v2  ;;  %v3040_v9 = vrot.slane %v3038_v2, 4  ;;  %v6001_v51 = vld [vmem:[%s7745_s6 + $0x9c] sm:$0xe]  ;;  %v5938_v15 = vld [vmem:[%s7745_s6 + $0xa0] sm:$0xf] }
  0xa0   : > { %v3035_v33 = vsel %vm8054_vm5, %v3033_v11, %v3034_v60  ;;  %v6014_v39 = vrot.slane %v5998_v25, 9  ;;  %v3045_v44 = vrot.slane %v8253_v12, 5  ;;  %v3048_v50 = vrot.slane %v8256_v18, 5  ;;  %v5939_v23 = vld [vmem:[%s7745_s6 + $0xa4] sm:$0x1] }
  0xa1   : > { %v694_v35 = vsel %vm7808_vm2, %v689_v14, %v693_v57  ;;  %v6044_v34 = vcombine.low %v3032_v8, %v3035_v33  ;;  %v3042_v47 = vsel %vm8054_vm5, %v3040_v9, %v3041_v61  ;;  %v6015_v53 = vrot.slane %v5999_v31, 9  ;;  %v5941_v60 = vld [vmem:[%s7745_s6 + $0xac] sm:$0xf]  ;;  %v8292_v62 = vld [vmem:[%s7745_s6 + $0x10] sm:$0xf] }
  0xa2   : > { %v5740_v1 = vcombine.low %v684_v20, %v694_v35  ;;  %v6045_v21 = vcombine.low %v3039_v29, %v3042_v47  ;;  %v3052_v54 = vrot.slane %v5932_v16, 5  ;;  %v3055_v46 = vrot.slane %v5933_v27, 5  ;;  %v7573_v25 = vld [vmem:[%s7745_s6 + $0xc] sm:$0xf]  ;;  %v7575_v9 = vld [vmem:[%s7745_s6 + $0x18] sm:$0xf] }
  0xa3   : > { %6972 = vmatmul.mubr.bf16.gmra.mrb[12].mxu0 %v6044_v34  ;;  %v3046_v52 = vsel %vm8054_vm5, %v6014_v39, %v3045_v44  ;;  %v3047_v56 = vrot.slane %v3045_v44, 4  ;;  %v3059_v59 = vrot.slane %v5935_v40, 5  ;;  %v5750_v7 = vcombine.low %v7573_v25, %v8292_v62  ;;  %v7493_v20 = vld [vmem:[%s9898_s1 + $0x88] sm:$0xff]   ;;  %v8304_v16 = vld [vmem:[%s7745_s6 + $0x1c] sm:$0xf] }
  0xa4   : > { %6748 = vmatmul.mubr.bf16.gmra.mrb[28].mxu1 %v5740_v1  ;;  %6975 = vmatprep.mubr.bf16.mxu0 %v6045_v21  ;;  %v3053_v57 = vsel %vm8054_vm5, %v6015_v53, %v3052_v54  ;;  %v3054_v58 = vrot.slane %v3052_v54, 4  ;;  %v6016_v2 = vrot.slane %v6000_v43, 9  ;;  %v3062_v8 = vrot.slane %v5936_v24, 5  ;;  %v5942_v31 = vld [vmem:[%s7745_s6 + $0xb0] sm:$0x1] }
  0xa5   : > { %6767 = vmatprep.mubr.bf16.mxu1 %v5749_v19  ;;  %v3049_v0 = vsel %vm8054_vm5, %v3047_v56, %v3048_v50  ;;  %v3061_v14 = vrot.slane %v3059_v59, 4  ;;  %v6017_v29 = vrot.slane %v6001_v51, 9  ;;  %v5751_v33 = vcombine.low %v7575_v9, %v8304_v16  ;;  %v6002_v35 = vld [vmem:[%s7745_s6 + $0xa8] sm:$0xe]  ;;  %v5944_v34 = vld [vmem:[%s7745_s6 + $0xb8] sm:$0xf] }
  0xa6   : > { %v6046_v11 = vcombine.low %v3046_v52, %v3049_v0  ;;  %v3056_v61 = vsel %vm8054_vm5, %v3054_v58, %v3055_v46  ;;  %v3066_v19 = vrot.slane %v5938_v15, 5  ;;  %v3069_v27 = vrot.slane %v5939_v23, 5  ;;  %v5945_v21 = vld [vmem:[%s7745_s6 + $0xbc] sm:$0x1]  ;;  %v6003_v24 = vld [vmem:[%s7745_s6 + $0xb4] sm:$0xe] }
  0xa7   : > { %v6047_v37 = vcombine.low %v3053_v57, %v3056_v61  ;;  %v3073_v39 = vrot.slane %v5941_v60, 5  ;;  %v3060_v40 = vsel %vm8054_vm5, %v6016_v2, %v3059_v59  ;;  %v3063_v1 = vsel %vm8054_vm5, %v3061_v14, %v3062_v8  ;;  %v7497_v51 = vld [vmem:[%s9898_s1 + $0x90] sm:$0xff]   ;;  %v5947_v54 = vld [vmem:[%s7745_s6 + $0xc4] sm:$0xf]  ;;  %v8327_v52 = vld [vmem:[%s7745_s6 + $0x28] sm:$0xf] }
  0xa8   : > { %v3068_v47 = vrot.slane %v3066_v19, 4  ;;  %v3067_v43 = vsel %vm8054_vm5, %v6017_v29, %v3066_v19  ;;  %v3080_v50 = vrot.slane %v5944_v34, 5  ;;  %v6018_v53 = vrot.slane %v6002_v35, 9  ;;  %v7577_v23 = vld [vmem:[%s7745_s6 + $0x24] sm:$0xf]  ;;  %v7501_v2 = vld [vmem:[%s9898_s1 + $0x98] sm:$0xff]  }
  0xa9   : > { %v6048_v46 = vcombine.low %v3060_v40, %v3063_v1  ;;  %v3075_v15 = vrot.slane %v3073_v39, 4  ;;  %v5752_v56 = vcombine.low %v7577_v23, %v8327_v52  ;;  %v7579_v58 = vld [vmem:[%s7745_s6 + $0x30] sm:$0xf]  ;;  %v8332_v59 = vld [vmem:[%s7745_s6 + $0x34] sm:$0xf]  ;;  %v6019_v25 = vrot.slane %v6003_v24, 9 }
  0xaa   : > { %v3070_v44 = vsel %vm8054_vm5, %v3068_v47, %v3069_v27  ;;  %v5753_v60 = vcombine.low %v7579_v58, %v8332_v59  ;;  %v3083_v0 = vrot.slane %v5945_v21, 5  ;;  %v6004_v8 = vld [vmem:[%s7745_s6 + $0xc0] sm:$0xe]  ;;  %v3074_v61 = vsel %vm8054_vm5, %v6018_v53, %v3073_v39  ;;  %v5948_v9 = vld [vmem:[%s7745_s6 + $0xc8] sm:$0x1]  ;;  %v7504_v23 = vld [vmem:[%s7745_s6 + $0x18] sm:$0xff]  }
  0xab   : > { %6976 = vmatmul.mubr.bf16.gmra.mrb[16].mxu0 %v6046_v11  ;;  %v6049_v57 = vcombine.low %v3067_v43, %v3070_v44  ;;  %v3087_v11 = vrot.slane %v5947_v54, 5  ;;  %v3081_v14 = vsel %vm8054_vm5, %v6019_v25, %v3080_v50  ;;  %v6020_v19 = vrot.slane %v6004_v8, 9  ;;  %v7581_v27 = vld [vmem:[%s7745_s6 + $0x3c] sm:$0xf]  ;;  %v7583_v40 = vld [vmem:[%s7745_s6 + $0x48] sm:$0xf] }
  0xac   : > { %6768 = vmatmul.mubr.bf16.vlgmr.msra.gmra.mrb[0].mxu1 %v5750_v7  ;;  %6979 = vmatprep.mubr.bf16.mxu0 %v6047_v37  ;;  %v3082_v7 = vrot.slane %v3080_v50, 4  ;;  %v3090_v39 = vrot.slane %v5948_v9, 5  ;;  %v8358_v1 = vld [vmem:[%s7745_s6 + $0x4c] sm:$0xf]  ;;  %v7518_v50 = vld [vmem:[%s9898_s1 + $0xb0] sm:$0xff]   ;;  %v2440_v53 = vshrl.u32 %v8253_v12, 16 }
  0xad   : > { %6800 = vmatpush3.bf16.msra.mxu1 %v7978_v5  ;;  %6771 = vmatprep.mubr.bf16.mxu1 %v5751_v33  ;;  %v3076_v5 = vrot.slane %v5942_v31, 5  ;;  %v7506_v33 = vld [vmem:[%s9898_s1 + $0xa0] sm:$0xff]   ;;  %v3089_v47 = vrot.slane %v3087_v11, 4  ;;  %v5755_v21 = vcombine.low %v7583_v40, %v8358_v1  ;;  %v7512_v24 = vld [vmem:[%s9898_s1 + $0xa8] sm:$0xff]   ;;  %v3088_v43 = vsel %vm8054_vm5, %v6020_v19, %v3087_v11  ;;  %v7510_v19 = vld [vmem:[%s7745_s6 + $0x30] sm:$0xff]  }
  0xae   : > { %6801 = vmatprep.subr.bf16.mxu1 %v7493_v20  ;;  %v3084_v29 = vsel %vm8054_vm5, %v3082_v7, %v3083_v0  ;;  %v8353_v31 = vld [vmem:[%s7745_s6 + $0x40] sm:$0xf]  ;;  %v8386_v58 = vrot.slane %v2440_v53, 4  ;;  %v7507_v7 = vld [vmem:[%s7745_s6 + $0x24] sm:$0xff]   ;;  %v1350_v8 = vrot.slane %v8292_v62, 5  ;;  %v2446_v9 = vshll.u32 %v8256_v18, 16 }
  0xaf   : > { %v5754_v35 = vcombine.low %v7581_v27, %v8353_v31  ;;  %v6051_v34 = vcombine.low %v3081_v14, %v3084_v29  ;;  %v3091_v44 = vsel %vm8054_vm5, %v3089_v47, %v3090_v39  ;;  %v1290_v0 = vld [vmem:[%s7745_s6] sm:$0xe]  ;;  %v1291_v11 = vld [vmem:[%s7745_s6 + $0xc] sm:$0xe]  ;;  %v1357_v14 = vrot.slane %v8304_v16, 5 }
  0xb0   : > { %v6052_v54 = vcombine.low %v3088_v43, %v3091_v44  ;;  %v1293_v62 = vld [vmem:[%s7745_s6 + $0x24] sm:$0xe]  ;;  %v5760_v16 = vcombine.low %v8106_v17, %v8114_v41  ;;  %v5761_v27 = vcombine.low %v8135_v3, %v8138_v4  ;;  %v5773_v18 = vrot.slane %v1290_v0, 9  ;;  %v7589_v39 = vld [vmem:[%s7745_s6 + $0x20] sm:$0x1]  ;;  %v7519_v3 = vld [vmem:[%s7745_s6 + $0x54] sm:$0xff]  }
  0xb1   : > { %6802 = vmatpush3.bf16.msra.mxu1 %v7493_v20  ;;  %v3077_v20 = vsel %vm8054_vm5, %v3075_v15, %v3076_v5  ;;  %v8375_v15 = vld [vmem:[%s7745_s6 + $0x58] sm:$0xf]  ;;  %v1359_v47 = vrot.slane %v1357_v14, 4  ;;  %v1360_v40 = vrot.slane %v7589_v39, 5  ;;  %v7590_v44 = vld [vmem:[%s7745_s6 + $0x2c] sm:$0x1] }
  0xb2   : > { %6803 = vmatprep.subr.bf16.mxu1 %v7497_v51  ;;  %v6050_v37 = vcombine.low %v3074_v61, %v3077_v20  ;;  %v8401_v61 = vld [vmem:[%s9898_s1 + $0xc0] sm:$0xff]   ;;  %v1292_v20 = vld [vmem:[%s7745_s6 + $0x18] sm:$0xe]  ;;  %v7593_v39 = vld [vmem:[%s7745_s6 + $0x50] sm:$0x1]  ;;  %v1392_v17 = vrot.slane %v8375_v15, 5 }
  0xb3   : > { %6980 = vmatmul.mubr.bf16.gmra.mrb[20].mxu0 %v6048_v46  ;;  %v7585_v46 = vld [vmem:[%s7745_s6 + $0x54] sm:$0xf]  ;;  %v8524_v41 = vld [vmem:[%s7745_s6 + $0x64] sm:$0xf] }
  0xb4   : > { %6772 = vmatmul.mubr.bf16.gmra.mrb[4].mxu1 %v5752_v56  ;;  %6983 = vmatprep.mubr.bf16.mxu0 %v6049_v57  ;;  %v5756_v5 = vcombine.low %v7585_v46, %v8375_v15  ;;  %v5757_v56 = vcombine.low %v8032_v26, %v8035_v36  ;;  %v7524_v57 = vld [vmem:[%s9898_s1 + $0xb8] sm:$0xff]   ;;  %v7588_v26 = vld [vmem:[%s7745_s6 + $0x14] sm:$0x1]  ;;  %v7522_v4 = vld [vmem:[%s7745_s6 + $0x60] sm:$0xff]  }
  0xb5   : > { %6775 = vmatprep.mubr.bf16.mxu1 %v5753_v60  ;;  %6804 = vmatpush3.bf16.msra.mxu1 %v7497_v51  ;;  %v2436_v51 = vshll.u32 %v8253_v12, 16  ;;  %v8389_v60 = vld [vmem:[%s7745_s6 + $0x8] sm:$0x1]  ;;  %v1353_v36 = vrot.slane %v7588_v26, 5 }
  0xb6   : > { %6805 = vmatprep.subr.bf16.mxu1 %v7501_v2  ;;  %v1346_v25 = vrot.slane %v8389_v60, 5 }
  0xb7   : > { %v8384_v12 = vrot.slane %v2436_v51, 5 }
  0xb9   : > { %6806 = vmatpush3.bf16.msra.mxu1 %v7501_v2  ;;  %v1343_v2 = vrot.slane %v8268_v63, 5  ;;  %v5758_v63 = vcombine.low %v8050_v6, %v8062_v22  ;;  %v5774_v22 = vrot.slane %v1291_v11, 9  ;;  %v6133_v11 = vld [vmem:[%s7745_s6 + $0x18] sm:$0xf] }
  0xba   : > { %6807 = vmatprep.subr.bf16.mxu1 %v7506_v33 }
  0xbb   : > { %6984 = vmatmul.mubr.bf16.gmra.mrb[24].mxu0 %v6050_v37  ;;  %v5759_v37 = vcombine.low %v8073_v48, %v8084_v55  ;;  %v1345_v6 = vrot.slane %v1343_v2, 4  ;;  %v7514_v48 = vld [vmem:[%s9898_s1 + $0x1c8] sm:$0xff]   ;;  %v5775_v55 = vrot.slane %v1292_v20, 9  ;;  %v8444_v60 = vsel %vm8054_vm5, %v5773_v18, %v1343_v2  ;;  %v6134_v20 = vld [vmem:[%s7745_s6 + $0x1c] sm:$0xf] }
  0xbc   : > { %6776 = vmatmul.mubr.bf16.gmra.mrb[8].mxu1 %v5754_v35  ;;  %6987 = vmatprep.mubr.bf16.mxu0 %v6051_v34  ;;  %v1371_v35 = vrot.slane %v8332_v59, 5  ;;  %v1352_v34 = vrot.slane %v1350_v8, 4  ;;  %v5776_v59 = vrot.slane %v1293_v62, 9  ;;  %v1385_v2 = vrot.slane %v8358_v1, 5  ;;  %v7516_v1 = vld [vmem:[%s7745_s6 + $0x48] sm:$0xff]  }
  0xbd   : > { %6779 = vmatprep.mubr.bf16.mxu1 %v5755_v21  ;;  %6808 = vmatpush3.bf16.msra.mxu1 %v7506_v33  ;;  %v1364_v33 = vrot.slane %v8327_v52, 5  ;;  %v1294_v52 = vld [vmem:[%s7745_s6 + $0x30] sm:$0xe]  ;;  %v5762_v21 = vcombine.low %v8156_v32, %v8165_v49  ;;  %v8452_v26 = vsel %vm8054_vm5, %v1345_v6, %v1346_v25  ;;  %v8460_v0 = vsel %vm8054_vm5, %v5775_v55, %v1357_v14  ;;  %v1296_v14 = vld [vmem:[%s7745_s6 + $0x48] sm:$0xe] }
  0xbe   : > { %6809 = vmatprep.subr.bf16.mxu1 %v7512_v24  ;;  %v5777_v51 = vrot.slane %v1294_v52, 9  ;;  %v1373_v53 = vrot.slane %v1371_v35, 4  ;;  %v3850_v6 = vshrl.u32 %v6133_v11, 16  ;;  %v3863_v52 = vshrl.u32 %v6134_v20, 16  ;;  %v7525_v49 = vld [vmem:[%s7745_s6 + $0x6c] sm:$0xff]  }
  0xbf   : > { %v1366_v43 = vrot.slane %v1364_v33, 4  ;;  %v8472_v25 = vsel %vm8054_vm5, %v5776_v59, %v1364_v33  ;;  %v7592_v33 = vld [vmem:[%s7745_s6 + $0x44] sm:$0x1]  ;;  %v5779_v55 = vrot.slane %v1296_v14, 9  ;;  %v6137_v14 = vld [vmem:[%s7745_s6 + $0x28] sm:$0xf] }
  0xc0   : > { %v8482_v62 = vsel %vm8054_vm5, %v5777_v51, %v1371_v35  ;;  %v1381_v18 = vrot.slane %v7592_v33, 5  ;;  %v6135_v51 = vld [vmem:[%s7745_s6 + $0x20] sm:$0x1]  ;;  %v1298_v33 = vld [vmem:[%s7745_s6 + $0x60] sm:$0xe] }
  0xc1   : > { %6810 = vmatpush3.bf16.msra.mxu1 %v7512_v24  ;;  %v5763_v24 = vcombine.low %v8190_v28, %v8193_v30 }
  0xc2   : > { %6811 = vmatprep.subr.bf16.mxu1 %v7518_v50 }
  0xc3   : > { %6988 = vmatmul.mubr.bf16.gmra.mrb[28].mxu0 %v6052_v54  ;;  %v7591_v54 = vld [vmem:[%s7745_s6 + $0x38] sm:$0x1] }
  0xc4   : > { %6780 = vmatmul.mubr.bf16.gmra.mrb[12].mxu1 %v5756_v5  ;;  %7007 = vmatprep.mubr.bf16.mxu0 %v7504_v23  ;;  %v1374_v46 = vrot.slane %v7591_v54, 5  ;;  %v1295_v5 = vld [vmem:[%s7745_s6 + $0x3c] sm:$0xe]  ;;  %v1378_v23 = vrot.slane %v8353_v31, 5  ;;  %v8448_v31 = vsel %vm8054_vm5, %v5774_v22, %v1350_v8  ;;  %v3853_v22 = vshll.u32 %v6133_v11, 16  ;;  %v7530_v54 = vld [vmem:[%s9898_s1 + $0x1e0] sm:$0xff]  }
  0xc5   : > { %6783 = vmatprep.mubr.bf16.mxu1 %v5757_v56  ;;  %6812 = vmatpush3.bf16.msra.mxu1 %v7518_v50  ;;  %v1367_v50 = vrot.slane %v7590_v44, 5  ;;  %v8435_v56 = vrot.slane %v2446_v9, 5  ;;  %v7513_v8 = vld [vmem:[%s7745_s6 + $0x3c] sm:$0xff]   ;;  %v8468_v9 = vsel %vm8054_vm5, %v1359_v47, %v1360_v40  ;;  %v1387_v47 = vrot.slane %v1385_v2, 4  ;;  %v6139_v44 = vld [vmem:[%s7745_s6 + $0x30] sm:$0xf] }
  0xc6   : > { %6813 = vmatprep.subr.bf16.mxu1 %v7524_v57  ;;  %v1388_v40 = vrot.slane %v7593_v39, 5  ;;  %v3852_v11 = vrot.slane %v3850_v6, 4 }
  0xc7   : > { %9919 = vst [vmem:[#allocation3_spill] sm:$0xff] %v8435_v56 }
  0xc9   : > { %6814 = vmatpush3.bf16.msra.mxu1 %v7524_v57  ;;  %v7520_v57 = vld [vmem:[%s9898_s1 + $0x1d0] sm:$0xff]  }
  0xca   : > { %6847 = vmatprep.subr.bf16.mxu1 %v8401_v61 }
  0xcb   : > { %7008 = vmatmul.mubr.bf16.vlgmr.msra.gmra.mrb[0].mxu0 %v7507_v7  ;;  %v8456_v7 = vsel %vm8054_vm5, %v1352_v34, %v1353_v36  ;;  %v8476_v36 = vsel %vm8054_vm5, %v1366_v43, %v1367_v50  ;;  %v3859_v34 = vshll.u32 %v6134_v20, 16  ;;  %v3855_v20 = vrot.slane %v3853_v22, 5  ;;  %v1299_v22 = vld [vmem:[%s7745_s6 + $0x6c] sm:$0xe] }
  0xcc   : > { %6784 = vmatmul.mubr.bf16.gmra.mrb[16].mxu1 %v5758_v63  ;;  %7040 = vmatpush3.bf16.msra.mxu0 %v8240_v45  ;;  %v5778_v63 = vrot.slane %v1295_v5, 9  ;;  %v5782_v59 = vrot.slane %v1299_v22, 9 }
  0xcd   : > { %6787 = vmatprep.mubr.bf16.mxu1 %v5759_v37  ;;  %7011 = vmatprep.mubr.bf16.mxu0 %v7510_v19  ;;  %v8486_v37 = vsel %vm8054_vm5, %v1373_v53, %v1374_v46  ;;  %v1380_v19 = vrot.slane %v1378_v23, 4  ;;  %v6136_v53 = vld [vmem:[%s7745_s6 + $0x24] sm:$0xf]  ;;  %v3887_v46 = vshrl.u32 %v6137_v14, 16 }
  0xce   : > { %7041 = vmatprep.subr.bf16.mxu0 %v7514_v48  ;;  %v8503_v50 = vsel %vm8054_vm5, %v5778_v63, %v1378_v23  ;;  %v8520_v23 = vld [vmem:[%s7745_s6 + $0x54] sm:$0xe]  ;;  %v3865_v63 = vrot.slane %v3863_v52, 4  ;;  %v3874_v39 = vshrl.u32 %v6136_v53, 16  ;;  %v3877_v29 = vshll.u32 %v6136_v53, 16 }
  0xcf   : > { %v8517_v5 = vsel %vm8054_vm5, %v1380_v19, %v1381_v18  ;;  %v3869_v18 = vshll.u32 %v6135_v51, 16  ;;  %v5780_v6 = vrot.slane %v8520_v23, 9  ;;  %v7534_v51 = vld [vmem:[%s9898_s1 + $0x1e8] sm:$0xff]   ;;  %v1394_v53 = vrot.slane %v1392_v17, 4 }
  0xd0   : > { %7042 = vmatpush3.bf16.msra.mxu0 %v7514_v48  ;;  %v7526_v48 = vld [vmem:[%s9898_s1 + $0x1d8] sm:$0xff]   ;;  %v3856_v23 = vor.u32 %v3855_v20, %v3852_v11  ;;  %v3876_v35 = vrot.slane %v3874_v39, 4  ;;  %v3879_v45 = vrot.slane %v3877_v29, 5  ;;  %v7598_v11 = vld [vmem:[%s7745_s6 + $0x74] sm:$0x1]  ;;  %v3889_v29 = vrot.slane %v3887_v46, 4 }
  0xd1   : > { %7043 = vmatprep.subr.bf16.mxu0 %v7520_v57  ;;  %v8558_v43 = vrot.slane %v3869_v18, 5  ;;  %v1409_v20 = vrot.slane %v7598_v11, 5  ;;  %v3898_v39 = vshrl.u32 %v6139_v44, 16  ;;  %v8583_v28 = vsel %vm8054_vm5, %v5780_v6, %v1392_v17 }
  0xd2   : > { %v3857_v22 = vrot.slane %v3856_v23, 4 }
  0xd3   : > { %7012 = vmatmul.mubr.bf16.gmra.mrb[4].mxu0 %v7513_v8  ;;  %v8530_v8 = vrot.slane %v3859_v34, 5  ;;  %v7596_v34 = vld [vmem:[%s7745_s6 + $0x70] sm:$0xf] }
  0xd4   : > { %6788 = vmatmul.mubr.bf16.gmra.mrb[20].mxu1 %v5760_v16  ;;  %7015 = vmatprep.mubr.bf16.mxu0 %v7516_v1  ;;  %v1399_v16 = vrot.slane %v8524_v41, 5  ;;  %v7595_v1 = vld [vmem:[%s7745_s6 + $0x5c] sm:$0x1]  ;;  %v1406_v52 = vrot.slane %v7596_v34, 5 }
  0xd5   : > { %6791 = vmatprep.mubr.bf16.mxu1 %v5761_v27  ;;  %7044 = vmatpush3.bf16.msra.mxu0 %v7520_v57  ;;  %v1395_v19 = vrot.slane %v7595_v1, 5  ;;  %v8539_v27 = vsel %vm8054_vm5, %v5779_v55, %v1385_v2  ;;  %v8543_v57 = vsel %vm8054_vm5, %v1387_v47, %v1388_v40  ;;  %v7597_v2 = vld [vmem:[%s7745_s6 + $0x68] sm:$0x1]  ;;  %v3883_v1 = vshll.u32 %v6137_v14, 16  ;;  %v7542_v41 = vld [vmem:[%s9898_s1 + $0x1f8] sm:$0xff]  }
  0xd6   : > { %7045 = vmatprep.subr.bf16.mxu0 %v7526_v48  ;;  %v1402_v55 = vrot.slane %v7597_v2, 5  ;;  %v5781_v47 = vrot.slane %v1298_v33, 9  ;;  %v1401_v40 = vrot.slane %v1399_v16, 4  ;;  %v3866_v34 = vor.u32 %v3865_v63, %v8530_v8  ;;  %v6140_v2 = vld [vmem:[%s7745_s6 + $0x34] sm:$0xf] }
  0xd7   : > { %v1408_v33 = vrot.slane %v1406_v52, 4  ;;  %v6138_v63 = vld [vmem:[%s7745_s6 + $0x2c] sm:$0x1]  ;;  %v8570_v18 = vrot.slane %v3883_v1, 5  ;;  %v3907_v14 = vshll.u32 %v6140_v2, 16  ;;  %v3911_v32 = vshrl.u32 %v6140_v2, 16 }
  0xd8   : > { %v3867_v11 = vrot.slane %v3866_v34, 4  ;;  %v8587_v30 = vsel %vm8054_vm5, %v1394_v53, %v1395_v19  ;;  %v8594_v46 = vsel %vm8054_vm5, %v5781_v47, %v1399_v16  ;;  %v8598_v15 = vsel %vm8054_vm5, %v1401_v40, %v1402_v55  ;;  %v1300_v19 = vld [vmem:[%s7745_s6 + $0x78] sm:$0xe] }
  0xd9   : > { %7046 = vmatpush3.bf16.msra.mxu0 %v7526_v48  ;;  %v8602_v17 = vsel %vm8054_vm5, %v5782_v59, %v1406_v52  ;;  %v8612_v16 = vsel %vm8054_vm5, %v1408_v33, %v1409_v20  ;;  %v3890_v6 = vor.u32 %v3889_v29, %v8570_v18  ;;  %v3900_v53 = vrot.slane %v3898_v39, 4  ;;  %v6142_v59 = vld [vmem:[%s7745_s6 + $0x3c] sm:$0xf]  ;;  %v6143_v52 = vld [vmem:[%s7745_s6 + $0x40] sm:$0xf] }
  0xda   : > { %7047 = vmatprep.subr.bf16.mxu0 %v7530_v54  ;;  %v3862_v1 = vsel %vm7808_vm2, %v3857_v22, %v8530_v8  ;;  %v3872_v47 = vsel %vm7808_vm2, %v3867_v11, %v8558_v43  ;;  %v8623_v40 = vrot.slane %v3907_v14, 5  ;;  %v3913_v23 = vrot.slane %v3911_v32, 4  ;;  %v7600_v20 = vld [vmem:[%s7745_s6 + $0x80] sm:$0x1]  ;;  %v8782_v48 = vld [vmem:[%s7745_s6 + $0x68] sm:$0x1] }
  0xdb   : > { %7016 = vmatmul.mubr.bf16.gmra.mrb[8].mxu0 %v7519_v3  ;;  %v3901_v3 = vshll.u32 %v6139_v44, 16  ;;  %v3893_v44 = vshll.u32 %v6138_v63, 16  ;;  %v5783_v33 = vrot.slane %v1300_v19, 9  ;;  %v1301_v63 = vld [vmem:[%s7745_s6 + $0x84] sm:$0xe]  ;;  %v3922_v29 = vshrl.u32 %v6142_v59, 16 }
  0xdc   : > { %6792 = vmatmul.mubr.bf16.gmra.mrb[24].mxu1 %v5762_v21  ;;  %7019 = vmatprep.mubr.bf16.mxu0 %v7522_v4  ;;  %v7538_v21 = vld [vmem:[%s9898_s1 + $0x1f0] sm:$0xff]   ;;  %v7599_v4 = vld [vmem:[%s7745_s6 + $0x7c] sm:$0xf]  ;;  %v3925_v8 = vshll.u32 %v6142_v59, 16  ;;  %v3931_v39 = vshll.u32 %v6143_v52, 16  ;;  %v9920_v43 = vcombine.low %v8213_v42, %v8218_v13  ;;  %v8634_v14 = vrot.slane %v3890_v6, 4 }
  0xdd   : > { %6795 = vmatprep.mubr.bf16.mxu1 %v5763_v24  ;;  %7048 = vmatpush3.bf16.msra.mxu0 %v7530_v54  ;;  %v3880_v24 = vor.u32 %v3879_v45, %v3876_v35  ;;  %v7527_v54 = vld [vmem:[%s7745_s6 + $0x78] sm:$0xff]   ;;  %v1413_v45 = vrot.slane %v7599_v4, 5  ;;  %v3903_v55 = vrot.slane %v3901_v3, 5  ;;  %v8627_v2 = vrot.slane %v3893_v44, 5  ;;  %v8639_v22 = vld [vmem:[%s9898_s1 + $0x200] sm:$0xff]   ;;  %9928 = vst [vmem:[#allocation6_spill] sm:$0xff] %v8782_v48 }
  0xde   : > { %7049 = vmatprep.subr.bf16.mxu0 %v7534_v51  ;;  %v6141_v35 = vld [vmem:[%s7745_s6 + $0x38] sm:$0x1]  ;;  %v3935_v3 = vshrl.u32 %v6143_v52, 16  ;;  %v7529_v44 = vld [vmem:[%s7745_s6 + $0x84] sm:$0xff]   ;;  %v3914_v13 = vor.u32 %v3913_v23, %v8623_v40  ;;  %v3927_v59 = vrot.slane %v3925_v8, 5  ;;  %v8661_v52 = vrot.slane %v3931_v39, 5 }
  0xdf   : > { %v8625_v34 = vrot.slane %v3880_v24, 4  ;;  %v1415_v11 = vrot.slane %v1413_v45, 4  ;;  %v3904_v32 = vor.u32 %v3903_v55, %v3900_v53  ;;  %v9921_v24 = vcombine.low %v8444_v60, %v8452_v26  ;;  %v7601_v19 = vld [vmem:[%s7745_s6 + $0x88] sm:$0xf]  ;;  %v6144_v6 = vld [vmem:[%s7745_s6 + $0x44] sm:$0x1] }
  0xe0   : > { %v1420_v4 = vrot.slane %v7601_v19, 5  ;;  %v8652_v60 = vcombine.low %v3862_v1, %v3872_v47  ;;  %v6145_v53 = vld [vmem:[%s7745_s6 + $0x48] sm:$0xf]  ;;  %v3924_v55 = vrot.slane %v3922_v29, 4  ;;  %v3937_v23 = vrot.slane %v3935_v3, 4 }
  0xe1   : > { %7050 = vmatpush3.bf16.msra.mxu0 %v7534_v51  ;;  %v1416_v51 = vrot.slane %v7600_v20, 5  ;;  %v7531_v20 = vld [vmem:[%s7745_s6 + $0x90] sm:$0xff]   ;;  %v3886_v1 = vsel %vm7808_vm2, %v8625_v34, %v8570_v18  ;;  %v3905_v47 = vrot.slane %v3904_v32, 4  ;;  %v3896_v29 = vsel %vm7808_vm2, %v8634_v14, %v8627_v2  ;;  %v8683_v34 = vld [vmem:[%s7745_s6 + $0x58] sm:$0xf]  ;;  %v7532_v32 = vld [vmem:[%s9898_s1 + $0xc8] sm:$0xff]  }
  0xe2   : > { %7051 = vmatprep.subr.bf16.mxu0 %v7538_v21  ;;  %v3915_v39 = vrot.slane %v3914_v13, 4  ;;  %v1422_v3 = vrot.slane %v1420_v4, 4  ;;  %v6148_v18 = vld [vmem:[%s7745_s6 + $0x54] sm:$0xf]  ;;  %v3941_v2 = vshll.u32 %v6144_v6, 16  ;;  %v3946_v14 = vshrl.u32 %v6145_v53, 16 }
  0xe3   : > { %7020 = vmatmul.mubr.bf16.gmra.mrb[12].mxu0 %v7525_v49  ;;  %v3917_v49 = vshll.u32 %v6141_v35, 16  ;;  %v8679_v8 = vsel %vm8054_vm5, %v1415_v11, %v1416_v51  ;;  %v3949_v51 = vshll.u32 %v6145_v53, 16  ;;  %v3928_v11 = vor.u32 %v3927_v59, %v3924_v55  ;;  %v7533_v55 = vld [vmem:[%s7745_s6 + $0x9c] sm:$0xff]   ;;  %v7607_v42 = vld [vmem:[%s7745_s6 + $0xac] sm:$0xf] }
  0xe4   : > { %6796 = vmatmul.mubr.bf16.gmra.mrb[28].mxu1 %v9920_v43  ;;  %7023 = vmatprep.mubr.bf16.mxu0 %v7527_v54  ;;  %v5784_v54 = vrot.slane %v1301_v63, 9  ;;  %v7602_v43 = vld [vmem:[%s7745_s6 + $0x8c] sm:$0x1]  ;;  %v3979_v6 = vshll.u32 %v8683_v34, 16  ;;  %v9923_v53 = vcombine.low %v8460_v0, %v8468_v9  ;;  %v8719_v0 = vld [vmem:[%s7745_s6 + $0x50] sm:$0x1] }
  0xe5   : > { %6815 = vmatprep.mubr.bf16.mxu1 %v9921_v24  ;;  %7052 = vmatpush3.bf16.msra.mxu0 %v7538_v21  ;;  %v8658_v21 = vsel %vm8054_vm5, %v5783_v33, %v1413_v45  ;;  %v3919_v63 = vrot.slane %v3917_v49, 5  ;;  %v1423_v24 = vrot.slane %v7602_v43, 5  ;;  %v1302_v45 = vld [vmem:[%s7745_s6 + $0x90] sm:$0xe]  ;;  %v8671_v33 = vld [vmem:[%s7745_s6 + $0x4c] sm:$0xf]  ;;  %v3938_v49 = vor.u32 %v3937_v23, %v8661_v52 }
  0xe6   : > { %7053 = vmatprep.subr.bf16.mxu0 %v7542_v41  ;;  %v3955_v13 = vshll.u32 %v8671_v33, 16  ;;  %v3959_v19 = vshrl.u32 %v8671_v33, 16  ;;  %v9922_v43 = vcombine.low %v8448_v31, %v8456_v7  ;;  %v7536_v31 = vld [vmem:[%s9898_s1 + $0xd0] sm:$0xff]   ;;  %v3910_v7 = vsel %vm7808_vm2, %v3905_v47, %v8623_v40  ;;  %v7535_v9 = vld [vmem:[%s7745_s6 + $0xa8] sm:$0xff]   ;;  %v8726_v40 = vld [vmem:[%s7745_s6 + $0x5c] sm:$0x1] }
  0xe7   : > { %v3920_v59 = vsel %vm7808_vm2, %v3915_v39, %v3919_v63  ;;  %v5785_v23 = vrot.slane %v1302_v45, 9  ;;  %v3951_v26 = vrot.slane %v3949_v51, 5  ;;  %9924 = vst [vmem:[#allocation4_spill] sm:$0xff] %v8726_v40  ;;  %v3929_v47 = vrot.slane %v3928_v11, 4 }
  0xe8   : > { %v3939_v63 = vrot.slane %v3938_v49, 4  ;;  %v8728_v39 = vrot.slane %v3955_v13, 5  ;;  %v8730_v35 = vrot.slane %v3979_v6, 5  ;;  %v8735_v51 = vcombine.low %v3886_v1, %v3896_v29  ;;  %v6151_v29 = vld [vmem:[%s7745_s6 + $0x60] sm:$0xf] }
  0xe9   : > { %7054 = vmatpush3.bf16.msra.mxu0 %v7542_v41  ;;  %v8691_v41 = vsel %vm8054_vm5, %v5784_v54, %v1420_v4  ;;  %v3970_v54 = vshrl.u32 %v6148_v18, 16  ;;  %v3973_v4 = vshll.u32 %v6148_v18, 16  ;;  %v7603_v18 = vld [vmem:[%s7745_s6 + $0x94] sm:$0xf]  ;;  %v8739_v49 = vcombine.low %v3910_v7, %v3920_v59 }
  0xea   : > { %7087 = vmatprep.subr.bf16.mxu0 %v8639_v22  ;;  %v3965_v1 = vshll.u32 %v8719_v0, 16  ;;  %v3934_v7 = vsel %vm7808_vm2, %v3929_v47, %v8661_v52  ;;  %v9927_v47 = vcombine.low %v8482_v62, %v8486_v37 }
  0xeb   : > { %7024 = vmatmul.mubr.bf16.gmra.mrb[16].mxu0 %v7529_v44  ;;  %v3983_v44 = vshrl.u32 %v8683_v34, 16  ;;  %v3972_v45 = vrot.slane %v3970_v54, 4  ;;  %v7604_v54 = vld [vmem:[%s7745_s6 + $0x98] sm:$0x1] }
  0xec   : > { %6816 = vmatmul.mubr.bf16.vlgmr.msra.gmra.mrb[0].mxu1 %v9922_v43  ;;  %7027 = vmatprep.mubr.bf16.mxu0 %v7531_v20  ;;  %v8722_v20 = vrot.slane %v3941_v2, 5  ;;  %v1427_v43 = vrot.slane %v7603_v18, 5  ;;  %v7605_v18 = vld [vmem:[%s7745_s6 + $0xa0] sm:$0xf]  ;;  %v3967_v37 = vrot.slane %v3965_v1, 5 }
  0xed   : > { %6848 = vmatpush3.bf16.msra.mxu1 %v8401_v61  ;;  %6819 = vmatprep.mubr.bf16.mxu1 %v9923_v53  ;;  %v8716_v61 = vsel %vm8054_vm5, %v1422_v3, %v1423_v24  ;;  %v3948_v53 = vrot.slane %v3946_v14, 4  ;;  %v3961_v24 = vrot.slane %v3959_v19, 4  ;;  %v3975_v3 = vrot.slane %v3973_v4, 5  ;;  %v7540_v14 = vld [vmem:[%s9898_s1 + $0xd8] sm:$0xff]  }
  0xee   : > { %6849 = vmatprep.subr.bf16.mxu1 %v7532_v32  ;;  %v3985_v2 = vrot.slane %v3983_v44, 4  ;;  %v1303_v19 = vld [vmem:[%s7745_s6 + $0x9c] sm:$0xe]  ;;  %v1430_v4 = vrot.slane %v7604_v54, 5  ;;  %v8752_v44 = vld [vmem:[%s7745_s6 + $0x64] sm:$0xf] }
  0xef   : > { %v3952_v6 = vor.u32 %v3951_v26, %v3948_v53  ;;  %9925 = vst [vmem:[#allocation5_spill] sm:$0xff] %v8752_v44  ;;  %v3962_v59 = vor.u32 %v3961_v24, %v8728_v39  ;;  %v1434_v13 = vrot.slane %v7605_v18, 5  ;;  %v9926_v26 = vcombine.low %v8472_v25, %v8476_v36  ;;  %v7537_v24 = vld [vmem:[%s7745_s6 + $0xb4] sm:$0xff]   ;;  %v7543_v25 = vld [vmem:[%s9898_s1 + $0xe0] sm:$0xff]   ;;  %v6154_v18 = vld [vmem:[%s7745_s6 + $0x6c] sm:$0xf] }
  0xf0   : > { %v1429_v53 = vrot.slane %v1427_v43, 4  ;;  %v3976_v54 = vor.u32 %v3975_v3, %v3972_v45  ;;  %v3986_v52 = vor.u32 %v3985_v2, %v8730_v35  ;;  %v3994_v36 = vshrl.u32 %v6151_v29, 16  ;;  %v7606_v3 = vld [vmem:[%s7745_s6 + $0xa4] sm:$0x1] }
  0xf1   : > { %6850 = vmatpush3.bf16.msra.mxu1 %v7532_v32  ;;  %v8746_v32 = vsel %vm8054_vm5, %v5785_v23, %v1427_v43  ;;  %v3989_v23 = vshll.u32 %v8726_v40, 16  ;;  %v4007_v43 = vshrl.u32 %v8752_v44, 16  ;;  %v3953_v62 = vrot.slane %v3952_v6, 4  ;;  %v8921_v40 = vld [vmem:[%s7745_s6 + $0x98] sm:$0x1] }
  0xf2   : > { %6851 = vmatprep.subr.bf16.mxu1 %v7536_v31  ;;  %v5786_v45 = vrot.slane %v1303_v19, 9  ;;  %v1437_v2 = vrot.slane %v7606_v3, 5  ;;  %v3977_v6 = vrot.slane %v3976_v54, 4  ;;  %v3987_v19 = vrot.slane %v3986_v52, 4  ;;  %9941 = vst [vmem:[#allocation15_spill] sm:$0xff] %v8921_v40 }
  0xf3   : > { %7028 = vmatmul.mubr.bf16.gmra.mrb[20].mxu0 %v7533_v55  ;;  %v3944_v55 = vsel %vm7808_vm2, %v3939_v63, %v8722_v20  ;;  %v4003_v20 = vshll.u32 %v8752_v44, 16  ;;  %v7539_v63 = vld [vmem:[%s7745_s6 + $0xc0] sm:$0xff]   ;;  %v3991_v11 = vrot.slane %v3989_v23, 5  ;;  %v8788_v44 = vsel %vm8054_vm5, %v1429_v53, %v1430_v4 }
  0xf4   : > { %6820 = vmatmul.mubr.bf16.gmra.mrb[4].mxu1 %v9926_v26  ;;  %7031 = vmatprep.mubr.bf16.mxu0 %v7535_v9  ;;  %v3997_v9 = vshll.u32 %v6151_v29, 16  ;;  %v3963_v26 = vrot.slane %v3962_v59, 4  ;;  %v1441_v29 = vrot.slane %v7607_v42, 5  ;;  %v8784_v56 = vcombine.low %v3934_v7, %v3944_v55  ;;  %v7545_v42 = vld [vmem:[%s9898_s1 + $0xe8] sm:$0xff]  }
  0xf5   : > { %6823 = vmatprep.mubr.bf16.mxu1 %v9927_v47  ;;  %6852 = vmatpush3.bf16.msra.mxu1 %v7536_v31  ;;  %v1304_v31 = vld [vmem:[%s7745_s6 + $0xa8] sm:$0xe]  ;;  %v1436_v47 = vrot.slane %v1434_v13, 4  ;;  %v3996_v1 = vrot.slane %v3994_v36, 4  ;;  %v8790_v59 = vrot.slane %v4003_v20, 5  ;;  %v4009_v23 = vrot.slane %v4007_v43, 4 }
  0xf6   : > { %6853 = vmatprep.subr.bf16.mxu1 %v7540_v14  ;;  %v3999_v3 = vrot.slane %v3997_v9, 5  ;;  %v3958_v4 = vsel %vm7808_vm2, %v3953_v62, %v8728_v39  ;;  %v8800_v7 = vsel %vm8054_vm5, %v5786_v45, %v1434_v13  ;;  %v4018_v55 = vshrl.u32 %v6154_v18, 16  ;;  %v7608_v39 = vld [vmem:[%s7745_s6 + $0xb0] sm:$0x1]  ;;  %v1305_v20 = vld [vmem:[%s7745_s6 + $0xb4] sm:$0xe] }
  0xf7   : > { %v4021_v53 = vshll.u32 %v6154_v18, 16  ;;  %v3968_v54 = vsel %vm7808_vm2, %v3963_v26, %v3967_v37  ;;  %v8809_v52 = vsel %vm8054_vm5, %v1436_v47, %v1437_v2  ;;  %v5787_v36 = vrot.slane %v1304_v31, 9  ;;  %v8831_v31 = vld [vmem:[%s7745_s6 + $0x74] sm:$0x1]  ;;  %v7609_v26 = vld [vmem:[%s7745_s6 + $0xb8] sm:$0xf] }
  0xf8   : > { %v1444_v9 = vrot.slane %v7608_v39, 5  ;;  %v9930_v13 = vcombine.low %v8503_v50, %v8517_v5  ;;  %v3982_v43 = vsel %vm7808_vm2, %v3977_v6, %v8730_v35  ;;  %v3992_v62 = vsel %vm7808_vm2, %v3987_v19, %v3991_v11  ;;  %v7541_v5 = vld [vmem:[%s7745_s6 + $0xcc] sm:$0xff]   ;;  %9932 = vst [vmem:[#allocation8_spill] sm:$0xff] %v8831_v31  ;;  %v6160_v39 = vld [vmem:[%s7745_s6 + $0x84] sm:$0xf] }
  0xf9   : > { %6854 = vmatpush3.bf16.msra.mxu1 %v7540_v14  ;;  %v8803_v14 = vld [vmem:[%s7745_s6 + $0x70] sm:$0xf]  ;;  %v1443_v37 = vrot.slane %v1441_v29, 4  ;;  %v4013_v45 = vshll.u32 %v8782_v48, 16  ;;  %v9931_v50 = vcombine.low %v8539_v27, %v8543_v57  ;;  %v4010_v2 = vor.u32 %v4009_v23, %v8790_v59  ;;  %v8848_v23 = vld [vmem:[%s7745_s6 + $0x7c] sm:$0xf] }
  0xfa   : > { %6855 = vmatprep.subr.bf16.mxu1 %v7543_v25  ;;  %9929 = vst [vmem:[#allocation7_spill] sm:$0xff] %v8803_v14  ;;  %v4027_v35 = vshll.u32 %v8803_v14, 16  ;;  %v4031_v11 = vshrl.u32 %v8803_v14, 16  ;;  %v5788_v18 = vrot.slane %v1305_v20, 9  ;;  %v1448_v47 = vrot.slane %v7609_v26, 5  ;;  %9933 = vst [vmem:[#allocation9_spill] sm:$0xff] %v8848_v23 }
  0xfb   : > { %7032 = vmatmul.mubr.bf16.gmra.mrb[24].mxu0 %v7537_v24  ;;  %v7547_v24 = vld [vmem:[%s9898_s1 + $0xf0] sm:$0xff]   ;;  %v4020_v27 = vrot.slane %v4018_v55, 4  ;;  %v4023_v57 = vrot.slane %v4021_v53, 5  ;;  %v8839_v19 = vcombine.low %v3958_v4, %v3968_v54  ;;  %v8851_v20 = vcombine.low %v3982_v43, %v3992_v62  ;;  %v7610_v4 = vld [vmem:[%s7745_s6 + $0xbc] sm:$0x1] }
  0xfc   : > { %6824 = vmatmul.mubr.bf16.gmra.mrb[8].mxu1 %v9930_v13  ;;  %7035 = vmatprep.mubr.bf16.mxu0 %v7539_v63  ;;  %v4000_v63 = vor.u32 %v3999_v3, %v3996_v1  ;;  %v8845_v3 = vsel %vm8054_vm5, %v5787_v36, %v1441_v29  ;;  %v8855_v55 = vsel %vm8054_vm5, %v1443_v37, %v1444_v9  ;;  %v8857_v53 = vrot.slane %v4013_v45, 5  ;;  %v7549_v13 = vld [vmem:[%s9898_s1 + $0xf8] sm:$0xff]   ;;  %v8864_v29 = vld [vmem:[%s7745_s6 + $0x88] sm:$0xf] }
  0xfd   : > { %6827 = vmatprep.mubr.bf16.mxu1 %v9931_v50  ;;  %6856 = vmatpush3.bf16.msra.mxu1 %v7543_v25  ;;  %v6157_v25 = vld [vmem:[%s7745_s6 + $0x78] sm:$0xf]  ;;  %v1451_v54 = vrot.slane %v7610_v4, 5  ;;  %9934 = vst [vmem:[#allocation10_spill] sm:$0xff] %v8864_v29  ;;  %v8868_v43 = vrot.slane %v4010_v2, 4  ;;  %v8870_v62 = vrot.slane %v4027_v35, 5  ;;  %v8874_v37 = vsel %vm8054_vm5, %v5788_v18, %v1448_v47 }
  0xfe   : > { %6857 = vmatprep.subr.bf16.mxu1 %v7545_v42  ;;  %v8866_v36 = vrot.slane %v4000_v63, 4  ;;  %v4033_v9 = vrot.slane %v4031_v11, 4  ;;  %v1450_v45 = vrot.slane %v1448_v47, 4  ;;  %v4024_v50 = vor.u32 %v4023_v57, %v4020_v27  ;;  %v6163_v4 = vld [vmem:[%s7745_s6 + $0x90] sm:$0xf] }
  0xff   : > { %v4037_v26 = vshll.u32 %v8831_v31, 16  ;;  %v4045_v1 = vshll.u32 %v6157_v25, 16  ;;  %v4051_v63 = vshll.u32 %v8848_v23, 16  ;;  %v4055_v2 = vshrl.u32 %v8848_v23, 16  ;;  %v8881_v35 = vld [vmem:[%s7745_s6 + $0x94] sm:$0xf] }
 0x100   : > { %9935 = vst [vmem:[#allocation11_spill] sm:$0xff] %v8881_v35  ;;  %v9936_v11 = vcombine.low %v8583_v28, %v8587_v30  ;;  %v4066_v18 = vshrl.u32 %v6160_v39, 16  ;;  %v4069_v47 = vshll.u32 %v6160_v39, 16  ;;  %v4079_v27 = vshrl.u32 %v8864_v29, 16  ;;  %v6166_v39 = vld [vmem:[%s7745_s6 + $0x9c] sm:$0xf] }
 0x101   : > { %6858 = vmatpush3.bf16.msra.mxu1 %v7545_v42  ;;  %v4042_v42 = vshrl.u32 %v6157_v25, 16  ;;  %v9937_v57 = vcombine.low %v8594_v46, %v8598_v15  ;;  %v4034_v30 = vor.u32 %v4033_v9, %v8870_v62  ;;  %v4093_v25 = vshll.u32 %v6163_v4, 16  ;;  %v8903_v46 = vld [vmem:[%s7745_s6 + $0x80] sm:$0x1] }
 0x102   : > { %6859 = vmatprep.subr.bf16.mxu1 %v7547_v24  ;;  %v8900_v6 = vrot.slane %v4037_v26, 5  ;;  %9938 = vst [vmem:[#allocation12_spill] sm:$0xff] %v8903_v46  ;;  %v4099_v15 = vshll.u32 %v8881_v35, 16  ;;  %v4047_v28 = vrot.slane %v4045_v1, 5  ;;  %v4057_v9 = vrot.slane %v4055_v2, 4 }
 0x103   : > { %7036 = vmatmul.mubr.bf16.gmra.mrb[28].mxu0 %v7541_v5  ;;  %v4075_v5 = vshll.u32 %v8864_v29, 16  ;;  %v8907_v29 = vrot.slane %v4051_v63, 5  ;;  %v8913_v23 = vld [vmem:[%s7745_s6 + $0xa0] sm:$0xf]  ;;  %v4068_v26 = vrot.slane %v4066_v18, 4  ;;  %v4071_v31 = vrot.slane %v4069_v47, 5 }
 0x104   : > { %6828 = vmatmul.mubr.bf16.gmra.mrb[12].mxu1 %v9936_v11  ;;  %7055 = vmatprep.mubr.bf16.mxu0 %v8652_v60  ;;  %v4090_v60 = vshrl.u32 %v6163_v4, 16  ;;  %v8898_v11 = vrot.slane %v4024_v50, 4  ;;  %v8910_v4 = vld [vmem:[%s7745_s6 + $0x8c] sm:$0x1]  ;;  %9940 = vst [vmem:[#allocation14_spill] sm:$0xff] %v8913_v23  ;;  %v4081_v48 = vrot.slane %v4079_v27, 4  ;;  %v8930_v63 = vsel %vm8054_vm5, %v1450_v45, %v1451_v54 }
 0x105   : > { %6831 = vmatprep.mubr.bf16.mxu1 %v9937_v57  ;;  %6860 = vmatpush3.bf16.msra.mxu1 %v7547_v24  ;;  %v4103_v24 = vshrl.u32 %v8881_v35, 16  ;;  %v4044_v57 = vrot.slane %v4042_v42, 4  ;;  %9939 = vst [vmem:[#allocation13_spill] sm:$0xff] %v8910_v4  ;;  %v7546_v50 = vld [vmem:[%s9898_s1 + $0x208] sm:$0xff]   ;;  %v8918_v14 = vrot.slane %v4075_v5, 5  ;;  %v4095_v35 = vrot.slane %v4093_v25, 5 }
 0x106   : > { %6861 = vmatprep.subr.bf16.mxu1 %v7549_v13  ;;  %v6169_v42 = vld [vmem:[%s7745_s6 + $0xa8] sm:$0xf]  ;;  %v4092_v2 = vrot.slane %v4090_v60, 4  ;;  %v8935_v18 = vld [vmem:[%s9898_s1 + $0x100] sm:$0xff]   ;;  %v8938_v47 = vrot.slane %v4099_v15, 5  ;;  %v4114_v27 = vshrl.u32 %v6166_v39, 16  ;;  %v9943_v25 = vcombine.low %v8602_v17, %v8612_v16 }
 0x107   : > { %9942 = vst [vmem:[#allocation16_spill] sm:$0xff] %v8935_v18  ;;  %v4105_v5 = vrot.slane %v4103_v24, 4  ;;  %v4117_v1 = vshll.u32 %v6166_v39, 16  ;;  %v8941_v54 = vrot.slane %v4034_v30, 4  ;;  %v4123_v45 = vshll.u32 %v8913_v23, 16  ;;  %v7548_v17 = vld [vmem:[%s9898_s1 + $0x210] sm:$0xff]  }
 0x108   : > { %v4127_v60 = vshrl.u32 %v8913_v23, 16  ;;  %v4048_v15 = vor.u32 %v4047_v28, %v4044_v57  ;;  %v4058_v39 = vor.u32 %v4057_v9, %v8907_v29  ;;  %v4072_v24 = vor.u32 %v4071_v31, %v4068_v26  ;;  %v8953_v30 = vld [vmem:[%s7745_s6 + $0xac] sm:$0xf]  ;;  %v8966_v26 = vld [vmem:[%s7745_s6 + $0xa4] sm:$0x1] }
 0x109   : > { %6862 = vmatpush3.bf16.msra.mxu1 %v7549_v13  ;;  %v4061_v13 = vshll.u32 %v8903_v46, 16  ;;  %9944 = vst [vmem:[#allocation17_spill] sm:$0xff] %v8953_v30  ;;  %v4082_v16 = vor.u32 %v4081_v48, %v8918_v14  ;;  %v4138_v28 = vshrl.u32 %v6169_v42, 16  ;;  %v4141_v31 = vshll.u32 %v6169_v42, 16 }
 0x10a   : > { %7135 = vmatprep.subr.bf16.mxu1 %v8935_v18  ;;  %v9945_v18 = vcombine.low %v8658_v21, %v8679_v8  ;;  %v4096_v57 = vor.u32 %v4095_v35, %v4092_v2  ;;  %v4106_v9 = vor.u32 %v4105_v5, %v8938_v47  ;;  %v4116_v21 = vrot.slane %v4114_v27, 4 }
 0x10b   : > { %7056 = vmatmul.mubr.bf16.vlgmr.msra.gmra.mrb[0].mxu0 %v8735_v51  ;;  %v4085_v51 = vshll.u32 %v8910_v4, 16  ;;  %v4119_v8 = vrot.slane %v4117_v1, 5  ;;  %v4151_v23 = vshrl.u32 %v8953_v30, 16  ;;  %v4049_v48 = vrot.slane %v4048_v15, 4  ;;  %v7550_v1 = vld [vmem:[%s9898_s1 + $0x218] sm:$0xff]  }
 0x10c   : > { %6832 = vmatmul.mubr.bf16.gmra.mrb[16].mxu1 %v9943_v25  ;;  %7088 = vmatpush3.bf16.msra.mxu0 %v8639_v22  ;;  %v4109_v22 = vshll.u32 %v8921_v40, 16  ;;  %v4147_v25 = vshll.u32 %v8953_v30, 16  ;;  %v4059_v40 = vrot.slane %v4058_v39, 4  ;;  %v4063_v4 = vrot.slane %v4061_v13, 5 }
 0x10d   : > { %6835 = vmatprep.mubr.bf16.mxu1 %v9945_v18  ;;  %7059 = vmatprep.mubr.bf16.mxu0 %v8739_v49  ;;  %v8968_v18 = vrot.slane %v4123_v45, 5  ;;  %v4129_v49 = vrot.slane %v4127_v60, 4  ;;  %v4087_v42 = vrot.slane %v4085_v51, 5  ;;  %v4073_v35 = vrot.slane %v4072_v24, 4 }
 0x10e   : > { %7089 = vmatprep.subr.bf16.mxu0 %v7546_v50  ;;  %v4083_v2 = vrot.slane %v4082_v16, 4  ;;  %v4140_v5 = vrot.slane %v4138_v28, 4  ;;  %v4143_v46 = vrot.slane %v4141_v31, 5  ;;  %v4097_v27 = vrot.slane %v4096_v57, 4  ;;  %v9034_v28 = vld [vmem:[%s7745_s6 + $0xbc] sm:$0x1] }
 0x10f   : > { %v4111_v45 = vrot.slane %v4109_v22, 5  ;;  %v4120_v60 = vor.u32 %v4119_v8, %v4116_v21  ;;  %v4133_v30 = vshll.u32 %v8966_v26, 16  ;;  %v4130_v13 = vor.u32 %v4129_v49, %v8968_v18  ;;  %v9001_v22 = vld [vmem:[%s7745_s6 + $0xb0] sm:$0x1] }
 0x110   : > { %7090 = vmatpush3.bf16.msra.mxu0 %v7546_v50  ;;  %v4107_v50 = vrot.slane %v4106_v9, 4  ;;  %v8978_v15 = vrot.slane %v4147_v25, 5  ;;  %v4153_v39 = vrot.slane %v4151_v23, 4  ;;  %v9946_v24 = vor.u32 %v8386_v58, %v8384_v12 }
 0x111   : > { %7091 = vmatprep.subr.bf16.mxu0 %v7548_v17  ;;  %v9947_v16 = vcombine.low %v8691_v41, %v8716_v61  ;;  %v4040_v23 = vsel %vm7808_vm2, %v8941_v54, %v8900_v6  ;;  %v4054_v58 = vsel %vm7808_vm2, %v4049_v48, %v8907_v29  ;;  %v9948_v41 = vcombine.low %v8746_v32, %v8788_v44  ;;  %v7553_v32 = vld [vmem:[%s9898_s1 + $0x220] sm:$0xff]  }
 0x112   : > { %v8983_v51 = vrot.slane %v9946_v24, 4  ;;  %v4064_v61 = vsel %vm7808_vm2, %v4059_v40, %v4063_v4  ;;  %v4144_v6 = vor.u32 %v4143_v46, %v4140_v5  ;;  %v4088_v29 = vsel %vm7808_vm2, %v4083_v2, %v4087_v42  ;;  %v6225_v42 = vld [vmem:[%s7745_s6 + $0x48] sm:$0xe] }
 0x113   : > { %7060 = vmatmul.mubr.bf16.gmra.mrb[4].mxu0 %v8784_v56  ;;  %v4030_v56 = vsel %vm7808_vm2, %v8898_v11, %v8870_v62  ;;  %v6172_v62 = vld [vmem:[%s7745_s6 + $0xb4] sm:$0xf]  ;;  %v9013_v11 = vld [vmem:[%s7745_s6 + $0xb8] sm:$0xf]  ;;  %v4102_v40 = vsel %vm7808_vm2, %v4097_v27, %v8938_v47  ;;  %v9023_v44 = vrot.slane %v4120_v60, 4  ;;  %v9025_v4 = vrot.slane %v4133_v30, 5 }
 0x114   : > { %6836 = vmatmul.mubr.bf16.gmra.mrb[20].mxu1 %v9947_v16  ;;  %7063 = vmatprep.mubr.bf16.mxu0 %v8839_v19  ;;  %v4078_v19 = vsel %vm7808_vm2, %v4073_v35, %v8918_v14  ;;  %v4112_v14 = vsel %vm7808_vm2, %v4107_v50, %v4111_v45  ;;  %v9029_v46 = vrot.slane %v4130_v13, 4  ;;  %v4154_v54 = vor.u32 %v4153_v39, %v8978_v15  ;;  %v6226_v27 = vld [vmem:[%s7745_s6 + $0x54] sm:$0xe] }
 0x115   : > { %6839 = vmatprep.mubr.bf16.mxu1 %v9948_v41  ;;  %7092 = vmatpush3.bf16.msra.mxu0 %v7548_v17  ;;  %v4157_v17 = vshll.u32 %v9001_v22, 16  ;;  %v9949_v47 = vsel %vm7808_vm2, %v8868_v43, %v8857_v53  ;;  %v9950_v30 = vsel %vm7808_vm2, %v8866_v36, %v8790_v59  ;;  %v4162_v57 = vshrl.u32 %v6172_v62, 16 }
 0x116   : > { %7093 = vmatprep.subr.bf16.mxu0 %v7550_v1  ;;  %v6203_v31 = vcombine.low %v9950_v30, %v9949_v47  ;;  %v4165_v9 = vshll.u32 %v6172_v62, 16  ;;  %v4171_v21 = vshll.u32 %v9013_v11, 16  ;;  %v5819_v8 = vcombine.low %v8845_v3, %v8855_v55  ;;  %v7556_v3 = vld [vmem:[%s9898_s1 + $0x228] sm:$0xff]   ;;  %v6175_v55 = vld [vmem:[%s7745_s6 + $0xc0] sm:$0xf]  ;;  %v9954_v30 = vld [vmem:[#allocation6_spill] sm:$0xff] }
 0x117   : > { %v5820_v49 = vcombine.low %v8874_v37, %v8930_v63  ;;  %v6204_v25 = vcombine.low %v4030_v56, %v4040_v23  ;;  %v9051_v53 = vrot.slane %v4144_v6, 4  ;;  %v6205_v43 = vcombine.low %v4054_v58, %v4064_v61 }
 0x118   : > { %v9053_v59 = vcombine.low %v4078_v19, %v4088_v29  ;;  %v9055_v36 = vcombine.low %v4102_v40, %v4112_v14  ;;  %v4126_v48 = vsel %vm7808_vm2, %v9023_v44, %v8968_v18  ;;  %v4136_v35 = vsel %vm7808_vm2, %v9029_v46, %v9025_v4  ;;  %v6228_v29 = vld [vmem:[%s7745_s6 + $0x6c] sm:$0xe] }
 0x119   : > { %7094 = vmatpush3.bf16.msra.mxu0 %v7550_v1  ;;  %v9071_v2 = vrot.slane %v4154_v54, 4  ;;  %v9073_v5 = vrot.slane %v4157_v17, 5  ;;  %v4175_v1 = vshrl.u32 %v9013_v11, 16  ;;  %v9951_v45 = vcombine.low %v8800_v7, %v8809_v52  ;;  %v7559_v7 = vld [vmem:[%s9898_s1 + $0x230] sm:$0xff]   ;;  %v9095_v52 = vld [vmem:[%s7745_s6 + $0xc4] sm:$0xf] }
 0x11a   : > { %7095 = vmatprep.subr.bf16.mxu0 %v7553_v32  ;;  %v9080_v60 = vrot.slane %v4162_v57, 4  ;;  %v9084_v50 = vrot.slane %v4171_v21, 5  ;;  %v4181_v13 = vshll.u32 %v9034_v28, 16  ;;  %v4150_v39 = vsel %vm7808_vm2, %v9051_v53, %v8978_v15  ;;  %v6227_v15 = vld [vmem:[%s7745_s6 + $0x60] sm:$0xe]  ;;  %v9952_v40 = vld [vmem:[#allocation4_spill] sm:$0xff] }
 0x11b   : > { %7064 = vmatmul.mubr.bf16.gmra.mrb[8].mxu0 %v8851_v20  ;;  %v9082_v20 = vrot.slane %v4165_v9, 5  ;;  %v4186_v24 = vshrl.u32 %v6175_v55, 16  ;;  %v6241_v16 = vrot.slane %v6225_v42, 9  ;;  %v4649_v56 = vrot.slane %v8671_v33, 5  ;;  %v7551_v14 = vld [vmem:[%s7745_s6 + $0xc] sm:$0xff]   ;;  %v7562_v57 = vld [vmem:[%s9898_s1 + $0x238] sm:$0xff]  }
 0x11c   : > { %6840 = vmatmul.mubr.bf16.gmra.mrb[24].mxu1 %v9951_v45  ;;  %7067 = vmatprep.mubr.bf16.mxu0 %v6203_v31  ;;  %v4189_v23 = vshll.u32 %v6175_v55, 16  ;;  %v4652_v58 = vrot.slane %v8719_v0, 5  ;;  %v6242_v41 = vrot.slane %v6226_v27, 9  ;;  %v4656_v61 = vrot.slane %v8683_v34, 5  ;;  %v9953_v17 = vld [vmem:[#allocation5_spill] sm:$0xff]  ;;  %v9955_v53 = vld [vmem:[#allocation7_spill] sm:$0xff] }
 0x11d   : > { %6843 = vmatprep.mubr.bf16.mxu1 %v5819_v8  ;;  %7096 = vmatpush3.bf16.msra.mxu0 %v7553_v32  ;;  %v4160_v19 = vsel %vm7808_vm2, %v9071_v2, %v9073_v5  ;;  %v9105_v6 = vrot.slane %v4175_v1, 4  ;;  %v9109_v62 = vsel %vm8054_vm5, %v6241_v16, %v4649_v56  ;;  %v4651_v33 = vrot.slane %v4649_v56, 4  ;;  %v9956_v5 = vld [vmem:[#allocation8_spill] sm:$0xff] }
 0x11e   : > { %7097 = vmatprep.subr.bf16.mxu0 %v7556_v3  ;;  %v4195_v32 = vshll.u32 %v9095_v52, 16  ;;  %v9115_v0 = vsel %vm8054_vm5, %v6242_v41, %v4656_v61  ;;  %v4658_v34 = vrot.slane %v4656_v61, 4  ;;  %v4659_v4 = vrot.slane %v9952_v40, 5  ;;  %v9146_v27 = vld [vmem:[%s7745_s6 + $0xc8] sm:$0x1]  ;;  %v7552_v41 = vld [vmem:[%s7745_s6 + $0x18] sm:$0xff]  }
 0x11f   : > { %v9121_v46 = vsel %vm8054_vm5, %v4651_v33, %v4652_v58  ;;  %v6243_v54 = vrot.slane %v6227_v15, 9  ;;  %v4663_v47 = vrot.slane %v9953_v17, 5  ;;  %v4666_v31 = vrot.slane %v9954_v30, 5  ;;  %v7554_v40 = vld [vmem:[%s7745_s6 + $0x24] sm:$0xff]  }
 0x120   : > { %v6273_v9 = vcombine.low %v9109_v62, %v9121_v46  ;;  %v9132_v21 = vsel %vm8054_vm5, %v4658_v34, %v4659_v4  ;;  %v6244_v8 = vrot.slane %v6228_v29, 9  ;;  %v4673_v1 = vrot.slane %v9956_v5, 5  ;;  %v9958_v29 = vld [vmem:[#allocation12_spill] sm:$0xff]  ;;  %v5934_v62 = vld [vmem:[%s7745_s6 + $0x90] sm:$0xf] }
 0x121   : > { %7098 = vmatpush3.bf16.msra.mxu0 %v7556_v3  ;;  %v4670_v3 = vrot.slane %v9955_v53, 5  ;;  %v6274_v55 = vcombine.low %v9115_v0, %v9132_v21  ;;  %v9139_v42 = vsel %vm8054_vm5, %v6243_v54, %v4663_v47  ;;  %v4665_v2 = vrot.slane %v4663_v47, 4  ;;  %v9959_v54 = vld [vmem:[#allocation3_spill] sm:$0xff]  ;;  %v7568_v46 = vld [vmem:[%s7745_s6 + $0xa8] sm:$0xff]  }
 0x122   : > { %7099 = vmatprep.subr.bf16.mxu0 %v7559_v7  ;;  %v9148_v45 = vrot.slane %v4186_v24, 4  ;;  %v9161_v37 = vcombine.low %v4126_v48, %v4136_v35  ;;  %v4168_v63 = vor.u32 %v9082_v20, %v9080_v60  ;;  %v6229_v24 = vld [vmem:[%s7745_s6 + $0x78] sm:$0xe]  ;;  %v9173_v58 = vrot.slane %v4181_v13, 5  ;;  %v6178_v13 = vld [vmem:[%s7745_s6 + $0xcc] sm:$0xf] }
 0x123   : > { %7068 = vmatmul.mubr.bf16.gmra.mrb[12].mxu0 %v6204_v25  ;;  %v9150_v25 = vrot.slane %v4189_v23, 5  ;;  %v9154_v16 = vsel %vm8054_vm5, %v6244_v8, %v4670_v3  ;;  %v4672_v56 = vrot.slane %v4670_v3, 4  ;;  %v9171_v23 = vcombine.low %v4150_v39, %v4160_v19  ;;  %v5928_v48 = vld [vmem:[%s7745_s6 + $0x78] sm:$0xf]  ;;  %v9957_v19 = vld [vmem:[#allocation9_spill] sm:$0xff] }
 0x124   : > { %6844 = vmatmul.mubr.bf16.gmra.mrb[28].mxu1 %v5820_v49  ;;  %7071 = vmatprep.mubr.bf16.mxu0 %v6205_v43  ;;  %v4199_v49 = vshrl.u32 %v9095_v52, 16  ;;  %v9168_v43 = vsel %vm8054_vm5, %v4665_v2, %v4666_v31  ;;  %v4178_v35 = vor.u32 %v9105_v6, %v9084_v50  ;;  %v9184_v60 = vrot.slane %v4195_v32, 5  ;;  %v9198_v32 = vld [vmem:[%s7745_s6 + $0xd0] sm:$0xf]  ;;  %v9960_v2 = vld [vmem:[#allocation10_spill] sm:$0xff] }
 0x125   : > { %6863 = vmatprep.mubr.bf16.mxu1 %v7551_v14  ;;  %7100 = vmatpush3.bf16.msra.mxu0 %v7559_v7  ;;  %v6275_v18 = vcombine.low %v9139_v42, %v9168_v43  ;;  %v9179_v44 = vsel %vm8054_vm5, %v4672_v56, %v4673_v1  ;;  %v4205_v20 = vshll.u32 %v9146_v27, 16  ;;  %v6230_v7 = vld [vmem:[%s7745_s6 + $0x84] sm:$0xe]  ;;  %v4192_v61 = vor.u32 %v9150_v25, %v9148_v45  ;;  %v9961_v25 = vld [vmem:[#allocation13_spill] sm:$0xff]  ;;  %v7632_v0 = vld [vmem:[%s7745_s6 + $0x8c] sm:$0x1] }
 0x126   : > { %7101 = vmatprep.subr.bf16.mxu0 %v7562_v57  ;;  %v6276_v39 = vcombine.low %v9154_v16, %v9179_v44  ;;  %v6245_v15 = vrot.slane %v6229_v24, 9  ;;  %v4677_v33 = vrot.slane %v9957_v19, 5  ;;  %v4680_v34 = vrot.slane %v9958_v29, 5 }
 0x127   : > { %v4201_v6 = vrot.slane %v4199_v49, 4  ;;  %v2427_v4 = vshrl.u32 %v5928_v48, 16  ;;  %v2430_v14 = vshll.u32 %v5928_v48, 16  ;;  %v2449_v17 = vsel %vm7808_vm2, %v8983_v51, %v9959_v54 }
 0x128   : > { %v4210_v47 = vshrl.u32 %v6178_v13, 16  ;;  %v9206_v30 = vsel %vm8054_vm5, %v6245_v15, %v4677_v33  ;;  %v4679_v31 = vrot.slane %v4677_v33, 4  ;;  %v6246_v8 = vrot.slane %v6230_v7, 9  ;;  %v7612_v7 = vld [vmem:[%s9898_s1 + $0x108] sm:$0xff]  }
 0x129   : > { %7102 = vmatpush3.bf16.msra.mxu0 %v7562_v57  ;;  %v4213_v53 = vshll.u32 %v6178_v13, 16  ;;  %v2429_v3 = vrot.slane %v2427_v4, 4  ;;  %v2432_v57 = vrot.slane %v2430_v14, 5  ;;  %v4684_v5 = vrot.slane %v9960_v2, 5  ;;  %v6231_v13 = vld [vmem:[%s7745_s6 + $0x90] sm:$0xe] }
 0x12a   : > { %v4219_v51 = vshll.u32 %v9198_v32, 16  ;;  %v4223_v1 = vshrl.u32 %v9198_v32, 16  ;;  %v9215_v45 = vsel %vm8054_vm5, %v4679_v31, %v4680_v34  ;;  %v4687_v56 = vrot.slane %v9961_v25, 5  ;;  %v7555_v4 = vld [vmem:[%s7745_s6 + $0x30] sm:$0xff]  }
 0x12b   : > { %7072 = vmatmul.mubr.bf16.gmra.mrb[16].mxu0 %v9053_v59  ;;  %v9962_v59 = vld [vmem:[#allocation16_spill] sm:$0xff]  ;;  %v4202_v49 = vor.u32 %v4201_v6, %v9184_v60  ;;  %v2433_v24 = vor.u32 %v2432_v57, %v2429_v3  ;;  %v4686_v48 = vrot.slane %v4684_v5, 4  ;;  %v4179_v15 = vrot.slane %v4178_v35, 4  ;;  %v9236_v14 = vld [vmem:[%s7745_s6 + $0xd4] sm:$0x1]  ;;  %v9963_v3 = vld [vmem:[#allocation11_spill] sm:$0xff] }
 0x12c   : > { %6864 = vmatmul.mubr.bf16.vlgmr.msra.gmra.mrb[0].mxu1 %v7552_v41  ;;  %7075 = vmatprep.mubr.bf16.mxu0 %v9055_v36  ;;  %v6277_v36 = vcombine.low %v9206_v30, %v9215_v45  ;;  %v4169_v41 = vrot.slane %v4168_v63, 4  ;;  %v4207_v19 = vrot.slane %v4205_v20, 5  ;;  %v9228_v33 = vsel %vm8054_vm5, %v6246_v8, %v4684_v5  ;;  %v7557_v20 = vld [vmem:[%s7745_s6 + $0x3c] sm:$0xff]   ;;  %v7613_v2 = vld [vmem:[%s9898_s1 + $0x110] sm:$0xff]  }
 0x12d   : > { %7143 = vmatpush3.bf16.msra.mxu1 %v9962_v59  ;;  %6867 = vmatprep.mubr.bf16.mxu1 %v7554_v40  ;;  %v4212_v29 = vrot.slane %v4210_v47, 4  ;;  %v4215_v34 = vrot.slane %v4213_v53, 5  ;;  %v2434_v40 = vrot.slane %v2433_v24, 4  ;;  %v9232_v6 = vsel %vm8054_vm5, %v4686_v48, %v4687_v56  ;;  %v7614_v48 = vld [vmem:[%s7745_s6 + $0x1c] sm:$0xf] }
 0x12e   : > { %7136 = vmatprep.subr.bf16.mxu1 %v7612_v7  ;;  %v9238_v54 = vrot.slane %v4219_v51, 5  ;;  %v4225_v31 = vrot.slane %v4223_v1, 4  ;;  %v6278_v63 = vcombine.low %v9228_v33, %v9232_v6  ;;  %v6247_v35 = vrot.slane %v6231_v13, 9 }
 0x12f   : > { %v4193_v8 = vrot.slane %v4192_v61, 4  ;;  %v4203_v47 = vrot.slane %v4202_v49, 4  ;;  %v2439_v53 = vsel %vm7808_vm2, %v2434_v40, %v8384_v12  ;;  %v4691_v57 = vrot.slane %v9963_v3, 5  ;;  %v9964_v12 = vld [vmem:[#allocation15_spill] sm:$0xff]  ;;  %v7558_v40 = vld [vmem:[%s7745_s6 + $0x48] sm:$0xff]  }
 0x130   : > { %v4174_v5 = vsel %vm7808_vm2, %v4169_v41, %v9084_v50  ;;  %v4184_v61 = vsel %vm7808_vm2, %v4179_v15, %v9173_v58  ;;  %v9256_v51 = vcombine.low %v2439_v53, %v2449_v17  ;;  %v4694_v1 = vrot.slane %v9964_v12, 5  ;;  %v6221_v58 = vld [vmem:[%s7745_s6 + $0x18] sm:$0xe]  ;;  %v6232_v17 = vld [vmem:[%s7745_s6 + $0x9c] sm:$0xe] }
 0x131   : > { %7144 = vmatpush3.bf16.msra.mxu1 %v7612_v7  ;;  %v4216_v25 = vor.u32 %v4215_v34, %v4212_v29  ;;  %v4229_v56 = vshll.u32 %v9236_v14, 16  ;;  %v9263_v59 = vsel %vm8054_vm5, %v6247_v35, %v4691_v57  ;;  %v4693_v49 = vrot.slane %v4691_v57, 4  ;;  %v7615_v41 = vld [vmem:[%s9898_s1 + $0x118] sm:$0xff]   ;;  %v7616_v3 = vld [vmem:[%s7745_s6 + $0x20] sm:$0x1] }
 0x132   : > { %7137 = vmatprep.subr.bf16.mxu1 %v7613_v2  ;;  %v4226_v50 = vor.u32 %v4225_v31, %v9238_v54  ;;  %v4208_v24 = vsel %vm7808_vm2, %v4203_v47, %v4207_v19  ;;  %v4621_v13 = vrot.slane %v7614_v48, 5  ;;  %v6210_v7 = vcombine.low %v4174_v5, %v4184_v61  ;;  %v9965_v35 = vld [vmem:[#allocation14_spill] sm:$0xff]  ;;  %v6233_v12 = vld [vmem:[%s7745_s6 + $0xa8] sm:$0xe] }
 0x133   : > { %7076 = vmatmul.mubr.bf16.gmra.mrb[20].mxu0 %v9161_v37  ;;  %v4198_v37 = vsel %vm7808_vm2, %v4193_v8, %v9184_v60  ;;  %v4217_v15 = vrot.slane %v4216_v25, 4  ;;  %v4231_v29 = vrot.slane %v4229_v56, 5  ;;  %v6237_v19 = vrot.slane %v6221_v58, 9  ;;  %v7560_v47 = vld [vmem:[%s7745_s6 + $0x54] sm:$0xff]   ;;  %v6222_v56 = vld [vmem:[%s7745_s6 + $0x24] sm:$0xe] }
 0x134   : > { %6868 = vmatmul.mubr.bf16.gmra.mrb[4].mxu1 %v7555_v4  ;;  %7079 = vmatprep.mubr.bf16.mxu0 %v9171_v23  ;;  %v9277_v23 = vsel %vm8054_vm5, %v4693_v49, %v4694_v1  ;;  %v6248_v34 = vrot.slane %v6232_v17, 9  ;;  %v6211_v4 = vcombine.low %v4198_v37, %v4208_v24  ;;  %v4227_v31 = vrot.slane %v4226_v50, 4  ;;  %v7618_v49 = vld [vmem:[%s7745_s6 + $0x28] sm:$0xf]  ;;  %v7619_v37 = vld [vmem:[%s7745_s6 + $0x34] sm:$0xf] }
 0x135   : > { %6871 = vmatprep.mubr.bf16.mxu1 %v7557_v20  ;;  %7145 = vmatpush3.bf16.msra.mxu1 %v7613_v2  ;;  %v6279_v60 = vcombine.low %v9263_v59, %v9277_v23  ;;  %v4698_v20 = vrot.slane %v9965_v35, 5  ;;  %v4701_v8 = vrot.slane %v8966_v26, 5  ;;  %v4623_v53 = vrot.slane %v4621_v13, 4  ;;  %v7617_v2 = vld [vmem:[%s9898_s1 + $0x120] sm:$0xff]  }
 0x136   : > { %7138 = vmatprep.subr.bf16.mxu1 %v7615_v41  ;;  %v4624_v57 = vrot.slane %v7616_v3, 5  ;;  %v4622_v26 = vsel %vm8054_vm5, %v6237_v19, %v4621_v13  ;;  %v4222_v1 = vsel %vm7808_vm2, %v4217_v15, %v9238_v54  ;;  %v4232_v25 = vsel %vm7808_vm2, %v4227_v31, %v4231_v29  ;;  %v6223_v13 = vld [vmem:[%s7745_s6 + $0x30] sm:$0xe]  ;;  %v7561_v31 = vld [vmem:[%s7745_s6 + $0x60] sm:$0xff]  }
 0x137   : > { %v9294_v5 = vsel %vm8054_vm5, %v6248_v34, %v4698_v20  ;;  %v4700_v61 = vrot.slane %v4698_v20, 4  ;;  %v4628_v50 = vrot.slane %v7618_v49, 5  ;;  %v4635_v24 = vrot.slane %v7619_v37, 5  ;;  %v7621_v34 = vld [vmem:[%s7745_s6 + $0x2c] sm:$0x1] }
 0x138   : > { %v4625_v17 = vsel %vm8054_vm5, %v4623_v53, %v4624_v57  ;;  %v6249_v48 = vrot.slane %v6233_v12, 9  ;;  %v6212_v29 = vcombine.low %v4222_v1, %v4232_v25  ;;  %v6238_v19 = vrot.slane %v6222_v56, 9  ;;  %v7563_v53 = vld [vmem:[%s7745_s6 + $0x6c] sm:$0xff]   ;;  %v6234_v12 = vld [vmem:[%s7745_s6 + $0xb4] sm:$0xe] }
 0x139   : > { %7146 = vmatpush3.bf16.msra.mxu1 %v7615_v41  ;;  %v9308_v58 = vsel %vm8054_vm5, %v4700_v61, %v4701_v8  ;;  %v9966_v41 = vld [vmem:[#allocation17_spill] sm:$0xff]  ;;  %v6269_v35 = vcombine.low %v4622_v26, %v4625_v17  ;;  %v4630_v20 = vrot.slane %v4628_v50, 4  ;;  %v6239_v3 = vrot.slane %v6223_v13, 9  ;;  %v6224_v1 = vld [vmem:[%s7745_s6 + $0x3c] sm:$0xe] }
 0x13a   : > { %7139 = vmatprep.subr.bf16.mxu1 %v7617_v2  ;;  %v6280_v54 = vcombine.low %v9294_v5, %v9308_v58  ;;  %v4705_v15 = vrot.slane %v9966_v41, 5  ;;  %v4637_v57 = vrot.slane %v4635_v24, 4  ;;  %v7623_v25 = vld [vmem:[%s7745_s6 + $0x40] sm:$0xf]  ;;  %v4629_v49 = vsel %vm8054_vm5, %v6238_v19, %v4628_v50  ;;  %v7625_v19 = vld [vmem:[%s7745_s6 + $0x44] sm:$0x1] }
 0x13b   : > { %7080 = vmatmul.mubr.bf16.gmra.mrb[24].mxu0 %v6210_v7  ;;  %v7620_v7 = vld [vmem:[%s9898_s1 + $0x128] sm:$0xff]   ;;  %v4642_v56 = vrot.slane %v7623_v25, 5  ;;  %v4712_v13 = vrot.slane %v9013_v11, 5  ;;  %v4636_v50 = vsel %vm8054_vm5, %v6239_v3, %v4635_v24  ;;  %v7626_v11 = vld [vmem:[%s9898_s1 + $0x138] sm:$0xff]   ;;  %v6235_v24 = vld [vmem:[%s7745_s6 + $0xc0] sm:$0xe] }
 0x13c   : > { %6872 = vmatmul.mubr.bf16.gmra.mrb[8].mxu1 %v7558_v40  ;;  %7083 = vmatprep.mubr.bf16.mxu0 %v6211_v4  ;;  %v4631_v40 = vrot.slane %v7621_v34, 5  ;;  %v4708_v4 = vrot.slane %v9001_v22, 5  ;;  %v9325_v8 = vsel %vm8054_vm5, %v6249_v48, %v4705_v15  ;;  %v7624_v22 = vld [vmem:[%s9898_s1 + $0x130] sm:$0xff]   ;;  %v6250_v48 = vrot.slane %v6234_v12, 9 }
 0x13d   : > { %6875 = vmatprep.mubr.bf16.mxu1 %v7560_v47  ;;  %7147 = vmatpush3.bf16.msra.mxu1 %v7617_v2  ;;  %v4707_v47 = vrot.slane %v4705_v15, 4  ;;  %v7622_v2 = vld [vmem:[%s7745_s6 + $0x38] sm:$0x1]  ;;  %v6240_v15 = vrot.slane %v6224_v1, 9  ;;  %v4645_v34 = vrot.slane %v7625_v19, 5  ;;  %v4719_v12 = vrot.slane %v9095_v52, 5 }
 0x13e   : > { %7140 = vmatprep.subr.bf16.mxu1 %v7620_v7  ;;  %v4638_v61 = vrot.slane %v7622_v2, 5  ;;  %v4632_v37 = vsel %vm8054_vm5, %v4630_v20, %v4631_v40  ;;  %v4714_v40 = vrot.slane %v4712_v13, 4  ;;  %v5925_v20 = vld [vmem:[%s7745_s6 + $0x6c] sm:$0xf]  ;;  %v7566_v19 = vld [vmem:[%s7745_s6 + $0x90] sm:$0xff]   ;;  %v2470_v21 = vshll.u32 %v7632_v0, 16 }
 0x13f   : > { %v9337_v26 = vsel %vm8054_vm5, %v4707_v47, %v4708_v4  ;;  %v6270_v4 = vcombine.low %v4629_v49, %v4632_v37  ;;  %v4643_v2 = vsel %vm8054_vm5, %v6240_v15, %v4642_v56  ;;  %v2403_v1 = vshrl.u32 %v5925_v20, 16  ;;  %v6236_v52 = vld [vmem:[%s7745_s6 + $0xcc] sm:$0xe] }
 0x140   : > { %v6281_v17 = vcombine.low %v9325_v8, %v9337_v26  ;;  %v4639_v41 = vsel %vm8054_vm5, %v4637_v57, %v4638_v61  ;;  %v6251_v57 = vrot.slane %v6235_v24, 9  ;;  %v2406_v25 = vshll.u32 %v5925_v20, 16 }
 0x141   : > { %7148 = vmatpush3.bf16.msra.mxu1 %v7620_v7  ;;  %v4715_v7 = vrot.slane %v9034_v28, 5  ;;  %v9357_v28 = vsel %vm8054_vm5, %v6250_v48, %v4712_v13  ;;  %v4722_v37 = vrot.slane %v9146_v27, 5  ;;  %v4721_v13 = vrot.slane %v4719_v12, 4 }
 0x142   : > { %7141 = vmatprep.subr.bf16.mxu1 %v7624_v22  ;;  %v2408_v27 = vrot.slane %v2406_v25, 5  ;;  %v4729_v24 = vrot.slane %v9236_v14, 5 }
 0x143   : > { %7084 = vmatmul.mubr.bf16.gmra.mrb[28].mxu0 %v6212_v29  ;;  %v4644_v29 = vrot.slane %v4642_v56, 4  ;;  %v9364_v47 = vsel %vm8054_vm5, %v4714_v40, %v4715_v7  ;;  %v9378_v56 = vsel %vm8054_vm5, %v6251_v57, %v4719_v12  ;;  %v4726_v40 = vrot.slane %v9198_v32, 5  ;;  %v7628_v57 = vld [vmem:[%s7745_s6 + $0x74] sm:$0x1] }
 0x144   : > { %6876 = vmatmul.mubr.bf16.gmra.mrb[12].mxu1 %v7561_v31  ;;  %7103 = vmatprep.mubr.bf16.mxu0 %v6269_v35  ;;  %v7564_v31 = vld [vmem:[%s7745_s6 + $0x78] sm:$0xff]   ;;  %v6271_v35 = vcombine.low %v4636_v50, %v4639_v41  ;;  %v6282_v3 = vcombine.low %v9357_v28, %v9364_v47  ;;  %v9383_v50 = vsel %vm8054_vm5, %v4721_v13, %v4722_v37  ;;  %v2405_v41 = vrot.slane %v2403_v1, 4  ;;  %v7629_v1 = vld [vmem:[%s7745_s6 + $0x88] sm:$0xf] }
 0x145   : > { %6879 = vmatprep.mubr.bf16.mxu1 %v7563_v53  ;;  %7149 = vmatpush3.bf16.msra.mxu1 %v7624_v22  ;;  %v7565_v53 = vld [vmem:[%s7745_s6 + $0x84] sm:$0xff]   ;;  %v4646_v61 = vsel %vm8054_vm5, %v4644_v29, %v4645_v34  ;;  %v7627_v22 = vld [vmem:[%s7745_s6 + $0x70] sm:$0xf]  ;;  %v6283_v29 = vcombine.low %v9378_v56, %v9383_v50  ;;  %v4728_v20 = vrot.slane %v4726_v40, 4  ;;  %v2460_v25 = vshll.u32 %v7629_v1, 16 }
 0x146   : > { %7142 = vmatprep.subr.bf16.mxu1 %v7626_v11  ;;  %v2412_v49 = vshll.u32 %v7627_v22, 16  ;;  %v2416_v48 = vshrl.u32 %v7627_v22, 16  ;;  %v6272_v7 = vcombine.low %v4643_v2, %v4646_v61  ;;  %v2422_v2 = vshll.u32 %v7628_v57, 16 }
 0x147   : > { %v9405_v12 = vsel %vm8054_vm5, %v4728_v20, %v4729_v24  ;;  %v2464_v22 = vshrl.u32 %v7629_v1, 16  ;;  %v7631_v20 = vld [vmem:[%s7745_s6 + $0xa0] sm:$0xf] }
 0x148   : > { %v9385_v15 = vrot.slane %v2412_v49, 5  ;;  %v2418_v34 = vrot.slane %v2416_v48, 4  ;;  %v2512_v57 = vshrl.u32 %v7631_v20, 16 }
 0x149   : > { %7150 = vmatpush3.bf16.msra.mxu1 %v7626_v11  ;;  %v6252_v11 = vrot.slane %v6236_v52, 9 }
 0x14a   : > { %v2419_v32 = vor.u32 %v2418_v34, %v9385_v15  ;;  %v2478_v34 = vshll.u32 %v5934_v62, 16 }
 0x14b   : > { %7104 = vmatmul.mubr.bf16.vlgmr.msra.gmra.mrb[0].mxu0 %v6270_v4  ;;  %v7567_v4 = vld [vmem:[%s7745_s6 + $0x9c] sm:$0xff]  }
 0x14c   : > { %6880 = vmatmul.mubr.bf16.gmra.mrb[16].mxu1 %v7564_v31  ;;  %7107 = vmatprep.mubr.bf16.mxu0 %v6271_v35  ;;  %v5931_v31 = vld [vmem:[%s7745_s6 + $0x84] sm:$0xf]  ;;  %v9396_v35 = vsel %vm8054_vm5, %v6252_v11, %v4726_v40  ;;  %v2420_v48 = vrot.slane %v2419_v32, 4  ;;  %v7630_v11 = vld [vmem:[%s7745_s6 + $0x94] sm:$0xf]  ;;  %v2480_v1 = vrot.slane %v2478_v34, 5 }
 0x14d   : > { %6883 = vmatprep.mubr.bf16.mxu1 %v7565_v53  ;;  %v2409_v53 = vor.u32 %v2408_v27, %v2405_v41  ;;  %v2451_v14 = vshrl.u32 %v5931_v31, 16  ;;  %v2454_v61 = vshll.u32 %v5931_v31, 16  ;;  %v6284_v49 = vcombine.low %v9396_v35, %v9405_v12 }
 0x14e   : > { %v9414_v41 = vrot.slane %v2460_v25, 5  ;;  %v2466_v27 = vrot.slane %v2464_v22, 4  ;;  %v2484_v40 = vshll.u32 %v7630_v11, 16  ;;  %v2488_v24 = vshrl.u32 %v7630_v11, 16  ;;  %v7634_v11 = vld [vmem:[%s7745_s6 + $0xa4] sm:$0x1] }
 0x14f   : > { %v2410_v37 = vrot.slane %v2409_v53, 4  ;;  %v2453_v13 = vrot.slane %v2451_v14, 4  ;;  %v2456_v52 = vrot.slane %v2454_v61, 5  ;;  %v2508_v53 = vshll.u32 %v7631_v20, 16  ;;  %v7635_v20 = vld [vmem:[%s7745_s6 + $0xac] sm:$0xf] }
 0x150   : > { %v2467_v14 = vor.u32 %v2466_v27, %v9414_v41  ;;  %v9431_v42 = vrot.slane %v2484_v40, 5  ;;  %v2490_v43 = vrot.slane %v2488_v24, 4  ;;  %v2514_v22 = vrot.slane %v2512_v57, 4  ;;  %v5943_v24 = vld [vmem:[%s7745_s6 + $0xb4] sm:$0xf] }
 0x151   : > { %v2518_v40 = vshll.u32 %v7634_v11, 16  ;;  %v2536_v16 = vshrl.u32 %v7635_v20, 16  ;;  %v2550_v0 = vshll.u32 %v5943_v24, 16 }
 0x152   : > { %v2491_v27 = vor.u32 %v2490_v43, %v9431_v42 }
 0x153   : > { %7108 = vmatmul.mubr.bf16.gmra.mrb[4].mxu0 %v6272_v7  ;;  %v5937_v7 = vld [vmem:[%s7745_s6 + $0x9c] sm:$0xf] }
 0x154   : > { %6884 = vmatmul.mubr.bf16.gmra.mrb[20].mxu1 %v7566_v19  ;;  %7111 = vmatprep.mubr.bf16.mxu0 %v6273_v9  ;;  %v2424_v9 = vrot.slane %v2422_v2, 5  ;;  %v2475_v19 = vshrl.u32 %v5934_v62, 16  ;;  %v2502_v31 = vshll.u32 %v5937_v7, 16  ;;  %v2415_v2 = vsel %vm7808_vm2, %v2410_v37, %v9385_v15  ;;  %v7570_v62 = vld [vmem:[%s7745_s6 + $0xc0] sm:$0xff]  }
 0x155   : > { %6887 = vmatprep.mubr.bf16.mxu1 %v7567_v4  ;;  %v2499_v4 = vshrl.u32 %v5937_v7, 16  ;;  %v9433_v15 = vrot.slane %v2508_v53, 5  ;;  %v2532_v53 = vshll.u32 %v7635_v20, 16 }
 0x156   : > { %v2425_v32 = vsel %vm7808_vm2, %v2420_v48, %v2424_v9  ;;  %v2477_v61 = vrot.slane %v2475_v19, 4  ;;  %v2504_v25 = vrot.slane %v2502_v31, 5  ;;  %v2472_v9 = vrot.slane %v2470_v21, 5  ;;  %v7636_v21 = vld [vmem:[%s7745_s6 + $0xb8] sm:$0xf] }
 0x157   : > { %v2468_v48 = vrot.slane %v2467_v14, 4  ;;  %v2515_v34 = vor.u32 %v2514_v22, %v9433_v15  ;;  %v2556_v30 = vshll.u32 %v7636_v21, 16  ;;  %v2560_v45 = vshrl.u32 %v7636_v21, 16 }
 0x159   : > { %v2516_v14 = vrot.slane %v2515_v34, 4 }
 0x15b   : > { %7112 = vmatmul.mubr.bf16.gmra.mrb[8].mxu0 %v6274_v55  ;;  %v2457_v55 = vor.u32 %v2456_v52, %v2453_v13  ;;  %v2481_v13 = vor.u32 %v2480_v1, %v2477_v61  ;;  %v7633_v52 = vld [vmem:[%s7745_s6 + $0x98] sm:$0x1]  ;;  %v2520_v61 = vrot.slane %v2518_v40, 5 }
 0x15c   : > { %6888 = vmatmul.mubr.bf16.gmra.mrb[24].mxu1 %v7568_v46  ;;  %7115 = vmatprep.mubr.bf16.mxu0 %v6275_v18  ;;  %v2501_v18 = vrot.slane %v2499_v4, 4  ;;  %v5973_v46 = vcombine.low %v2415_v2, %v2425_v32  ;;  %v2494_v7 = vshll.u32 %v7633_v52, 16  ;;  %v2547_v32 = vshrl.u32 %v5943_v24, 16 }
 0x15d   : > { %6891 = vmatprep.mubr.bf16.mxu1 %v7569_v10  ;;  %v2458_v37 = vrot.slane %v2457_v55, 4  ;;  %v5940_v10 = vld [vmem:[%s7745_s6 + $0xa8] sm:$0xf]  ;;  %v2482_v57 = vrot.slane %v2481_v13, 4  ;;  %v2521_v33 = vsel %vm7808_vm2, %v2516_v14, %v2520_v61 }
 0x15e   : > { %v2505_v19 = vor.u32 %v2504_v25, %v2501_v18  ;;  %v2523_v4 = vshrl.u32 %v5940_v10, 16  ;;  %v2526_v31 = vshll.u32 %v5940_v10, 16  ;;  %v2496_v2 = vrot.slane %v2494_v7, 5 }
 0x15f   : > { %v2463_v44 = vsel %vm7808_vm2, %v2458_v37, %v9414_v41  ;;  %v2534_v18 = vrot.slane %v2532_v53, 5  ;;  %v2538_v25 = vrot.slane %v2536_v16, 4  ;;  %v2549_v22 = vrot.slane %v2547_v32, 4  ;;  %v5946_v37 = vld [vmem:[%s7745_s6 + $0xc0] sm:$0xf] }
 0x160   : > { %v2506_v55 = vrot.slane %v2505_v19, 4  ;;  %v2525_v1 = vrot.slane %v2523_v4, 4  ;;  %v2528_v43 = vrot.slane %v2526_v31, 5  ;;  %v2571_v10 = vshrl.u32 %v5946_v37, 16  ;;  %v7638_v19 = vld [vmem:[%s7745_s6 + $0xc4] sm:$0xf] }
 0x161   : > { %v2580_v34 = vshll.u32 %v7638_v19, 16 }
 0x162   : > { %v2511_v52 = vsel %vm7808_vm2, %v2506_v55, %v9433_v15  ;;  %v2529_v6 = vor.u32 %v2528_v43, %v2525_v1  ;;  %v2584_v15 = vshrl.u32 %v7638_v19, 16  ;;  %v2573_v20 = vrot.slane %v2571_v10, 4 }
 0x163   : > { %7116 = vmatmul.mubr.bf16.gmra.mrb[12].mxu0 %v6276_v39  ;;  %v2473_v39 = vsel %vm7808_vm2, %v2468_v48, %v2472_v9  ;;  %v2562_v9 = vrot.slane %v2560_v45, 4  ;;  %v2487_v48 = vsel %vm7808_vm2, %v2482_v57, %v9431_v42  ;;  %v7637_v42 = vld [vmem:[%s7745_s6 + $0xb0] sm:$0x1]  ;;  %v5977_v59 = vcombine.low %v2511_v52, %v2521_v33  ;;  %v7640_v45 = vld [vmem:[%s7745_s6 + $0xc8] sm:$0x1] }
 0x164   : > { %6892 = vmatmul.mubr.bf16.gmra.mrb[28].mxu1 %v7570_v62  ;;  %7119 = vmatprep.mubr.bf16.mxu0 %v6277_v36  ;;  %v2492_v36 = vrot.slane %v2491_v27, 4  ;;  %v5975_v41 = vcombine.low %v2463_v44, %v2473_v39  ;;  %v2552_v62 = vrot.slane %v2550_v0, 5  ;;  %v2542_v7 = vshll.u32 %v7637_v42, 16 }
 0x165   : > { %6927 = vmatprep.mubr.bf16.mxu1 %v5973_v46  ;;  %v2558_v46 = vrot.slane %v2556_v30, 5  ;;  %v2574_v27 = vshll.u32 %v5946_v37, 16  ;;  %v2530_v23 = vrot.slane %v2529_v6, 4  ;;  %v2582_v16 = vrot.slane %v2580_v34, 5 }
 0x166   : > { %v2497_v13 = vsel %vm7808_vm2, %v2492_v36, %v2496_v2  ;;  %v2553_v11 = vor.u32 %v2552_v62, %v2549_v22  ;;  %v2544_v31 = vrot.slane %v2542_v7, 5  ;;  %v2586_v44 = vrot.slane %v2584_v15, 4  ;;  %v5095_v22 = vld [vmem:[#allocation2 + $0x18] sm:$0xff]  ;;  %v5093_v62 = vld [vmem:[#allocation2 + $0x8] sm:$0xff] }
 0x167   : > { %v2563_v40 = vor.u32 %v2562_v9, %v2558_v46  ;;  %v5976_v4 = vcombine.low %v2487_v48, %v2497_v13  ;;  %v2576_v53 = vrot.slane %v2574_v27, 5  ;;  %v2535_v32 = vsel %vm7808_vm2, %v2530_v23, %v2534_v18  ;;  %v5096_v48 = vld [vmem:[#allocation2 + $0x20] sm:$0xff]  ;;  %v5097_v15 = vld [vmem:[#allocation2 + $0x28] sm:$0xff] }
 0x168   : > { %v2554_v39 = vrot.slane %v2553_v11, 4  ;;  %v2587_v30 = vor.u32 %v2586_v44, %v2582_v16  ;;  %v2590_v36 = vshll.u32 %v7640_v45, 16  ;;  %vm5127_vm8 = vcmp.gt.f32.partialorder %v5095_v22, 1.0  ;;  %v5100_v23 = vld [vmem:[#allocation2 + $0x40] sm:$0xff] }
 0x169   : > { %v2564_v57 = vrot.slane %v2563_v40, 4  ;;  %v2577_v21 = vor.u32 %v2576_v53, %v2573_v20  ;;  %v7682_v13 = vmov 0.0   ;;  %v9535_v33 = vmul.f32 0.9, %v5095_v22  ;;  %v5101_v53 = vld [vmem:[#allocation2 + $0x48] sm:$0xff] }
 0x16a   : > { %v2559_v5 = vsel %vm7808_vm2, %v2554_v39, %v2558_v46  ;;  %v2592_v55 = vrot.slane %v2590_v36, 5  ;;  %v5098_v46 = vld [vmem:[#allocation2 + $0x30] sm:$0xff]  ;;  %v9537_v6 = vmul.f32 0.9, %v5093_v62  ;;  %vm5125_vm9 = vcmp.gt.f32.partialorder %v5093_v62, 1.0 }
 0x16b   : > { %7120 = vmatmul.mubr.bf16.gmra.mrb[16].mxu0 %v6278_v63  ;;  %v2539_v63 = vor.u32 %v2538_v25, %v2534_v18  ;;  %v2578_v26 = vrot.slane %v2577_v21, 4  ;;  %v5094_v25 = vld [vmem:[#allocation2 + $0x10] sm:$0xff]  ;;  %vm5130_vm10 = vcmp.gt.f32.partialorder %v5098_v46, 1.0  ;;  %v9544_v10 = vmul.f32 0.9, %v5098_v46 }
 0x16c   : > { %6928 = vmatmul.mubr.bf16.vlgmr.msra.gmra.mrb[16].mxu1 %v9256_v51  ;;  %7123 = vmatprep.mubr.bf16.mxu0 %v6279_v60  ;;  %v7639_v51 = vld [vmem:[%s7745_s6 + $0xbc] sm:$0x1]  ;;  %vm5126_vm6 = vcmp.gt.f32.partialorder %v5094_v25, 1.0  ;;  %v9528_v9 = vmul.f32 0.9, %v5094_v25  ;;  %v9549_v19 = vsel %vm5127_vm8, 1.0, %v7682_v13 }
 0x16d   : > { %6931 = vmatprep.mubr.bf16.mxu1 %v5975_v41  ;;  %v2566_v24 = vshll.u32 %v7639_v51, 16  ;;  %v2540_v60 = vrot.slane %v2539_v63, 4  ;;  %v2583_v14 = vsel %vm7808_vm2, %v2578_v26, %v2582_v16  ;;  %v5092_v41 = vld [vmem:[#allocation2] sm:$0xff]  ;;  %v9533_v52 = vsel %vm5126_vm6, 1.0, %v7682_v13  ;;  %v5099_v63 = vld [vmem:[#allocation2 + $0x38] sm:$0xff]  ;;  %v5102_v51 = vld [vmem:[#allocation2 + $0x50] sm:$0xff] }
 0x16e   : > { %vm5124_vm7 = vcmp.gt.f32.partialorder %v5092_v41, 1.0  ;;  %v9530_v37 = vmul.f32 0.9, %v5092_v41  ;;  %vm5128_vm11 = vcmp.gt.f32.partialorder %v5096_v48, 1.0  ;;  %v9551_v34 = vmul.f32 0.9, %v5096_v48 }
 0x16f   : > { %v2568_v2 = vrot.slane %v2566_v24, 5  ;;  %v2545_v0 = vsel %vm7808_vm2, %v2540_v60, %v2544_v31  ;;  %v9542_v7 = vsel %vm5124_vm7, 1.0, %v7682_v13  ;;  %vm5131_vm12 = vcmp.gt.f32.partialorder %v5099_v63, 1.0  ;;  %v5103_v60 = vld [vmem:[#allocation2 + $0x58] sm:$0xff]  ;;  %v9573_v16 = vld [vmem:[%s9899_s2] ss:$0 sm:$0xff] }
 0x170   : > { %v9555_v40 = vmul.f32 0.9, %v5099_v63  ;;  %vm5129_vm13 = vcmp.gt.f32.partialorder %v5097_v15, 1.0  ;;  %vm5134_vm14 = vcmp.gt.f32.partialorder %v5102_v51, 1.0  ;;  %v9566_v31 = vsel %vm5128_vm11, 1.0, %v7682_v13  ;;  %v5110_v46 = vld [vmem:[#allocation2 + $0x90] sm:$0xff] }
 0x171   : > { %v2569_v58 = vsel %vm7808_vm2, %v2564_v57, %v2568_v2  ;;  %v9568_v20 = vmul.f32 0.9, %v5097_v15  ;;  %vm5132_vm15 = vcmp.gt.f32.partialorder %v5100_v23, 1.0  ;;  %vm5135_vm0 = vcmp.gt.f32.partialorder %v5103_v60, 1.0  ;;  %v5106_v2 = vld [vmem:[#allocation2 + $0x70] sm:$0xff] }
 0x172   : > { %v5979_v8 = vcombine.low %v2559_v5, %v2569_v58  ;;  %v9577_v44 = vsel %vm5131_vm12, 1.0, %v7682_v13  ;;  %v9580_v39 = vsel %vm5129_vm13, 1.0, %v7682_v13  ;;  %v9582_v57 = vmul.f32 0.9, %v5102_v51  ;;  %v5108_v51 = vld [vmem:[#allocation2 + $0x80] sm:$0xff] }
 0x173   : > { %7124 = vmatmul.mubr.bf16.gmra.mrb[20].mxu0 %v6280_v54  ;;  %v5978_v54 = vcombine.low %v2535_v32, %v2545_v0  ;;  %vm5133_vm1 = vcmp.gt.f32.partialorder %v5101_v53, 1.0  ;;  %v9585_v32 = vsel %vm5134_vm14, 1.0, %v7682_v13  ;;  %v9587_v0 = vmul.f32 0.9, %v5100_v23 }
 0x174   : > { %6932 = vmatmul.mubr.bf16.gmra.mrb[20].mxu1 %v5976_v4  ;;  %7127 = vmatprep.mubr.bf16.mxu0 %v6281_v17  ;;  %v2588_v17 = vrot.slane %v2587_v30, 4  ;;  %v9560_v4 = vsel %vm5125_vm9, 1.0, %v7682_v13  ;;  %v9589_v21 = vmul.f32 0.9, %v5103_v60  ;;  %v5104_v30 = vld [vmem:[#allocation2 + $0x60] sm:$0xff]  ;;  %v9592_v36 = vsel %vm5132_vm15, 1.0, %v7682_v13 }
 0x175   : > { %6935 = vmatprep.mubr.bf16.mxu1 %v5977_v59  ;;  %v9563_v59 = vsel %vm5130_vm10, 1.0, %v7682_v13  ;;  %v9595_v5 = vsel %vm5135_vm0, 1.0, %v7682_v13  ;;  %v9597_v58 = vmul.f32 0.9, %v5101_v53  ;;  %vm5136_vm3 = vcmp.gt.f32.partialorder %v5104_v30, 1.0 }
 0x176   : > { %v2593_v61 = vsel %vm7808_vm2, %v2588_v17, %v2592_v55  ;;  %v9601_v17 = vsel %vm5133_vm1, 1.0, %v7682_v13  ;;  %vm5138_vm2 = vcmp.gt.f32.partialorder %v5106_v2, 1.0  ;;  %v9603_v55 = vmul.f32 0.9, %v5106_v2 }
 0x177   : > { %v5980_v1 = vcombine.low %v2583_v14, %v2593_v61  ;;  %v5105_v14 = vld [vmem:[#allocation2 + $0x68] sm:$0xff]  ;;  %v9606_v25 = vmul.f32 0.9, %v5104_v30  ;;  %v9624_v60 = vsel %vm5136_vm3, 1.0, %v7682_v13  ;;  %vm5142_vm6 = vcmp.gt.f32.partialorder %v5110_v46, 1.0 }
 0x178   : > { %vm5137_vm5 = vcmp.gt.f32.partialorder %v5105_v14, 1.0  ;;  %v9618_v15 = vmul.f32 0.9, %v5105_v14  ;;  %v9638_v30 = vmul.f32 0.9, %v5108_v51  ;;  %vm5140_vm7 = vcmp.gt.f32.partialorder %v5108_v51, 1.0 }
 0x17b   : > { %7128 = vmatmul.mubr.bf16.gmra.mrb[24].mxu0 %v6282_v3 }
 0x17c   : > { %6936 = vmatmul.mubr.bf16.gmra.mrb[24].mxu1 %v5978_v54  ;;  %7131 = vmatprep.mubr.bf16.mxu0 %v6283_v29  ;;  %v5107_v54 = vld [vmem:[#allocation2 + $0x78] sm:$0xff] }
 0x17d   : > { %6939 = vmatprep.mubr.bf16.mxu1 %v5979_v8  ;;  %vm5139_vm4 = vcmp.gt.f32.partialorder %v5107_v54, 1.0  ;;  %v9610_v62 = vmul.f32 0.9, %v5107_v54  ;;  %v9632_v54 = vsel %vm5137_vm5, 1.0, %v7682_v13 }
 0x17e   : > { %v9627_v53 = vsel %vm5139_vm4, 1.0, %v7682_v13 }
 0x183   : > { %7132 = vmatmul.mubr.bf16.gmra.mrb[28].mxu0 %v6284_v49 }
 0x184   : > { %6940 = vmatmul.mubr.bf16.gmra.mrb[28].mxu1 %v5980_v1 }
 0x1ff   : > { %v9504_v28 = vpop.f32.mrb[0].mxu1 }
 0x200   : > { %v9506_v47 = vpop.f32.mrb[1].mxu1 }
 0x201   : > { %v9508_v3 = vpop.f32.mrb[2].mxu1 }
 0x202   : > { %v9510_v56 = vpop.f32.mrb[3].mxu1 }
 0x207   : > { %v9512_v50 = vpop.f32.mrb[4].mxu1 }
 0x208   : > { %v9514_v29 = vpop.f32.mrb[5].mxu1 }
 0x209   : > { %v9516_v38 = vpop.f32.mrb[6].mxu1 }
 0x20a   : > { %v9518_v43 = vpop.f32.mrb[7].mxu1 }
 0x20f   : > { %v9520_v18 = vpop.f32.mrb[8].mxu1 }
 0x210   : > { %v9522_v35 = vpop.f32.mrb[9].mxu1 }
 0x211   : > { %v9524_v12 = vpop.f32.mrb[10].mxu1 }
 0x212   : > { %v9526_v49 = vpop.f32.mrb[11].mxu1 }
 0x217   : > { %v9539_v42 = vpop.f32.mrb[12].mxu1 }
 0x218   : > { %v9546_v27 = vpop.f32.mrb[13].mxu1 }
 0x219   : > { %v9553_v11 = vpop.f32.mrb[14].mxu1 }
 0x21a   : > { %v9557_v24 = vpop.f32.mrb[15].mxu1 }
 0x21e   : > { %v7105_v45 = vpop.f32.mrb[0].mxu0 }
 0x21f   : > { %v7151_v8 = vadd.f32 %v7105_v45, %v9504_v28  ;;  %v4894_v26 = vpop.f32.mrb[1].mxu0  ;;  %v5111_v45 = vld [vmem:[#allocation2 + $0x98] sm:$0xff] }
 0x220   : > { %v7152_v61 = vadd.f32 %v4894_v26, %v9506_v47  ;;  %v7106_v1 = vpop.f32.mrb[2].mxu0  ;;  %v9616_v47 = vsel %vm5138_vm2, 1.0, %v7682_v13  ;;  %vm5143_vm9 = vcmp.gt.f32.partialorder %v5111_v45, 1.0 }
 0x221   : > { %v5062_v41 = vadd.f32 %v7151_v8, %v9573_v16  ;;  %v7153_v22 = vadd.f32 %v7106_v1, %v9508_v3  ;;  %v4897_v28 = vpop.f32.mrb[3].mxu0  ;;  %v9634_v8 = vmul.f32 0.9, %v5110_v46 }
 0x222   : > { %v5060_v48 = vadd.f32 %v7152_v61, %v9573_v16  ;;  %v7154_v63 = vadd.f32 %v4897_v28, %v9510_v56 }
 0x223   : > { %v5254_v23 = vadd.f32 %v9528_v9, %v5062_v41  ;;  %v5063_v3 = vadd.f32 %v7153_v22, %v9573_v16 }
 0x224   : > { %v5252_v56 = vadd.f32 %v9530_v37, %v5060_v48  ;;  %v5061_v2 = vadd.f32 %v7154_v63, %v9573_v16  ;;  %v9642_v37 = vmul.f32 0.9, %v5111_v45 }
 0x225   : > { %v5286_v9 = vsub.f32 %v5254_v23, %v9533_v52  ;;  %v5255_v26 = vadd.f32 %v9535_v33, %v5063_v3 }
 0x226   : > { %v5284_v14 = vsub.f32 %v5252_v56, %v9542_v7  ;;  %v5253_v61 = vadd.f32 %v9537_v6, %v5061_v2  ;;  %v7109_v1 = vpop.f32.mrb[4].mxu0 }
 0x227   : > { %5318 = vst [vmem:[#allocation2 + $0x10] sm:$0xff] %v5286_v9  ;;  %vm5350_vm8 = vcmp.gt.f32.partialorder %v5286_v9, 1.0  ;;  %v5287_v41 = vsub.f32 %v5255_v26, %v9549_v19  ;;  %v7155_v22 = vadd.f32 %v7109_v1, %v9512_v50  ;;  %v4910_v52 = vpop.f32.mrb[5].mxu0 }
 0x228   : > { %v6328_v33 = vsel %vm5350_vm8, 1.0, %v7682_v13  ;;  %5316 = vst [vmem:[#allocation2] sm:$0xff] %v5284_v14  ;;  %vm5348_vm10 = vcmp.gt.f32.partialorder %v5284_v14, 1.0  ;;  %v5285_v7 = vsub.f32 %v5253_v61, %v9560_v4  ;;  %v7156_v6 = vadd.f32 %v4910_v52, %v9514_v29  ;;  %v7110_v28 = vpop.f32.mrb[6].mxu0  ;;  %v5109_v4 = vld [vmem:[#allocation2 + $0x88] sm:$0xff] }
 0x229   : > { %v6326_v48 = vsel %vm5348_vm10, 1.0, %v7682_v13  ;;  %5319 = vst [vmem:[#allocation2 + $0x18] sm:$0xff] %v5287_v41  ;;  %vm5351_vm11 = vcmp.gt.f32.partialorder %v5287_v41, 1.0  ;;  %v5066_v63 = vadd.f32 %v7155_v22, %v9573_v16  ;;  %v7157_v19 = vadd.f32 %v7110_v28, %v9516_v38  ;;  %v4913_v50 = vpop.f32.mrb[7].mxu0 }
 0x22a   : > { %v6329_v23 = vsel %vm5351_vm11, 1.0, %v7682_v13  ;;  %5317 = vst [vmem:[#allocation2 + $0x8] sm:$0xff] %v5285_v7  ;;  %vm5349_vm12 = vcmp.gt.f32.partialorder %v5285_v7, 1.0  ;;  %v5064_v3 = vadd.f32 %v7156_v6, %v9573_v16  ;;  %v7158_v29 = vadd.f32 %v4913_v50, %v9518_v43  ;;  %v9697_v50 = vld [vmem:[#allocation2 + $0xa0] sm:$0xff] }
 0x22b   : > { %v6428_v56 = vpack.c.bf16 %v6329_v23, %v6328_v33  ;;  %v6327_v2 = vsel %vm5349_vm12, 1.0, %v7682_v13  ;;  %v5258_v9 = vadd.f32 %v9544_v10, %v5066_v63  ;;  %v5067_v26 = vadd.f32 %v7157_v19, %v9573_v16  ;;  %v9692_v63 = vld [vmem:[#allocation2 + $0xb0] sm:$0xff] }
 0x22c   : > { %v6425_v38 = vpack.c.bf16 %v6327_v2, %v6326_v48  ;;  %v5256_v14 = vadd.f32 %v9551_v34, %v5064_v3  ;;  %v5065_v61 = vadd.f32 %v7158_v29, %v9573_v16  ;;  %vm5141_vm13 = vcmp.gt.f32.partialorder %v5109_v4, 1.0 }
 0x22d   : > { %6472 = vst [vmem:[%s7740_s30 + $0x8] sm:$0xff] %v6428_v56   ;;  %v5290_v1 = vsub.f32 %v5258_v9, %v9563_v59  ;;  %v5259_v41 = vadd.f32 %v9555_v40, %v5067_v26  ;;  %v9665_v43 = vsel %vm5142_vm6, 1.0, %v7682_v13  ;;  %v9667_v22 = vmul.f32 0.9, %v5109_v4  ;;  %v5115_v4 = vld [vmem:[#allocation2 + $0xb8] sm:$0xff] }
 0x22e   : > { %6426 = vst [vmem:[%s7740_s30] sm:$0xff] %v6425_v38   ;;  %v5288_v10 = vsub.f32 %v5256_v14, %v9566_v31  ;;  %v5257_v52 = vadd.f32 %v9568_v20, %v5065_v61  ;;  %v7113_v34 = vpop.f32.mrb[8].mxu0  ;;  %v9674_v33 = vsel %vm5140_vm7, 1.0, %v7682_v13  ;;  %v9678_v59 = vsel %vm5143_vm9, 1.0, %v7682_v13 }
 0x22f   : > { %5322 = vst [vmem:[#allocation2 + $0x30] sm:$0xff] %v5290_v1  ;;  %vm5354_vm14 = vcmp.gt.f32.partialorder %v5290_v1, 1.0  ;;  %v5291_v40 = vsub.f32 %v5259_v41, %v9577_v44  ;;  %v7159_v46 = vadd.f32 %v7113_v34, %v9520_v18  ;;  %v4926_v7 = vpop.f32.mrb[9].mxu0  ;;  %v9684_v31 = vsel %vm5141_vm13, 1.0, %v7682_v13 }
 0x230   : > { %v6332_v20 = vsel %vm5354_vm14, 1.0, %v7682_v13  ;;  %5320 = vst [vmem:[#allocation2 + $0x20] sm:$0xff] %v5288_v10  ;;  %vm5352_vm15 = vcmp.gt.f32.partialorder %v5288_v10, 1.0  ;;  %v5289_v51 = vsub.f32 %v5257_v52, %v9580_v39  ;;  %v7160_v45 = vadd.f32 %v4926_v7, %v9522_v35  ;;  %v7114_v6 = vpop.f32.mrb[10].mxu0 }
 0x231   : > { %v6330_v28 = vsel %vm5352_vm15, 1.0, %v7682_v13  ;;  %5323 = vst [vmem:[#allocation2 + $0x38] sm:$0xff] %v5291_v40  ;;  %vm5355_vm0 = vcmp.gt.f32.partialorder %v5291_v40, 1.0  ;;  %v5070_v18 = vadd.f32 %v7159_v46, %v9573_v16  ;;  %v7161_v44 = vadd.f32 %v7114_v6, %v9524_v12  ;;  %v4929_v48 = vpop.f32.mrb[11].mxu0 }
 0x232   : > { %v6333_v19 = vsel %vm5355_vm0, 1.0, %v7682_v13  ;;  %5321 = vst [vmem:[#allocation2 + $0x28] sm:$0xff] %v5289_v51  ;;  %vm5353_vm1 = vcmp.gt.f32.partialorder %v5289_v51, 1.0  ;;  %v5068_v39 = vadd.f32 %v7160_v45, %v9573_v16  ;;  %v7162_v35 = vadd.f32 %v4929_v48, %v9526_v49 }
 0x233   : > { %v6434_v23 = vpack.c.bf16 %v6333_v19, %v6332_v20  ;;  %v6331_v3 = vsel %vm5353_vm1, 1.0, %v7682_v13  ;;  %v5262_v12 = vadd.f32 %v9582_v57, %v5070_v18  ;;  %v5071_v29 = vadd.f32 %v7161_v44, %v9573_v16  ;;  %v5118_v44 = vld [vmem:[#allocation2 + $0xd0] sm:$0xff] }
 0x234   : > { %v6431_v56 = vpack.c.bf16 %v6331_v3, %v6330_v28  ;;  %v5260_v2 = vadd.f32 %v9587_v0, %v5068_v39  ;;  %v5069_v9 = vadd.f32 %v7162_v35, %v9573_v16  ;;  %v9705_v26 = vmul.f32 0.9, %v9692_v63 }
 0x235   : > { %6474 = vst [vmem:[%s7740_s30 + $0x18] sm:$0xff] %v6434_v23   ;;  %v5294_v49 = vsub.f32 %v5262_v12, %v9585_v32  ;;  %v5263_v38 = vadd.f32 %v9589_v21, %v5071_v29  ;;  %vm5146_vm2 = vcmp.gt.f32.partialorder %v9692_v63, 1.0  ;;  %v9712_v57 = vmul.f32 0.9, %v9697_v50 }
 0x236   : > { %6473 = vst [vmem:[%s7740_s30 + $0x10] sm:$0xff] %v6431_v56   ;;  %v5292_v14 = vsub.f32 %v5260_v2, %v9592_v36  ;;  %v5261_v0 = vadd.f32 %v9597_v58, %v5069_v9  ;;  %v7117_v61 = vpop.f32.mrb[12].mxu0  ;;  %vm5144_vm3 = vcmp.gt.f32.partialorder %v9697_v50, 1.0  ;;  %v9718_v1 = vmul.f32 0.9, %v5115_v4 }
 0x237   : > { %5326 = vst [vmem:[#allocation2 + $0x50] sm:$0xff] %v5294_v49  ;;  %vm5358_vm4 = vcmp.gt.f32.partialorder %v5294_v49, 1.0  ;;  %v5295_v32 = vsub.f32 %v5263_v38, %v9595_v5  ;;  %v7163_v21 = vadd.f32 %v7117_v61, %v9539_v42  ;;  %v4942_v41 = vpop.f32.mrb[13].mxu0  ;;  %vm5147_vm5 = vcmp.gt.f32.partialorder %v5115_v4, 1.0  ;;  %v5116_v61 = vld [vmem:[#allocation2 + $0xc0] sm:$0xff] }
 0x238   : > { %v6336_v10 = vsel %vm5358_vm4, 1.0, %v7682_v13  ;;  %5324 = vst [vmem:[#allocation2 + $0x40] sm:$0xff] %v5292_v14  ;;  %vm5356_vm6 = vcmp.gt.f32.partialorder %v5292_v14, 1.0  ;;  %v5293_v36 = vsub.f32 %v5261_v0, %v9601_v17  ;;  %v7164_v58 = vadd.f32 %v4942_v41, %v9546_v27  ;;  %v7118_v52 = vpop.f32.mrb[14].mxu0  ;;  %v5113_v27 = vld [vmem:[#allocation2 + $0xa8] sm:$0xff] }
 0x239   : > { %v6334_v34 = vsel %vm5356_vm6, 1.0, %v7682_v13  ;;  %5327 = vst [vmem:[#allocation2 + $0x58] sm:$0xff] %v5295_v32  ;;  %vm5359_vm7 = vcmp.gt.f32.partialorder %v5295_v32, 1.0  ;;  %v5074_v40 = vadd.f32 %v7163_v21, %v9573_v16  ;;  %v7165_v5 = vadd.f32 %v7118_v52, %v9553_v11  ;;  %v4945_v42 = vpop.f32.mrb[15].mxu0  ;;  %v5119_v32 = vld [vmem:[#allocation2 + $0xd8] sm:$0xff] }
 0x23a   : > { %v6337_v46 = vsel %vm5359_vm7, 1.0, %v7682_v13  ;;  %5325 = vst [vmem:[#allocation2 + $0x48] sm:$0xff] %v5293_v36  ;;  %vm5357_vm8 = vcmp.gt.f32.partialorder %v5293_v36, 1.0  ;;  %v5072_v7 = vadd.f32 %v7164_v58, %v9573_v16  ;;  %v7166_v17 = vadd.f32 %v4945_v42, %v9557_v24  ;;  %v5117_v58 = vld [vmem:[#allocation2 + $0xc8] sm:$0xff] }
 0x23b   : > { %v6440_v20 = vpack.c.bf16 %v6337_v46, %v6336_v10  ;;  %v6335_v51 = vsel %vm5357_vm8, 1.0, %v7682_v13  ;;  %v5266_v45 = vadd.f32 %v9603_v55, %v5074_v40  ;;  %v5075_v6 = vadd.f32 %v7165_v5, %v9573_v16 }
 0x23c   : > { %v6437_v11 = vpack.c.bf16 %v6335_v51, %v6334_v34  ;;  %v5264_v28 = vadd.f32 %v9606_v25, %v5072_v7  ;;  %v5073_v18 = vadd.f32 %v7166_v17, %v9573_v16  ;;  %vm5145_vm9 = vcmp.gt.f32.partialorder %v5113_v27, 1.0 }
 0x23d   : > { %6476 = vst [vmem:[%s7740_s30 + $0x28] sm:$0xff] %v6440_v20   ;;  %v5298_v48 = vsub.f32 %v5266_v45, %v9616_v47  ;;  %v5267_v24 = vadd.f32 %v9610_v62, %v5075_v6  ;;  %v9742_v19 = vsel %vm5146_vm2, 1.0, %v7682_v13  ;;  %v9744_v55 = vmul.f32 0.9, %v5113_v27 }
 0x23e   : > { %6475 = vst [vmem:[%s7740_s30 + $0x20] sm:$0xff] %v6437_v11   ;;  %v5296_v39 = vsub.f32 %v5264_v28, %v9624_v60  ;;  %v5265_v25 = vadd.f32 %v9618_v15, %v5073_v18  ;;  %v7121_v35 = vpop.f32.mrb[16].mxu0  ;;  %v9752_v23 = vsel %vm5144_vm3, 1.0, %v7682_v13  ;;  %v9756_v62 = vsel %vm5147_vm5, 1.0, %v7682_v13 }
 0x23f   : > { %5330 = vst [vmem:[#allocation2 + $0x70] sm:$0xff] %v5298_v48  ;;  %vm5362_vm10 = vcmp.gt.f32.partialorder %v5298_v48, 1.0  ;;  %v5299_v47 = vsub.f32 %v5267_v24, %v9627_v53  ;;  %v6929_v63 = vpop.f32.mrb[16].mxu1  ;;  %v4958_v3 = vpop.f32.mrb[17].mxu0  ;;  %v9761_v60 = vsel %vm5145_vm9, 1.0, %v7682_v13  ;;  %vm5150_vm12 = vcmp.gt.f32.partialorder %v5118_v44, 1.0 }
 0x240   : > { %v9763_v15 = vmul.f32 0.9, %v5118_v44  ;;  %5328 = vst [vmem:[#allocation2 + $0x60] sm:$0xff] %v5296_v39  ;;  %vm5360_vm11 = vcmp.gt.f32.partialorder %v5296_v39, 1.0  ;;  %v5297_v50 = vsub.f32 %v5265_v25, %v9632_v54  ;;  %v7167_v12 = vadd.f32 %v7121_v35, %v6929_v63  ;;  %v2821_v29 = vpop.f32.mrb[17].mxu1  ;;  %v7122_v4 = vpop.f32.mrb[18].mxu0 }
 0x241   : > { %v6340_v56 = vsel %vm5362_vm10, 1.0, %v7682_v13  ;;  %v6338_v53 = vsel %vm5360_vm11, 1.0, %v7682_v13  ;;  %5331 = vst [vmem:[#allocation2 + $0x78] sm:$0xff] %v5299_v47  ;;  %vm5363_vm13 = vcmp.gt.f32.partialorder %v5299_v47, 1.0  ;;  %v7168_v2 = vadd.f32 %v4958_v3, %v2821_v29  ;;  %v6930_v9 = vpop.f32.mrb[18].mxu1  ;;  %v4961_v49 = vpop.f32.mrb[19].mxu0 }
 0x242   : > { %v6341_v38 = vsel %vm5363_vm13, 1.0, %v7682_v13  ;;  %5329 = vst [vmem:[#allocation2 + $0x68] sm:$0xff] %v5297_v50  ;;  %vm5361_vm14 = vcmp.gt.f32.partialorder %v5297_v50, 1.0  ;;  %v5078_v54 = vadd.f32 %v7167_v12, %v9573_v16  ;;  %v7169_v14 = vadd.f32 %v7122_v4, %v6930_v9  ;;  %v2824_v0 = vpop.f32.mrb[19].mxu1 }
 0x243   : > { %v6446_v21 = vpack.c.bf16 %v6341_v38, %v6340_v56  ;;  %v6339_v41 = vsel %vm5361_vm14, 1.0, %v7682_v13  ;;  %v5076_v10 = vadd.f32 %v7168_v2, %v9573_v16  ;;  %v7170_v36 = vadd.f32 %v4961_v49, %v2824_v0 }
 0x244   : > { %v6443_v52 = vpack.c.bf16 %v6339_v41, %v6338_v53  ;;  %v5270_v34 = vadd.f32 %v9634_v8, %v5078_v54  ;;  %v5079_v40 = vadd.f32 %v7169_v14, %v9573_v16  ;;  %vm5148_vm15 = vcmp.gt.f32.partialorder %v5116_v61, 1.0  ;;  %v9808_v53 = vld [vmem:[#allocation2 + $0xe0] sm:$0xff] }
 0x245   : > { %6478 = vst [vmem:[%s7740_s30 + $0x38] sm:$0xff] %v6446_v21   ;;  %v5268_v5 = vadd.f32 %v9638_v30, %v5076_v10  ;;  %v5077_v42 = vadd.f32 %v7170_v36, %v9573_v16  ;;  %v9777_v46 = vmul.f32 0.9, %v5116_v61  ;;  %v9779_v7 = vmul.f32 0.9, %v5119_v32 }
 0x246   : > { %6477 = vst [vmem:[%s7740_s30 + $0x30] sm:$0xff] %v6443_v52   ;;  %v5302_v17 = vsub.f32 %v5270_v34, %v9665_v43  ;;  %v5271_v27 = vadd.f32 %v9642_v37, %v5079_v40  ;;  %v7125_v20 = vpop.f32.mrb[20].mxu0  ;;  %v9786_v8 = vsel %vm5150_vm12, 1.0, %v7682_v13  ;;  %v9788_v51 = vmul.f32 0.9, %v5117_v58 }
 0x247   : > { %v5300_v30 = vsub.f32 %v5268_v5, %v9674_v33  ;;  %v5269_v45 = vadd.f32 %v9667_v22, %v5077_v42  ;;  %v6933_v6 = vpop.f32.mrb[20].mxu1  ;;  %v4974_v11 = vpop.f32.mrb[21].mxu0  ;;  %v9794_v28 = vsel %vm5148_vm15, 1.0, %v7682_v13  ;;  %vm5151_vm0 = vcmp.gt.f32.partialorder %v5119_v32, 1.0 }
 0x248   : > { %5334 = vst [vmem:[#allocation2 + $0x90] sm:$0xff] %v5302_v17  ;;  %vm5366_vm1 = vcmp.gt.f32.partialorder %v5302_v17, 1.0  ;;  %v5303_v37 = vsub.f32 %v5271_v27, %v9678_v59  ;;  %v7171_v43 = vadd.f32 %v7125_v20, %v6933_v6  ;;  %v2837_v18 = vpop.f32.mrb[21].mxu1  ;;  %v7126_v44 = vpop.f32.mrb[22].mxu0  ;;  %vm5149_vm2 = vcmp.gt.f32.partialorder %v5117_v58, 1.0  ;;  %v5123_v27 = vld [vmem:[#allocation2 + $0xf8] sm:$0xff] }
 0x249   : > { %v6344_v48 = vsel %vm5366_vm1, 1.0, %v7682_v13  ;;  %5332 = vst [vmem:[#allocation2 + $0x80] sm:$0xff] %v5300_v30  ;;  %vm5364_vm3 = vcmp.gt.f32.partialorder %v5300_v30, 1.0  ;;  %v5301_v22 = vsub.f32 %v5269_v45, %v9684_v31  ;;  %v7172_v33 = vadd.f32 %v4974_v11, %v2837_v18  ;;  %v6934_v24 = vpop.f32.mrb[22].mxu1  ;;  %v4977_v39 = vpop.f32.mrb[23].mxu0  ;;  %v9803_v31 = vld [vmem:[#allocation2 + $0xf0] sm:$0xff] }
 0x24a   : > { %v6342_v25 = vsel %vm5364_vm3, 1.0, %v7682_v13  ;;  %5335 = vst [vmem:[#allocation2 + $0x98] sm:$0xff] %v5303_v37  ;;  %vm5367_vm4 = vcmp.gt.f32.partialorder %v5303_v37, 1.0  ;;  %v5082_v35 = vadd.f32 %v7171_v43, %v9573_v16  ;;  %v7173_v59 = vadd.f32 %v7126_v44, %v6934_v24  ;;  %v2840_v47 = vpop.f32.mrb[23].mxu1  ;;  %v5121_v45 = vld [vmem:[#allocation2 + $0xe8] sm:$0xff] }
 0x24b   : > { %v6345_v63 = vsel %vm5367_vm4, 1.0, %v7682_v13  ;;  %5333 = vst [vmem:[#allocation2 + $0x88] sm:$0xff] %v5301_v22  ;;  %vm5365_vm5 = vcmp.gt.f32.partialorder %v5301_v22, 1.0  ;;  %v5080_v3 = vadd.f32 %v7172_v33, %v9573_v16  ;;  %v7174_v50 = vadd.f32 %v4977_v39, %v2840_v47 }
 0x24c   : > { %v6452_v12 = vpack.c.bf16 %v6345_v63, %v6344_v48  ;;  %v6343_v29 = vsel %vm5365_vm5, 1.0, %v7682_v13  ;;  %v5274_v4 = vadd.f32 %v9705_v26, %v5082_v35  ;;  %v5083_v56 = vadd.f32 %v7173_v59, %v9573_v16 }
 0x24d   : > { %v6449_v2 = vpack.c.bf16 %v6343_v29, %v6342_v25  ;;  %v5272_v9 = vadd.f32 %v9712_v57, %v5080_v3  ;;  %v5081_v49 = vadd.f32 %v7174_v50, %v9573_v16  ;;  %v9814_v38 = vsel %vm5151_vm0, 1.0, %v7682_v13 }
 0x24e   : > { %6480 = vst [vmem:[%s7740_s30 + $0x48] sm:$0xff] %v6452_v12   ;;  %v5306_v54 = vsub.f32 %v5274_v4, %v9742_v19  ;;  %v5275_v14 = vadd.f32 %v9718_v1, %v5083_v56  ;;  %v7129_v0 = vpop.f32.mrb[24].mxu0  ;;  %v9821_v26 = vsel %vm5149_vm2, 1.0, %v7682_v13  ;;  %v9824_v61 = vmul.f32 0.9, %v9803_v31 }
 0x24f   : > { %6479 = vst [vmem:[%s7740_s30 + $0x40] sm:$0xff] %v6449_v2   ;;  %v5304_v57 = vsub.f32 %v5272_v9, %v9752_v23  ;;  %v5273_v32 = vadd.f32 %v9744_v55, %v5081_v49  ;;  %v6937_v21 = vpop.f32.mrb[24].mxu1  ;;  %v4990_v41 = vpop.f32.mrb[25].mxu0  ;;  %vm5154_vm6 = vcmp.gt.f32.partialorder %v9803_v31, 1.0  ;;  %v9831_v19 = vmul.f32 0.9, %v9808_v53 }
 0x250   : > { %5338 = vst [vmem:[#allocation2 + $0xb0] sm:$0xff] %v5306_v54  ;;  %vm5370_vm7 = vcmp.gt.f32.partialorder %v5306_v54, 1.0  ;;  %v5307_v1 = vsub.f32 %v5275_v14, %v9756_v62  ;;  %v7175_v10 = vadd.f32 %v7129_v0, %v6937_v21  ;;  %v2853_v36 = vpop.f32.mrb[25].mxu1  ;;  %v7130_v58 = vpop.f32.mrb[26].mxu0  ;;  %vm5152_vm8 = vcmp.gt.f32.partialorder %v9808_v53, 1.0 }
 0x251   : > { %v6348_v23 = vsel %vm5370_vm7, 1.0, %v7682_v13  ;;  %5336 = vst [vmem:[#allocation2 + $0xa0] sm:$0xff] %v5304_v57  ;;  %vm5368_vm9 = vcmp.gt.f32.partialorder %v5304_v57, 1.0  ;;  %v5305_v55 = vsub.f32 %v5273_v32, %v9761_v60  ;;  %v7176_v52 = vadd.f32 %v4990_v41, %v2853_v36  ;;  %v6938_v34 = vpop.f32.mrb[26].mxu1  ;;  %v4993_v40 = vpop.f32.mrb[27].mxu0 }
 0x252   : > { %v6346_v5 = vsel %vm5368_vm9, 1.0, %v7682_v13  ;;  %5339 = vst [vmem:[#allocation2 + $0xb8] sm:$0xff] %v5307_v1  ;;  %vm5371_vm10 = vcmp.gt.f32.partialorder %v5307_v1, 1.0  ;;  %v5086_v62 = vadd.f32 %v7175_v10, %v9573_v16  ;;  %v7177_v42 = vadd.f32 %v7130_v58, %v6938_v34  ;;  %v2856_v17 = vpop.f32.mrb[27].mxu1 }
 0x253   : > { %v6349_v20 = vsel %vm5371_vm10, 1.0, %v7682_v13  ;;  %5337 = vst [vmem:[#allocation2 + $0xa8] sm:$0xff] %v5305_v55  ;;  %vm5369_vm11 = vcmp.gt.f32.partialorder %v5305_v55, 1.0  ;;  %v5084_v30 = vadd.f32 %v7176_v52, %v9573_v16  ;;  %v7178_v60 = vadd.f32 %v4993_v40, %v2856_v17 }
 0x254   : > { %v6458_v6 = vpack.c.bf16 %v6349_v20, %v6348_v23  ;;  %v6347_v11 = vsel %vm5369_vm11, 1.0, %v7682_v13  ;;  %v5278_v37 = vadd.f32 %v9763_v15, %v5086_v62  ;;  %v5087_v43 = vadd.f32 %v7177_v42, %v9573_v16 }
 0x255   : > { %v6455_v18 = vpack.c.bf16 %v6347_v11, %v6346_v5  ;;  %v5276_v44 = vadd.f32 %v9777_v46, %v5084_v30  ;;  %v5085_v48 = vadd.f32 %v7178_v60, %v9573_v16  ;;  %v5251_v22 = vmul.f32 0.9, %v5123_v27 }
 0x256   : > { %6482 = vst [vmem:[%s7740_s30 + $0x58] sm:$0xff] %v6458_v6   ;;  %v5310_v33 = vsub.f32 %v5278_v37, %v9786_v8  ;;  %v5279_v24 = vadd.f32 %v9779_v7, %v5087_v43  ;;  %v7133_v39 = vpop.f32.mrb[28].mxu0  ;;  %v6324_v25 = vsel %vm5154_vm6, 1.0, %v7682_v13  ;;  %v5249_v35 = vmul.f32 0.9, %v5121_v45 }
 0x257   : > { %6481 = vst [vmem:[%s7740_s30 + $0x50] sm:$0xff] %v6455_v18   ;;  %v5308_v15 = vsub.f32 %v5276_v44, %v9794_v28  ;;  %v5277_v59 = vadd.f32 %v9788_v51, %v5085_v48  ;;  %v6941_v46 = vpop.f32.mrb[28].mxu1  ;;  %v5006_v47 = vpop.f32.mrb[29].mxu0  ;;  %v6322_v63 = vsel %vm5152_vm8, 1.0, %v7682_v13  ;;  %vm5155_vm12 = vcmp.gt.f32.partialorder %v5123_v27, 1.0 }
 0x258   : > { %5342 = vst [vmem:[#allocation2 + $0xd0] sm:$0xff] %v5310_v33  ;;  %vm5374_vm13 = vcmp.gt.f32.partialorder %v5310_v33, 1.0  ;;  %v5311_v7 = vsub.f32 %v5279_v24, %v9814_v38  ;;  %v7179_v8 = vadd.f32 %v7133_v39, %v6941_v46  ;;  %v2869_v3 = vpop.f32.mrb[29].mxu1  ;;  %v7134_v50 = vpop.f32.mrb[30].mxu0  ;;  %vm5153_vm14 = vcmp.gt.f32.partialorder %v5121_v45, 1.0 }
 0x259   : > { %v6352_v31 = vsel %vm5374_vm13, 1.0, %v7682_v13  ;;  %5340 = vst [vmem:[#allocation2 + $0xc0] sm:$0xff] %v5308_v15  ;;  %vm5372_vm15 = vcmp.gt.f32.partialorder %v5308_v15, 1.0  ;;  %v5309_v51 = vsub.f32 %v5277_v59, %v9821_v26  ;;  %v7180_v28 = vadd.f32 %v5006_v47, %v2869_v3  ;;  %v6942_v12 = vpop.f32.mrb[30].mxu1  ;;  %v5009_v29 = vpop.f32.mrb[31].mxu0 }
 0x25a   : > { %v6350_v4 = vsel %vm5372_vm15, 1.0, %v7682_v13  ;;  %5343 = vst [vmem:[#allocation2 + $0xd8] sm:$0xff] %v5311_v7  ;;  %vm5375_vm0 = vcmp.gt.f32.partialorder %v5311_v7, 1.0  ;;  %v5090_v56 = vadd.f32 %v7179_v8, %v9573_v16  ;;  %v7181_v53 = vadd.f32 %v7134_v50, %v6942_v12  ;;  %v2872_v2 = vpop.f32.mrb[31].mxu1 }
 0x25b   : > { %v6353_v9 = vsel %vm5375_vm0, 1.0, %v7682_v13  ;;  %5341 = vst [vmem:[#allocation2 + $0xc8] sm:$0xff] %v5309_v51  ;;  %vm5373_vm1 = vcmp.gt.f32.partialorder %v5309_v51, 1.0  ;;  %v5088_v49 = vadd.f32 %v7180_v28, %v9573_v16  ;;  %v7182_v38 = vadd.f32 %v5009_v29, %v2872_v2 }
 0x25c   : > { %v6464_v54 = vpack.c.bf16 %v6353_v9, %v6352_v31  ;;  %v6351_v14 = vsel %vm5373_vm1, 1.0, %v7682_v13  ;;  %v5282_v0 = vadd.f32 %v9824_v61, %v5090_v56  ;;  %v5091_v26 = vadd.f32 %v7181_v53, %v9573_v16 }
 0x25d   : > { %v6461_v57 = vpack.c.bf16 %v6351_v14, %v6350_v4  ;;  %v5280_v32 = vadd.f32 %v9831_v19, %v5088_v49  ;;  %v6325_v21 = vsel %vm5155_vm12, 1.0, %v7682_v13  ;;  %v5089_v41 = vadd.f32 %v7182_v38, %v9573_v16 }
 0x25e   : > { %6484 = vst [vmem:[%s7740_s30 + $0x68] sm:$0xff] %v6464_v54   ;;  %v5314_v1 = vsub.f32 %v5282_v0, %v6324_v25  ;;  %v5283_v10 = vadd.f32 %v5251_v22, %v5091_v26  ;;  %v6323_v36 = vsel %vm5153_vm14, 1.0, %v7682_v13 }
 0x25f   : > { %6483 = vst [vmem:[%s7740_s30 + $0x60] sm:$0xff] %v6461_v57   ;;  %v5312_v58 = vsub.f32 %v5280_v32, %v6322_v63  ;;  %v5281_v23 = vadd.f32 %v5249_v35, %v5089_v41 }
 0x260   : > { %5346 = vst [vmem:[#allocation2 + $0xf0] sm:$0xff] %v5314_v1  ;;  %vm5378_vm2 = vcmp.gt.f32.partialorder %v5314_v1, 1.0  ;;  %v5315_v61 = vsub.f32 %v5283_v10, %v6325_v21 }
 0x261   : > { %5344 = vst [vmem:[#allocation2 + $0xe0] sm:$0xff] %v5312_v58  ;;  %vm5376_vm3 = vcmp.gt.f32.partialorder %v5312_v58, 1.0  ;;  %v5313_v19 = vsub.f32 %v5281_v23, %v6323_v36  ;;  %v6356_v16 = vsel %vm5378_vm2, 1.0, %v7682_v13 }
 0x262   : > { %v6354_v55 = vsel %vm5376_vm3, 1.0, %v7682_v13  ;;  %5347 = vst [vmem:[#allocation2 + $0xf8] sm:$0xff] %v5315_v61  ;;  %vm5379_vm4 = vcmp.gt.f32.partialorder %v5315_v61, 1.0 }
 0x263   : > { %v6357_v52 = vsel %vm5379_vm4, 1.0, %v7682_v13  ;;  %5345 = vst [vmem:[#allocation2 + $0xe8] sm:$0xff] %v5313_v19  ;;  %vm5377_vm5 = vcmp.gt.f32.partialorder %v5313_v19, 1.0 }
 0x264   : > { %v6470_v34 = vpack.c.bf16 %v6357_v52, %v6356_v16  ;;  %v6355_v40 = vsel %vm5377_vm5, 1.0, %v7682_v13 }
 0x265   : > { %v6467_v5 = vpack.c.bf16 %v6355_v40, %v6354_v55 }
 0x266   : > { %6486 = vst [vmem:[%s7740_s30 + $0x78] sm:$0xff] %v6470_v34  }
 0x267   : > { %6485 = vst [vmem:[%s7740_s30 + $0x70] sm:$0xff] %v6467_v5  }
 0x268 PF: > { %s13_s16 = sadd.s32 1, %s7679_s16   ;;  %s9967_s12 = smov %s7671_s14 }
 0x269   : > { %p10_p8 = scmp.ge.s32.totalorder %s13_s16, 10   ;;  %s9968_s13 = smov %s7675_s15 }
 0x26a   : > { %s9969_s14 = smov %s9972_s17  ;;  %s9970_s15 = smov %s9976_s18 }
 0x26b   :  { %12 = sbr.rel (!%p10_p8) target bundleno = 3 (0x3), region = 76 }

// kernel: sresnet_block_forward.3
= control target key start
LH: loop header
LB: loop body
LE: loop exit
PB: predicated region body
PF: predicated region fallthrough
CT: control target
= control target key end

     0   :  { %s8816_s15 = smov 0   ;;  %s8818_s16 = smov 0   ;;  %s11667_s0 = inlined_call_operand.vmem [shape: bf16[4,2,18,18,128], index: 0, kind: input, shape index: {}]   ;;  %s11668_s1 = inlined_call_operand.vmem [shape: bf16[4,2,18,18,128], index: 1, kind: input, shape index: {}]   ;;  %s11669_s2 = inlined_call_operand.vmem [shape: bf16[9,128,128], index: 2, kind: input, shape index: {}]   ;;  %s11670_s3 = inlined_call_operand.vmem [shape: f32[1,128], index: 3, kind: input, shape index: {}]   ;;  %s11671_s4 = inlined_call_operand.vmem [shape: bf16[4,2,16,16,128], index: 4, kind: output, shape index: {}]  }
   0x1   :  { %s8820_s17 = smov 0   ;;  %s8822_s18 = smov 0  }
   0x2   :  { %s8824_s19 = smov 0  }
   0x3 LB: > { %s23_s20 = sadd.s32 1, %s8779_s17  ;;  %s26_s21 = sadd.s32 1, %s8783_s18  ;;  %s8787_s19 = sphi %s8824_s19, %s14_s19   ;;  %s8783_s18 = sphi %s8822_s18, %s11994_s18   ;;  %s8779_s17 = sphi %s8820_s17, %s11993_s17   ;;  %s8775_s16 = sphi %s8818_s16, %s11992_s16   ;;  %s8771_s15 = sphi %s8816_s15, %s11991_s15  }
   0x4   : > { %p24_p0 = scmp.ge.s32.totalorder %s23_s20, 4  ;;  %p6698_p1 = scmp.ge.s32.totalorder %s8787_s19, 1 }
   0x5   : > { %p198_p2 = scmp.lt.s32.totalorder %s8787_s19, 9 }
   0x6   : > { %s11996_s20 = smov (%p24_p0, %s23_s20), 0  ;;  %s11998_s21 = smov (!%p24_p0, %s26_s21), %s8783_s18 }
   0x7   : > { %p199_p3 = pnand %p6698_p1, %p198_p2  ;;  %p28_p4 = scmp.ge.s32.totalorder %s11998_s21, 2 }
   0x9   : > { %s12000_s21 = smov (%p28_p4, %s11998_s21), 0  ;;  %202 = sbr.rel (%p199_p3) target bundleno = 667 (0x29b), region = 36 }
  0x10   : > { %p241_p5 = scmp.lt.s32.totalorder %s8771_s15, 3  ;;  %p243_p6 = scmp.lt.s32.totalorder %s8775_s16, 1 }
  0x11   : > { %p6704_p7 = scmp.ne.s32.totalorder %s8771_s15, 0 }
  0x12   : > { %s242_s22 = scalar_select %p241_p5, %s8771_s15, 3 }
  0x13   : > { %s12002_s16 = smov (!%p243_p6, %s8775_s16), 1  ;;  %272 = sbr.rel (%p6704_p7) target bundleno = 53 (0x35), region = 40 }
  0x14   : > { %s8516_s23 = smul.u32 108, %s242_s22  ;;  %s6702_s24 = sshll.u32 %s242_s22, 6  ;;  %v8789_v0 = vmov (!%p6704_p7), 0.0  }
  0x15   : > { %s8515_s25 = smul.u32 54, %s12002_s16  ;;  %s6701_s26 = sshll.u32 %s12002_s16, 5  ;;  %273 = vst [vmem:[#allocation2] sm:$0xff] (!%p6704_p7), %v8789_v0  ;;  %274 = vst [vmem:[#allocation2 + $0x8] sm:$0xff] (!%p6704_p7), %v8789_v0 }
  0x16   : > { %s265_s27 = sadd.s32 %s6702_s24, %s6701_s26  ;;  %275 = vst [vmem:[#allocation2 + $0x10] sm:$0xff] (!%p6704_p7), %v8789_v0  ;;  %276 = vst [vmem:[#allocation2 + $0x18] sm:$0xff] (!%p6704_p7), %v8789_v0 }
  0x17   : > { %s247_s28 = sadd.s32 %s8516_s23, %s8515_s25  ;;  %s6703_s29 = sshll.u32 %s265_s27, 2  ;;  %277 = vst [vmem:[#allocation2 + $0x20] sm:$0xff] (!%p6704_p7), %v8789_v0  ;;  %278 = vst [vmem:[#allocation2 + $0x28] sm:$0xff] (!%p6704_p7), %v8789_v0 }
  0x18   : > { %s6699_s30 = sshll.u32 %s247_s28, 2  ;;  %s8853_s7 = scalar_lea.vmem %s11671_s4, %s6703_s29  ;;  %279 = vst [vmem:[#allocation2 + $0x30] sm:$0xff] (!%p6704_p7), %v8789_v0  ;;  %280 = vst [vmem:[#allocation2 + $0x38] sm:$0xff] (!%p6704_p7), %v8789_v0 }
  0x19   : > { %s8858_s10 = scalar_lea.vmem %s11667_s0, %s6699_s30  ;;  %s8863_s13 = scalar_lea.vmem %s11668_s1, %s6699_s30  ;;  %281 = vst [vmem:[#allocation2 + $0x40] sm:$0xff] (!%p6704_p7), %v8789_v0  ;;  %282 = vst [vmem:[#allocation2 + $0x48] sm:$0xff] (!%p6704_p7), %v8789_v0 }
  0x1a   : > { %283 = vst [vmem:[#allocation2 + $0x50] sm:$0xff] %v8789_v0  ;;  %284 = vst [vmem:[#allocation2 + $0x58] sm:$0xff] %v8789_v0 }
  0x1b   : > { %285 = vst [vmem:[#allocation2 + $0x60] sm:$0xff] %v8789_v0  ;;  %286 = vst [vmem:[#allocation2 + $0x68] sm:$0xff] %v8789_v0 }
  0x1c   : > { %287 = vst [vmem:[#allocation2 + $0x70] sm:$0xff] %v8789_v0  ;;  %288 = vst [vmem:[#allocation2 + $0x78] sm:$0xff] %v8789_v0 }
  0x1d   : > { %289 = vst [vmem:[#allocation2 + $0x80] sm:$0xff] %v8789_v0  ;;  %290 = vst [vmem:[#allocation2 + $0x88] sm:$0xff] %v8789_v0 }
  0x1e   : > { %291 = vst [vmem:[#allocation2 + $0x90] sm:$0xff] %v8789_v0  ;;  %292 = vst [vmem:[#allocation2 + $0x98] sm:$0xff] %v8789_v0 }
  0x1f   : > { %293 = vst [vmem:[#allocation2 + $0xa0] sm:$0xff] %v8789_v0  ;;  %294 = vst [vmem:[#allocation2 + $0xa8] sm:$0xff] %v8789_v0 }
  0x20   : > { %295 = vst [vmem:[#allocation2 + $0xb0] sm:$0xff] %v8789_v0  ;;  %296 = vst [vmem:[#allocation2 + $0xb8] sm:$0xff] %v8789_v0 }
  0x21   : > { %297 = vst [vmem:[#allocation2 + $0xc0] sm:$0xff] %v8789_v0  ;;  %298 = vst [vmem:[#allocation2 + $0xc8] sm:$0xff] %v8789_v0 }
  0x22   : > { %299 = vst [vmem:[#allocation2 + $0xd0] sm:$0xff] %v8789_v0  ;;  %300 = vst [vmem:[#allocation2 + $0xd8] sm:$0xff] %v8789_v0 }
  0x23   : > { %301 = vst [vmem:[#allocation2 + $0xe0] sm:$0xff] %v8789_v0  ;;  %302 = vst [vmem:[#allocation2 + $0xe8] sm:$0xff] %v8789_v0 }
  0x24   : > { %303 = vst [vmem:[#allocation2 + $0xf0] sm:$0xff] %v8789_v0  ;;  %304 = vst [vmem:[#allocation2 + $0xf8] sm:$0xff] %v8789_v0 }
  0x25   : > { %305 = vst [vmem:[#allocation3] sm:$0xff] %v8789_v0  ;;  %306 = vst [vmem:[#allocation3 + $0x8] sm:$0xff] %v8789_v0 }
  0x26   : > { %307 = vst [vmem:[#allocation3 + $0x10] sm:$0xff] %v8789_v0  ;;  %308 = vst [vmem:[#allocation3 + $0x18] sm:$0xff] %v8789_v0 }
  0x27   : > { %309 = vst [vmem:[#allocation3 + $0x20] sm:$0xff] %v8789_v0  ;;  %310 = vst [vmem:[#allocation3 + $0x28] sm:$0xff] %v8789_v0 }
  0x28   : > { %311 = vst [vmem:[#allocation3 + $0x30] sm:$0xff] %v8789_v0  ;;  %312 = vst [vmem:[#allocation3 + $0x38] sm:$0xff] %v8789_v0 }
  0x29   : > { %313 = vst [vmem:[#allocation3 + $0x40] sm:$0xff] %v8789_v0  ;;  %314 = vst [vmem:[#allocation3 + $0x48] sm:$0xff] %v8789_v0 }
  0x2a   : > { %315 = vst [vmem:[#allocation3 + $0x50] sm:$0xff] %v8789_v0  ;;  %316 = vst [vmem:[#allocation3 + $0x58] sm:$0xff] %v8789_v0 }
  0x2b   : > { %317 = vst [vmem:[#allocation3 + $0x60] sm:$0xff] %v8789_v0  ;;  %318 = vst [vmem:[#allocation3 + $0x68] sm:$0xff] %v8789_v0 }
  0x2c   : > { %319 = vst [vmem:[#allocation3 + $0x70] sm:$0xff] %v8789_v0  ;;  %320 = vst [vmem:[#allocation3 + $0x78] sm:$0xff] %v8789_v0 }
  0x2d   : > { %321 = vst [vmem:[#allocation3 + $0x80] sm:$0xff] %v8789_v0  ;;  %322 = vst [vmem:[#allocation3 + $0x88] sm:$0xff] %v8789_v0 }
  0x2e   : > { %323 = vst [vmem:[#allocation3 + $0x90] sm:$0xff] %v8789_v0  ;;  %324 = vst [vmem:[#allocation3 + $0x98] sm:$0xff] %v8789_v0 }
  0x2f   : > { %325 = vst [vmem:[#allocation3 + $0xa0] sm:$0xff] %v8789_v0  ;;  %326 = vst [vmem:[#allocation3 + $0xa8] sm:$0xff] %v8789_v0 }
  0x30   : > { %327 = vst [vmem:[#allocation3 + $0xb0] sm:$0xff] %v8789_v0  ;;  %328 = vst [vmem:[#allocation3 + $0xb8] sm:$0xff] %v8789_v0 }
  0x31   : > { %329 = vst [vmem:[#allocation3 + $0xc0] sm:$0xff] %v8789_v0  ;;  %330 = vst [vmem:[#allocation3 + $0xc8] sm:$0xff] %v8789_v0 }
  0x32   : > { %331 = vst [vmem:[#allocation3 + $0xd0] sm:$0xff] %v8789_v0  ;;  %332 = vst [vmem:[#allocation3 + $0xd8] sm:$0xff] %v8789_v0 }
  0x33   : > { %333 = vst [vmem:[#allocation3 + $0xe0] sm:$0xff] %v8789_v0  ;;  %334 = vst [vmem:[#allocation3 + $0xe8] sm:$0xff] %v8789_v0 }
  0x34   : > { %335 = vst [vmem:[#allocation3 + $0xf0] sm:$0xff] %v8789_v0  ;;  %336 = vst [vmem:[#allocation3 + $0xf8] sm:$0xff] %v8789_v0 }
  0x35 PF: > { %v8559_v1 = vld [vmem:[%s11669_s2 + $0x40] sm:$0xff]   ;;  %v8561_v3 = vld [vmem:[%s11669_s2 + $0x48] sm:$0xff]   ;;  %v8563_v5 = vld [vmem:[%s11669_s2 + $0x50] sm:$0xff]   ;;  %vm401_vm0 = vsmask.f32 3328  ;;  %vm1431_vm3 = vcmask 1042432  }
  0x36   : > { %v8560_v2 = vld [vmem:[%s11669_s2 + $0x100] sm:$0xff]   ;;  %7811 = vmatprep.subr.bf16.mxu1 %v8559_v1  ;;  %v8562_v4 = vld [vmem:[%s11669_s2 + $0x108] sm:$0xff]   ;;  %v8564_v6 = vld [vmem:[%s11669_s2 + $0x110] sm:$0xff]   ;;  %vm402_vm1 = vsmask.f32 7440  ;;  %vm1432_vm4 = vcmask 1046532  }
  0x37   : > { %8003 = vmatprep.subr.bf16.mxu0 %v8560_v2  ;;  %7812 = vmatpush3.bf16.msra.mxu1 %v8559_v1  ;;  %v8565_v7 = vld [vmem:[%s11669_s2 + $0x58] sm:$0xff]   ;;  %v8567_v9 = vld [vmem:[%s11669_s2 + $0x60] sm:$0xff]   ;;  %v8569_v11 = vld [vmem:[%s11669_s2 + $0x68] sm:$0xff]  }
  0x38   : > { %8004 = vmatpush3.bf16.msra.mxu0 %v8560_v2  ;;  %7813 = vmatprep.subr.bf16.mxu1 %v8561_v3  ;;  %v8566_v8 = vld [vmem:[%s11669_s2 + $0x118] sm:$0xff]   ;;  %v8568_v10 = vld [vmem:[%s11669_s2 + $0x120] sm:$0xff]   ;;  %v8570_v12 = vld [vmem:[%s11669_s2 + $0x128] sm:$0xff]  }
  0x39   : > { %8005 = vmatprep.subr.bf16.mxu0 %v8562_v4  ;;  %v337_v13 = vld [vmem:[%s8858_s10] sm:$0xf]  ;;  %v338_v14 = vld [vmem:[%s8858_s10 + $0x4] sm:$0xf]  ;;  %v385_v15 = vld [vmem:[%s8858_s10 + $0x8] sm:$0x1] }
  0x3a   : > { %v405_v16 = vshrl.u32 %v337_v13, 16  ;;  %v408_v17 = vshll.u32 %v337_v13, 16  ;;  %v414_v18 = vshll.u32 %v338_v14, 16  ;;  %v418_v19 = vshrl.u32 %v338_v14, 16  ;;  %v6897_v21 = vld [vmem:[%s8858_s10 + $0xc] sm:$0xf]  ;;  %vm8990_vm2 = vmor %vm401_vm0, %vm402_vm1 }
  0x3b   : > { %7814 = vmatpush3.bf16.msra.mxu1 %v8561_v3  ;;  %v424_v20 = vshll.u32 %v385_v15, 16  ;;  %v8971_v24 = vld [vmem:[%s8858_s10 + $0x10] sm:$0xf]  ;;  %v8974_v25 = vld [vmem:[%s8858_s10 + $0x14] sm:$0x1]  ;;  %v2304_v30 = vshrl.u32 %v6897_v21, 16  ;;  %vm9236_vm5 = vmor %vm1431_vm3, %vm1432_vm4 }
  0x3c   : > { %8006 = vmatpush3.bf16.msra.mxu0 %v8562_v4  ;;  %7815 = vmatprep.subr.bf16.mxu1 %v8563_v5  ;;  %v407_v22 = vrot.slane %v405_v16, 4  ;;  %v410_v23 = vrot.slane %v408_v17, 5  ;;  %v8571_v26 = vld [vmem:[%s11669_s2 + $0x70] sm:$0xff]   ;;  %v416_v27 = vrot.slane %v414_v18, 5  ;;  %v420_v28 = vrot.slane %v418_v19, 4  ;;  %v8573_v37 = vld [vmem:[%s11669_s2 + $0x78] sm:$0xff]  }
  0x3d   : > { %8007 = vmatprep.subr.bf16.mxu0 %v8564_v6  ;;  %v426_v29 = vrot.slane %v424_v20, 5  ;;  %v8572_v31 = vld [vmem:[%s11669_s2 + $0x130] sm:$0xff]   ;;  %v2307_v33 = vshll.u32 %v6897_v21, 16  ;;  %v2313_v34 = vshll.u32 %v8971_v24, 16  ;;  %v2317_v35 = vshrl.u32 %v8971_v24, 16  ;;  %v8574_v52 = vld [vmem:[%s11669_s2 + $0x138] sm:$0xff]  }
  0x3e   : > { %v411_v32 = vor.u32 %v410_v23, %v407_v22  ;;  %v339_v36 = vld [vmem:[%s8858_s10 + $0xc] sm:$0xf]  ;;  %v421_v39 = vor.u32 %v420_v28, %v416_v27  ;;  %v2306_v40 = vrot.slane %v2304_v30, 4  ;;  %v2323_v41 = vshll.u32 %v8974_v25, 16  ;;  %v340_v43 = vld [vmem:[%s8858_s10 + $0x10] sm:$0xf] }
  0x3f   : > { %7816 = vmatpush3.bf16.msra.mxu1 %v8563_v5  ;;  %v3078_v42 = vrot.slane %v8974_v25, 5  ;;  %v2309_v45 = vrot.slane %v2307_v33, 5  ;;  %v2315_v46 = vrot.slane %v2313_v34, 5  ;;  %v2319_v47 = vrot.slane %v2317_v35, 4  ;;  %v386_v56 = vld [vmem:[%s8858_s10 + $0x14] sm:$0x1] }
  0x40   : > { %8008 = vmatpush3.bf16.msra.mxu0 %v8564_v6  ;;  %7817 = vmatprep.subr.bf16.mxu1 %v8565_v7  ;;  %v412_v44 = vrot.slane %v411_v32, 4  ;;  %v422_v48 = vrot.slane %v421_v39, 4  ;;  %v2325_v49 = vrot.slane %v2323_v41, 5  ;;  %v429_v50 = vshrl.u32 %v339_v36, 16  ;;  %v6900_v58 = vld [vmem:[%s8858_s10 + $0x18] sm:$0xf] }
  0x41   : > { %8009 = vmatprep.subr.bf16.mxu0 %v8566_v8  ;;  %v432_v51 = vshll.u32 %v339_v36, 16  ;;  %v2310_v54 = vor.u32 %v2309_v45, %v2306_v40  ;;  %v2320_v55 = vor.u32 %v2319_v47, %v2315_v46  ;;  %v438_v57 = vshll.u32 %v340_v43, 16  ;;  %v9007_v63 = vld [vmem:[%s8858_s10 + $0x1c] sm:$0xf]  ;;  %v8575_v4 = vld [vmem:[%s11669_s2] sm:$0xff]   ;;  %v8578_v47 = vld [vmem:[%s11669_s2 + $0x8] sm:$0xff]  }
  0x42   : > { %v417_v53 = vsel %vm8990_vm2, %v412_v44, %v416_v27  ;;  %v427_v59 = vsel %vm8990_vm2, %v422_v48, %v426_v29  ;;  %v431_v60 = vrot.slane %v429_v50, 4  ;;  %v442_v62 = vshrl.u32 %v340_v43, 16  ;;  %v9015_v5 = vld [vmem:[%s11669_s2 + $0x140] sm:$0xff]   ;;  %v341_v22 = vld [vmem:[%s8858_s10 + $0x18] sm:$0xf] }
  0x43   : > { %7818 = vmatpush3.bf16.msra.mxu1 %v8565_v7  ;;  %v434_v61 = vrot.slane %v432_v51, 5  ;;  %v6721_v0 = vcombine.low %v417_v53, %v427_v59  ;;  %v2311_v1 = vrot.slane %v2310_v54, 4  ;;  %v2321_v2 = vrot.slane %v2320_v55, 4  ;;  %v342_v29 = vld [vmem:[%s8858_s10 + $0x1c] sm:$0xf] }
  0x44   : > { %8010 = vmatpush3.bf16.msra.mxu0 %v8566_v8  ;;  %7819 = vmatprep.subr.bf16.mxu1 %v8567_v9  ;;  %v440_v3 = vrot.slane %v438_v57, 5  ;;  %v444_v7 = vrot.slane %v442_v62, 4  ;;  %v448_v8 = vshll.u32 %v386_v56, 16  ;;  %v2331_v13 = vshll.u32 %v6900_v58, 16  ;;  %v387_v34 = vld [vmem:[%s8858_s10 + $0x20] sm:$0x1] }
  0x45   : > { %8011 = vmatprep.subr.bf16.mxu0 %v8568_v10  ;;  %v435_v6 = vor.u32 %v434_v61, %v431_v60  ;;  %7827 = vmatprep.mubr.bf16.mxu1 %v6721_v0  ;;  %v2337_v20 = vshll.u32 %v9007_v63, 16  ;;  %v2341_v21 = vshrl.u32 %v9007_v63, 16  ;;  %v3082_v28 = vrot.slane %v9007_v63, 5  ;;  %v6903_v40 = vld [vmem:[%s8858_s10 + $0x24] sm:$0xf]  ;;  %v8577_v0 = vld [vmem:[%s11669_s2 + $0x148] sm:$0xff]  }
  0x46   : > { %v445_v16 = vor.u32 %v444_v7, %v440_v3  ;;  %v450_v17 = vrot.slane %v448_v8, 5  ;;  %v2333_v19 = vrot.slane %v2331_v13, 5  ;;  %v453_v39 = vshrl.u32 %v341_v22, 16  ;;  %v343_v53 = vld [vmem:[%s8858_s10 + $0x24] sm:$0xf] }
  0x47   : > { %7820 = vmatpush3.bf16.msra.mxu1 %v8567_v9  ;;  %v9018_v9 = vld [vmem:[%s8858_s10 + $0x20] sm:$0x1]  ;;  %v436_v15 = vrot.slane %v435_v6, 4  ;;  %v2343_v32 = vrot.slane %v2341_v21, 4  ;;  %v456_v45 = vshll.u32 %v341_v22, 16  ;;  %v466_v50 = vshrl.u32 %v342_v29, 16 }
  0x48   : > { %8012 = vmatpush3.bf16.msra.mxu0 %v8568_v10  ;;  %7821 = vmatprep.subr.bf16.mxu1 %v8569_v11  ;;  %v2316_v10 = vsel %vm8990_vm2, %v2311_v1, %v2315_v46  ;;  %v2347_v27 = vshll.u32 %v9018_v9, 16  ;;  %v3085_v33 = vrot.slane %v9018_v9, 5  ;;  %v9043_v46 = vld [vmem:[%s8858_s10 + $0x28] sm:$0xf]  ;;  %v455_v48 = vrot.slane %v453_v39, 4 }
  0x49   : > { %8013 = vmatprep.subr.bf16.mxu0 %v8570_v12  ;;  %v441_v23 = vsel %vm8990_vm2, %v436_v15, %v440_v3  ;;  %v472_v51 = vshll.u32 %v387_v34, 16  ;;  %v458_v56 = vrot.slane %v456_v45, 5  ;;  %v2352_v57 = vshrl.u32 %v6903_v40, 16  ;;  %v344_v6 = vld [vmem:[%s8858_s10 + $0x28] sm:$0xf] }
  0x4a   : > { %v2349_v36 = vrot.slane %v2347_v27, 5  ;;  %v468_v59 = vrot.slane %v466_v50, 4  ;;  %v2355_v61 = vshll.u32 %v6903_v40, 16  ;;  %v2361_v3 = vshll.u32 %v9043_v46, 16  ;;  %v9074_v34 = vld [vmem:[%s8858_s10 + $0x34] sm:$0xf] }
  0x4b   : > { %7822 = vmatpush3.bf16.msra.mxu1 %v8569_v11  ;;  %v2326_v11 = vsel %vm8990_vm2, %v2321_v2, %v2325_v49  ;;  %v462_v49 = vshll.u32 %v342_v29, 16  ;;  %v474_v60 = vrot.slane %v472_v51, 5  ;;  %v459_v1 = vor.u32 %v458_v56, %v455_v48 }
  0x4c   : > { %8014 = vmatpush3.bf16.msra.mxu0 %v8570_v12  ;;  %7823 = vmatprep.subr.bf16.mxu1 %v8571_v26  ;;  %v2328_v12 = vshrl.u32 %v6900_v58, 16  ;;  %v6961_v14 = vcombine.low %v2316_v10, %v2326_v11  ;;  %v2354_v2 = vrot.slane %v2352_v57, 4  ;;  %v2357_v10 = vrot.slane %v2355_v61, 5  ;;  %v8587_v61 = vld [vmem:[%s11669_s2 + $0x20] sm:$0xff]  }
  0x4d   : > { %8015 = vmatprep.subr.bf16.mxu0 %v8572_v31  ;;  %v464_v58 = vrot.slane %v462_v49, 5  ;;  %v2365_v11 = vshrl.u32 %v9043_v46, 16  ;;  %v460_v13 = vrot.slane %v459_v1, 4  ;;  %v480_v21 = vshll.u32 %v343_v53, 16  ;;  %v8580_v49 = vld [vmem:[%s11669_s2 + $0x158] sm:$0xff]  }
  0x4e   : > { %v2330_v18 = vrot.slane %v2328_v12, 4  ;;  %8019 = vmatprep.mubr.bf16.mxu0 %v6961_v14  ;;  %v388_v12 = vld [vmem:[%s8858_s10 + $0x2c] sm:$0x1]  ;;  %v2363_v14 = vrot.slane %v2361_v3, 5  ;;  %v486_v27 = vshll.u32 %v344_v6, 16  ;;  %v490_v40 = vshrl.u32 %v344_v6, 16 }
  0x4f   : > { %7824 = vmatpush3.bf16.msra.mxu1 %v8571_v26  ;;  %v446_v26 = vrot.slane %v445_v16, 4  ;;  %v469_v8 = vor.u32 %v468_v59, %v464_v58  ;;  %v477_v16 = vshrl.u32 %v343_v53, 16  ;;  %v465_v22 = vsel %vm8990_vm2, %v460_v13, %v464_v58  ;;  %v389_v3 = vld [vmem:[%s8858_s10 + $0x38] sm:$0x1] }
  0x50   : > { %8016 = vmatpush3.bf16.msra.mxu0 %v8572_v31  ;;  %7825 = vmatprep.subr.bf16.mxu1 %v8573_v37  ;;  %v2334_v30 = vor.u32 %v2333_v19, %v2330_v18  ;;  %v2339_v31 = vrot.slane %v2337_v20, 5  ;;  %v2358_v19 = vor.u32 %v2357_v10, %v2354_v2  ;;  %v2367_v20 = vrot.slane %v2365_v11, 4  ;;  %v6909_v10 = vld [vmem:[%s8858_s10 + $0x3c] sm:$0xf] }
  0x51   : > { %8017 = vmatprep.subr.bf16.mxu0 %v8574_v52  ;;  %v451_v35 = vsel %vm8990_vm2, %v446_v26, %v450_v17  ;;  %v6906_v17 = vld [vmem:[%s8858_s10 + $0x30] sm:$0xf]  ;;  %v470_v18 = vrot.slane %v469_v8, 4  ;;  %v479_v26 = vrot.slane %v477_v16, 4  ;;  %v488_v39 = vrot.slane %v486_v27, 5 }
  0x52   : > { %v6722_v41 = vcombine.low %v441_v23, %v451_v35  ;;  %v2335_v43 = vrot.slane %v2334_v30, 4  ;;  %v2344_v44 = vor.u32 %v2343_v32, %v2339_v31  ;;  %v2359_v30 = vrot.slane %v2358_v19, 4  ;;  %v8584_v35 = vld [vmem:[%s11669_s2 + $0x18] sm:$0xff]  }
  0x53   : > { %7826 = vmatpush3.bf16.msra.mxu1 %v8573_v37  ;;  %v9039_v37 = vrot.slane %v3082_v28, 4  ;;  %v475_v29 = vsel %vm8990_vm2, %v470_v18, %v474_v60  ;;  %v482_v32 = vrot.slane %v480_v21, 5  ;;  %v2376_v48 = vshrl.u32 %v6906_v17, 16  ;;  %v346_v60 = vld [vmem:[%s8858_s10 + $0x34] sm:$0xf]  ;;  %v8582_v21 = vld [vmem:[%s11669_s2 + $0x160] sm:$0xff]  }
  0x54   : > { %8018 = vmatpush3.bf16.msra.mxu0 %v8574_v52  ;;  %7859 = vmatprep.subr.bf16.mxu1 %v8575_v4  ;;  %v9049_v52 = vld [vmem:[%s8858_s10 + $0x2c] sm:$0x1]  ;;  %v2340_v54 = vsel %vm8990_vm2, %v2335_v43, %v2339_v31  ;;  %v2345_v55 = vrot.slane %v2344_v44, 4  ;;  %v2368_v31 = vor.u32 %v2367_v20, %v2363_v14  ;;  %v2364_v43 = vsel %vm8990_vm2, %v2359_v30, %v2363_v14  ;;  %v9108_v20 = vld [vmem:[%s8858_s10 + $0x40] sm:$0xf] }
  0x55   : > { %8051 = vmatprep.subr.bf16.mxu0 %v9015_v5  ;;  %v2371_v15 = vshll.u32 %v9049_v52, 16  ;;  %v483_v45 = vor.u32 %v482_v32, %v479_v26  ;;  %v492_v50 = vrot.slane %v490_v40, 4  ;;  %v2379_v53 = vshll.u32 %v6906_v17, 16 }
  0x56   : > { %7828 = vmatmul.mubr.bf16.vlgmr.msra.gmra.mrb[0].mxu1 %v6722_v41  ;;  %v2350_v62 = vsel %vm8990_vm2, %v2345_v55, %v2349_v36  ;;  %v6723_v36 = vcombine.low %v465_v22, %v475_v29  ;;  %v496_v41 = vshll.u32 %v388_v12, 16  ;;  %v2369_v44 = vrot.slane %v2368_v31, 4  ;;  %v345_v55 = vld [vmem:[%s8858_s10 + $0x30] sm:$0xf]  ;;  %v9116_v29 = vld [vmem:[%s8858_s10 + $0x44] sm:$0x1] }
  0x57   : > { %7860 = vmatpush3.bf16.msra.mxu1 %v8575_v4  ;;  %v8581_v4 = vld [vmem:[%s11669_s2 + $0x10] sm:$0xff]   ;;  %v6962_v7 = vcombine.low %v2340_v54, %v2350_v62  ;;  %v2373_v23 = vrot.slane %v2371_v15, 5  ;;  %v2385_v54 = vshll.u32 %v9074_v34, 16  ;;  %v484_v57 = vrot.slane %v483_v45, 4  ;;  %v8589_v15 = vld [vmem:[%s11669_s2 + $0x28] sm:$0xff]  }
  0x58   : > { %7861 = vmatprep.subr.bf16.mxu1 %v8578_v47  ;;  %7831 = vmatprep.mubr.bf16.mxu1 %v6723_v36  ;;  %v498_v51 = vrot.slane %v496_v41, 5  ;;  %v2378_v58 = vrot.slane %v2376_v48, 4  ;;  %v2389_v59 = vshrl.u32 %v9074_v34, 16  ;;  %v2381_v1 = vrot.slane %v2379_v53, 5  ;;  %v8591_v36 = vld [vmem:[%s11669_s2 + $0x30] sm:$0xff]  }
  0x59   : > { %8020 = vmatmul.mubr.bf16.vlgmr.msra.gmra.mrb[0].mxu0 %v6962_v7  ;;  %v2374_v56 = vsel %vm8990_vm2, %v2369_v44, %v2373_v23  ;;  %v2387_v2 = vrot.slane %v2385_v54, 5  ;;  %v489_v6 = vsel %vm8990_vm2, %v484_v57, %v488_v39  ;;  %v501_v8 = vshrl.u32 %v345_v55, 16 }
  0x5a   : > { %8052 = vmatpush3.bf16.msra.mxu0 %v9015_v5  ;;  %v8579_v5 = vld [vmem:[%s11669_s2 + $0x150] sm:$0xff]   ;;  %v6963_v62 = vcombine.low %v2364_v43, %v2374_v56  ;;  %v2382_v12 = vor.u32 %v2381_v1, %v2378_v58  ;;  %v504_v13 = vshll.u32 %v345_v55, 16  ;;  %v510_v14 = vshll.u32 %v346_v60, 16  ;;  %v348_v56 = vld [vmem:[%s8858_s10 + $0x40] sm:$0xf] }
  0x5b   : > { %7862 = vmatpush3.bf16.msra.mxu1 %v8578_v47  ;;  %8053 = vmatprep.subr.bf16.mxu0 %v8577_v0  ;;  %v9085_v47 = vld [vmem:[%s8858_s10 + $0x38] sm:$0x1]  ;;  %v503_v18 = vrot.slane %v501_v8, 4  ;;  %v514_v19 = vshrl.u32 %v346_v60, 16  ;;  %v2400_v41 = vshrl.u32 %v6909_v10, 16  ;;  %v2403_v43 = vshll.u32 %v6909_v10, 16 }
  0x5c   : > { %7863 = vmatprep.subr.bf16.mxu1 %v8581_v4  ;;  %v2395_v7 = vshll.u32 %v9085_v47, 16  ;;  %8023 = vmatprep.mubr.bf16.mxu0 %v6963_v62  ;;  %v2383_v23 = vrot.slane %v2382_v12, 4  ;;  %v506_v26 = vrot.slane %v504_v13, 5  ;;  %v512_v27 = vrot.slane %v510_v14, 5  ;;  %v6912_v10 = vld [vmem:[%s8858_s10 + $0x48] sm:$0xf] }
  0x5d   : > { %v516_v32 = vrot.slane %v514_v19, 4  ;;  %v2402_v54 = vrot.slane %v2400_v41, 4  ;;  %v2405_v55 = vrot.slane %v2403_v43, 5  ;;  %v2419_v60 = vshll.u32 %v9116_v29, 16 }
  0x5e   : > { %8054 = vmatpush3.bf16.msra.mxu0 %v8577_v0  ;;  %v493_v0 = vor.u32 %v492_v50, %v488_v39  ;;  %v2397_v17 = vrot.slane %v2395_v7, 5  ;;  %v2388_v39 = vsel %vm8990_vm2, %v2383_v23, %v2387_v2  ;;  %v507_v40 = vor.u32 %v506_v26, %v503_v18  ;;  %v9149_v23 = vld [vmem:[%s8858_s10 + $0x50] sm:$0x1] }
  0x5f   : > { %7864 = vmatpush3.bf16.msra.mxu1 %v8581_v4  ;;  %8055 = vmatprep.subr.bf16.mxu0 %v8579_v5  ;;  %v2391_v4 = vrot.slane %v2389_v59, 4  ;;  %v517_v45 = vor.u32 %v516_v32, %v512_v27  ;;  %v2409_v50 = vshll.u32 %v9108_v20, 16  ;;  %v2413_v59 = vshrl.u32 %v9108_v20, 16  ;;  %v8586_v32 = vld [vmem:[%s11669_s2 + $0x178] sm:$0xff]  }
  0x60   : > { %7865 = vmatprep.subr.bf16.mxu1 %v8584_v35  ;;  %v494_v11 = vrot.slane %v493_v0, 4  ;;  %v508_v53 = vrot.slane %v507_v40, 4  ;;  %v2406_v62 = vor.u32 %v2405_v55, %v2402_v54  ;;  %v390_v0 = vld [vmem:[%s8858_s10 + $0x44] sm:$0x1]  ;;  %v2421_v7 = vrot.slane %v2419_v60, 5 }
  0x61   : > { %v2392_v16 = vor.u32 %v2391_v4, %v2387_v2  ;;  %v518_v57 = vrot.slane %v517_v45, 4  ;;  %v2411_v58 = vrot.slane %v2409_v50, 5  ;;  %v2415_v4 = vrot.slane %v2413_v59, 4  ;;  %v350_v54 = vld [vmem:[%s8858_s10 + $0x4c] sm:$0xf] }
  0x62   : > { %8056 = vmatpush3.bf16.msra.mxu0 %v8579_v5  ;;  %v499_v22 = vsel %vm8990_vm2, %v494_v11, %v498_v51  ;;  %v520_v5 = vshll.u32 %v389_v3, 16  ;;  %v8593_v3 = vld [vmem:[%s11669_s2 + $0x38] sm:$0xff]   ;;  %v534_v8 = vshll.u32 %v348_v56, 16  ;;  %v2407_v12 = vrot.slane %v2406_v62, 4  ;;  %v391_v55 = vld [vmem:[%s8858_s10 + $0x50] sm:$0x1] }
  0x63   : > { %7866 = vmatpush3.bf16.msra.mxu1 %v8584_v35  ;;  %8057 = vmatprep.subr.bf16.mxu0 %v8580_v49  ;;  %v6724_v30 = vcombine.low %v489_v6, %v499_v22  ;;  %v2393_v31 = vrot.slane %v2392_v16, 4  ;;  %v347_v35 = vld [vmem:[%s8858_s10 + $0x3c] sm:$0xf]  ;;  %v8585_v16 = vld [vmem:[%s11669_s2 + $0x170] sm:$0xff]   ;;  %v538_v19 = vshrl.u32 %v348_v56, 16  ;;  %v544_v22 = vshll.u32 %v390_v0, 16 }
  0x64   : > { %7867 = vmatprep.subr.bf16.mxu1 %v8587_v61  ;;  %v522_v48 = vrot.slane %v520_v5, 5  ;;  %v525_v1 = vshrl.u32 %v347_v35, 16  ;;  %v528_v2 = vshll.u32 %v347_v35, 16  ;;  %v536_v18 = vrot.slane %v534_v8, 5  ;;  %v9160_v5 = vld [vmem:[%s11669_s2 + $0x80] sm:$0xff]  }
  0x65   : > { %7832 = vmatmul.mubr.bf16.gmra.mrb[4].mxu1 %v6724_v30  ;;  %v2398_v44 = vsel %vm8990_vm2, %v2393_v31, %v2397_v17  ;;  %v2416_v17 = vor.u32 %v2415_v4, %v2411_v58  ;;  %v2427_v30 = vshll.u32 %v6912_v10, 16  ;;  %v349_v31 = vld [vmem:[%s8858_s10 + $0x48] sm:$0xf]  ;;  %v6915_v59 = vld [vmem:[%s8858_s10 + $0x54] sm:$0xf]  ;;  %v562_v4 = vshrl.u32 %v350_v54, 16 }
  0x66   : > { %8058 = vmatpush3.bf16.msra.mxu0 %v8580_v49  ;;  %v6964_v51 = vcombine.low %v2388_v39, %v2398_v44  ;;  %v8583_v49 = vld [vmem:[%s11669_s2 + $0x168] sm:$0xff]   ;;  %v523_v6 = vsel %vm8990_vm2, %v518_v57, %v522_v48  ;;  %v527_v13 = vrot.slane %v525_v1, 4  ;;  %v530_v14 = vrot.slane %v528_v2, 5  ;;  %v9174_v1 = vld [vmem:[%s8858_s10 + $0x58] sm:$0xf] }
  0x67   : > { %7868 = vmatpush3.bf16.msra.mxu1 %v8587_v61  ;;  %8059 = vmatprep.subr.bf16.mxu0 %v8582_v21  ;;  %v513_v61 = vsel %vm8990_vm2, %v508_v53, %v512_v27  ;;  %v2424_v27 = vshrl.u32 %v6912_v10, 16  ;;  %v2417_v35 = vrot.slane %v2416_v17, 4  ;;  %v546_v39 = vrot.slane %v544_v22, 5 }
  0x68   : > { %7869 = vmatprep.subr.bf16.mxu1 %v8589_v15  ;;  %8024 = vmatmul.mubr.bf16.gmra.mrb[4].mxu0 %v6964_v51  ;;  %v6725_v11 = vcombine.low %v513_v61, %v523_v6  ;;  %v531_v26 = vor.u32 %v530_v14, %v527_v13  ;;  %v2429_v44 = vrot.slane %v2427_v30, 5  ;;  %v2443_v53 = vshll.u32 %v9149_v23, 16 }
  0x69   : > { %v2426_v43 = vrot.slane %v2424_v27, 4  ;;  %v2422_v48 = vsel %vm8990_vm2, %v2417_v35, %v2421_v7  ;;  %v549_v62 = vshrl.u32 %v349_v31, 16  ;;  %v552_v0 = vshll.u32 %v349_v31, 16  ;;  %v9179_v7 = vld [vmem:[%s11669_s2 + $0x180] sm:$0xff]  }
  0x6a   : > { %8060 = vmatpush3.bf16.msra.mxu0 %v8582_v21  ;;  %7835 = vmatprep.mubr.bf16.mxu1 %v6725_v11  ;;  %v2412_v21 = vsel %vm8990_vm2, %v2407_v12, %v2411_v58  ;;  %v532_v41 = vrot.slane %v531_v26, 4  ;;  %v2445_v61 = vrot.slane %v2443_v53, 5  ;;  %v568_v12 = vshll.u32 %v391_v55, 16  ;;  %v6918_v53 = vld [vmem:[%s8858_s10 + $0x60] sm:$0xf] }
  0x6b   : > { %7870 = vmatpush3.bf16.msra.mxu1 %v8589_v15  ;;  %v9143_v15 = vld [vmem:[%s8858_s10 + $0x4c] sm:$0xf]  ;;  %8061 = vmatprep.subr.bf16.mxu0 %v8583_v49  ;;  %v6965_v56 = vcombine.low %v2412_v21, %v2422_v48  ;;  %v2430_v57 = vor.u32 %v2429_v44, %v2426_v43  ;;  %v551_v10 = vrot.slane %v549_v62, 4  ;;  %v554_v11 = vrot.slane %v552_v0, 5  ;;  %v9186_v21 = vld [vmem:[%s8858_s10 + $0x5c] sm:$0x1] }
  0x6c   : > { %7871 = vmatprep.subr.bf16.mxu1 %v8591_v36  ;;  %v2433_v40 = vshll.u32 %v9143_v15, 16  ;;  %v2437_v45 = vshrl.u32 %v9143_v15, 16  ;;  %v570_v22 = vrot.slane %v568_v12, 5  ;;  %v2448_v26 = vshrl.u32 %v6915_v59, 16  ;;  %v352_v44 = vld [vmem:[%s8858_s10 + $0x58] sm:$0xf] }
  0x6d   : > { %8027 = vmatprep.mubr.bf16.mxu0 %v6965_v56  ;;  %v2431_v2 = vrot.slane %v2430_v57, 4  ;;  %v2451_v30 = vshll.u32 %v6915_v59, 16  ;;  %v2457_v31 = vshll.u32 %v9174_v1, 16  ;;  %v2461_v35 = vshrl.u32 %v9174_v1, 16 }
  0x6e   : > { %8062 = vmatpush3.bf16.msra.mxu0 %v8583_v49  ;;  %v2435_v51 = vrot.slane %v2433_v40, 5  ;;  %v537_v49 = vsel %vm8990_vm2, %v532_v41, %v536_v18  ;;  %v2439_v58 = vrot.slane %v2437_v45, 4  ;;  %v2450_v43 = vrot.slane %v2448_v26, 4  ;;  %v9214_v26 = vld [vmem:[%s8858_s10 + $0x60] sm:$0xf] }
  0x6f   : > { %7872 = vmatpush3.bf16.msra.mxu1 %v8591_v36  ;;  %v540_v36 = vrot.slane %v538_v19, 4  ;;  %8063 = vmatprep.subr.bf16.mxu0 %v8585_v16  ;;  %v564_v19 = vrot.slane %v562_v4, 4  ;;  %v2459_v45 = vrot.slane %v2457_v31, 5  ;;  %v2463_v48 = vrot.slane %v2461_v35, 4 }
  0x70   : > { %7873 = vmatprep.subr.bf16.mxu1 %v8593_v3  ;;  %v2440_v6 = vor.u32 %v2439_v58, %v2435_v51  ;;  %v2436_v14 = vsel %vm8990_vm2, %v2431_v2, %v2435_v51  ;;  %v392_v51 = vld [vmem:[%s8858_s10 + $0x5c] sm:$0x1] }
  0x71   : > { %v541_v50 = vor.u32 %v540_v36, %v536_v18  ;;  %v555_v18 = vor.u32 %v554_v11, %v551_v10  ;;  %v351_v36 = vld [vmem:[%s8858_s10 + $0x54] sm:$0xf]  ;;  %v2464_v58 = vor.u32 %v2463_v48, %v2459_v45 }
  0x72   : > { %8064 = vmatpush3.bf16.msra.mxu0 %v8585_v16  ;;  %v2441_v16 = vrot.slane %v2440_v6, 4  ;;  %v573_v56 = vshrl.u32 %v351_v36, 16  ;;  %v586_v6 = vshrl.u32 %v352_v44, 16 }
  0x73   : > { %7874 = vmatpush3.bf16.msra.mxu1 %v8593_v3  ;;  %v542_v60 = vrot.slane %v541_v50, 4  ;;  %v558_v3 = vshll.u32 %v350_v54, 16  ;;  %8065 = vmatprep.subr.bf16.mxu0 %v8586_v32  ;;  %v556_v40 = vrot.slane %v555_v18, 4  ;;  %v2467_v50 = vshll.u32 %v9186_v21, 16  ;;  %v9210_v18 = vld [vmem:[%s8858_s10 + $0x68] sm:$0x1] }
  0x74   : > { %7907 = vmatprep.subr.bf16.mxu1 %v9160_v5  ;;  %v2446_v27 = vsel %vm8990_vm2, %v2441_v16, %v2445_v61  ;;  %v9201_v61 = vld [vmem:[%s8858_s10 + $0x64] sm:$0xf]  ;;  %v575_v0 = vrot.slane %v573_v56, 4  ;;  %v588_v12 = vrot.slane %v586_v6, 4  ;;  %v2491_v48 = vshll.u32 %v9210_v18, 16 }
  0x75   : > { %v547_v8 = vsel %vm8990_vm2, %v542_v60, %v546_v39  ;;  %v560_v17 = vrot.slane %v558_v3, 5  ;;  %v6966_v39 = vcombine.low %v2436_v14, %v2446_v27  ;;  %v2469_v59 = vrot.slane %v2467_v50, 5  ;;  %v9232_v6 = vld [vmem:[%s8858_s10 + $0x6c] sm:$0xf] }
  0x76   : > { %v6726_v13 = vcombine.low %v537_v49, %v547_v8  ;;  %8066 = vmatpush3.bf16.msra.mxu0 %v8586_v32  ;;  %v2453_v32 = vrot.slane %v2451_v30, 5  ;;  %v576_v49 = vshll.u32 %v351_v36, 16  ;;  %v582_v60 = vshll.u32 %v352_v44, 16  ;;  %v9217_v36 = vld [vmem:[%s8858_s10 + $0x64] sm:$0xf] }
  0x77   : > { %8099 = vmatprep.subr.bf16.mxu0 %v9179_v7  ;;  %v565_v41 = vor.u32 %v564_v19, %v560_v17  ;;  %8028 = vmatmul.mubr.bf16.gmra.mrb[8].mxu0 %v6966_v39  ;;  %v561_v54 = vsel %vm8990_vm2, %v556_v40, %v560_v17  ;;  %v2465_v8 = vrot.slane %v2464_v58, 4  ;;  %v2472_v14 = vshrl.u32 %v6918_v53, 16  ;;  %v393_v44 = vld [vmem:[%s8858_s10 + $0x68] sm:$0x1] }
  0x78   : > { %7836 = vmatmul.mubr.bf16.gmra.mrb[8].mxu1 %v6726_v13  ;;  %v2454_v57 = vor.u32 %v2453_v32, %v2450_v43  ;;  %v578_v2 = vrot.slane %v576_v49, 5  ;;  %v584_v10 = vrot.slane %v582_v60, 5  ;;  %v592_v13 = vshll.u32 %v392_v51, 16  ;;  %v6985_v51 = vld [vmem:[%s8858_s10 + $0xc] sm:$0xe] }
  0x79   : > { %v566_v55 = vrot.slane %v565_v41, 4  ;;  %v2470_v17 = vsel %vm8990_vm2, %v2465_v8, %v2469_v59  ;;  %v2475_v19 = vshll.u32 %v6918_v53, 16  ;;  %v2474_v39 = vrot.slane %v2472_v14, 4 }
  0x7a   : > { %v2455_v4 = vrot.slane %v2454_v57, 4  ;;  %v579_v11 = vor.u32 %v578_v2, %v575_v0  ;;  %v589_v31 = vor.u32 %v588_v12, %v584_v10  ;;  %v594_v35 = vrot.slane %v592_v13, 5 }
  0x7b   : > { %v571_v62 = vsel %vm8990_vm2, %v566_v55, %v570_v22  ;;  %v2481_v22 = vshll.u32 %v9201_v61, 16  ;;  %v2477_v40 = vrot.slane %v2475_v19, 5  ;;  %v2485_v43 = vshrl.u32 %v9201_v61, 16 }
  0x7c   : > { %v6727_v3 = vcombine.low %v561_v54, %v571_v62  ;;  %v2460_v16 = vsel %vm8990_vm2, %v2455_v4, %v2459_v45  ;;  %v580_v30 = vrot.slane %v579_v11, 4  ;;  %v590_v45 = vrot.slane %v589_v31, 4 }
  0x7d   : > { %v6967_v27 = vcombine.low %v2460_v16, %v2470_v17  ;;  %v2483_v41 = vrot.slane %v2481_v22, 5  ;;  %v597_v50 = vshrl.u32 %v9214_v26, 16  ;;  %v2478_v53 = vor.u32 %v2477_v40, %v2474_v39  ;;  %v9244_v22 = vld [vmem:[%s8858_s10 + $0x70] sm:$0xf] }
  0x7e   : > { %7839 = vmatprep.mubr.bf16.mxu1 %v6727_v3  ;;  %v585_v32 = vsel %vm8990_vm2, %v580_v30, %v584_v10  ;;  %v2487_v54 = vrot.slane %v2485_v43, 4  ;;  %v600_v55 = vshll.u32 %v9214_v26, 16  ;;  %v606_v56 = vshll.u32 %v9217_v36, 16  ;;  %v8677_v10 = vld [vmem:[%s8858_s10 + $0xb4] sm:$0xff]  }
  0x7f   : > { %8031 = vmatprep.mubr.bf16.mxu0 %v6967_v27  ;;  %v595_v49 = vsel %vm8990_vm2, %v590_v45, %v594_v35  ;;  %v2493_v57 = vrot.slane %v2491_v48, 5  ;;  %v599_v58 = vrot.slane %v597_v50, 4  ;;  %v610_v59 = vshrl.u32 %v9217_v36, 16  ;;  %v9255_v48 = vld [vmem:[%s8858_s10 + $0x78] sm:$0xf] }
  0x80   : > { %v6728_v60 = vcombine.low %v585_v32, %v595_v49  ;;  %v2479_v62 = vrot.slane %v2478_v53, 4  ;;  %v2488_v0 = vor.u32 %v2487_v54, %v2483_v41  ;;  %v602_v2 = vrot.slane %v600_v55, 5  ;;  %v9266_v55 = vld [vmem:[%s8858_s10 + $0x7c] sm:$0xf] }
  0x81   : > { %v608_v3 = vrot.slane %v606_v56, 5  ;;  %v612_v4 = vrot.slane %v610_v59, 4  ;;  %v616_v8 = vshll.u32 %v393_v44, 16  ;;  %v7001_v11 = vrot.slane %v6985_v51, 9  ;;  %v395_v59 = vld [vmem:[%s8858_s10 + $0x80] sm:$0x1] }
  0x82   : > { %7840 = vmatmul.mubr.bf16.gmra.mrb[12].mxu1 %v6728_v60  ;;  %v2484_v12 = vsel %vm8990_vm2, %v2479_v62, %v2483_v41  ;;  %v2489_v13 = vrot.slane %v2488_v0, 4  ;;  %v603_v14 = vor.u32 %v602_v2, %v599_v58  ;;  %v3075_v16 = vrot.slane %v8971_v24, 5  ;;  %v394_v41 = vld [vmem:[%s8858_s10 + $0x74] sm:$0x1]  ;;  %v6986_v24 = vld [vmem:[%s8858_s10 + $0x18] sm:$0xe] }
  0x83   : > { %v613_v17 = vor.u32 %v612_v4, %v608_v3  ;;  %v618_v19 = vrot.slane %v616_v8, 5  ;;  %v621_v27 = vshrl.u32 %v9232_v6, 16  ;;  %v624_v30 = vshll.u32 %v9232_v6, 16 }
  0x84   : > { %v2494_v31 = vsel %vm8990_vm2, %v2489_v13, %v2493_v57  ;;  %v604_v35 = vrot.slane %v603_v14, 4  ;;  %v3076_v39 = vsel %vm9236_vm5, %v7001_v11, %v3075_v16  ;;  %v3077_v40 = vrot.slane %v3075_v16, 4  ;;  %v6987_v14 = vld [vmem:[%s8858_s10 + $0x24] sm:$0xe] }
  0x85   : > { %v6968_v43 = vcombine.low %v2484_v12, %v2494_v31  ;;  %v614_v44 = vrot.slane %v613_v17, 4  ;;  %v623_v32 = vrot.slane %v621_v27, 4  ;;  %v626_v45 = vrot.slane %v624_v30, 5  ;;  %v9288_v17 = vld [vmem:[%s8858_s10 + $0x84] sm:$0xf]  ;;  %v8590_v30 = vld [vmem:[%s11669_s2 + $0x188] sm:$0xff]  }
  0x86   : > { %v609_v50 = vsel %vm8990_vm2, %v604_v35, %v608_v3  ;;  %v3079_v51 = vsel %vm9236_vm5, %v3077_v40, %v3078_v42  ;;  %v630_v53 = vshll.u32 %v9244_v22, 16  ;;  %v634_v54 = vshrl.u32 %v9244_v22, 16 }
  0x87   : > { %8032 = vmatmul.mubr.bf16.gmra.mrb[12].mxu0 %v6968_v43  ;;  %v619_v56 = vsel %vm8990_vm2, %v614_v44, %v618_v19  ;;  %v7033_v49 = vcombine.low %v3076_v39, %v3079_v51  ;;  %v627_v57 = vor.u32 %v626_v45, %v623_v32  ;;  %v640_v58 = vshll.u32 %v394_v41, 16  ;;  %v9296_v41 = vld [vmem:[%s8858_s10 + $0x88] sm:$0xf]  ;;  %v396_v32 = vld [vmem:[%s8858_s10 + $0x8c] sm:$0x1] }
  0x88   : > { %v6729_v60 = vcombine.low %v609_v50, %v619_v56  ;;  %v632_v25 = vrot.slane %v630_v53, 5  ;;  %v636_v62 = vrot.slane %v634_v54, 4  ;;  %v7002_v0 = vrot.slane %v6986_v24, 9 }
  0x89   : > { %8067 = vmatprep.mubr.bf16.mxu0 %v7033_v49  ;;  %v628_v42 = vrot.slane %v627_v57, 4  ;;  %v642_v2 = vrot.slane %v640_v58, 5  ;;  %v3086_v3 = vsel %vm9236_vm5, %v9039_v37, %v3085_v33  ;;  %v645_v4 = vshrl.u32 %v9255_v48, 16 }
  0x8a   : > { %7843 = vmatprep.mubr.bf16.mxu1 %v6729_v60  ;;  %v637_v8 = vor.u32 %v636_v62, %v632_v25  ;;  %v3083_v11 = vsel %vm9236_vm5, %v7002_v0, %v3082_v28  ;;  %v648_v12 = vshll.u32 %v9255_v48, 16  ;;  %v654_v13 = vshll.u32 %v9266_v55, 16 }
  0x8b   : > { %v633_v9 = vsel %vm8990_vm2, %v628_v42, %v632_v25  ;;  %v7034_v16 = vcombine.low %v3083_v11, %v3086_v3  ;;  %v647_v33 = vrot.slane %v645_v4, 4  ;;  %v658_v37 = vshrl.u32 %v9266_v55, 16  ;;  %v9317_v3 = vld [vmem:[%s8858_s10 + $0x90] sm:$0xf]  ;;  %v9320_v4 = vld [vmem:[%s8858_s10 + $0x94] sm:$0xf] }
  0x8c   : > { %v638_v63 = vrot.slane %v637_v8, 4  ;;  %v650_v19 = vrot.slane %v648_v12, 5  ;;  %v656_v27 = vrot.slane %v654_v13, 5  ;;  %v664_v28 = vshll.u32 %v395_v59, 16 }
  0x8d   : > { %v660_v31 = vrot.slane %v658_v37, 4  ;;  %v7003_v35 = vrot.slane %v6987_v14, 9  ;;  %v3089_v39 = vrot.slane %v9043_v46, 5  ;;  %v3092_v40 = vrot.slane %v9049_v52, 5  ;;  %v6988_v46 = vld [vmem:[%s8858_s10 + $0x30] sm:$0xe] }
  0x8e   : > { %v643_v24 = vsel %vm8990_vm2, %v638_v63, %v642_v2  ;;  %v651_v43 = vor.u32 %v650_v19, %v647_v33  ;;  %v666_v44 = vrot.slane %v664_v28, 5  ;;  %v669_v45 = vshrl.u32 %v9288_v17, 16  ;;  %v397_v63 = vld [vmem:[%s8858_s10 + $0x98] sm:$0x1] }
  0x8f   : > { %v6730_v50 = vcombine.low %v633_v9, %v643_v24  ;;  %8068 = vmatmul.mubr.bf16.vlgmr.msra.gmra.mrb[0].mxu0 %v7034_v16  ;;  %v661_v51 = vor.u32 %v660_v31, %v656_v27  ;;  %v3090_v53 = vsel %vm9236_vm5, %v7003_v35, %v3089_v39  ;;  %v3091_v54 = vrot.slane %v3089_v39, 4  ;;  %v8594_v31 = vld [vmem:[%s11669_s2 + $0x198] sm:$0xff]  }
  0x90   : > { %8100 = vmatpush3.bf16.msra.mxu0 %v9179_v7  ;;  %v652_v52 = vrot.slane %v651_v43, 4  ;;  %v671_v56 = vrot.slane %v669_v45, 4  ;;  %v672_v49 = vshll.u32 %v9288_v17, 16  ;;  %v678_v57 = vshll.u32 %v9296_v41, 16  ;;  %v8592_v7 = vld [vmem:[%s11669_s2 + $0x190] sm:$0xff]  }
  0x91   : > { %7844 = vmatmul.mubr.bf16.gmra.mrb[16].mxu1 %v6730_v50  ;;  %v662_v58 = vrot.slane %v661_v51, 4  ;;  %v3093_v59 = vsel %vm9236_vm5, %v3091_v54, %v3092_v40  ;;  %v682_v60 = vshrl.u32 %v9296_v41, 16  ;;  %v688_v25 = vshll.u32 %v396_v32, 16  ;;  %8101 = vmatprep.subr.bf16.mxu0 %v8590_v30  ;;  %v6989_v39 = vld [vmem:[%s8858_s10 + $0x3c] sm:$0xe] }
  0x92   : > { %v657_v62 = vsel %vm8990_vm2, %v652_v52, %v656_v27  ;;  %v7035_v0 = vcombine.low %v3090_v53, %v3093_v59  ;;  %v674_v42 = vrot.slane %v672_v49, 5  ;;  %v680_v2 = vrot.slane %v678_v57, 5  ;;  %v9338_v32 = vld [vmem:[%s8858_s10 + $0x9c] sm:$0xf]  ;;  %v9347_v49 = vld [vmem:[%s8858_s10 + $0xa0] sm:$0xf] }
  0x93   : > { %v667_v8 = vsel %vm8990_vm2, %v662_v58, %v666_v44  ;;  %v684_v11 = vrot.slane %v682_v60, 4  ;;  %v690_v12 = vrot.slane %v688_v25, 5  ;;  %v7004_v13 = vrot.slane %v6988_v46, 9  ;;  %v8598_v57 = vld [vmem:[%s11669_s2 + $0x1a0] sm:$0xff]  }
  0x94   : > { %v6731_v14 = vcombine.low %v657_v62, %v667_v8  ;;  %8071 = vmatprep.mubr.bf16.mxu0 %v7035_v0  ;;  %v675_v9 = vor.u32 %v674_v42, %v671_v56  ;;  %v3096_v16 = vrot.slane %v9074_v34, 5  ;;  %v3099_v33 = vrot.slane %v9085_v47, 5  ;;  %8102 = vmatpush3.bf16.msra.mxu0 %v8590_v30  ;;  %v398_v62 = vld [vmem:[%s8858_s10 + $0xa4] sm:$0x1] }
  0x95   : > { %v685_v37 = vor.u32 %v684_v11, %v680_v2  ;;  %v693_v19 = vshrl.u32 %v9317_v3, 16  ;;  %v696_v27 = vshll.u32 %v9317_v3, 16  ;;  %v702_v28 = vshll.u32 %v9320_v4, 16  ;;  %8103 = vmatprep.subr.bf16.mxu0 %v8592_v7 }
  0x96   : > { %7847 = vmatprep.mubr.bf16.mxu1 %v6731_v14  ;;  %v676_v35 = vrot.slane %v675_v9, 4  ;;  %v3097_v34 = vsel %vm9236_vm5, %v7004_v13, %v3096_v16  ;;  %v3098_v47 = vrot.slane %v3096_v16, 4  ;;  %v706_v30 = vshrl.u32 %v9320_v4, 16  ;;  %v6990_v16 = vld [vmem:[%s8858_s10 + $0x48] sm:$0xe] }
  0x97   : > { %v686_v40 = vrot.slane %v685_v37, 4  ;;  %v695_v24 = vrot.slane %v693_v19, 4  ;;  %v698_v43 = vrot.slane %v696_v27, 5  ;;  %v704_v44 = vrot.slane %v702_v28, 5  ;;  %v9372_v28 = vld [vmem:[%s8858_s10 + $0xa8] sm:$0xf] }
  0x98   : > { %v681_v45 = vsel %vm8990_vm2, %v676_v35, %v680_v2  ;;  %v3100_v50 = vsel %vm9236_vm5, %v3098_v47, %v3099_v33  ;;  %v708_v51 = vrot.slane %v706_v30, 4  ;;  %v712_v53 = vshll.u32 %v397_v63, 16  ;;  %8104 = vmatpush3.bf16.msra.mxu0 %v8592_v7  ;;  %v8602_v33 = vld [vmem:[%s11669_s2 + $0x1a8] sm:$0xff]  }
  0x99   : > { %v691_v54 = vsel %vm8990_vm2, %v686_v40, %v690_v12  ;;  %v7036_v46 = vcombine.low %v3097_v34, %v3100_v50  ;;  %v699_v52 = vor.u32 %v698_v43, %v695_v24  ;;  %v7005_v56 = vrot.slane %v6989_v39, 9  ;;  %8105 = vmatprep.subr.bf16.mxu0 %v8594_v31  ;;  %v9375_v30 = vld [vmem:[%s8858_s10 + $0xac] sm:$0xf] }
  0x9a   : > { %v6732_v58 = vcombine.low %v681_v45, %v691_v54  ;;  %v709_v59 = vor.u32 %v708_v51, %v704_v44  ;;  %v714_v60 = vrot.slane %v712_v53, 5  ;;  %v3103_v25 = vrot.slane %v9108_v20, 5  ;;  %v6991_v54 = vld [vmem:[%s8858_s10 + $0x54] sm:$0xe] }
  0x9b   : > { %8072 = vmatmul.mubr.bf16.gmra.mrb[4].mxu0 %v7036_v46  ;;  %v700_v7 = vrot.slane %v699_v52, 4  ;;  %v3106_v0 = vrot.slane %v9116_v29, 5  ;;  %v717_v42 = vshrl.u32 %v9338_v32, 16  ;;  %v720_v2 = vshll.u32 %v9338_v32, 16  ;;  %v8606_v46 = vld [vmem:[%s11669_s2 + $0x1b0] sm:$0xff]  }
  0x9c   : > { %7848 = vmatmul.mubr.bf16.gmra.mrb[20].mxu1 %v6732_v58  ;;  %v710_v8 = vrot.slane %v709_v59, 4  ;;  %v3104_v11 = vsel %vm9236_vm5, %v7005_v56, %v3103_v25  ;;  %v3105_v12 = vrot.slane %v3103_v25, 4  ;;  %v726_v13 = vshll.u32 %v9347_v49, 16  ;;  %8106 = vmatpush3.bf16.msra.mxu0 %v8594_v31 }
  0x9d   : > { %v705_v20 = vsel %vm8990_vm2, %v700_v7, %v704_v44  ;;  %v719_v14 = vrot.slane %v717_v42, 4  ;;  %v722_v29 = vrot.slane %v720_v2, 5  ;;  %v730_v9 = vshrl.u32 %v9347_v49, 16  ;;  %8107 = vmatprep.subr.bf16.mxu0 %v8598_v57  ;;  %v399_v44 = vld [vmem:[%s8858_s10 + $0xb0] sm:$0x1] }
  0x9e   : > { %v715_v37 = vsel %vm8990_vm2, %v710_v8, %v714_v60  ;;  %v3107_v63 = vsel %vm9236_vm5, %v3105_v12, %v3106_v0  ;;  %v728_v19 = vrot.slane %v726_v13, 5  ;;  %v736_v27 = vshll.u32 %v398_v62, 16  ;;  %v9395_v42 = vld [vmem:[%s8858_s10 + $0xb4] sm:$0xf]  ;;  %v9400_v13 = vld [vmem:[%s8858_s10 + $0xb8] sm:$0xf] }
  0x9f   : > { %v6733_v31 = vcombine.low %v705_v20, %v715_v37  ;;  %v7037_v35 = vcombine.low %v3104_v11, %v3107_v63  ;;  %v723_v34 = vor.u32 %v722_v29, %v719_v14  ;;  %v732_v47 = vrot.slane %v730_v9, 4  ;;  %v400_v20 = vld [vmem:[%s8858_s10 + $0xbc] sm:$0x1] }
  0xa0   : > { %v738_v39 = vrot.slane %v736_v27, 5  ;;  %v7006_v40 = vrot.slane %v6990_v16, 9  ;;  %v3110_v24 = vrot.slane %v9143_v15, 5  ;;  %v3113_v43 = vrot.slane %v9149_v23, 5  ;;  %8108 = vmatpush3.bf16.msra.mxu0 %v8598_v57  ;;  %v8610_v14 = vld [vmem:[%s11669_s2 + $0x1b8] sm:$0xff]  }
  0xa1   : > { %7851 = vmatprep.mubr.bf16.mxu1 %v6733_v31  ;;  %8075 = vmatprep.mubr.bf16.mxu0 %v7037_v35  ;;  %v724_v45 = vrot.slane %v723_v34, 4  ;;  %v733_v50 = vor.u32 %v732_v47, %v728_v19  ;;  %v741_v51 = vshrl.u32 %v9372_v28, 16  ;;  %v744_v53 = vshll.u32 %v9372_v28, 16  ;;  %v6992_v31 = vld [vmem:[%s8858_s10 + $0x60] sm:$0xe] }
  0xa2   : > { %v3111_v15 = vsel %vm9236_vm5, %v7006_v40, %v3110_v24  ;;  %v3112_v23 = vrot.slane %v3110_v24, 4  ;;  %v750_v52 = vshll.u32 %v9375_v30, 16  ;;  %v754_v56 = vshrl.u32 %v9375_v30, 16  ;;  %8109 = vmatprep.subr.bf16.mxu0 %v8602_v33  ;;  %v6922_v40 = vld [vmem:[%s8858_s10 + $0x70] sm:$0xf] }
  0xa3   : > { %v729_v57 = vsel %vm8990_vm2, %v724_v45, %v728_v19  ;;  %v734_v58 = vrot.slane %v733_v50, 4  ;;  %v743_v59 = vrot.slane %v741_v51, 4  ;;  %v746_v60 = vrot.slane %v744_v53, 5  ;;  %v9422_v45 = vld [vmem:[%s11669_s2 + $0x1c0] sm:$0xff]  }
  0xa4   : > { %v3114_v25 = vsel %vm9236_vm5, %v3112_v23, %v3113_v43  ;;  %v752_v62 = vrot.slane %v750_v52, 5  ;;  %v756_v7 = vrot.slane %v754_v56, 4  ;;  %v760_v0 = vshll.u32 %v399_v44, 16  ;;  %8110 = vmatpush3.bf16.msra.mxu0 %v8602_v33  ;;  %v6993_v44 = vld [vmem:[%s8858_s10 + $0x6c] sm:$0xe] }
  0xa5   : > { %v739_v2 = vsel %vm8990_vm2, %v734_v58, %v738_v39  ;;  %v7038_v8 = vcombine.low %v3111_v15, %v3114_v25  ;;  %v747_v11 = vor.u32 %v746_v60, %v743_v59  ;;  %v7007_v12 = vrot.slane %v6991_v54, 9  ;;  %8111 = vmatprep.subr.bf16.mxu0 %v8606_v46  ;;  %v6923_v56 = vld [vmem:[%s8858_s10 + $0x74] sm:$0x1]  ;;  %v6994_v25 = vld [vmem:[%s8858_s10 + $0x78] sm:$0xe] }
  0xa6   : > { %v6734_v29 = vcombine.low %v729_v57, %v739_v2  ;;  %v757_v9 = vor.u32 %v756_v7, %v752_v62  ;;  %v762_v16 = vrot.slane %v760_v0, 5  ;;  %v3117_v33 = vrot.slane %v9174_v1, 5 }
  0xa7   : > { %8076 = vmatmul.mubr.bf16.gmra.mrb[8].mxu0 %v7038_v8  ;;  %v748_v37 = vrot.slane %v747_v11, 4  ;;  %v3120_v63 = vrot.slane %v9186_v21, 5  ;;  %v765_v19 = vshrl.u32 %v9395_v42, 16  ;;  %v768_v27 = vshll.u32 %v9395_v42, 16 }
  0xa8   : > { %7852 = vmatmul.mubr.bf16.gmra.mrb[24].mxu1 %v6734_v29  ;;  %v758_v35 = vrot.slane %v757_v9, 4  ;;  %v3118_v34 = vsel %vm9236_vm5, %v7007_v12, %v3117_v33  ;;  %v3119_v47 = vrot.slane %v3117_v33, 4  ;;  %v774_v39 = vshll.u32 %v9400_v13, 16  ;;  %8112 = vmatpush3.bf16.msra.mxu0 %v8606_v46  ;;  %v9435_v12 = vld [vmem:[%s8858_s10 + $0x7c] sm:$0xf] }
  0xa9   : > { %v753_v1 = vsel %vm8990_vm2, %v748_v37, %v752_v62  ;;  %v767_v21 = vrot.slane %v765_v19, 4  ;;  %v770_v24 = vrot.slane %v768_v27, 5  ;;  %v778_v43 = vshrl.u32 %v9400_v13, 16  ;;  %8113 = vmatprep.subr.bf16.mxu0 %v8610_v14  ;;  %v8679_v37 = vld [vmem:[%s8858_s10] sm:$0xf] }
  0xaa   : > { %v763_v50 = vsel %vm8990_vm2, %v758_v35, %v762_v16  ;;  %v3121_v51 = vsel %vm9236_vm5, %v3119_v47, %v3120_v63  ;;  %v776_v53 = vrot.slane %v774_v39, 5  ;;  %v784_v54 = vshll.u32 %v400_v20, 16  ;;  %v6928_v16 = vld [vmem:[%s8858_s10 + $0x88] sm:$0xf]  ;;  %v9450_v63 = vld [vmem:[%s8858_s10 + $0x4] sm:$0xf] }
  0xab   : > { %v6735_v46 = vcombine.low %v753_v1, %v763_v50  ;;  %v7039_v15 = vcombine.low %v3118_v34, %v3121_v51  ;;  %v771_v23 = vor.u32 %v770_v24, %v767_v21  ;;  %v780_v52 = vrot.slane %v778_v43, 4  ;;  %v6929_v27 = vld [vmem:[%s8858_s10 + $0x8c] sm:$0x1]  ;;  %v6932_v24 = vld [vmem:[%s8858_s10 + $0x98] sm:$0x1] }
  0xac   : > { %v786_v57 = vrot.slane %v784_v54, 5  ;;  %v7008_v58 = vrot.slane %v6992_v31, 9  ;;  %v3124_v59 = vrot.slane %v9201_v61, 5  ;;  %v3127_v60 = vrot.slane %v9210_v18, 5  ;;  %8114 = vmatpush3.bf16.msra.mxu0 %v8610_v14  ;;  %v9438_v18 = vld [vmem:[%s8858_s10 + $0x80] sm:$0x1] }
  0xad   : > { %7855 = vmatprep.mubr.bf16.mxu1 %v6735_v46  ;;  %8079 = vmatprep.mubr.bf16.mxu0 %v7039_v15  ;;  %v772_v62 = vrot.slane %v771_v23, 4  ;;  %v781_v7 = vor.u32 %v780_v52, %v776_v53  ;;  %v7009_v0 = vrot.slane %v6993_v44, 9  ;;  %v3131_v2 = vrot.slane %v6922_v40, 5  ;;  %v6995_v31 = vld [vmem:[%s8858_s10 + $0x84] sm:$0xe] }
  0xae   : > { %v3125_v8 = vsel %vm9236_vm5, %v7008_v58, %v3124_v59  ;;  %v3126_v11 = vrot.slane %v3124_v59, 4  ;;  %v3134_v61 = vrot.slane %v6923_v56, 5  ;;  %8147 = vmatprep.subr.bf16.mxu0 %v9422_v45  ;;  %v6745_v19 = vcombine.low %v8679_v37, %v9450_v63  ;;  %v6931_v40 = vld [vmem:[%s8858_s10 + $0x94] sm:$0xf]  ;;  %v6996_v43 = vld [vmem:[%s8858_s10 + $0x90] sm:$0xe] }
  0xaf   : > { %v777_v20 = vsel %vm8990_vm2, %v772_v62, %v776_v53  ;;  %v782_v14 = vrot.slane %v781_v7, 4  ;;  %v3132_v29 = vsel %vm9236_vm5, %v7009_v0, %v3131_v2  ;;  %v3133_v9 = vrot.slane %v3131_v2, 4  ;;  %v6997_v51 = vld [vmem:[%s8858_s10 + $0x9c] sm:$0xe]  ;;  %v6934_v15 = vld [vmem:[%s8858_s10 + $0xa0] sm:$0xf] }
  0xb0   : > { %v3128_v33 = vsel %vm9236_vm5, %v3126_v11, %v3127_v60  ;;  %v7010_v39 = vrot.slane %v6994_v25, 9  ;;  %v3138_v44 = vrot.slane %v9435_v12, 5  ;;  %v3141_v50 = vrot.slane %v9438_v18, 5  ;;  %v6935_v23 = vld [vmem:[%s8858_s10 + $0xa4] sm:$0x1] }
  0xb1   : > { %v787_v35 = vsel %vm8990_vm2, %v782_v14, %v786_v57  ;;  %v7040_v34 = vcombine.low %v3125_v8, %v3128_v33  ;;  %v3135_v47 = vsel %vm9236_vm5, %v3133_v9, %v3134_v61  ;;  %v7011_v53 = vrot.slane %v6995_v31, 9  ;;  %v6937_v60 = vld [vmem:[%s8858_s10 + $0xac] sm:$0xf]  ;;  %v9474_v62 = vld [vmem:[%s8858_s10 + $0x10] sm:$0xf] }
  0xb2   : > { %v6736_v1 = vcombine.low %v777_v20, %v787_v35  ;;  %v7041_v21 = vcombine.low %v3132_v29, %v3135_v47  ;;  %v3145_v54 = vrot.slane %v6928_v16, 5  ;;  %v3148_v46 = vrot.slane %v6929_v27, 5  ;;  %v8681_v25 = vld [vmem:[%s8858_s10 + $0xc] sm:$0xf]  ;;  %v8683_v9 = vld [vmem:[%s8858_s10 + $0x18] sm:$0xf] }
  0xb3   : > { %8080 = vmatmul.mubr.bf16.gmra.mrb[12].mxu0 %v7040_v34  ;;  %v3139_v52 = vsel %vm9236_vm5, %v7010_v39, %v3138_v44  ;;  %v3140_v56 = vrot.slane %v3138_v44, 4  ;;  %v3152_v59 = vrot.slane %v6931_v40, 5  ;;  %v6746_v7 = vcombine.low %v8681_v25, %v9474_v62  ;;  %v8601_v20 = vld [vmem:[%s11669_s2 + $0x88] sm:$0xff]   ;;  %v9486_v16 = vld [vmem:[%s8858_s10 + $0x1c] sm:$0xf] }
  0xb4   : > { %7856 = vmatmul.mubr.bf16.gmra.mrb[28].mxu1 %v6736_v1  ;;  %8083 = vmatprep.mubr.bf16.mxu0 %v7041_v21  ;;  %v3146_v57 = vsel %vm9236_vm5, %v7011_v53, %v3145_v54  ;;  %v3147_v58 = vrot.slane %v3145_v54, 4  ;;  %v7012_v2 = vrot.slane %v6996_v43, 9  ;;  %v3155_v8 = vrot.slane %v6932_v24, 5  ;;  %v6938_v31 = vld [vmem:[%s8858_s10 + $0xb0] sm:$0x1] }
  0xb5   : > { %7875 = vmatprep.mubr.bf16.mxu1 %v6745_v19  ;;  %v3142_v0 = vsel %vm9236_vm5, %v3140_v56, %v3141_v50  ;;  %v3154_v14 = vrot.slane %v3152_v59, 4  ;;  %v7013_v29 = vrot.slane %v6997_v51, 9  ;;  %v6747_v33 = vcombine.low %v8683_v9, %v9486_v16  ;;  %v6998_v35 = vld [vmem:[%s8858_s10 + $0xa8] sm:$0xe]  ;;  %v6940_v34 = vld [vmem:[%s8858_s10 + $0xb8] sm:$0xf] }
  0xb6   : > { %v7042_v11 = vcombine.low %v3139_v52, %v3142_v0  ;;  %v3149_v61 = vsel %vm9236_vm5, %v3147_v58, %v3148_v46  ;;  %v3159_v19 = vrot.slane %v6934_v15, 5  ;;  %v3162_v27 = vrot.slane %v6935_v23, 5  ;;  %v6941_v21 = vld [vmem:[%s8858_s10 + $0xbc] sm:$0x1]  ;;  %v6999_v24 = vld [vmem:[%s8858_s10 + $0xb4] sm:$0xe] }
  0xb7   : > { %v7043_v37 = vcombine.low %v3146_v57, %v3149_v61  ;;  %v3166_v39 = vrot.slane %v6937_v60, 5  ;;  %v3153_v40 = vsel %vm9236_vm5, %v7012_v2, %v3152_v59  ;;  %v3156_v1 = vsel %vm9236_vm5, %v3154_v14, %v3155_v8  ;;  %v8605_v51 = vld [vmem:[%s11669_s2 + $0x90] sm:$0xff]   ;;  %v6943_v54 = vld [vmem:[%s8858_s10 + $0xc4] sm:$0xf]  ;;  %v9509_v52 = vld [vmem:[%s8858_s10 + $0x28] sm:$0xf] }
  0xb8   : > { %v3161_v47 = vrot.slane %v3159_v19, 4  ;;  %v3160_v43 = vsel %vm9236_vm5, %v7013_v29, %v3159_v19  ;;  %v3173_v50 = vrot.slane %v6940_v34, 5  ;;  %v7014_v53 = vrot.slane %v6998_v35, 9  ;;  %v8685_v23 = vld [vmem:[%s8858_s10 + $0x24] sm:$0xf]  ;;  %v8609_v2 = vld [vmem:[%s11669_s2 + $0x98] sm:$0xff]  }
  0xb9   : > { %v7044_v46 = vcombine.low %v3153_v40, %v3156_v1  ;;  %v3168_v15 = vrot.slane %v3166_v39, 4  ;;  %v6748_v56 = vcombine.low %v8685_v23, %v9509_v52  ;;  %v8687_v58 = vld [vmem:[%s8858_s10 + $0x30] sm:$0xf]  ;;  %v9514_v59 = vld [vmem:[%s8858_s10 + $0x34] sm:$0xf]  ;;  %v7015_v25 = vrot.slane %v6999_v24, 9 }
  0xba   : > { %v3163_v44 = vsel %vm9236_vm5, %v3161_v47, %v3162_v27  ;;  %v6749_v60 = vcombine.low %v8687_v58, %v9514_v59  ;;  %v3176_v0 = vrot.slane %v6941_v21, 5  ;;  %v7000_v8 = vld [vmem:[%s8858_s10 + $0xc0] sm:$0xe]  ;;  %v3167_v61 = vsel %vm9236_vm5, %v7014_v53, %v3166_v39  ;;  %v6944_v9 = vld [vmem:[%s8858_s10 + $0xc8] sm:$0x1]  ;;  %v8612_v23 = vld [vmem:[%s8858_s10 + $0x18] sm:$0xff]  }
  0xbb   : > { %8084 = vmatmul.mubr.bf16.gmra.mrb[16].mxu0 %v7042_v11  ;;  %v7045_v57 = vcombine.low %v3160_v43, %v3163_v44  ;;  %v3180_v11 = vrot.slane %v6943_v54, 5  ;;  %v3174_v14 = vsel %vm9236_vm5, %v7015_v25, %v3173_v50  ;;  %v7016_v19 = vrot.slane %v7000_v8, 9  ;;  %v8689_v27 = vld [vmem:[%s8858_s10 + $0x3c] sm:$0xf]  ;;  %v8691_v40 = vld [vmem:[%s8858_s10 + $0x48] sm:$0xf] }
  0xbc   : > { %7876 = vmatmul.mubr.bf16.vlgmr.msra.gmra.mrb[0].mxu1 %v6746_v7  ;;  %8087 = vmatprep.mubr.bf16.mxu0 %v7043_v37  ;;  %v3175_v7 = vrot.slane %v3173_v50, 4  ;;  %v3183_v39 = vrot.slane %v6944_v9, 5  ;;  %v9540_v1 = vld [vmem:[%s8858_s10 + $0x4c] sm:$0xf]  ;;  %v8626_v50 = vld [vmem:[%s11669_s2 + $0xb0] sm:$0xff]   ;;  %v2533_v53 = vshrl.u32 %v9435_v12, 16 }
  0xbd   : > { %7908 = vmatpush3.bf16.msra.mxu1 %v9160_v5  ;;  %7879 = vmatprep.mubr.bf16.mxu1 %v6747_v33  ;;  %v3169_v5 = vrot.slane %v6938_v31, 5  ;;  %v8614_v33 = vld [vmem:[%s11669_s2 + $0xa0] sm:$0xff]   ;;  %v3182_v47 = vrot.slane %v3180_v11, 4  ;;  %v6751_v21 = vcombine.low %v8691_v40, %v9540_v1  ;;  %v8620_v24 = vld [vmem:[%s11669_s2 + $0xa8] sm:$0xff]   ;;  %v3181_v43 = vsel %vm9236_vm5, %v7016_v19, %v3180_v11  ;;  %v8618_v19 = vld [vmem:[%s8858_s10 + $0x30] sm:$0xff]  }
  0xbe   : > { %7909 = vmatprep.subr.bf16.mxu1 %v8601_v20  ;;  %v3177_v29 = vsel %vm9236_vm5, %v3175_v7, %v3176_v0  ;;  %v9535_v31 = vld [vmem:[%s8858_s10 + $0x40] sm:$0xf]  ;;  %v9568_v58 = vrot.slane %v2533_v53, 4  ;;  %v8615_v7 = vld [vmem:[%s8858_s10 + $0x24] sm:$0xff]   ;;  %v1443_v8 = vrot.slane %v9474_v62, 5  ;;  %v2539_v9 = vshll.u32 %v9438_v18, 16 }
  0xbf   : > { %v6750_v35 = vcombine.low %v8689_v27, %v9535_v31  ;;  %v7047_v34 = vcombine.low %v3174_v14, %v3177_v29  ;;  %v3184_v44 = vsel %vm9236_vm5, %v3182_v47, %v3183_v39  ;;  %v1383_v0 = vld [vmem:[%s8858_s10] sm:$0xe]  ;;  %v1384_v11 = vld [vmem:[%s8858_s10 + $0xc] sm:$0xe]  ;;  %v1450_v14 = vrot.slane %v9486_v16, 5 }
  0xc0   : > { %v7048_v54 = vcombine.low %v3181_v43, %v3184_v44  ;;  %v1386_v62 = vld [vmem:[%s8858_s10 + $0x24] sm:$0xe]  ;;  %v6756_v16 = vcombine.low %v9288_v17, %v9296_v41  ;;  %v6757_v27 = vcombine.low %v9317_v3, %v9320_v4  ;;  %v6769_v18 = vrot.slane %v1383_v0, 9  ;;  %v8697_v39 = vld [vmem:[%s8858_s10 + $0x20] sm:$0x1]  ;;  %v8627_v3 = vld [vmem:[%s8858_s10 + $0x54] sm:$0xff]  }
  0xc1   : > { %7910 = vmatpush3.bf16.msra.mxu1 %v8601_v20  ;;  %v3170_v20 = vsel %vm9236_vm5, %v3168_v15, %v3169_v5  ;;  %v9557_v15 = vld [vmem:[%s8858_s10 + $0x58] sm:$0xf]  ;;  %v1452_v47 = vrot.slane %v1450_v14, 4  ;;  %v1453_v40 = vrot.slane %v8697_v39, 5  ;;  %v8698_v44 = vld [vmem:[%s8858_s10 + $0x2c] sm:$0x1] }
  0xc2   : > { %7911 = vmatprep.subr.bf16.mxu1 %v8605_v51  ;;  %v7046_v37 = vcombine.low %v3167_v61, %v3170_v20  ;;  %v9583_v61 = vld [vmem:[%s11669_s2 + $0xc0] sm:$0xff]   ;;  %v1385_v20 = vld [vmem:[%s8858_s10 + $0x18] sm:$0xe]  ;;  %v8701_v39 = vld [vmem:[%s8858_s10 + $0x50] sm:$0x1]  ;;  %v1485_v17 = vrot.slane %v9557_v15, 5 }
  0xc3   : > { %8088 = vmatmul.mubr.bf16.gmra.mrb[20].mxu0 %v7044_v46  ;;  %v8693_v46 = vld [vmem:[%s8858_s10 + $0x54] sm:$0xf]  ;;  %v9706_v41 = vld [vmem:[%s8858_s10 + $0x64] sm:$0xf] }
  0xc4   : > { %7880 = vmatmul.mubr.bf16.gmra.mrb[4].mxu1 %v6748_v56  ;;  %8091 = vmatprep.mubr.bf16.mxu0 %v7045_v57  ;;  %v6752_v5 = vcombine.low %v8693_v46, %v9557_v15  ;;  %v6753_v56 = vcombine.low %v9214_v26, %v9217_v36  ;;  %v8632_v57 = vld [vmem:[%s11669_s2 + $0xb8] sm:$0xff]   ;;  %v8696_v26 = vld [vmem:[%s8858_s10 + $0x14] sm:$0x1]  ;;  %v8630_v4 = vld [vmem:[%s8858_s10 + $0x60] sm:$0xff]  }
  0xc5   : > { %7883 = vmatprep.mubr.bf16.mxu1 %v6749_v60  ;;  %7912 = vmatpush3.bf16.msra.mxu1 %v8605_v51  ;;  %v2529_v51 = vshll.u32 %v9435_v12, 16  ;;  %v9571_v60 = vld [vmem:[%s8858_s10 + $0x8] sm:$0x1]  ;;  %v1446_v36 = vrot.slane %v8696_v26, 5 }
  0xc6   : > { %7913 = vmatprep.subr.bf16.mxu1 %v8609_v2  ;;  %v1439_v25 = vrot.slane %v9571_v60, 5 }
  0xc7   : > { %v9566_v12 = vrot.slane %v2529_v51, 5 }
  0xc9   : > { %7914 = vmatpush3.bf16.msra.mxu1 %v8609_v2  ;;  %v1436_v2 = vrot.slane %v9450_v63, 5  ;;  %v6754_v63 = vcombine.low %v9232_v6, %v9244_v22  ;;  %v6770_v22 = vrot.slane %v1384_v11, 9  ;;  %v7129_v11 = vld [vmem:[%s8858_s10 + $0x18] sm:$0xf] }
  0xca   : > { %7915 = vmatprep.subr.bf16.mxu1 %v8614_v33 }
  0xcb   : > { %8092 = vmatmul.mubr.bf16.gmra.mrb[24].mxu0 %v7046_v37  ;;  %v6755_v37 = vcombine.low %v9255_v48, %v9266_v55  ;;  %v1438_v6 = vrot.slane %v1436_v2, 4  ;;  %v8622_v48 = vld [vmem:[%s11669_s2 + $0x1c8] sm:$0xff]   ;;  %v6771_v55 = vrot.slane %v1385_v20, 9  ;;  %v9626_v60 = vsel %vm9236_vm5, %v6769_v18, %v1436_v2  ;;  %v7130_v20 = vld [vmem:[%s8858_s10 + $0x1c] sm:$0xf] }
  0xcc   : > { %7884 = vmatmul.mubr.bf16.gmra.mrb[8].mxu1 %v6750_v35  ;;  %8095 = vmatprep.mubr.bf16.mxu0 %v7047_v34  ;;  %v1464_v35 = vrot.slane %v9514_v59, 5  ;;  %v1445_v34 = vrot.slane %v1443_v8, 4  ;;  %v6772_v59 = vrot.slane %v1386_v62, 9  ;;  %v1478_v2 = vrot.slane %v9540_v1, 5  ;;  %v8624_v1 = vld [vmem:[%s8858_s10 + $0x48] sm:$0xff]  }
  0xcd   : > { %7887 = vmatprep.mubr.bf16.mxu1 %v6751_v21  ;;  %7916 = vmatpush3.bf16.msra.mxu1 %v8614_v33  ;;  %v1457_v33 = vrot.slane %v9509_v52, 5  ;;  %v1387_v52 = vld [vmem:[%s8858_s10 + $0x30] sm:$0xe]  ;;  %v6758_v21 = vcombine.low %v9338_v32, %v9347_v49  ;;  %v9634_v26 = vsel %vm9236_vm5, %v1438_v6, %v1439_v25  ;;  %v9642_v0 = vsel %vm9236_vm5, %v6771_v55, %v1450_v14  ;;  %v1389_v14 = vld [vmem:[%s8858_s10 + $0x48] sm:$0xe] }
  0xce   : > { %7917 = vmatprep.subr.bf16.mxu1 %v8620_v24  ;;  %v6773_v51 = vrot.slane %v1387_v52, 9  ;;  %v1466_v53 = vrot.slane %v1464_v35, 4  ;;  %v3943_v6 = vshrl.u32 %v7129_v11, 16  ;;  %v3956_v52 = vshrl.u32 %v7130_v20, 16  ;;  %v8633_v49 = vld [vmem:[%s8858_s10 + $0x6c] sm:$0xff]  }
  0xcf   : > { %v1459_v43 = vrot.slane %v1457_v33, 4  ;;  %v9654_v25 = vsel %vm9236_vm5, %v6772_v59, %v1457_v33  ;;  %v8700_v33 = vld [vmem:[%s8858_s10 + $0x44] sm:$0x1]  ;;  %v6775_v55 = vrot.slane %v1389_v14, 9  ;;  %v7133_v14 = vld [vmem:[%s8858_s10 + $0x28] sm:$0xf] }
  0xd0   : > { %v9664_v62 = vsel %vm9236_vm5, %v6773_v51, %v1464_v35  ;;  %v1474_v18 = vrot.slane %v8700_v33, 5  ;;  %v7131_v51 = vld [vmem:[%s8858_s10 + $0x20] sm:$0x1]  ;;  %v1391_v33 = vld [vmem:[%s8858_s10 + $0x60] sm:$0xe] }
  0xd1   : > { %7918 = vmatpush3.bf16.msra.mxu1 %v8620_v24  ;;  %v6759_v24 = vcombine.low %v9372_v28, %v9375_v30 }
  0xd2   : > { %7919 = vmatprep.subr.bf16.mxu1 %v8626_v50 }
  0xd3   : > { %8096 = vmatmul.mubr.bf16.gmra.mrb[28].mxu0 %v7048_v54  ;;  %v8699_v54 = vld [vmem:[%s8858_s10 + $0x38] sm:$0x1] }
  0xd4   : > { %7888 = vmatmul.mubr.bf16.gmra.mrb[12].mxu1 %v6752_v5  ;;  %8115 = vmatprep.mubr.bf16.mxu0 %v8612_v23  ;;  %v1467_v46 = vrot.slane %v8699_v54, 5  ;;  %v1388_v5 = vld [vmem:[%s8858_s10 + $0x3c] sm:$0xe]  ;;  %v1471_v23 = vrot.slane %v9535_v31, 5  ;;  %v9630_v31 = vsel %vm9236_vm5, %v6770_v22, %v1443_v8  ;;  %v3946_v22 = vshll.u32 %v7129_v11, 16  ;;  %v8638_v54 = vld [vmem:[%s11669_s2 + $0x1e0] sm:$0xff]  }
  0xd5   : > { %7891 = vmatprep.mubr.bf16.mxu1 %v6753_v56  ;;  %7920 = vmatpush3.bf16.msra.mxu1 %v8626_v50  ;;  %v1460_v50 = vrot.slane %v8698_v44, 5  ;;  %v9617_v56 = vrot.slane %v2539_v9, 5  ;;  %v8621_v8 = vld [vmem:[%s8858_s10 + $0x3c] sm:$0xff]   ;;  %v9650_v9 = vsel %vm9236_vm5, %v1452_v47, %v1453_v40  ;;  %v1480_v47 = vrot.slane %v1478_v2, 4  ;;  %v7135_v44 = vld [vmem:[%s8858_s10 + $0x30] sm:$0xf] }
  0xd6   : > { %7921 = vmatprep.subr.bf16.mxu1 %v8632_v57  ;;  %v1481_v40 = vrot.slane %v8701_v39, 5  ;;  %v3945_v11 = vrot.slane %v3943_v6, 4 }
  0xd7   : > { %11692 = vst [vmem:[#allocation4_spill] sm:$0xff] %v9617_v56 }
  0xd9   : > { %7922 = vmatpush3.bf16.msra.mxu1 %v8632_v57  ;;  %v8628_v57 = vld [vmem:[%s11669_s2 + $0x1d0] sm:$0xff]  }
  0xda   : > { %7955 = vmatprep.subr.bf16.mxu1 %v9583_v61 }
  0xdb   : > { %8116 = vmatmul.mubr.bf16.vlgmr.msra.gmra.mrb[0].mxu0 %v8615_v7  ;;  %v9638_v7 = vsel %vm9236_vm5, %v1445_v34, %v1446_v36  ;;  %v9658_v36 = vsel %vm9236_vm5, %v1459_v43, %v1460_v50  ;;  %v3952_v34 = vshll.u32 %v7130_v20, 16  ;;  %v3948_v20 = vrot.slane %v3946_v22, 5  ;;  %v1392_v22 = vld [vmem:[%s8858_s10 + $0x6c] sm:$0xe] }
  0xdc   : > { %7892 = vmatmul.mubr.bf16.gmra.mrb[16].mxu1 %v6754_v63  ;;  %8148 = vmatpush3.bf16.msra.mxu0 %v9422_v45  ;;  %v6774_v63 = vrot.slane %v1388_v5, 9  ;;  %v6778_v59 = vrot.slane %v1392_v22, 9 }
  0xdd   : > { %7895 = vmatprep.mubr.bf16.mxu1 %v6755_v37  ;;  %8119 = vmatprep.mubr.bf16.mxu0 %v8618_v19  ;;  %v9668_v37 = vsel %vm9236_vm5, %v1466_v53, %v1467_v46  ;;  %v1473_v19 = vrot.slane %v1471_v23, 4  ;;  %v7132_v53 = vld [vmem:[%s8858_s10 + $0x24] sm:$0xf]  ;;  %v3980_v46 = vshrl.u32 %v7133_v14, 16 }
  0xde   : > { %8149 = vmatprep.subr.bf16.mxu0 %v8622_v48  ;;  %v9685_v50 = vsel %vm9236_vm5, %v6774_v63, %v1471_v23  ;;  %v9702_v23 = vld [vmem:[%s8858_s10 + $0x54] sm:$0xe]  ;;  %v3958_v63 = vrot.slane %v3956_v52, 4  ;;  %v3967_v39 = vshrl.u32 %v7132_v53, 16  ;;  %v3970_v29 = vshll.u32 %v7132_v53, 16 }
  0xdf   : > { %v9699_v5 = vsel %vm9236_vm5, %v1473_v19, %v1474_v18  ;;  %v3962_v18 = vshll.u32 %v7131_v51, 16  ;;  %v6776_v6 = vrot.slane %v9702_v23, 9  ;;  %v8642_v51 = vld [vmem:[%s11669_s2 + $0x1e8] sm:$0xff]   ;;  %v1487_v53 = vrot.slane %v1485_v17, 4 }
  0xe0   : > { %8150 = vmatpush3.bf16.msra.mxu0 %v8622_v48  ;;  %v8634_v48 = vld [vmem:[%s11669_s2 + $0x1d8] sm:$0xff]   ;;  %v3949_v23 = vor.u32 %v3948_v20, %v3945_v11  ;;  %v3969_v35 = vrot.slane %v3967_v39, 4  ;;  %v3972_v45 = vrot.slane %v3970_v29, 5  ;;  %v8706_v11 = vld [vmem:[%s8858_s10 + $0x74] sm:$0x1]  ;;  %v3982_v29 = vrot.slane %v3980_v46, 4 }
  0xe1   : > { %8151 = vmatprep.subr.bf16.mxu0 %v8628_v57  ;;  %v9740_v43 = vrot.slane %v3962_v18, 5  ;;  %v1502_v20 = vrot.slane %v8706_v11, 5  ;;  %v3991_v39 = vshrl.u32 %v7135_v44, 16  ;;  %v9765_v28 = vsel %vm9236_vm5, %v6776_v6, %v1485_v17 }
  0xe2   : > { %v3950_v22 = vrot.slane %v3949_v23, 4 }
  0xe3   : > { %8120 = vmatmul.mubr.bf16.gmra.mrb[4].mxu0 %v8621_v8  ;;  %v9712_v8 = vrot.slane %v3952_v34, 5  ;;  %v8704_v34 = vld [vmem:[%s8858_s10 + $0x70] sm:$0xf] }
  0xe4   : > { %7896 = vmatmul.mubr.bf16.gmra.mrb[20].mxu1 %v6756_v16  ;;  %8123 = vmatprep.mubr.bf16.mxu0 %v8624_v1  ;;  %v1492_v16 = vrot.slane %v9706_v41, 5  ;;  %v8703_v1 = vld [vmem:[%s8858_s10 + $0x5c] sm:$0x1]  ;;  %v1499_v52 = vrot.slane %v8704_v34, 5 }
  0xe5   : > { %7899 = vmatprep.mubr.bf16.mxu1 %v6757_v27  ;;  %8152 = vmatpush3.bf16.msra.mxu0 %v8628_v57  ;;  %v1488_v19 = vrot.slane %v8703_v1, 5  ;;  %v9721_v27 = vsel %vm9236_vm5, %v6775_v55, %v1478_v2  ;;  %v9725_v57 = vsel %vm9236_vm5, %v1480_v47, %v1481_v40  ;;  %v8705_v2 = vld [vmem:[%s8858_s10 + $0x68] sm:$0x1]  ;;  %v3976_v1 = vshll.u32 %v7133_v14, 16  ;;  %v8650_v41 = vld [vmem:[%s11669_s2 + $0x1f8] sm:$0xff]  }
  0xe6   : > { %8153 = vmatprep.subr.bf16.mxu0 %v8634_v48  ;;  %v1495_v55 = vrot.slane %v8705_v2, 5  ;;  %v6777_v47 = vrot.slane %v1391_v33, 9  ;;  %v1494_v40 = vrot.slane %v1492_v16, 4  ;;  %v3959_v34 = vor.u32 %v3958_v63, %v9712_v8  ;;  %v7136_v2 = vld [vmem:[%s8858_s10 + $0x34] sm:$0xf] }
  0xe7   : > { %v1501_v33 = vrot.slane %v1499_v52, 4  ;;  %v7134_v63 = vld [vmem:[%s8858_s10 + $0x2c] sm:$0x1]  ;;  %v9752_v18 = vrot.slane %v3976_v1, 5  ;;  %v4000_v14 = vshll.u32 %v7136_v2, 16  ;;  %v4004_v32 = vshrl.u32 %v7136_v2, 16 }
  0xe8   : > { %v3960_v11 = vrot.slane %v3959_v34, 4  ;;  %v9769_v30 = vsel %vm9236_vm5, %v1487_v53, %v1488_v19  ;;  %v9776_v46 = vsel %vm9236_vm5, %v6777_v47, %v1492_v16  ;;  %v9780_v15 = vsel %vm9236_vm5, %v1494_v40, %v1495_v55  ;;  %v1393_v19 = vld [vmem:[%s8858_s10 + $0x78] sm:$0xe] }
  0xe9   : > { %8154 = vmatpush3.bf16.msra.mxu0 %v8634_v48  ;;  %v9784_v17 = vsel %vm9236_vm5, %v6778_v59, %v1499_v52  ;;  %v9794_v16 = vsel %vm9236_vm5, %v1501_v33, %v1502_v20  ;;  %v3983_v6 = vor.u32 %v3982_v29, %v9752_v18  ;;  %v3993_v53 = vrot.slane %v3991_v39, 4  ;;  %v7138_v59 = vld [vmem:[%s8858_s10 + $0x3c] sm:$0xf]  ;;  %v7139_v52 = vld [vmem:[%s8858_s10 + $0x40] sm:$0xf] }
  0xea   : > { %8155 = vmatprep.subr.bf16.mxu0 %v8638_v54  ;;  %v3955_v1 = vsel %vm8990_vm2, %v3950_v22, %v9712_v8  ;;  %v3965_v47 = vsel %vm8990_vm2, %v3960_v11, %v9740_v43  ;;  %v9805_v40 = vrot.slane %v4000_v14, 5  ;;  %v4006_v23 = vrot.slane %v4004_v32, 4  ;;  %v8708_v20 = vld [vmem:[%s8858_s10 + $0x80] sm:$0x1]  ;;  %v9964_v48 = vld [vmem:[%s8858_s10 + $0x68] sm:$0x1] }
  0xeb   : > { %8124 = vmatmul.mubr.bf16.gmra.mrb[8].mxu0 %v8627_v3  ;;  %v3994_v3 = vshll.u32 %v7135_v44, 16  ;;  %v3986_v44 = vshll.u32 %v7134_v63, 16  ;;  %v6779_v33 = vrot.slane %v1393_v19, 9  ;;  %v1394_v63 = vld [vmem:[%s8858_s10 + $0x84] sm:$0xe]  ;;  %v4015_v29 = vshrl.u32 %v7138_v59, 16 }
  0xec   : > { %7900 = vmatmul.mubr.bf16.gmra.mrb[24].mxu1 %v6758_v21  ;;  %8127 = vmatprep.mubr.bf16.mxu0 %v8630_v4  ;;  %v8646_v21 = vld [vmem:[%s11669_s2 + $0x1f0] sm:$0xff]   ;;  %v8707_v4 = vld [vmem:[%s8858_s10 + $0x7c] sm:$0xf]  ;;  %v4018_v8 = vshll.u32 %v7138_v59, 16  ;;  %v4024_v39 = vshll.u32 %v7139_v52, 16  ;;  %v11693_v43 = vcombine.low %v9395_v42, %v9400_v13  ;;  %v9816_v14 = vrot.slane %v3983_v6, 4 }
  0xed   : > { %7903 = vmatprep.mubr.bf16.mxu1 %v6759_v24  ;;  %8156 = vmatpush3.bf16.msra.mxu0 %v8638_v54  ;;  %v3973_v24 = vor.u32 %v3972_v45, %v3969_v35  ;;  %v8635_v54 = vld [vmem:[%s8858_s10 + $0x78] sm:$0xff]   ;;  %v1506_v45 = vrot.slane %v8707_v4, 5  ;;  %v3996_v55 = vrot.slane %v3994_v3, 5  ;;  %v9809_v2 = vrot.slane %v3986_v44, 5  ;;  %v9821_v22 = vld [vmem:[%s11669_s2 + $0x200] sm:$0xff]   ;;  %11701 = vst [vmem:[#allocation7_spill] sm:$0xff] %v9964_v48 }
  0xee   : > { %8157 = vmatprep.subr.bf16.mxu0 %v8642_v51  ;;  %v7137_v35 = vld [vmem:[%s8858_s10 + $0x38] sm:$0x1]  ;;  %v4028_v3 = vshrl.u32 %v7139_v52, 16  ;;  %v8637_v44 = vld [vmem:[%s8858_s10 + $0x84] sm:$0xff]   ;;  %v4007_v13 = vor.u32 %v4006_v23, %v9805_v40  ;;  %v4020_v59 = vrot.slane %v4018_v8, 5  ;;  %v9843_v52 = vrot.slane %v4024_v39, 5 }
  0xef   : > { %v9807_v34 = vrot.slane %v3973_v24, 4  ;;  %v1508_v11 = vrot.slane %v1506_v45, 4  ;;  %v3997_v32 = vor.u32 %v3996_v55, %v3993_v53  ;;  %v11694_v24 = vcombine.low %v9626_v60, %v9634_v26  ;;  %v8709_v19 = vld [vmem:[%s8858_s10 + $0x88] sm:$0xf]  ;;  %v7140_v6 = vld [vmem:[%s8858_s10 + $0x44] sm:$0x1] }
  0xf0   : > { %v1513_v4 = vrot.slane %v8709_v19, 5  ;;  %v9834_v60 = vcombine.low %v3955_v1, %v3965_v47  ;;  %v7141_v53 = vld [vmem:[%s8858_s10 + $0x48] sm:$0xf]  ;;  %v4017_v55 = vrot.slane %v4015_v29, 4  ;;  %v4030_v23 = vrot.slane %v4028_v3, 4 }
  0xf1   : > { %8158 = vmatpush3.bf16.msra.mxu0 %v8642_v51  ;;  %v1509_v51 = vrot.slane %v8708_v20, 5  ;;  %v8639_v20 = vld [vmem:[%s8858_s10 + $0x90] sm:$0xff]   ;;  %v3979_v1 = vsel %vm8990_vm2, %v9807_v34, %v9752_v18  ;;  %v3998_v47 = vrot.slane %v3997_v32, 4  ;;  %v3989_v29 = vsel %vm8990_vm2, %v9816_v14, %v9809_v2  ;;  %v9865_v34 = vld [vmem:[%s8858_s10 + $0x58] sm:$0xf]  ;;  %v8640_v32 = vld [vmem:[%s11669_s2 + $0xc8] sm:$0xff]  }
  0xf2   : > { %8159 = vmatprep.subr.bf16.mxu0 %v8646_v21  ;;  %v4008_v39 = vrot.slane %v4007_v13, 4  ;;  %v1515_v3 = vrot.slane %v1513_v4, 4  ;;  %v7144_v18 = vld [vmem:[%s8858_s10 + $0x54] sm:$0xf]  ;;  %v4034_v2 = vshll.u32 %v7140_v6, 16  ;;  %v4039_v14 = vshrl.u32 %v7141_v53, 16 }
  0xf3   : > { %8128 = vmatmul.mubr.bf16.gmra.mrb[12].mxu0 %v8633_v49  ;;  %v4010_v49 = vshll.u32 %v7137_v35, 16  ;;  %v9861_v8 = vsel %vm9236_vm5, %v1508_v11, %v1509_v51  ;;  %v4042_v51 = vshll.u32 %v7141_v53, 16  ;;  %v4021_v11 = vor.u32 %v4020_v59, %v4017_v55  ;;  %v8641_v55 = vld [vmem:[%s8858_s10 + $0x9c] sm:$0xff]   ;;  %v8715_v42 = vld [vmem:[%s8858_s10 + $0xac] sm:$0xf] }
  0xf4   : > { %7904 = vmatmul.mubr.bf16.gmra.mrb[28].mxu1 %v11693_v43  ;;  %8131 = vmatprep.mubr.bf16.mxu0 %v8635_v54  ;;  %v6780_v54 = vrot.slane %v1394_v63, 9  ;;  %v8710_v43 = vld [vmem:[%s8858_s10 + $0x8c] sm:$0x1]  ;;  %v4072_v6 = vshll.u32 %v9865_v34, 16  ;;  %v11696_v53 = vcombine.low %v9642_v0, %v9650_v9  ;;  %v9901_v0 = vld [vmem:[%s8858_s10 + $0x50] sm:$0x1] }
  0xf5   : > { %7923 = vmatprep.mubr.bf16.mxu1 %v11694_v24  ;;  %8160 = vmatpush3.bf16.msra.mxu0 %v8646_v21  ;;  %v9840_v21 = vsel %vm9236_vm5, %v6779_v33, %v1506_v45  ;;  %v4012_v63 = vrot.slane %v4010_v49, 5  ;;  %v1516_v24 = vrot.slane %v8710_v43, 5  ;;  %v1395_v45 = vld [vmem:[%s8858_s10 + $0x90] sm:$0xe]  ;;  %v9853_v33 = vld [vmem:[%s8858_s10 + $0x4c] sm:$0xf]  ;;  %v4031_v49 = vor.u32 %v4030_v23, %v9843_v52 }
  0xf6   : > { %8161 = vmatprep.subr.bf16.mxu0 %v8650_v41  ;;  %v4048_v13 = vshll.u32 %v9853_v33, 16  ;;  %v4052_v19 = vshrl.u32 %v9853_v33, 16  ;;  %v11695_v43 = vcombine.low %v9630_v31, %v9638_v7  ;;  %v8644_v31 = vld [vmem:[%s11669_s2 + $0xd0] sm:$0xff]   ;;  %v4003_v7 = vsel %vm8990_vm2, %v3998_v47, %v9805_v40  ;;  %v8643_v9 = vld [vmem:[%s8858_s10 + $0xa8] sm:$0xff]   ;;  %v9908_v40 = vld [vmem:[%s8858_s10 + $0x5c] sm:$0x1] }
  0xf7   : > { %v4013_v59 = vsel %vm8990_vm2, %v4008_v39, %v4012_v63  ;;  %v6781_v23 = vrot.slane %v1395_v45, 9  ;;  %v4044_v26 = vrot.slane %v4042_v51, 5  ;;  %11697 = vst [vmem:[#allocation5_spill] sm:$0xff] %v9908_v40  ;;  %v4022_v47 = vrot.slane %v4021_v11, 4 }
  0xf8   : > { %v4032_v63 = vrot.slane %v4031_v49, 4  ;;  %v9910_v39 = vrot.slane %v4048_v13, 5  ;;  %v9912_v35 = vrot.slane %v4072_v6, 5  ;;  %v9917_v51 = vcombine.low %v3979_v1, %v3989_v29  ;;  %v7147_v29 = vld [vmem:[%s8858_s10 + $0x60] sm:$0xf] }
  0xf9   : > { %8162 = vmatpush3.bf16.msra.mxu0 %v8650_v41  ;;  %v9873_v41 = vsel %vm9236_vm5, %v6780_v54, %v1513_v4  ;;  %v4063_v54 = vshrl.u32 %v7144_v18, 16  ;;  %v4066_v4 = vshll.u32 %v7144_v18, 16  ;;  %v8711_v18 = vld [vmem:[%s8858_s10 + $0x94] sm:$0xf]  ;;  %v9921_v49 = vcombine.low %v4003_v7, %v4013_v59 }
  0xfa   : > { %8195 = vmatprep.subr.bf16.mxu0 %v9821_v22  ;;  %v4058_v1 = vshll.u32 %v9901_v0, 16  ;;  %v4027_v7 = vsel %vm8990_vm2, %v4022_v47, %v9843_v52  ;;  %v11700_v47 = vcombine.low %v9664_v62, %v9668_v37 }
  0xfb   : > { %8132 = vmatmul.mubr.bf16.gmra.mrb[16].mxu0 %v8637_v44  ;;  %v4076_v44 = vshrl.u32 %v9865_v34, 16  ;;  %v4065_v45 = vrot.slane %v4063_v54, 4  ;;  %v8712_v54 = vld [vmem:[%s8858_s10 + $0x98] sm:$0x1] }
  0xfc   : > { %7924 = vmatmul.mubr.bf16.vlgmr.msra.gmra.mrb[0].mxu1 %v11695_v43  ;;  %8135 = vmatprep.mubr.bf16.mxu0 %v8639_v20  ;;  %v9904_v20 = vrot.slane %v4034_v2, 5  ;;  %v1520_v43 = vrot.slane %v8711_v18, 5  ;;  %v8713_v18 = vld [vmem:[%s8858_s10 + $0xa0] sm:$0xf]  ;;  %v4060_v37 = vrot.slane %v4058_v1, 5 }
  0xfd   : > { %7956 = vmatpush3.bf16.msra.mxu1 %v9583_v61  ;;  %7927 = vmatprep.mubr.bf16.mxu1 %v11696_v53  ;;  %v9898_v61 = vsel %vm9236_vm5, %v1515_v3, %v1516_v24  ;;  %v4041_v53 = vrot.slane %v4039_v14, 4  ;;  %v4054_v24 = vrot.slane %v4052_v19, 4  ;;  %v4068_v3 = vrot.slane %v4066_v4, 5  ;;  %v8648_v14 = vld [vmem:[%s11669_s2 + $0xd8] sm:$0xff]  }
  0xfe   : > { %7957 = vmatprep.subr.bf16.mxu1 %v8640_v32  ;;  %v4078_v2 = vrot.slane %v4076_v44, 4  ;;  %v1396_v19 = vld [vmem:[%s8858_s10 + $0x9c] sm:$0xe]  ;;  %v1523_v4 = vrot.slane %v8712_v54, 5  ;;  %v9934_v44 = vld [vmem:[%s8858_s10 + $0x64] sm:$0xf] }
  0xff   : > { %v4045_v6 = vor.u32 %v4044_v26, %v4041_v53  ;;  %11698 = vst [vmem:[#allocation6_spill] sm:$0xff] %v9934_v44  ;;  %v4055_v59 = vor.u32 %v4054_v24, %v9910_v39  ;;  %v1527_v13 = vrot.slane %v8713_v18, 5  ;;  %v11699_v26 = vcombine.low %v9654_v25, %v9658_v36  ;;  %v8645_v24 = vld [vmem:[%s8858_s10 + $0xb4] sm:$0xff]   ;;  %v8651_v25 = vld [vmem:[%s11669_s2 + $0xe0] sm:$0xff]   ;;  %v7150_v18 = vld [vmem:[%s8858_s10 + $0x6c] sm:$0xf] }
 0x100   : > { %v1522_v53 = vrot.slane %v1520_v43, 4  ;;  %v4069_v54 = vor.u32 %v4068_v3, %v4065_v45  ;;  %v4079_v52 = vor.u32 %v4078_v2, %v9912_v35  ;;  %v4087_v36 = vshrl.u32 %v7147_v29, 16  ;;  %v8714_v3 = vld [vmem:[%s8858_s10 + $0xa4] sm:$0x1] }
 0x101   : > { %7958 = vmatpush3.bf16.msra.mxu1 %v8640_v32  ;;  %v9928_v32 = vsel %vm9236_vm5, %v6781_v23, %v1520_v43  ;;  %v4082_v23 = vshll.u32 %v9908_v40, 16  ;;  %v4100_v43 = vshrl.u32 %v9934_v44, 16  ;;  %v4046_v62 = vrot.slane %v4045_v6, 4  ;;  %v10103_v40 = vld [vmem:[%s8858_s10 + $0x98] sm:$0x1] }
 0x102   : > { %7959 = vmatprep.subr.bf16.mxu1 %v8644_v31  ;;  %v6782_v45 = vrot.slane %v1396_v19, 9  ;;  %v1530_v2 = vrot.slane %v8714_v3, 5  ;;  %v4070_v6 = vrot.slane %v4069_v54, 4  ;;  %v4080_v19 = vrot.slane %v4079_v52, 4  ;;  %11714 = vst [vmem:[#allocation16_spill] sm:$0xff] %v10103_v40 }
 0x103   : > { %8136 = vmatmul.mubr.bf16.gmra.mrb[20].mxu0 %v8641_v55  ;;  %v4037_v55 = vsel %vm8990_vm2, %v4032_v63, %v9904_v20  ;;  %v4096_v20 = vshll.u32 %v9934_v44, 16  ;;  %v8647_v63 = vld [vmem:[%s8858_s10 + $0xc0] sm:$0xff]   ;;  %v4084_v11 = vrot.slane %v4082_v23, 5  ;;  %v9970_v44 = vsel %vm9236_vm5, %v1522_v53, %v1523_v4 }
 0x104   : > { %7928 = vmatmul.mubr.bf16.gmra.mrb[4].mxu1 %v11699_v26  ;;  %8139 = vmatprep.mubr.bf16.mxu0 %v8643_v9  ;;  %v4090_v9 = vshll.u32 %v7147_v29, 16  ;;  %v4056_v26 = vrot.slane %v4055_v59, 4  ;;  %v1534_v29 = vrot.slane %v8715_v42, 5  ;;  %v9966_v56 = vcombine.low %v4027_v7, %v4037_v55  ;;  %v8653_v42 = vld [vmem:[%s11669_s2 + $0xe8] sm:$0xff]  }
 0x105   : > { %7931 = vmatprep.mubr.bf16.mxu1 %v11700_v47  ;;  %7960 = vmatpush3.bf16.msra.mxu1 %v8644_v31  ;;  %v1397_v31 = vld [vmem:[%s8858_s10 + $0xa8] sm:$0xe]  ;;  %v1529_v47 = vrot.slane %v1527_v13, 4  ;;  %v4089_v1 = vrot.slane %v4087_v36, 4  ;;  %v9972_v59 = vrot.slane %v4096_v20, 5  ;;  %v4102_v23 = vrot.slane %v4100_v43, 4 }
 0x106   : > { %7961 = vmatprep.subr.bf16.mxu1 %v8648_v14  ;;  %v4092_v3 = vrot.slane %v4090_v9, 5  ;;  %v4051_v4 = vsel %vm8990_vm2, %v4046_v62, %v9910_v39  ;;  %v9982_v7 = vsel %vm9236_vm5, %v6782_v45, %v1527_v13  ;;  %v4111_v55 = vshrl.u32 %v7150_v18, 16  ;;  %v8716_v39 = vld [vmem:[%s8858_s10 + $0xb0] sm:$0x1]  ;;  %v1398_v20 = vld [vmem:[%s8858_s10 + $0xb4] sm:$0xe] }
 0x107   : > { %v4114_v53 = vshll.u32 %v7150_v18, 16  ;;  %v4061_v54 = vsel %vm8990_vm2, %v4056_v26, %v4060_v37  ;;  %v9991_v52 = vsel %vm9236_vm5, %v1529_v47, %v1530_v2  ;;  %v6783_v36 = vrot.slane %v1397_v31, 9  ;;  %v10013_v31 = vld [vmem:[%s8858_s10 + $0x74] sm:$0x1]  ;;  %v8717_v26 = vld [vmem:[%s8858_s10 + $0xb8] sm:$0xf] }
 0x108   : > { %v1537_v9 = vrot.slane %v8716_v39, 5  ;;  %v11703_v13 = vcombine.low %v9685_v50, %v9699_v5  ;;  %v4075_v43 = vsel %vm8990_vm2, %v4070_v6, %v9912_v35  ;;  %v4085_v62 = vsel %vm8990_vm2, %v4080_v19, %v4084_v11  ;;  %v8649_v5 = vld [vmem:[%s8858_s10 + $0xcc] sm:$0xff]   ;;  %11705 = vst [vmem:[#allocation9_spill] sm:$0xff] %v10013_v31  ;;  %v7156_v39 = vld [vmem:[%s8858_s10 + $0x84] sm:$0xf] }
 0x109   : > { %7962 = vmatpush3.bf16.msra.mxu1 %v8648_v14  ;;  %v9985_v14 = vld [vmem:[%s8858_s10 + $0x70] sm:$0xf]  ;;  %v1536_v37 = vrot.slane %v1534_v29, 4  ;;  %v4106_v45 = vshll.u32 %v9964_v48, 16  ;;  %v11704_v50 = vcombine.low %v9721_v27, %v9725_v57  ;;  %v4103_v2 = vor.u32 %v4102_v23, %v9972_v59  ;;  %v10030_v23 = vld [vmem:[%s8858_s10 + $0x7c] sm:$0xf] }
 0x10a   : > { %7963 = vmatprep.subr.bf16.mxu1 %v8651_v25  ;;  %11702 = vst [vmem:[#allocation8_spill] sm:$0xff] %v9985_v14  ;;  %v4120_v35 = vshll.u32 %v9985_v14, 16  ;;  %v4124_v11 = vshrl.u32 %v9985_v14, 16  ;;  %v6784_v18 = vrot.slane %v1398_v20, 9  ;;  %v1541_v47 = vrot.slane %v8717_v26, 5  ;;  %11706 = vst [vmem:[#allocation10_spill] sm:$0xff] %v10030_v23 }
 0x10b   : > { %8140 = vmatmul.mubr.bf16.gmra.mrb[24].mxu0 %v8645_v24  ;;  %v8655_v24 = vld [vmem:[%s11669_s2 + $0xf0] sm:$0xff]   ;;  %v4113_v27 = vrot.slane %v4111_v55, 4  ;;  %v4116_v57 = vrot.slane %v4114_v53, 5  ;;  %v10021_v19 = vcombine.low %v4051_v4, %v4061_v54  ;;  %v10033_v20 = vcombine.low %v4075_v43, %v4085_v62  ;;  %v8718_v4 = vld [vmem:[%s8858_s10 + $0xbc] sm:$0x1] }
 0x10c   : > { %7932 = vmatmul.mubr.bf16.gmra.mrb[8].mxu1 %v11703_v13  ;;  %8143 = vmatprep.mubr.bf16.mxu0 %v8647_v63  ;;  %v4093_v63 = vor.u32 %v4092_v3, %v4089_v1  ;;  %v10027_v3 = vsel %vm9236_vm5, %v6783_v36, %v1534_v29  ;;  %v10037_v55 = vsel %vm9236_vm5, %v1536_v37, %v1537_v9  ;;  %v10039_v53 = vrot.slane %v4106_v45, 5  ;;  %v8657_v13 = vld [vmem:[%s11669_s2 + $0xf8] sm:$0xff]   ;;  %v10046_v29 = vld [vmem:[%s8858_s10 + $0x88] sm:$0xf] }
 0x10d   : > { %7935 = vmatprep.mubr.bf16.mxu1 %v11704_v50  ;;  %7964 = vmatpush3.bf16.msra.mxu1 %v8651_v25  ;;  %v7153_v25 = vld [vmem:[%s8858_s10 + $0x78] sm:$0xf]  ;;  %v1544_v54 = vrot.slane %v8718_v4, 5  ;;  %11707 = vst [vmem:[#allocation11_spill] sm:$0xff] %v10046_v29  ;;  %v10050_v43 = vrot.slane %v4103_v2, 4  ;;  %v10052_v62 = vrot.slane %v4120_v35, 5  ;;  %v10056_v37 = vsel %vm9236_vm5, %v6784_v18, %v1541_v47 }
 0x10e   : > { %7965 = vmatprep.subr.bf16.mxu1 %v8653_v42  ;;  %v10048_v36 = vrot.slane %v4093_v63, 4  ;;  %v4126_v9 = vrot.slane %v4124_v11, 4  ;;  %v1543_v45 = vrot.slane %v1541_v47, 4  ;;  %v4117_v50 = vor.u32 %v4116_v57, %v4113_v27  ;;  %v7159_v4 = vld [vmem:[%s8858_s10 + $0x90] sm:$0xf] }
 0x10f   : > { %v4130_v26 = vshll.u32 %v10013_v31, 16  ;;  %v4138_v1 = vshll.u32 %v7153_v25, 16  ;;  %v4144_v63 = vshll.u32 %v10030_v23, 16  ;;  %v4148_v2 = vshrl.u32 %v10030_v23, 16  ;;  %v10063_v35 = vld [vmem:[%s8858_s10 + $0x94] sm:$0xf] }
 0x110   : > { %11708 = vst [vmem:[#allocation12_spill] sm:$0xff] %v10063_v35  ;;  %v11709_v11 = vcombine.low %v9765_v28, %v9769_v30  ;;  %v4159_v18 = vshrl.u32 %v7156_v39, 16  ;;  %v4162_v47 = vshll.u32 %v7156_v39, 16  ;;  %v4172_v27 = vshrl.u32 %v10046_v29, 16  ;;  %v7162_v39 = vld [vmem:[%s8858_s10 + $0x9c] sm:$0xf] }
 0x111   : > { %7966 = vmatpush3.bf16.msra.mxu1 %v8653_v42  ;;  %v4135_v42 = vshrl.u32 %v7153_v25, 16  ;;  %v11710_v57 = vcombine.low %v9776_v46, %v9780_v15  ;;  %v4127_v30 = vor.u32 %v4126_v9, %v10052_v62  ;;  %v4186_v25 = vshll.u32 %v7159_v4, 16  ;;  %v10085_v46 = vld [vmem:[%s8858_s10 + $0x80] sm:$0x1] }
 0x112   : > { %7967 = vmatprep.subr.bf16.mxu1 %v8655_v24  ;;  %v10082_v6 = vrot.slane %v4130_v26, 5  ;;  %11711 = vst [vmem:[#allocation13_spill] sm:$0xff] %v10085_v46  ;;  %v4192_v15 = vshll.u32 %v10063_v35, 16  ;;  %v4140_v28 = vrot.slane %v4138_v1, 5  ;;  %v4150_v9 = vrot.slane %v4148_v2, 4 }
 0x113   : > { %8144 = vmatmul.mubr.bf16.gmra.mrb[28].mxu0 %v8649_v5  ;;  %v4168_v5 = vshll.u32 %v10046_v29, 16  ;;  %v10089_v29 = vrot.slane %v4144_v63, 5  ;;  %v10095_v23 = vld [vmem:[%s8858_s10 + $0xa0] sm:$0xf]  ;;  %v4161_v26 = vrot.slane %v4159_v18, 4  ;;  %v4164_v31 = vrot.slane %v4162_v47, 5 }
 0x114   : > { %7936 = vmatmul.mubr.bf16.gmra.mrb[12].mxu1 %v11709_v11  ;;  %8163 = vmatprep.mubr.bf16.mxu0 %v9834_v60  ;;  %v4183_v60 = vshrl.u32 %v7159_v4, 16  ;;  %v10080_v11 = vrot.slane %v4117_v50, 4  ;;  %v10092_v4 = vld [vmem:[%s8858_s10 + $0x8c] sm:$0x1]  ;;  %11713 = vst [vmem:[#allocation15_spill] sm:$0xff] %v10095_v23  ;;  %v4174_v48 = vrot.slane %v4172_v27, 4  ;;  %v10112_v63 = vsel %vm9236_vm5, %v1543_v45, %v1544_v54 }
 0x115   : > { %7939 = vmatprep.mubr.bf16.mxu1 %v11710_v57  ;;  %7968 = vmatpush3.bf16.msra.mxu1 %v8655_v24  ;;  %v4196_v24 = vshrl.u32 %v10063_v35, 16  ;;  %v4137_v57 = vrot.slane %v4135_v42, 4  ;;  %11712 = vst [vmem:[#allocation14_spill] sm:$0xff] %v10092_v4  ;;  %v8654_v50 = vld [vmem:[%s11669_s2 + $0x208] sm:$0xff]   ;;  %v10100_v14 = vrot.slane %v4168_v5, 5  ;;  %v4188_v35 = vrot.slane %v4186_v25, 5 }
 0x116   : > { %7969 = vmatprep.subr.bf16.mxu1 %v8657_v13  ;;  %v7165_v42 = vld [vmem:[%s8858_s10 + $0xa8] sm:$0xf]  ;;  %v4185_v2 = vrot.slane %v4183_v60, 4  ;;  %v10117_v18 = vld [vmem:[%s11669_s2 + $0x100] sm:$0xff]   ;;  %v10120_v47 = vrot.slane %v4192_v15, 5  ;;  %v4207_v27 = vshrl.u32 %v7162_v39, 16  ;;  %v11716_v25 = vcombine.low %v9784_v17, %v9794_v16 }
 0x117   : > { %11715 = vst [vmem:[#allocation17_spill] sm:$0xff] %v10117_v18  ;;  %v4198_v5 = vrot.slane %v4196_v24, 4  ;;  %v4210_v1 = vshll.u32 %v7162_v39, 16  ;;  %v10123_v54 = vrot.slane %v4127_v30, 4  ;;  %v4216_v45 = vshll.u32 %v10095_v23, 16  ;;  %v8656_v17 = vld [vmem:[%s11669_s2 + $0x210] sm:$0xff]  }
 0x118   : > { %v4220_v60 = vshrl.u32 %v10095_v23, 16  ;;  %v4141_v15 = vor.u32 %v4140_v28, %v4137_v57  ;;  %v4151_v39 = vor.u32 %v4150_v9, %v10089_v29  ;;  %v4165_v24 = vor.u32 %v4164_v31, %v4161_v26  ;;  %v10135_v30 = vld [vmem:[%s8858_s10 + $0xac] sm:$0xf]  ;;  %v10148_v26 = vld [vmem:[%s8858_s10 + $0xa4] sm:$0x1] }
 0x119   : > { %7970 = vmatpush3.bf16.msra.mxu1 %v8657_v13  ;;  %v4154_v13 = vshll.u32 %v10085_v46, 16  ;;  %11717 = vst [vmem:[#allocation18_spill] sm:$0xff] %v10135_v30  ;;  %v4175_v16 = vor.u32 %v4174_v48, %v10100_v14  ;;  %v4231_v28 = vshrl.u32 %v7165_v42, 16  ;;  %v4234_v31 = vshll.u32 %v7165_v42, 16 }
 0x11a   : > { %8243 = vmatprep.subr.bf16.mxu1 %v10117_v18  ;;  %v11718_v18 = vcombine.low %v9840_v21, %v9861_v8  ;;  %v4189_v57 = vor.u32 %v4188_v35, %v4185_v2  ;;  %v4199_v9 = vor.u32 %v4198_v5, %v10120_v47  ;;  %v4209_v21 = vrot.slane %v4207_v27, 4 }
 0x11b   : > { %8164 = vmatmul.mubr.bf16.vlgmr.msra.gmra.mrb[0].mxu0 %v9917_v51  ;;  %v4178_v51 = vshll.u32 %v10092_v4, 16  ;;  %v4212_v8 = vrot.slane %v4210_v1, 5  ;;  %v4244_v23 = vshrl.u32 %v10135_v30, 16  ;;  %v4142_v48 = vrot.slane %v4141_v15, 4  ;;  %v8658_v1 = vld [vmem:[%s11669_s2 + $0x218] sm:$0xff]  }
 0x11c   : > { %7940 = vmatmul.mubr.bf16.gmra.mrb[16].mxu1 %v11716_v25  ;;  %8196 = vmatpush3.bf16.msra.mxu0 %v9821_v22  ;;  %v4202_v22 = vshll.u32 %v10103_v40, 16  ;;  %v4240_v25 = vshll.u32 %v10135_v30, 16  ;;  %v4152_v40 = vrot.slane %v4151_v39, 4  ;;  %v4156_v4 = vrot.slane %v4154_v13, 5 }
 0x11d   : > { %7943 = vmatprep.mubr.bf16.mxu1 %v11718_v18  ;;  %8167 = vmatprep.mubr.bf16.mxu0 %v9921_v49  ;;  %v10150_v18 = vrot.slane %v4216_v45, 5  ;;  %v4222_v49 = vrot.slane %v4220_v60, 4  ;;  %v4180_v42 = vrot.slane %v4178_v51, 5  ;;  %v4166_v35 = vrot.slane %v4165_v24, 4 }
 0x11e   : > { %8197 = vmatprep.subr.bf16.mxu0 %v8654_v50  ;;  %v4176_v2 = vrot.slane %v4175_v16, 4  ;;  %v4233_v5 = vrot.slane %v4231_v28, 4  ;;  %v4236_v46 = vrot.slane %v4234_v31, 5  ;;  %v4190_v27 = vrot.slane %v4189_v57, 4  ;;  %v10216_v28 = vld [vmem:[%s8858_s10 + $0xbc] sm:$0x1] }
 0x11f   : > { %v4204_v45 = vrot.slane %v4202_v22, 5  ;;  %v4213_v60 = vor.u32 %v4212_v8, %v4209_v21  ;;  %v4226_v30 = vshll.u32 %v10148_v26, 16  ;;  %v4223_v13 = vor.u32 %v4222_v49, %v10150_v18  ;;  %v10183_v22 = vld [vmem:[%s8858_s10 + $0xb0] sm:$0x1] }
 0x120   : > { %8198 = vmatpush3.bf16.msra.mxu0 %v8654_v50  ;;  %v4200_v50 = vrot.slane %v4199_v9, 4  ;;  %v10160_v15 = vrot.slane %v4240_v25, 5  ;;  %v4246_v39 = vrot.slane %v4244_v23, 4  ;;  %v11719_v24 = vor.u32 %v9568_v58, %v9566_v12 }
 0x121   : > { %8199 = vmatprep.subr.bf16.mxu0 %v8656_v17  ;;  %v11720_v16 = vcombine.low %v9873_v41, %v9898_v61  ;;  %v4133_v23 = vsel %vm8990_vm2, %v10123_v54, %v10082_v6  ;;  %v4147_v58 = vsel %vm8990_vm2, %v4142_v48, %v10089_v29  ;;  %v11721_v41 = vcombine.low %v9928_v32, %v9970_v44  ;;  %v8661_v32 = vld [vmem:[%s11669_s2 + $0x220] sm:$0xff]  }
 0x122   : > { %v10165_v51 = vrot.slane %v11719_v24, 4  ;;  %v4157_v61 = vsel %vm8990_vm2, %v4152_v40, %v4156_v4  ;;  %v4237_v6 = vor.u32 %v4236_v46, %v4233_v5  ;;  %v4181_v29 = vsel %vm8990_vm2, %v4176_v2, %v4180_v42  ;;  %v7221_v42 = vld [vmem:[%s8858_s10 + $0x48] sm:$0xe] }
 0x123   : > { %8168 = vmatmul.mubr.bf16.gmra.mrb[4].mxu0 %v9966_v56  ;;  %v4123_v56 = vsel %vm8990_vm2, %v10080_v11, %v10052_v62  ;;  %v7168_v62 = vld [vmem:[%s8858_s10 + $0xb4] sm:$0xf]  ;;  %v10195_v11 = vld [vmem:[%s8858_s10 + $0xb8] sm:$0xf]  ;;  %v4195_v40 = vsel %vm8990_vm2, %v4190_v27, %v10120_v47  ;;  %v10205_v44 = vrot.slane %v4213_v60, 4  ;;  %v10207_v4 = vrot.slane %v4226_v30, 5 }
 0x124   : > { %7944 = vmatmul.mubr.bf16.gmra.mrb[20].mxu1 %v11720_v16  ;;  %8171 = vmatprep.mubr.bf16.mxu0 %v10021_v19  ;;  %v4171_v19 = vsel %vm8990_vm2, %v4166_v35, %v10100_v14  ;;  %v4205_v14 = vsel %vm8990_vm2, %v4200_v50, %v4204_v45  ;;  %v10211_v46 = vrot.slane %v4223_v13, 4  ;;  %v4247_v54 = vor.u32 %v4246_v39, %v10160_v15  ;;  %v7222_v27 = vld [vmem:[%s8858_s10 + $0x54] sm:$0xe] }
 0x125   : > { %7947 = vmatprep.mubr.bf16.mxu1 %v11721_v41  ;;  %8200 = vmatpush3.bf16.msra.mxu0 %v8656_v17  ;;  %v4250_v17 = vshll.u32 %v10183_v22, 16  ;;  %v11722_v47 = vsel %vm8990_vm2, %v10050_v43, %v10039_v53  ;;  %v11723_v30 = vsel %vm8990_vm2, %v10048_v36, %v9972_v59  ;;  %v4255_v57 = vshrl.u32 %v7168_v62, 16 }
 0x126   : > { %8201 = vmatprep.subr.bf16.mxu0 %v8658_v1  ;;  %v7199_v31 = vcombine.low %v11723_v30, %v11722_v47  ;;  %v4258_v9 = vshll.u32 %v7168_v62, 16  ;;  %v4264_v21 = vshll.u32 %v10195_v11, 16  ;;  %v6815_v8 = vcombine.low %v10027_v3, %v10037_v55  ;;  %v8664_v3 = vld [vmem:[%s11669_s2 + $0x228] sm:$0xff]   ;;  %v7171_v55 = vld [vmem:[%s8858_s10 + $0xc0] sm:$0xf]  ;;  %v11727_v30 = vld [vmem:[#allocation7_spill] sm:$0xff] }
 0x127   : > { %v6816_v49 = vcombine.low %v10056_v37, %v10112_v63  ;;  %v7200_v25 = vcombine.low %v4123_v56, %v4133_v23  ;;  %v10233_v53 = vrot.slane %v4237_v6, 4  ;;  %v7201_v43 = vcombine.low %v4147_v58, %v4157_v61 }
 0x128   : > { %v10235_v59 = vcombine.low %v4171_v19, %v4181_v29  ;;  %v10237_v36 = vcombine.low %v4195_v40, %v4205_v14  ;;  %v4219_v48 = vsel %vm8990_vm2, %v10205_v44, %v10150_v18  ;;  %v4229_v35 = vsel %vm8990_vm2, %v10211_v46, %v10207_v4  ;;  %v7224_v29 = vld [vmem:[%s8858_s10 + $0x6c] sm:$0xe] }
 0x129   : > { %8202 = vmatpush3.bf16.msra.mxu0 %v8658_v1  ;;  %v10253_v2 = vrot.slane %v4247_v54, 4  ;;  %v10255_v5 = vrot.slane %v4250_v17, 5  ;;  %v4268_v1 = vshrl.u32 %v10195_v11, 16  ;;  %v11724_v45 = vcombine.low %v9982_v7, %v9991_v52  ;;  %v8667_v7 = vld [vmem:[%s11669_s2 + $0x230] sm:$0xff]   ;;  %v10277_v52 = vld [vmem:[%s8858_s10 + $0xc4] sm:$0xf] }
 0x12a   : > { %8203 = vmatprep.subr.bf16.mxu0 %v8661_v32  ;;  %v10262_v60 = vrot.slane %v4255_v57, 4  ;;  %v10266_v50 = vrot.slane %v4264_v21, 5  ;;  %v4274_v13 = vshll.u32 %v10216_v28, 16  ;;  %v4243_v39 = vsel %vm8990_vm2, %v10233_v53, %v10160_v15  ;;  %v7223_v15 = vld [vmem:[%s8858_s10 + $0x60] sm:$0xe]  ;;  %v11725_v40 = vld [vmem:[#allocation5_spill] sm:$0xff] }
 0x12b   : > { %8172 = vmatmul.mubr.bf16.gmra.mrb[8].mxu0 %v10033_v20  ;;  %v10264_v20 = vrot.slane %v4258_v9, 5  ;;  %v4279_v24 = vshrl.u32 %v7171_v55, 16  ;;  %v7237_v16 = vrot.slane %v7221_v42, 9  ;;  %v4742_v56 = vrot.slane %v9853_v33, 5  ;;  %v8659_v14 = vld [vmem:[%s8858_s10 + $0xc] sm:$0xff]   ;;  %v8670_v57 = vld [vmem:[%s11669_s2 + $0x238] sm:$0xff]  }
 0x12c   : > { %7948 = vmatmul.mubr.bf16.gmra.mrb[24].mxu1 %v11724_v45  ;;  %8175 = vmatprep.mubr.bf16.mxu0 %v7199_v31  ;;  %v4282_v23 = vshll.u32 %v7171_v55, 16  ;;  %v4745_v58 = vrot.slane %v9901_v0, 5  ;;  %v7238_v41 = vrot.slane %v7222_v27, 9  ;;  %v4749_v61 = vrot.slane %v9865_v34, 5  ;;  %v11726_v17 = vld [vmem:[#allocation6_spill] sm:$0xff]  ;;  %v11728_v53 = vld [vmem:[#allocation8_spill] sm:$0xff] }
 0x12d   : > { %7951 = vmatprep.mubr.bf16.mxu1 %v6815_v8  ;;  %8204 = vmatpush3.bf16.msra.mxu0 %v8661_v32  ;;  %v4253_v19 = vsel %vm8990_vm2, %v10253_v2, %v10255_v5  ;;  %v10287_v6 = vrot.slane %v4268_v1, 4  ;;  %v10291_v62 = vsel %vm9236_vm5, %v7237_v16, %v4742_v56  ;;  %v4744_v33 = vrot.slane %v4742_v56, 4  ;;  %v11729_v5 = vld [vmem:[#allocation9_spill] sm:$0xff] }
 0x12e   : > { %8205 = vmatprep.subr.bf16.mxu0 %v8664_v3  ;;  %v4288_v32 = vshll.u32 %v10277_v52, 16  ;;  %v10297_v0 = vsel %vm9236_vm5, %v7238_v41, %v4749_v61  ;;  %v4751_v34 = vrot.slane %v4749_v61, 4  ;;  %v4752_v4 = vrot.slane %v11725_v40, 5  ;;  %v10328_v27 = vld [vmem:[%s8858_s10 + $0xc8] sm:$0x1]  ;;  %v8660_v41 = vld [vmem:[%s8858_s10 + $0x18] sm:$0xff]  }
 0x12f   : > { %v10303_v46 = vsel %vm9236_vm5, %v4744_v33, %v4745_v58  ;;  %v7239_v54 = vrot.slane %v7223_v15, 9  ;;  %v4756_v47 = vrot.slane %v11726_v17, 5  ;;  %v4759_v31 = vrot.slane %v11727_v30, 5  ;;  %v8662_v40 = vld [vmem:[%s8858_s10 + $0x24] sm:$0xff]  }
 0x130   : > { %v7269_v9 = vcombine.low %v10291_v62, %v10303_v46  ;;  %v10314_v21 = vsel %vm9236_vm5, %v4751_v34, %v4752_v4  ;;  %v7240_v8 = vrot.slane %v7224_v29, 9  ;;  %v4766_v1 = vrot.slane %v11729_v5, 5  ;;  %v11731_v29 = vld [vmem:[#allocation13_spill] sm:$0xff]  ;;  %v6930_v62 = vld [vmem:[%s8858_s10 + $0x90] sm:$0xf] }
 0x131   : > { %8206 = vmatpush3.bf16.msra.mxu0 %v8664_v3  ;;  %v4763_v3 = vrot.slane %v11728_v53, 5  ;;  %v7270_v55 = vcombine.low %v10297_v0, %v10314_v21  ;;  %v10321_v42 = vsel %vm9236_vm5, %v7239_v54, %v4756_v47  ;;  %v4758_v2 = vrot.slane %v4756_v47, 4  ;;  %v11732_v54 = vld [vmem:[#allocation4_spill] sm:$0xff]  ;;  %v8676_v46 = vld [vmem:[%s8858_s10 + $0xa8] sm:$0xff]  }
 0x132   : > { %8207 = vmatprep.subr.bf16.mxu0 %v8667_v7  ;;  %v10330_v45 = vrot.slane %v4279_v24, 4  ;;  %v10343_v37 = vcombine.low %v4219_v48, %v4229_v35  ;;  %v4261_v63 = vor.u32 %v10264_v20, %v10262_v60  ;;  %v7225_v24 = vld [vmem:[%s8858_s10 + $0x78] sm:$0xe]  ;;  %v10355_v58 = vrot.slane %v4274_v13, 5  ;;  %v7174_v13 = vld [vmem:[%s8858_s10 + $0xcc] sm:$0xf] }
 0x133   : > { %8176 = vmatmul.mubr.bf16.gmra.mrb[12].mxu0 %v7200_v25  ;;  %v10332_v25 = vrot.slane %v4282_v23, 5  ;;  %v10336_v16 = vsel %vm9236_vm5, %v7240_v8, %v4763_v3  ;;  %v4765_v56 = vrot.slane %v4763_v3, 4  ;;  %v10353_v23 = vcombine.low %v4243_v39, %v4253_v19  ;;  %v6924_v48 = vld [vmem:[%s8858_s10 + $0x78] sm:$0xf]  ;;  %v11730_v19 = vld [vmem:[#allocation10_spill] sm:$0xff] }
 0x134   : > { %7952 = vmatmul.mubr.bf16.gmra.mrb[28].mxu1 %v6816_v49  ;;  %8179 = vmatprep.mubr.bf16.mxu0 %v7201_v43  ;;  %v4292_v49 = vshrl.u32 %v10277_v52, 16  ;;  %v10350_v43 = vsel %vm9236_vm5, %v4758_v2, %v4759_v31  ;;  %v4271_v35 = vor.u32 %v10287_v6, %v10266_v50  ;;  %v10366_v60 = vrot.slane %v4288_v32, 5  ;;  %v10380_v32 = vld [vmem:[%s8858_s10 + $0xd0] sm:$0xf]  ;;  %v11733_v2 = vld [vmem:[#allocation11_spill] sm:$0xff] }
 0x135   : > { %7971 = vmatprep.mubr.bf16.mxu1 %v8659_v14  ;;  %8208 = vmatpush3.bf16.msra.mxu0 %v8667_v7  ;;  %v7271_v18 = vcombine.low %v10321_v42, %v10350_v43  ;;  %v10361_v44 = vsel %vm9236_vm5, %v4765_v56, %v4766_v1  ;;  %v4298_v20 = vshll.u32 %v10328_v27, 16  ;;  %v7226_v7 = vld [vmem:[%s8858_s10 + $0x84] sm:$0xe]  ;;  %v4285_v61 = vor.u32 %v10332_v25, %v10330_v45  ;;  %v11734_v25 = vld [vmem:[#allocation14_spill] sm:$0xff]  ;;  %v8740_v0 = vld [vmem:[%s8858_s10 + $0x8c] sm:$0x1] }
 0x136   : > { %8209 = vmatprep.subr.bf16.mxu0 %v8670_v57  ;;  %v7272_v39 = vcombine.low %v10336_v16, %v10361_v44  ;;  %v7241_v15 = vrot.slane %v7225_v24, 9  ;;  %v4770_v33 = vrot.slane %v11730_v19, 5  ;;  %v4773_v34 = vrot.slane %v11731_v29, 5 }
 0x137   : > { %v4294_v6 = vrot.slane %v4292_v49, 4  ;;  %v2520_v4 = vshrl.u32 %v6924_v48, 16  ;;  %v2523_v14 = vshll.u32 %v6924_v48, 16  ;;  %v2542_v17 = vsel %vm8990_vm2, %v10165_v51, %v11732_v54 }
 0x138   : > { %v4303_v47 = vshrl.u32 %v7174_v13, 16  ;;  %v10388_v30 = vsel %vm9236_vm5, %v7241_v15, %v4770_v33  ;;  %v4772_v31 = vrot.slane %v4770_v33, 4  ;;  %v7242_v8 = vrot.slane %v7226_v7, 9  ;;  %v8720_v7 = vld [vmem:[%s11669_s2 + $0x108] sm:$0xff]  }
 0x139   : > { %8210 = vmatpush3.bf16.msra.mxu0 %v8670_v57  ;;  %v4306_v53 = vshll.u32 %v7174_v13, 16  ;;  %v2522_v3 = vrot.slane %v2520_v4, 4  ;;  %v2525_v57 = vrot.slane %v2523_v14, 5  ;;  %v4777_v5 = vrot.slane %v11733_v2, 5  ;;  %v7227_v13 = vld [vmem:[%s8858_s10 + $0x90] sm:$0xe] }
 0x13a   : > { %v4312_v51 = vshll.u32 %v10380_v32, 16  ;;  %v4316_v1 = vshrl.u32 %v10380_v32, 16  ;;  %v10397_v45 = vsel %vm9236_vm5, %v4772_v31, %v4773_v34  ;;  %v4780_v56 = vrot.slane %v11734_v25, 5  ;;  %v8663_v4 = vld [vmem:[%s8858_s10 + $0x30] sm:$0xff]  }
 0x13b   : > { %8180 = vmatmul.mubr.bf16.gmra.mrb[16].mxu0 %v10235_v59  ;;  %v11735_v59 = vld [vmem:[#allocation17_spill] sm:$0xff]  ;;  %v4295_v49 = vor.u32 %v4294_v6, %v10366_v60  ;;  %v2526_v24 = vor.u32 %v2525_v57, %v2522_v3  ;;  %v4779_v48 = vrot.slane %v4777_v5, 4  ;;  %v4272_v15 = vrot.slane %v4271_v35, 4  ;;  %v10418_v14 = vld [vmem:[%s8858_s10 + $0xd4] sm:$0x1]  ;;  %v11736_v3 = vld [vmem:[#allocation12_spill] sm:$0xff] }
 0x13c   : > { %7972 = vmatmul.mubr.bf16.vlgmr.msra.gmra.mrb[0].mxu1 %v8660_v41  ;;  %8183 = vmatprep.mubr.bf16.mxu0 %v10237_v36  ;;  %v7273_v36 = vcombine.low %v10388_v30, %v10397_v45  ;;  %v4262_v41 = vrot.slane %v4261_v63, 4  ;;  %v4300_v19 = vrot.slane %v4298_v20, 5  ;;  %v10410_v33 = vsel %vm9236_vm5, %v7242_v8, %v4777_v5  ;;  %v8665_v20 = vld [vmem:[%s8858_s10 + $0x3c] sm:$0xff]   ;;  %v8721_v2 = vld [vmem:[%s11669_s2 + $0x110] sm:$0xff]  }
 0x13d   : > { %8251 = vmatpush3.bf16.msra.mxu1 %v11735_v59  ;;  %7975 = vmatprep.mubr.bf16.mxu1 %v8662_v40  ;;  %v4305_v29 = vrot.slane %v4303_v47, 4  ;;  %v4308_v34 = vrot.slane %v4306_v53, 5  ;;  %v2527_v40 = vrot.slane %v2526_v24, 4  ;;  %v10414_v6 = vsel %vm9236_vm5, %v4779_v48, %v4780_v56  ;;  %v8722_v48 = vld [vmem:[%s8858_s10 + $0x1c] sm:$0xf] }
 0x13e   : > { %8244 = vmatprep.subr.bf16.mxu1 %v8720_v7  ;;  %v10420_v54 = vrot.slane %v4312_v51, 5  ;;  %v4318_v31 = vrot.slane %v4316_v1, 4  ;;  %v7274_v63 = vcombine.low %v10410_v33, %v10414_v6  ;;  %v7243_v35 = vrot.slane %v7227_v13, 9 }
 0x13f   : > { %v4286_v8 = vrot.slane %v4285_v61, 4  ;;  %v4296_v47 = vrot.slane %v4295_v49, 4  ;;  %v2532_v53 = vsel %vm8990_vm2, %v2527_v40, %v9566_v12  ;;  %v4784_v57 = vrot.slane %v11736_v3, 5  ;;  %v11737_v12 = vld [vmem:[#allocation16_spill] sm:$0xff]  ;;  %v8666_v40 = vld [vmem:[%s8858_s10 + $0x48] sm:$0xff]  }
 0x140   : > { %v4267_v5 = vsel %vm8990_vm2, %v4262_v41, %v10266_v50  ;;  %v4277_v61 = vsel %vm8990_vm2, %v4272_v15, %v10355_v58  ;;  %v10438_v51 = vcombine.low %v2532_v53, %v2542_v17  ;;  %v4787_v1 = vrot.slane %v11737_v12, 5  ;;  %v7217_v58 = vld [vmem:[%s8858_s10 + $0x18] sm:$0xe]  ;;  %v7228_v17 = vld [vmem:[%s8858_s10 + $0x9c] sm:$0xe] }
 0x141   : > { %8252 = vmatpush3.bf16.msra.mxu1 %v8720_v7  ;;  %v4309_v25 = vor.u32 %v4308_v34, %v4305_v29  ;;  %v4322_v56 = vshll.u32 %v10418_v14, 16  ;;  %v10445_v59 = vsel %vm9236_vm5, %v7243_v35, %v4784_v57  ;;  %v4786_v49 = vrot.slane %v4784_v57, 4  ;;  %v8723_v41 = vld [vmem:[%s11669_s2 + $0x118] sm:$0xff]   ;;  %v8724_v3 = vld [vmem:[%s8858_s10 + $0x20] sm:$0x1] }
 0x142   : > { %8245 = vmatprep.subr.bf16.mxu1 %v8721_v2  ;;  %v4319_v50 = vor.u32 %v4318_v31, %v10420_v54  ;;  %v4301_v24 = vsel %vm8990_vm2, %v4296_v47, %v4300_v19  ;;  %v4714_v13 = vrot.slane %v8722_v48, 5  ;;  %v7206_v7 = vcombine.low %v4267_v5, %v4277_v61  ;;  %v11738_v35 = vld [vmem:[#allocation15_spill] sm:$0xff]  ;;  %v7229_v12 = vld [vmem:[%s8858_s10 + $0xa8] sm:$0xe] }
 0x143   : > { %8184 = vmatmul.mubr.bf16.gmra.mrb[20].mxu0 %v10343_v37  ;;  %v4291_v37 = vsel %vm8990_vm2, %v4286_v8, %v10366_v60  ;;  %v4310_v15 = vrot.slane %v4309_v25, 4  ;;  %v4324_v29 = vrot.slane %v4322_v56, 5  ;;  %v7233_v19 = vrot.slane %v7217_v58, 9  ;;  %v8668_v47 = vld [vmem:[%s8858_s10 + $0x54] sm:$0xff]   ;;  %v7218_v56 = vld [vmem:[%s8858_s10 + $0x24] sm:$0xe] }
 0x144   : > { %7976 = vmatmul.mubr.bf16.gmra.mrb[4].mxu1 %v8663_v4  ;;  %8187 = vmatprep.mubr.bf16.mxu0 %v10353_v23  ;;  %v10459_v23 = vsel %vm9236_vm5, %v4786_v49, %v4787_v1  ;;  %v7244_v34 = vrot.slane %v7228_v17, 9  ;;  %v7207_v4 = vcombine.low %v4291_v37, %v4301_v24  ;;  %v4320_v31 = vrot.slane %v4319_v50, 4  ;;  %v8726_v49 = vld [vmem:[%s8858_s10 + $0x28] sm:$0xf]  ;;  %v8727_v37 = vld [vmem:[%s8858_s10 + $0x34] sm:$0xf] }
 0x145   : > { %7979 = vmatprep.mubr.bf16.mxu1 %v8665_v20  ;;  %8253 = vmatpush3.bf16.msra.mxu1 %v8721_v2  ;;  %v7275_v60 = vcombine.low %v10445_v59, %v10459_v23  ;;  %v4791_v20 = vrot.slane %v11738_v35, 5  ;;  %v4794_v8 = vrot.slane %v10148_v26, 5  ;;  %v4716_v53 = vrot.slane %v4714_v13, 4  ;;  %v8725_v2 = vld [vmem:[%s11669_s2 + $0x120] sm:$0xff]  }
 0x146   : > { %8246 = vmatprep.subr.bf16.mxu1 %v8723_v41  ;;  %v4717_v57 = vrot.slane %v8724_v3, 5  ;;  %v4715_v26 = vsel %vm9236_vm5, %v7233_v19, %v4714_v13  ;;  %v4315_v1 = vsel %vm8990_vm2, %v4310_v15, %v10420_v54  ;;  %v4325_v25 = vsel %vm8990_vm2, %v4320_v31, %v4324_v29  ;;  %v7219_v13 = vld [vmem:[%s8858_s10 + $0x30] sm:$0xe]  ;;  %v8669_v31 = vld [vmem:[%s8858_s10 + $0x60] sm:$0xff]  }
 0x147   : > { %v10476_v5 = vsel %vm9236_vm5, %v7244_v34, %v4791_v20  ;;  %v4793_v61 = vrot.slane %v4791_v20, 4  ;;  %v4721_v50 = vrot.slane %v8726_v49, 5  ;;  %v4728_v24 = vrot.slane %v8727_v37, 5  ;;  %v8729_v34 = vld [vmem:[%s8858_s10 + $0x2c] sm:$0x1] }
 0x148   : > { %v4718_v17 = vsel %vm9236_vm5, %v4716_v53, %v4717_v57  ;;  %v7245_v48 = vrot.slane %v7229_v12, 9  ;;  %v7208_v29 = vcombine.low %v4315_v1, %v4325_v25  ;;  %v7234_v19 = vrot.slane %v7218_v56, 9  ;;  %v8671_v53 = vld [vmem:[%s8858_s10 + $0x6c] sm:$0xff]   ;;  %v7230_v12 = vld [vmem:[%s8858_s10 + $0xb4] sm:$0xe] }
 0x149   : > { %8254 = vmatpush3.bf16.msra.mxu1 %v8723_v41  ;;  %v10490_v58 = vsel %vm9236_vm5, %v4793_v61, %v4794_v8  ;;  %v11739_v41 = vld [vmem:[#allocation18_spill] sm:$0xff]  ;;  %v7265_v35 = vcombine.low %v4715_v26, %v4718_v17  ;;  %v4723_v20 = vrot.slane %v4721_v50, 4  ;;  %v7235_v3 = vrot.slane %v7219_v13, 9  ;;  %v7220_v1 = vld [vmem:[%s8858_s10 + $0x3c] sm:$0xe] }
 0x14a   : > { %8247 = vmatprep.subr.bf16.mxu1 %v8725_v2  ;;  %v7276_v54 = vcombine.low %v10476_v5, %v10490_v58  ;;  %v4798_v15 = vrot.slane %v11739_v41, 5  ;;  %v4730_v57 = vrot.slane %v4728_v24, 4  ;;  %v8731_v25 = vld [vmem:[%s8858_s10 + $0x40] sm:$0xf]  ;;  %v4722_v49 = vsel %vm9236_vm5, %v7234_v19, %v4721_v50  ;;  %v8733_v19 = vld [vmem:[%s8858_s10 + $0x44] sm:$0x1] }
 0x14b   : > { %8188 = vmatmul.mubr.bf16.gmra.mrb[24].mxu0 %v7206_v7  ;;  %v8728_v7 = vld [vmem:[%s11669_s2 + $0x128] sm:$0xff]   ;;  %v4735_v56 = vrot.slane %v8731_v25, 5  ;;  %v4805_v13 = vrot.slane %v10195_v11, 5  ;;  %v4729_v50 = vsel %vm9236_vm5, %v7235_v3, %v4728_v24  ;;  %v8734_v11 = vld [vmem:[%s11669_s2 + $0x138] sm:$0xff]   ;;  %v7231_v24 = vld [vmem:[%s8858_s10 + $0xc0] sm:$0xe] }
 0x14c   : > { %7980 = vmatmul.mubr.bf16.gmra.mrb[8].mxu1 %v8666_v40  ;;  %8191 = vmatprep.mubr.bf16.mxu0 %v7207_v4  ;;  %v4724_v40 = vrot.slane %v8729_v34, 5  ;;  %v4801_v4 = vrot.slane %v10183_v22, 5  ;;  %v10507_v8 = vsel %vm9236_vm5, %v7245_v48, %v4798_v15  ;;  %v8732_v22 = vld [vmem:[%s11669_s2 + $0x130] sm:$0xff]   ;;  %v7246_v48 = vrot.slane %v7230_v12, 9 }
 0x14d   : > { %7983 = vmatprep.mubr.bf16.mxu1 %v8668_v47  ;;  %8255 = vmatpush3.bf16.msra.mxu1 %v8725_v2  ;;  %v4800_v47 = vrot.slane %v4798_v15, 4  ;;  %v8730_v2 = vld [vmem:[%s8858_s10 + $0x38] sm:$0x1]  ;;  %v7236_v15 = vrot.slane %v7220_v1, 9  ;;  %v4738_v34 = vrot.slane %v8733_v19, 5  ;;  %v4812_v12 = vrot.slane %v10277_v52, 5 }
 0x14e   : > { %8248 = vmatprep.subr.bf16.mxu1 %v8728_v7  ;;  %v4731_v61 = vrot.slane %v8730_v2, 5  ;;  %v4725_v37 = vsel %vm9236_vm5, %v4723_v20, %v4724_v40  ;;  %v4807_v40 = vrot.slane %v4805_v13, 4  ;;  %v6921_v20 = vld [vmem:[%s8858_s10 + $0x6c] sm:$0xf]  ;;  %v8674_v19 = vld [vmem:[%s8858_s10 + $0x90] sm:$0xff]   ;;  %v2563_v21 = vshll.u32 %v8740_v0, 16 }
 0x14f   : > { %v10519_v26 = vsel %vm9236_vm5, %v4800_v47, %v4801_v4  ;;  %v7266_v4 = vcombine.low %v4722_v49, %v4725_v37  ;;  %v4736_v2 = vsel %vm9236_vm5, %v7236_v15, %v4735_v56  ;;  %v2496_v1 = vshrl.u32 %v6921_v20, 16  ;;  %v7232_v52 = vld [vmem:[%s8858_s10 + $0xcc] sm:$0xe] }
 0x150   : > { %v7277_v17 = vcombine.low %v10507_v8, %v10519_v26  ;;  %v4732_v41 = vsel %vm9236_vm5, %v4730_v57, %v4731_v61  ;;  %v7247_v57 = vrot.slane %v7231_v24, 9  ;;  %v2499_v25 = vshll.u32 %v6921_v20, 16 }
 0x151   : > { %8256 = vmatpush3.bf16.msra.mxu1 %v8728_v7  ;;  %v4808_v7 = vrot.slane %v10216_v28, 5  ;;  %v10539_v28 = vsel %vm9236_vm5, %v7246_v48, %v4805_v13  ;;  %v4815_v37 = vrot.slane %v10328_v27, 5  ;;  %v4814_v13 = vrot.slane %v4812_v12, 4 }
 0x152   : > { %8249 = vmatprep.subr.bf16.mxu1 %v8732_v22  ;;  %v2501_v27 = vrot.slane %v2499_v25, 5  ;;  %v4822_v24 = vrot.slane %v10418_v14, 5 }
 0x153   : > { %8192 = vmatmul.mubr.bf16.gmra.mrb[28].mxu0 %v7208_v29  ;;  %v4737_v29 = vrot.slane %v4735_v56, 4  ;;  %v10546_v47 = vsel %vm9236_vm5, %v4807_v40, %v4808_v7  ;;  %v10560_v56 = vsel %vm9236_vm5, %v7247_v57, %v4812_v12  ;;  %v4819_v40 = vrot.slane %v10380_v32, 5  ;;  %v8736_v57 = vld [vmem:[%s8858_s10 + $0x74] sm:$0x1] }
 0x154   : > { %7984 = vmatmul.mubr.bf16.gmra.mrb[12].mxu1 %v8669_v31  ;;  %8211 = vmatprep.mubr.bf16.mxu0 %v7265_v35  ;;  %v8672_v31 = vld [vmem:[%s8858_s10 + $0x78] sm:$0xff]   ;;  %v7267_v35 = vcombine.low %v4729_v50, %v4732_v41  ;;  %v7278_v3 = vcombine.low %v10539_v28, %v10546_v47  ;;  %v10565_v50 = vsel %vm9236_vm5, %v4814_v13, %v4815_v37  ;;  %v2498_v41 = vrot.slane %v2496_v1, 4  ;;  %v8737_v1 = vld [vmem:[%s8858_s10 + $0x88] sm:$0xf] }
 0x155   : > { %7987 = vmatprep.mubr.bf16.mxu1 %v8671_v53  ;;  %8257 = vmatpush3.bf16.msra.mxu1 %v8732_v22  ;;  %v8673_v53 = vld [vmem:[%s8858_s10 + $0x84] sm:$0xff]   ;;  %v4739_v61 = vsel %vm9236_vm5, %v4737_v29, %v4738_v34  ;;  %v8735_v22 = vld [vmem:[%s8858_s10 + $0x70] sm:$0xf]  ;;  %v7279_v29 = vcombine.low %v10560_v56, %v10565_v50  ;;  %v4821_v20 = vrot.slane %v4819_v40, 4  ;;  %v2553_v25 = vshll.u32 %v8737_v1, 16 }
 0x156   : > { %8250 = vmatprep.subr.bf16.mxu1 %v8734_v11  ;;  %v2505_v49 = vshll.u32 %v8735_v22, 16  ;;  %v2509_v48 = vshrl.u32 %v8735_v22, 16  ;;  %v7268_v7 = vcombine.low %v4736_v2, %v4739_v61  ;;  %v2515_v2 = vshll.u32 %v8736_v57, 16  ;;  %v7357_v28 = vld [vmem:[%s8863_s13 + $0x18] sm:$0xf] }
 0x157   : > { %v10587_v12 = vsel %vm9236_vm5, %v4821_v20, %v4822_v24  ;;  %v2557_v22 = vshrl.u32 %v8737_v1, 16  ;;  %v8739_v20 = vld [vmem:[%s8858_s10 + $0xa0] sm:$0xf]  ;;  %v5611_v47 = vshrl.u32 %v7357_v28, 16  ;;  %v7358_v56 = vld [vmem:[%s8863_s13 + $0x1c] sm:$0xf] }
 0x158   : > { %v10567_v15 = vrot.slane %v2505_v49, 5  ;;  %v2511_v34 = vrot.slane %v2509_v48, 4  ;;  %v2605_v57 = vshrl.u32 %v8739_v20, 16 }
 0x159   : > { %8258 = vmatpush3.bf16.msra.mxu1 %v8734_v11  ;;  %v7248_v11 = vrot.slane %v7232_v52, 9 }
 0x15a   : > { %v2512_v32 = vor.u32 %v2511_v34, %v10567_v15  ;;  %v2571_v34 = vshll.u32 %v6930_v62, 16 }
 0x15b   : > { %8212 = vmatmul.mubr.bf16.vlgmr.msra.gmra.mrb[0].mxu0 %v7266_v4  ;;  %v8675_v4 = vld [vmem:[%s8858_s10 + $0x9c] sm:$0xff]  }
 0x15c   : > { %7988 = vmatmul.mubr.bf16.gmra.mrb[16].mxu1 %v8672_v31  ;;  %8215 = vmatprep.mubr.bf16.mxu0 %v7267_v35  ;;  %v6927_v31 = vld [vmem:[%s8858_s10 + $0x84] sm:$0xf]  ;;  %v10578_v35 = vsel %vm9236_vm5, %v7248_v11, %v4819_v40  ;;  %v2513_v48 = vrot.slane %v2512_v32, 4  ;;  %v8738_v11 = vld [vmem:[%s8858_s10 + $0x94] sm:$0xf]  ;;  %v2573_v1 = vrot.slane %v2571_v34, 5 }
 0x15d   : > { %7991 = vmatprep.mubr.bf16.mxu1 %v8673_v53  ;;  %v2502_v53 = vor.u32 %v2501_v27, %v2498_v41  ;;  %v2544_v14 = vshrl.u32 %v6927_v31, 16  ;;  %v2547_v61 = vshll.u32 %v6927_v31, 16  ;;  %v7280_v49 = vcombine.low %v10578_v35, %v10587_v12  ;;  %v5187_v35 = vld [vmem:[#allocation2 + $0x10] sm:$0xff] }
 0x15e   : > { %v10596_v41 = vrot.slane %v2553_v25, 5  ;;  %v2559_v27 = vrot.slane %v2557_v22, 4  ;;  %v2577_v40 = vshll.u32 %v8738_v11, 16  ;;  %v2581_v24 = vshrl.u32 %v8738_v11, 16  ;;  %v8742_v11 = vld [vmem:[%s8858_s10 + $0xa4] sm:$0x1] }
 0x15f   : > { %v2503_v37 = vrot.slane %v2502_v53, 4  ;;  %v2546_v13 = vrot.slane %v2544_v14, 4  ;;  %v2549_v52 = vrot.slane %v2547_v61, 5  ;;  %v2601_v53 = vshll.u32 %v8739_v20, 16  ;;  %v8743_v20 = vld [vmem:[%s8858_s10 + $0xac] sm:$0xf] }
 0x160   : > { %v2560_v14 = vor.u32 %v2559_v27, %v10596_v41  ;;  %v10613_v42 = vrot.slane %v2577_v40, 5  ;;  %v2583_v43 = vrot.slane %v2581_v24, 4  ;;  %v2607_v22 = vrot.slane %v2605_v57, 4  ;;  %v6939_v24 = vld [vmem:[%s8858_s10 + $0xb4] sm:$0xf] }
 0x161   : > { %v2611_v40 = vshll.u32 %v8742_v11, 16  ;;  %v2629_v16 = vshrl.u32 %v8743_v20, 16  ;;  %v2643_v0 = vshll.u32 %v6939_v24, 16  ;;  %vm5219_vm6 = vcmp.gt.f32.partialorder %v5187_v35, 1.0 }
 0x162   : > { %v2584_v27 = vor.u32 %v2583_v43, %v10613_v42 }
 0x163   : > { %8216 = vmatmul.mubr.bf16.gmra.mrb[4].mxu0 %v7268_v7  ;;  %v6933_v7 = vld [vmem:[%s8858_s10 + $0x9c] sm:$0xf] }
 0x164   : > { %7992 = vmatmul.mubr.bf16.gmra.mrb[20].mxu1 %v8674_v19  ;;  %8219 = vmatprep.mubr.bf16.mxu0 %v7269_v9  ;;  %v2517_v9 = vrot.slane %v2515_v2, 5  ;;  %v2568_v19 = vshrl.u32 %v6930_v62, 16  ;;  %v2595_v31 = vshll.u32 %v6933_v7, 16  ;;  %v2508_v2 = vsel %vm8990_vm2, %v2503_v37, %v10567_v15  ;;  %v8678_v62 = vld [vmem:[%s8858_s10 + $0xc0] sm:$0xff]  }
 0x165   : > { %7995 = vmatprep.mubr.bf16.mxu1 %v8675_v4  ;;  %v2592_v4 = vshrl.u32 %v6933_v7, 16  ;;  %v10615_v15 = vrot.slane %v2601_v53, 5  ;;  %v2625_v53 = vshll.u32 %v8743_v20, 16 }
 0x166   : > { %v2518_v32 = vsel %vm8990_vm2, %v2513_v48, %v2517_v9  ;;  %v2570_v61 = vrot.slane %v2568_v19, 4  ;;  %v2597_v25 = vrot.slane %v2595_v31, 5  ;;  %v2565_v9 = vrot.slane %v2563_v21, 5  ;;  %v8744_v21 = vld [vmem:[%s8858_s10 + $0xb8] sm:$0xf] }
 0x167   : > { %v2561_v48 = vrot.slane %v2560_v14, 4  ;;  %v2608_v34 = vor.u32 %v2607_v22, %v10615_v15  ;;  %v2649_v30 = vshll.u32 %v8744_v21, 16  ;;  %v2653_v45 = vshrl.u32 %v8744_v21, 16 }
 0x169   : > { %v2609_v14 = vrot.slane %v2608_v34, 4 }
 0x16b   : > { %8220 = vmatmul.mubr.bf16.gmra.mrb[8].mxu0 %v7270_v55  ;;  %v2550_v55 = vor.u32 %v2549_v52, %v2546_v13  ;;  %v2574_v13 = vor.u32 %v2573_v1, %v2570_v61  ;;  %v8741_v52 = vld [vmem:[%s8858_s10 + $0x98] sm:$0x1]  ;;  %v2613_v61 = vrot.slane %v2611_v40, 5 }
 0x16c   : > { %7996 = vmatmul.mubr.bf16.gmra.mrb[24].mxu1 %v8676_v46  ;;  %8223 = vmatprep.mubr.bf16.mxu0 %v7271_v18  ;;  %v2594_v18 = vrot.slane %v2592_v4, 4  ;;  %v6969_v46 = vcombine.low %v2508_v2, %v2518_v32  ;;  %v2587_v7 = vshll.u32 %v8741_v52, 16  ;;  %v2640_v32 = vshrl.u32 %v6939_v24, 16 }
 0x16d   : > { %7999 = vmatprep.mubr.bf16.mxu1 %v8677_v10  ;;  %v2551_v37 = vrot.slane %v2550_v55, 4  ;;  %v6936_v10 = vld [vmem:[%s8858_s10 + $0xa8] sm:$0xf]  ;;  %v2575_v57 = vrot.slane %v2574_v13, 4  ;;  %v2614_v33 = vsel %vm8990_vm2, %v2609_v14, %v2613_v61 }
 0x16e   : > { %v2598_v19 = vor.u32 %v2597_v25, %v2594_v18  ;;  %v2616_v4 = vshrl.u32 %v6936_v10, 16  ;;  %v2619_v31 = vshll.u32 %v6936_v10, 16  ;;  %v2589_v2 = vrot.slane %v2587_v7, 5 }
 0x16f   : > { %v2556_v44 = vsel %vm8990_vm2, %v2551_v37, %v10596_v41  ;;  %v2627_v18 = vrot.slane %v2625_v53, 5  ;;  %v2631_v25 = vrot.slane %v2629_v16, 4  ;;  %v2642_v22 = vrot.slane %v2640_v32, 4  ;;  %v6942_v37 = vld [vmem:[%s8858_s10 + $0xc0] sm:$0xf] }
 0x170   : > { %v2599_v55 = vrot.slane %v2598_v19, 4  ;;  %v2618_v1 = vrot.slane %v2616_v4, 4  ;;  %v2621_v43 = vrot.slane %v2619_v31, 5  ;;  %v2664_v10 = vshrl.u32 %v6942_v37, 16  ;;  %v8746_v19 = vld [vmem:[%s8858_s10 + $0xc4] sm:$0xf] }
 0x171   : > { %v2673_v34 = vshll.u32 %v8746_v19, 16 }
 0x172   : > { %v2604_v52 = vsel %vm8990_vm2, %v2599_v55, %v10615_v15  ;;  %v2622_v6 = vor.u32 %v2621_v43, %v2618_v1  ;;  %v2677_v15 = vshrl.u32 %v8746_v19, 16  ;;  %v2666_v20 = vrot.slane %v2664_v10, 4  ;;  %v7354_v43 = vld [vmem:[%s8863_s13 + $0xc] sm:$0xf] }
 0x173   : > { %8224 = vmatmul.mubr.bf16.gmra.mrb[12].mxu0 %v7272_v39  ;;  %v2566_v39 = vsel %vm8990_vm2, %v2561_v48, %v2565_v9  ;;  %v2655_v9 = vrot.slane %v2653_v45, 4  ;;  %v2580_v48 = vsel %vm8990_vm2, %v2575_v57, %v10613_v42  ;;  %v8745_v42 = vld [vmem:[%s8858_s10 + $0xb0] sm:$0x1]  ;;  %v6973_v59 = vcombine.low %v2604_v52, %v2614_v33  ;;  %v8748_v45 = vld [vmem:[%s8858_s10 + $0xc8] sm:$0x1]  ;;  %v5188_v33 = vld [vmem:[#allocation2 + $0x18] sm:$0xff] }
 0x174   : > { %8000 = vmatmul.mubr.bf16.gmra.mrb[28].mxu1 %v8678_v62  ;;  %8227 = vmatprep.mubr.bf16.mxu0 %v7273_v36  ;;  %v2585_v36 = vrot.slane %v2584_v27, 4  ;;  %v6971_v41 = vcombine.low %v2556_v44, %v2566_v39  ;;  %v2645_v62 = vrot.slane %v2643_v0, 5  ;;  %v2635_v7 = vshll.u32 %v8745_v42, 16 }
 0x175   : > { %8035 = vmatprep.mubr.bf16.mxu1 %v6969_v46  ;;  %v2651_v46 = vrot.slane %v2649_v30, 5  ;;  %v2667_v27 = vshll.u32 %v6942_v37, 16  ;;  %v2623_v23 = vrot.slane %v2622_v6, 4  ;;  %v2675_v16 = vrot.slane %v2673_v34, 5  ;;  %v7355_v37 = vld [vmem:[%s8863_s13 + $0x10] sm:$0xf] }
 0x176   : > { %v2590_v13 = vsel %vm8990_vm2, %v2585_v36, %v2589_v2  ;;  %v2646_v11 = vor.u32 %v2645_v62, %v2642_v22  ;;  %v2637_v31 = vrot.slane %v2635_v7, 5  ;;  %v2679_v44 = vrot.slane %v2677_v15, 4  ;;  %v7359_v6 = vld [vmem:[%s8863_s13 + $0x20] sm:$0x1] }
 0x177   : > { %v2656_v40 = vor.u32 %v2655_v9, %v2651_v46  ;;  %v6972_v4 = vcombine.low %v2580_v48, %v2590_v13  ;;  %v2669_v53 = vrot.slane %v2667_v27, 5  ;;  %v2628_v32 = vsel %vm8990_vm2, %v2623_v23, %v2627_v18 }
 0x178   : > { %v2647_v39 = vrot.slane %v2646_v11, 4  ;;  %v2680_v30 = vor.u32 %v2679_v44, %v2675_v16  ;;  %v2683_v36 = vshll.u32 %v8748_v45, 16  ;;  %v5587_v50 = vshrl.u32 %v7354_v43, 16 }
 0x179   : > { %v2657_v57 = vrot.slane %v2656_v40, 4  ;;  %v2670_v21 = vor.u32 %v2669_v53, %v2666_v20  ;;  %v5624_v22 = vshrl.u32 %v7358_v56, 16  ;;  %v5596_v52 = vshll.u32 %v7355_v37, 16  ;;  %v5186_v40 = vld [vmem:[#allocation2 + $0x8] sm:$0xff]  ;;  %v7360_v53 = vld [vmem:[%s8863_s13 + $0x24] sm:$0xf] }
 0x17a   : > { %v2652_v5 = vsel %vm8990_vm2, %v2647_v39, %v2651_v46  ;;  %v2685_v55 = vrot.slane %v2683_v36, 5  ;;  %v5589_v62 = vrot.slane %v5587_v50, 4  ;;  %v5600_v42 = vshrl.u32 %v7355_v37, 16 }
 0x17b   : > { %8228 = vmatmul.mubr.bf16.gmra.mrb[16].mxu0 %v7274_v63  ;;  %v2632_v63 = vor.u32 %v2631_v25, %v2627_v18  ;;  %v2671_v26 = vrot.slane %v2670_v21, 4  ;;  %v5613_v18 = vrot.slane %v5611_v47, 4  ;;  %v5626_v48 = vrot.slane %v5624_v22, 4  ;;  %v5191_v21 = vld [vmem:[#allocation2 + $0x30] sm:$0xff] }
 0x17c   : > { %8036 = vmatmul.mubr.bf16.vlgmr.msra.gmra.mrb[16].mxu1 %v10438_v51  ;;  %8231 = vmatprep.mubr.bf16.mxu0 %v7275_v60  ;;  %v8747_v51 = vld [vmem:[%s8858_s10 + $0xbc] sm:$0x1]  ;;  %v11686_v7 = vmov 0.0   ;;  %v10694_v27 = vmul.f32 0.9, %v5187_v35  ;;  %v5630_v11 = vshll.u32 %v7359_v6, 16 }
 0x17d   : > { %8039 = vmatprep.mubr.bf16.mxu1 %v6971_v41  ;;  %v2659_v24 = vshll.u32 %v8747_v51, 16  ;;  %v2633_v60 = vrot.slane %v2632_v63, 4  ;;  %v2676_v14 = vsel %vm8990_vm2, %v2671_v26, %v2675_v16  ;;  %v5620_v41 = vshll.u32 %v7358_v56, 16  ;;  %v7363_v51 = vld [vmem:[%s8863_s13 + $0x30] sm:$0xf]  ;;  %v5189_v35 = vld [vmem:[#allocation2 + $0x20] sm:$0xff] }
 0x17e   : > { %v10692_v10 = vsel %vm5219_vm6, 1.0, %v11686_v7  ;;  %v10698_v34 = vmul.f32 0.9, %v5188_v33  ;;  %v5598_v23 = vrot.slane %v5596_v52, 5  ;;  %vm5220_vm8 = vcmp.gt.f32.partialorder %v5188_v33, 1.0  ;;  %v5192_v33 = vld [vmem:[#allocation2 + $0x38] sm:$0xff] }
 0x17f   : > { %v2661_v2 = vrot.slane %v2659_v24, 5  ;;  %v2638_v0 = vsel %vm8990_vm2, %v2633_v60, %v2637_v31  ;;  %v5622_v12 = vrot.slane %v5620_v41, 5  ;;  %v6036_v24 = vld [vmem:[#allocation3 + $0x10] sm:$0xff]  ;;  %v5602_v20 = vrot.slane %v5600_v42, 4  ;;  %v7361_v41 = vld [vmem:[%s8863_s13 + $0x28] sm:$0xf] }
 0x180   : > { %vm6068_vm9 = vcmp.gt.f32.partialorder %v6036_v24, 1.0  ;;  %v7356_v31 = vld [vmem:[%s8863_s13 + $0x14] sm:$0x1]  ;;  %vm5218_vm10 = vcmp.gt.f32.partialorder %v5186_v40, 1.0  ;;  %v10708_v16 = vmul.f32 0.9, %v5186_v40 }
 0x181   : > { %v2662_v58 = vsel %vm8990_vm2, %v2657_v57, %v2661_v2  ;;  %v5627_v15 = vor.u32 %v5626_v48, %v5622_v12  ;;  %v5659_v44 = vshrl.u32 %v7363_v51, 16  ;;  %v5662_v39 = vshll.u32 %v7363_v51, 16  ;;  %v7365_v40 = vld [vmem:[%s8863_s13 + $0x38] sm:$0x1] }
 0x182   : > { %v6975_v8 = vcombine.low %v2652_v5, %v2662_v58  ;;  %v10710_v57 = vmul.f32 0.9, %v6036_v24  ;;  %v10713_v2 = vsel %vm5220_vm8, 1.0, %v11686_v7  ;;  %v10718_v45 = vsel %vm6068_vm9, 1.0, %v11686_v7  ;;  %v6034_v5 = vld [vmem:[#allocation3] sm:$0xff]  ;;  %v6037_v58 = vld [vmem:[#allocation3 + $0x18] sm:$0xff] }
 0x183   : > { %8232 = vmatmul.mubr.bf16.gmra.mrb[20].mxu0 %v7276_v54  ;;  %v6974_v54 = vcombine.low %v2628_v32, %v2638_v0  ;;  %v5628_v32 = vrot.slane %v5627_v15, 4  ;;  %v5632_v0 = vrot.slane %v5630_v11, 5  ;;  %vm6066_vm11 = vcmp.gt.f32.partialorder %v6034_v5, 1.0 }
 0x184   : > { %8040 = vmatmul.mubr.bf16.gmra.mrb[20].mxu1 %v6972_v4  ;;  %8235 = vmatprep.mubr.bf16.mxu0 %v7277_v17  ;;  %v2681_v17 = vrot.slane %v2680_v30, 4  ;;  %v10725_v26 = vsel %vm5218_vm10, 1.0, %v11686_v7  ;;  %vm5223_vm12 = vcmp.gt.f32.partialorder %v5191_v21, 1.0  ;;  %v10727_v47 = vmul.f32 0.9, %v6034_v5 }
 0x185   : > { %8043 = vmatprep.mubr.bf16.mxu1 %v6973_v59  ;;  %v5633_v50 = vsel %vm8990_vm2, %v5628_v32, %v5632_v0  ;;  %v10741_v22 = vsel %vm6066_vm11, 1.0, %v11686_v7  ;;  %vm6069_vm13 = vcmp.gt.f32.partialorder %v6037_v58, 1.0  ;;  %v5648_v52 = vshrl.u32 %v7361_v41, 16  ;;  %v5190_v32 = vld [vmem:[#allocation2 + $0x28] sm:$0xff] }
 0x186   : > { %v2686_v61 = vsel %vm8990_vm2, %v2681_v17, %v2685_v55  ;;  %v5603_v17 = vor.u32 %v5602_v20, %v5598_v23  ;;  %v6035_v55 = vld [vmem:[#allocation3 + $0x8] sm:$0xff]  ;;  %v10748_v42 = vsel %vm6069_vm13, 1.0, %v11686_v7  ;;  %v10756_v51 = vunpack.c.l.bf16 %v5633_v50 }
 0x187   : > { %v6976_v1 = vcombine.low %v2676_v14, %v2686_v61  ;;  %v5661_v14 = vrot.slane %v5659_v44, 4  ;;  %v5664_v61 = vrot.slane %v5662_v39, 5  ;;  %vm6067_vm14 = vcmp.gt.f32.partialorder %v6035_v55, 1.0  ;;  %v7362_v5 = vld [vmem:[%s8863_s13 + $0x2c] sm:$0x1] }
 0x188   : > { %v10751_v15 = vsel %vm6067_vm14, 1.0, %v11686_v7  ;;  %vm5221_vm15 = vcmp.gt.f32.partialorder %v5189_v35, 1.0  ;;  %vm5224_vm1 = vcmp.gt.f32.partialorder %v5192_v33, 1.0  ;;  %v5678_v39 = vshll.u32 %v7365_v40, 16 }
 0x189   : > { %v5665_v37 = vor.u32 %v5664_v61, %v5661_v14  ;;  %v5650_v0 = vrot.slane %v5648_v52, 4  ;;  %v7366_v14 = vld [vmem:[%s8863_s13 + $0x3c] sm:$0xf]  ;;  %vm5222_vm4 = vcmp.gt.f32.partialorder %v5190_v32, 1.0  ;;  %v10793_v52 = vmul.f32 0.9, %v5190_v32 }
 0x18a   : > { %v5680_v50 = vrot.slane %v5678_v39, 5  ;;  %v5195_v39 = vld [vmem:[#allocation2 + $0x50] sm:$0xff] }
 0x18b   : > { %8236 = vmatmul.mubr.bf16.gmra.mrb[24].mxu0 %v7278_v3  ;;  %v5614_v3 = vshll.u32 %v7357_v28, 16  ;;  %v5638_v28 = vshll.u32 %v7360_v53, 16  ;;  %11748 = vst [vmem:[#allocation11_spill] sm:$0xff] %v10793_v52 }
 0x18c   : > { %8044 = vmatmul.mubr.bf16.gmra.mrb[24].mxu1 %v6974_v54  ;;  %8239 = vmatprep.mubr.bf16.mxu0 %v7279_v29  ;;  %v5590_v29 = vshll.u32 %v7354_v43, 16  ;;  %v5606_v54 = vshll.u32 %v7356_v31, 16  ;;  %v5666_v31 = vrot.slane %v5665_v37, 4 }
 0x18d   : > { %8047 = vmatprep.mubr.bf16.mxu1 %v6975_v8  ;;  %v5616_v25 = vrot.slane %v5614_v3, 5  ;;  %v7364_v8 = vld [vmem:[%s8863_s13 + $0x34] sm:$0xf]  ;;  %v10729_v3 = vmul.f32 0.9, %v6037_v58 }
 0x18e   : > { %v5592_v46 = vrot.slane %v5590_v29, 5  ;;  %v5668_v43 = vshll.u32 %v7364_v8, 16  ;;  %v5672_v56 = vshrl.u32 %v7364_v8, 16  ;;  %v5608_v29 = vrot.slane %v5606_v54, 5 }
 0x18f   : > { %v5617_v9 = vor.u32 %v5616_v25, %v5613_v18  ;;  %v10733_v18 = vmul.f32 0.9, %v6035_v55  ;;  %v10736_v25 = vsel %vm5223_vm12, 1.0, %v11686_v7  ;;  %v10776_v55 = vsel %vm5224_vm1, 1.0, %v11686_v7 }
 0x190   : > { %v5593_v13 = vor.u32 %v5592_v46, %v5589_v62  ;;  %v5604_v62 = vrot.slane %v5603_v17, 4  ;;  %v6040_v46 = vld [vmem:[#allocation3 + $0x30] sm:$0xff]  ;;  %v5670_v48 = vrot.slane %v5668_v43, 5  ;;  %v5674_v6 = vrot.slane %v5672_v56, 4  ;;  %11743 = vst [vmem:[#allocation8_spill] sm:$0xff] %v10776_v55  ;;  %v6041_v43 = vld [vmem:[#allocation3 + $0x38] sm:$0xff] }
 0x191   : > { %v5618_v63 = vrot.slane %v5617_v9, 4  ;;  %v10743_v9 = vmul.f32 0.9, %v5191_v21  ;;  %v10753_v11 = vmul.f32 0.9, %v6040_v46  ;;  %vm6072_vm0 = vcmp.gt.f32.partialorder %v6040_v46, 1.0 }
 0x192   : > { %v5594_v59 = vrot.slane %v5593_v13, 4  ;;  %v5644_v13 = vshll.u32 %v7361_v41, 16  ;;  %v5609_v24 = vsel %vm8990_vm2, %v5604_v62, %v5608_v29  ;;  %v5675_v44 = vor.u32 %v5674_v6, %v5670_v48  ;;  %v7370_v62 = vld [vmem:[%s8863_s13 + $0x4c] sm:$0xf] }
 0x193   : > { %8240 = vmatmul.mubr.bf16.gmra.mrb[28].mxu0 %v7280_v49  ;;  %v5185_v49 = vld [vmem:[#allocation2] sm:$0xff]  ;;  %v5623_v60 = vsel %vm8990_vm2, %v5618_v63, %v5622_v12  ;;  %11740 = vst [vmem:[#allocation5_spill] sm:$0xff] %v10753_v11  ;;  %v10763_v21 = vunpack.c.l.bf16 %v5609_v24  ;;  %v10769_v8 = vsel %vm6072_vm0, 1.0, %v11686_v7  ;;  %v10773_v17 = vsel %vm5221_vm15, 1.0, %v11686_v7  ;;  %v6039_v6 = vld [vmem:[#allocation3 + $0x28] sm:$0xff] }
 0x194   : > { %8048 = vmatmul.mubr.bf16.gmra.mrb[28].mxu1 %v6976_v1  ;;  %vm5217_vm7 = vcmp.gt.f32.partialorder %v5185_v49, 1.0  ;;  %v10696_v19 = vmul.f32 0.9, %v5185_v49  ;;  %v10715_v30 = vunpack.c.l.bf16 %v5623_v60  ;;  %v5599_v36 = vsel %vm8990_vm2, %v5594_v59, %v5598_v23  ;;  %v6038_v23 = vld [vmem:[#allocation3 + $0x20] sm:$0xff]  ;;  %v7369_v60 = vld [vmem:[%s8863_s13 + $0x48] sm:$0xf] }
 0x195   : > { %v10702_v4 = vsel %vm5217_vm7, 1.0, %v11686_v7  ;;  %v5635_v1 = vshrl.u32 %v7360_v53, 16  ;;  %v5640_v49 = vrot.slane %v5638_v28, 5  ;;  %v10745_v63 = vunpack.c.l.bf16 %v5599_v36  ;;  %11742 = vst [vmem:[#allocation7_spill] sm:$0xff] %v10769_v8 }
 0x196   : > { %v10760_v59 = vmul.f32 0.9, %v5189_v35  ;;  %v5646_v53 = vrot.slane %v5644_v13, 5  ;;  %v10765_v36 = vmul.f32 0.9, %v6038_v23  ;;  %v5707_v58 = vshrl.u32 %v7369_v60, 16 }
 0x197   : > { %v5637_v12 = vrot.slane %v5635_v1, 4  ;;  %v5710_v54 = vshll.u32 %v7369_v60, 16  ;;  %vm6070_vm3 = vcmp.gt.f32.partialorder %v6038_v23, 1.0  ;;  %v5671_v61 = vsel %vm8990_vm2, %v5666_v31, %v5670_v48  ;;  %v7367_v60 = vld [vmem:[%s8863_s13 + $0x40] sm:$0xf] }
 0x198   : > { %11741 = vst [vmem:[#allocation6_spill] sm:$0xff] %v10765_v36  ;;  %v10781_v28 = vmul.f32 0.9, %v5192_v33  ;;  %v5676_v56 = vrot.slane %v5675_v44, 4  ;;  %v5651_v29 = vor.u32 %v5650_v0, %v5646_v53  ;;  %v5654_v41 = vshll.u32 %v7362_v5, 16 }
 0x199   : > { %v5641_v20 = vor.u32 %v5640_v49, %v5637_v12  ;;  %v5709_v46 = vrot.slane %v5707_v58, 4  ;;  %v5712_v37 = vrot.slane %v5710_v54, 5  ;;  %v5683_v35 = vshrl.u32 %v7366_v14, 16 }
 0x19a   : > { %11744 = vst [vmem:[#allocation9_spill] sm:$0xff] %v10781_v28  ;;  %v5686_v12 = vshll.u32 %v7366_v14, 16  ;;  %v10786_v49 = vsel %vm6070_vm3, 1.0, %v11686_v7  ;;  %v10788_v48 = vmul.f32 0.9, %v6041_v43  ;;  %v10791_v13 = vsel %vm5222_vm4, 1.0, %v11686_v7 }
 0x19b   : > { %v5642_v1 = vrot.slane %v5641_v20, 4  ;;  %11745 = vst [vmem:[#allocation10_spill] sm:$0xff] %v10786_v49  ;;  %11747 = vst [vmem:[#allocation4_spill] sm:$0xff] %v10791_v13  ;;  %v10795_v33 = vunpack.c.l.bf16 %v5671_v61  ;;  %vm6073_vm5 = vcmp.gt.f32.partialorder %v6041_v43, 1.0  ;;  %v5716_v40 = vshll.u32 %v7370_v62, 16 }
 0x19c   : > { %11746 = vst [vmem:[#allocation13_spill] sm:$0xff] %v10788_v48  ;;  %v5720_v24 = vshrl.u32 %v7370_v62, 16  ;;  %v5652_v23 = vrot.slane %v5651_v29, 4  ;;  %v5656_v20 = vrot.slane %v5654_v41, 5  ;;  %vm6071_vm6 = vcmp.gt.f32.partialorder %v6039_v6, 1.0 }
 0x19d   : > { %v5647_v31 = vsel %vm8990_vm2, %v5642_v1, %v5646_v53  ;;  %v5681_v44 = vsel %vm8990_vm2, %v5676_v56, %v5680_v50  ;;  %v5713_v0 = vor.u32 %v5712_v37, %v5709_v46  ;;  %v5685_v32 = vrot.slane %v5683_v35, 4  ;;  %v5193_v1 = vld [vmem:[#allocation2 + $0x40] sm:$0xff]  ;;  %v6044_v46 = vld [vmem:[#allocation3 + $0x50] sm:$0xff] }
 0x19e   : > { %v5688_v5 = vrot.slane %v5686_v12, 5  ;;  %v10803_v58 = vsel %vm6073_vm5, 1.0, %v11686_v7  ;;  %v10805_v54 = vmul.f32 0.9, %v6039_v6  ;;  %v5692_v14 = vshll.u32 %v7367_v60, 16 }
 0x19f   : > { %11749 = vst [vmem:[#allocation14_spill] sm:$0xff] %v10803_v58  ;;  %v5696_v61 = vshrl.u32 %v7367_v60, 16  ;;  %v10807_v43 = vunpack.c.l.bf16 %v5647_v31  ;;  %vm5227_vm7 = vcmp.gt.f32.partialorder %v5195_v39, 1.0  ;;  %v5718_v53 = vrot.slane %v5716_v40, 5  ;;  %v7371_v37 = vld [vmem:[%s8863_s13 + $0x50] sm:$0x1] }
 0x1a0   : > { %11750 = vst [vmem:[#allocation17_spill] sm:$0xff] %v10805_v54  ;;  %v5722_v29 = vrot.slane %v5720_v24, 4  ;;  %v10809_v56 = vunpack.c.l.bf16 %v5681_v44  ;;  %v5657_v50 = vsel %vm8990_vm2, %v5652_v23, %v5656_v20  ;;  %v10815_v41 = vsel %vm6071_vm6, 1.0, %v11686_v7  ;;  %v6042_v40 = vld [vmem:[#allocation3 + $0x40] sm:$0xff] }
 0x1a1   : > { %11751 = vst [vmem:[#allocation12_spill] sm:$0xff] %v10807_v43  ;;  %11753 = vst [vmem:[#allocation15_spill] sm:$0xff] %v10815_v41  ;;  %v10817_v62 = vmul.f32 0.9, %v5195_v39  ;;  %v5714_v35 = vrot.slane %v5713_v0, 4  ;;  %vm6076_vm8 = vcmp.gt.f32.partialorder %v6044_v46, 1.0  ;;  %v5689_v12 = vor.u32 %v5688_v5, %v5685_v32 }
 0x1a2   : > { %11752 = vst [vmem:[#allocation16_spill] sm:$0xff] %v10809_v56  ;;  %vm5225_vm9 = vcmp.gt.f32.partialorder %v5193_v1, 1.0  ;;  %v7368_v24 = vld [vmem:[%s8863_s13 + $0x44] sm:$0x1]  ;;  %v10823_v60 = vsel %vm5227_vm7, 1.0, %v11686_v7  ;;  %v5694_v31 = vrot.slane %v5692_v14, 5  ;;  %v5723_v0 = vor.u32 %v5722_v29, %v5718_v53 }
 0x1a3   : > { %11754 = vst [vmem:[#allocation18_spill] sm:$0xff] %v10817_v62  ;;  %11755 = vst [vmem:[#allocation19_spill] sm:$0xff] %v10823_v60  ;;  %vm6074_vm10 = vcmp.gt.f32.partialorder %v6042_v40, 1.0  ;;  %v5698_v6 = vrot.slane %v5696_v61, 4  ;;  %v7375_v23 = vld [vmem:[%s8863_s13 + $0x60] sm:$0xf]  ;;  %v10830_v58 = vunpack.c.l.bf16 %v5657_v50  ;;  %v5719_v5 = vsel %vm8990_vm2, %v5714_v35, %v5718_v53 }
 0x1a4   : > { %v10826_v20 = vmul.f32 0.9, %v6044_v46  ;;  %v10828_v44 = vmul.f32 0.9, %v5193_v1  ;;  %v5196_v41 = vld [vmem:[#allocation2 + $0x58] sm:$0xff]  ;;  %v5726_v54 = vshll.u32 %v7371_v37, 16 }
 0x1a5   : > { %11758 = vst [vmem:[#allocation22_spill] sm:$0xff] %v10830_v58  ;;  %v10834_v32 = vsel %vm6076_vm8, 1.0, %v11686_v7  ;;  %v10838_v39 = vsel %vm5225_vm9, 1.0, %v11686_v7  ;;  %vm5228_vm11 = vcmp.gt.f32.partialorder %v5196_v41, 1.0  ;;  %v5690_v14 = vrot.slane %v5689_v12, 4  ;;  %v6045_v37 = vld [vmem:[#allocation3 + $0x58] sm:$0xff] }
 0x1a6   : > { %11756 = vst [vmem:[#allocation20_spill] sm:$0xff] %v10826_v20  ;;  %11757 = vst [vmem:[#allocation21_spill] sm:$0xff] %v10828_v44  ;;  %v10843_v61 = vsel %vm6074_vm10, 1.0, %v11686_v7  ;;  %v10845_v29 = vmul.f32 0.9, %v6042_v40  ;;  %v5699_v20 = vor.u32 %v5698_v6, %v5694_v31  ;;  %v5702_v46 = vshll.u32 %v7368_v24, 16 }
 0x1a7   : > { %11759 = vst [vmem:[#allocation23_spill] sm:$0xff] %v10834_v32  ;;  %11760 = vst [vmem:[#allocation24_spill] sm:$0xff] %v10838_v39  ;;  %v7372_v50 = vld [vmem:[%s8863_s13 + $0x54] sm:$0xf]  ;;  %v5755_v60 = vshrl.u32 %v7375_v23, 16  ;;  %v5758_v32 = vshll.u32 %v7375_v23, 16  ;;  %v5695_v24 = vsel %vm8990_vm2, %v5690_v14, %v5694_v31 }
 0x1a8   : > { %11761 = vst [vmem:[#allocation25_spill] sm:$0xff] %v10843_v61  ;;  %11762 = vst [vmem:[#allocation26_spill] sm:$0xff] %v10845_v29  ;;  %v10849_v1 = vsel %vm5228_vm11, 1.0, %v11686_v7  ;;  %v10851_v39 = vmul.f32 0.9, %v5196_v41  ;;  %v5724_v58 = vrot.slane %v5723_v0, 4  ;;  %v10853_v29 = vunpack.c.l.bf16 %v5719_v5 }
 0x1a9   : > { %11763 = vst [vmem:[#allocation27_spill] sm:$0xff] %v10849_v1  ;;  %v5728_v53 = vrot.slane %v5726_v54, 5  ;;  %v5194_v35 = vld [vmem:[#allocation2 + $0x48] sm:$0xff]  ;;  %vm6077_vm12 = vcmp.gt.f32.partialorder %v6045_v37, 1.0  ;;  %v5731_v40 = vshrl.u32 %v7372_v50, 16  ;;  %v5734_v61 = vshll.u32 %v7372_v50, 16 }
 0x1aa   : > { %11764 = vst [vmem:[#allocation28_spill] sm:$0xff] %v10851_v39  ;;  %vm5226_vm13 = vcmp.gt.f32.partialorder %v5194_v35, 1.0  ;;  %v6043_v12 = vld [vmem:[#allocation3 + $0x48] sm:$0xff]  ;;  %11765 = vst [vmem:[#allocation29_spill] sm:$0xff] %v10853_v29  ;;  %v10857_v6 = vmul.f32 0.9, %v6045_v37 }
 0x1ab   : > { %vm6075_vm14 = vcmp.gt.f32.partialorder %v6043_v12, 1.0  ;;  %v7376_v23 = vld [vmem:[%s8863_s13 + $0x64] sm:$0xf]  ;;  %v5700_v41 = vrot.slane %v5699_v20, 4  ;;  %v5704_v7 = vrot.slane %v5702_v46, 5  ;;  %v5757_v0 = vrot.slane %v5755_v60, 4 }
 0x1ac   : > { %11766 = vst [vmem:[#allocation30_spill] sm:$0xff] %v10857_v6  ;;  %v5760_v54 = vrot.slane %v5758_v32, 5  ;;  %v5729_v1 = vsel %vm8990_vm2, %v5724_v58, %v5728_v53  ;;  %v11767_v39 = vmov 0.0   ;;  %v10868_v50 = vmul.f32 0.9, %v5194_v35  ;;  %v5199_v14 = vld [vmem:[#allocation2 + $0x70] sm:$0xff] }
 0x1ad   : > { %v10863_v48 = vsel %vm6077_vm12, 1.0, %v11767_v39  ;;  %v10866_v5 = vsel %vm5226_vm13, 1.0, %v11767_v39  ;;  %v7373_v31 = vld [vmem:[%s8863_s13 + $0x58] sm:$0xf]  ;;  %v5764_v37 = vshll.u32 %v7376_v23, 16  ;;  %v5768_v6 = vshrl.u32 %v7376_v23, 16 }
 0x1ae   : > { %11768 = vst [vmem:[#allocation31_spill] sm:$0xff] %v10863_v48  ;;  %11769 = vst [vmem:[#allocation32_spill] sm:$0xff] %v10866_v5  ;;  %v6048_v29 = vld [vmem:[#allocation3 + $0x70] sm:$0xff]  ;;  %v5733_v20 = vrot.slane %v5731_v40, 4  ;;  %v5736_v46 = vrot.slane %v5734_v61, 5  ;;  %v10871_v60 = vunpack.c.l.bf16 %v5695_v24  ;;  %v10875_v58 = vsel %vm6075_vm14, 1.0, %v11767_v39 }
 0x1af   : > { %11770 = vst [vmem:[#allocation33_spill] sm:$0xff] %v10868_v50  ;;  %11772 = vst [vmem:[#allocation35_spill] sm:$0xff] %v10875_v58  ;;  %vm5231_vm15 = vcmp.gt.f32.partialorder %v5199_v14, 1.0  ;;  %vm6080_vm0 = vcmp.gt.f32.partialorder %v6048_v29, 1.0  ;;  %v5705_v32 = vsel %vm8990_vm2, %v5700_v41, %v5704_v7  ;;  %v5761_v53 = vor.u32 %v5760_v54, %v5757_v0  ;;  %v5197_v35 = vld [vmem:[#allocation2 + $0x60] sm:$0xff]  ;;  %v5200_v50 = vld [vmem:[#allocation2 + $0x78] sm:$0xff] }
 0x1b0   : > { %11771 = vst [vmem:[#allocation34_spill] sm:$0xff] %v10871_v60  ;;  %v5740_v48 = vshll.u32 %v7373_v31, 16  ;;  %v5744_v5 = vshrl.u32 %v7373_v31, 16  ;;  %v10879_v23 = vunpack.c.l.bf16 %v5729_v1  ;;  %v10881_v61 = vmul.f32 0.9, %v6043_v12  ;;  %v6046_v24 = vld [vmem:[#allocation3 + $0x60] sm:$0xff] }
 0x1b1   : > { %v10883_v40 = vmul.f32 0.9, %v5199_v14  ;;  %vm5229_vm1 = vcmp.gt.f32.partialorder %v5197_v35, 1.0  ;;  %v5766_v58 = vrot.slane %v5764_v37, 5  ;;  %v5737_v60 = vor.u32 %v5736_v46, %v5733_v20  ;;  %v7377_v7 = vld [vmem:[%s8863_s13 + $0x68] sm:$0x1] }
 0x1b2   : > { %11773 = vst [vmem:[#allocation36_spill] sm:$0xff] %v10879_v23  ;;  %11774 = vst [vmem:[#allocation37_spill] sm:$0xff] %v10881_v61  ;;  %vm6078_vm3 = vcmp.gt.f32.partialorder %v6046_v24, 1.0  ;;  %v5770_v41 = vrot.slane %v5768_v6, 4  ;;  %v10886_v0 = vunpack.c.l.bf16 %v5705_v32  ;;  %v10890_v1 = vsel %vm5231_vm15, 1.0, %v11767_v39 }
 0x1b3   : > { %11775 = vst [vmem:[#allocation38_spill] sm:$0xff] %v10883_v40  ;;  %11777 = vst [vmem:[#allocation40_spill] sm:$0xff] %v10890_v1  ;;  %v10894_v12 = vsel %vm6080_vm0, 1.0, %v11767_v39  ;;  %v10896_v54 = vmul.f32 0.9, %v6048_v29  ;;  %v5762_v61 = vrot.slane %v5761_v53, 4 }
 0x1b4   : > { %11776 = vst [vmem:[#allocation39_spill] sm:$0xff] %v10886_v0  ;;  %11778 = vst [vmem:[#allocation41_spill] sm:$0xff] %v10894_v12  ;;  %v7374_v31 = vld [vmem:[%s8863_s13 + $0x5c] sm:$0x1]  ;;  %v7381_v37 = vld [vmem:[%s8863_s13 + $0x78] sm:$0xf] }
 0x1b5   : > { %11779 = vst [vmem:[#allocation42_spill] sm:$0xff] %v10896_v54  ;;  %v10901_v20 = vsel %vm5229_vm1, 1.0, %v11767_v39  ;;  %v5742_v46 = vrot.slane %v5740_v48, 5  ;;  %v5746_v6 = vrot.slane %v5744_v5, 4  ;;  %v7378_v32 = vld [vmem:[%s8863_s13 + $0x6c] sm:$0xf]  ;;  %v5771_v54 = vor.u32 %v5770_v41, %v5766_v58 }
 0x1b6   : > { %11780 = vst [vmem:[#allocation43_spill] sm:$0xff] %v10901_v20  ;;  %v10904_v40 = vmul.f32 0.9, %v5197_v35  ;;  %v10908_v14 = vsel %vm6078_vm3, 1.0, %v11767_v39  ;;  %vm5232_vm4 = vcmp.gt.f32.partialorder %v5200_v50, 1.0  ;;  %v5774_v12 = vshll.u32 %v7377_v7, 16 }
 0x1b7   : > { %11782 = vst [vmem:[#allocation45_spill] sm:$0xff] %v10908_v14  ;;  %v5738_v29 = vrot.slane %v5737_v60, 4  ;;  %v6049_v1 = vld [vmem:[#allocation3 + $0x78] sm:$0xff]  ;;  %v5803_v0 = vshrl.u32 %v7381_v37, 16  ;;  %v5806_v53 = vshll.u32 %v7381_v37, 16  ;;  %v5779_v48 = vshrl.u32 %v7378_v32, 16 }
 0x1b8   : > { %11781 = vst [vmem:[#allocation44_spill] sm:$0xff] %v10904_v40  ;;  %v10910_v23 = vmul.f32 0.9, %v6046_v24  ;;  %v10912_v20 = vmul.f32 0.9, %v5200_v50  ;;  %v5782_v5 = vshll.u32 %v7378_v32, 16  ;;  %v5767_v35 = vsel %vm8990_vm2, %v5762_v61, %v5766_v58 }
 0x1b9   : > { %v10917_v40 = vsel %vm5232_vm4, 1.0, %v11767_v39  ;;  %v5198_v14 = vld [vmem:[#allocation2 + $0x68] sm:$0xff]  ;;  %v5747_v44 = vor.u32 %v5746_v6, %v5742_v46  ;;  %v5750_v7 = vshll.u32 %v7374_v31, 16  ;;  %v7382_v60 = vld [vmem:[%s8863_s13 + $0x7c] sm:$0xf]  ;;  %v5776_v41 = vrot.slane %v5774_v12, 5 }
 0x1ba   : > { %11783 = vst [vmem:[#allocation46_spill] sm:$0xff] %v10910_v23  ;;  %11784 = vst [vmem:[#allocation47_spill] sm:$0xff] %v10912_v20  ;;  %vm6081_vm5 = vcmp.gt.f32.partialorder %v6049_v1, 1.0  ;;  %v10920_v37 = vmul.f32 0.9, %v6049_v1  ;;  %vm5230_vm6 = vcmp.gt.f32.partialorder %v5198_v14, 1.0  ;;  %v5743_v50 = vsel %vm8990_vm2, %v5738_v29, %v5742_v46 }
 0x1bb   : > { %11785 = vst [vmem:[#allocation48_spill] sm:$0xff] %v10917_v40  ;;  %v5772_v24 = vrot.slane %v5771_v54, 4  ;;  %v5805_v32 = vrot.slane %v5803_v0, 4  ;;  %v5808_v23 = vrot.slane %v5806_v53, 5  ;;  %v6047_v58 = vld [vmem:[#allocation3 + $0x68] sm:$0xff]  ;;  %v5812_v61 = vshll.u32 %v7382_v60, 16 }
 0x1bc   : > { %11786 = vst [vmem:[#allocation49_spill] sm:$0xff] %v10920_v37  ;;  %v5816_v20 = vshrl.u32 %v7382_v60, 16  ;;  %v5781_v40 = vrot.slane %v5779_v48, 4  ;;  %v5784_v62 = vrot.slane %v5782_v5, 5  ;;  %v10924_v6 = vunpack.c.l.bf16 %v5767_v35  ;;  %v7379_v56 = vld [vmem:[%s8863_s13 + $0x70] sm:$0xf] }
 0x1bd   : > { %v5748_v31 = vrot.slane %v5747_v44, 4  ;;  %v5752_v12 = vrot.slane %v5750_v7, 5  ;;  %vm6079_vm7 = vcmp.gt.f32.partialorder %v6047_v58, 1.0  ;;  %v10927_v37 = vunpack.c.l.bf16 %v5743_v50  ;;  %v5203_v29 = vld [vmem:[#allocation2 + $0x90] sm:$0xff]  ;;  %v7383_v7 = vld [vmem:[%s8863_s13 + $0x80] sm:$0x1] }
 0x1be   : > { %11787 = vst [vmem:[#allocation50_spill] sm:$0xff] %v10924_v6  ;;  %v10931_v46 = vsel %vm6081_vm5, 1.0, %v11767_v39  ;;  %v10935_v0 = vsel %vm5230_vm6, 1.0, %v11767_v39  ;;  %v10937_v54 = vmul.f32 0.9, %v5198_v14  ;;  %v6052_v53 = vld [vmem:[#allocation3 + $0x90] sm:$0xff]  ;;  %v5777_v44 = vsel %vm8990_vm2, %v5772_v24, %v5776_v41 }
 0x1bf   : > { %11788 = vst [vmem:[#allocation51_spill] sm:$0xff] %v10927_v37  ;;  %11789 = vst [vmem:[#allocation52_spill] sm:$0xff] %v10931_v46  ;;  %vm5235_vm8 = vcmp.gt.f32.partialorder %v5203_v29, 1.0  ;;  %v5809_v48 = vor.u32 %v5808_v23, %v5805_v32  ;;  %vm6084_vm9 = vcmp.gt.f32.partialorder %v6052_v53, 1.0  ;;  %v10942_v5 = vsel %vm6079_vm7, 1.0, %v11767_v39  ;;  %v5201_v46 = vld [vmem:[#allocation2 + $0x80] sm:$0xff] }
 0x1c0   : > { %11790 = vst [vmem:[#allocation53_spill] sm:$0xff] %v10935_v0  ;;  %11791 = vst [vmem:[#allocation54_spill] sm:$0xff] %v10937_v54  ;;  %v5814_v1 = vrot.slane %v5812_v61, 5  ;;  %v5785_v35 = vor.u32 %v5784_v62, %v5781_v40  ;;  %v5818_v60 = vrot.slane %v5816_v20, 4  ;;  %v5753_v14 = vsel %vm8990_vm2, %v5748_v31, %v5752_v12  ;;  %v6050_v41 = vld [vmem:[#allocation3 + $0x80] sm:$0xff]  ;;  %v5204_v31 = vld [vmem:[#allocation2 + $0x98] sm:$0xff] }
 0x1c1   : > { %11792 = vst [vmem:[#allocation55_spill] sm:$0xff] %v10942_v5  ;;  %v10947_v50 = vmul.f32 0.9, %v6047_v58  ;;  %v5788_v37 = vshll.u32 %v7379_v56, 16  ;;  %v5792_v0 = vshrl.u32 %v7379_v56, 16  ;;  %v10949_v24 = vunpack.c.l.bf16 %v5777_v44  ;;  %v6053_v5 = vld [vmem:[#allocation3 + $0x98] sm:$0xff] }
 0x1c2   : > { %v10952_v23 = vsel %vm5235_vm8, 1.0, %v11767_v39  ;;  %v10954_v32 = vmul.f32 0.9, %v5203_v29  ;;  %v10957_v62 = vsel %vm6084_vm9, 1.0, %v11767_v39  ;;  %v7387_v40 = vld [vmem:[%s8863_s13 + $0x90] sm:$0xf]  ;;  %v10962_v58 = vunpack.c.l.bf16 %v5753_v14 }
 0x1c3   : > { %11793 = vst [vmem:[#allocation56_spill] sm:$0xff] %v10947_v50  ;;  %11794 = vst [vmem:[#allocation57_spill] sm:$0xff] %v10949_v24  ;;  %v5810_v20 = vrot.slane %v5809_v48, 4  ;;  %v10960_v61 = vmul.f32 0.9, %v6052_v53  ;;  %vm5233_vm10 = vcmp.gt.f32.partialorder %v5201_v46, 1.0  ;;  %v5819_v12 = vor.u32 %v5818_v60, %v5814_v1 }
 0x1c4   : > { %11795 = vst [vmem:[#allocation58_spill] sm:$0xff] %v10952_v23  ;;  %11796 = vst [vmem:[#allocation59_spill] sm:$0xff] %v10954_v32  ;;  %vm6082_vm11 = vcmp.gt.f32.partialorder %v6050_v41, 1.0  ;;  %v5786_v56 = vrot.slane %v5785_v35, 4  ;;  %v5822_v44 = vshll.u32 %v7383_v7, 16  ;;  %v5790_v50 = vrot.slane %v5788_v37, 5 }
 0x1c5   : > { %11797 = vst [vmem:[#allocation60_spill] sm:$0xff] %v10957_v62  ;;  %11798 = vst [vmem:[#allocation61_spill] sm:$0xff] %v10960_v61  ;;  %v5202_v29 = vld [vmem:[#allocation2 + $0x88] sm:$0xff]  ;;  %v7380_v23 = vld [vmem:[%s8863_s13 + $0x74] sm:$0x1]  ;;  %v5794_v24 = vrot.slane %v5792_v0, 4  ;;  %v5815_v7 = vsel %vm8990_vm2, %v5810_v20, %v5814_v1 }
 0x1c6   : > { %11799 = vst [vmem:[#allocation62_spill] sm:$0xff] %v10962_v58  ;;  %v5851_v62 = vshrl.u32 %v7387_v40, 16  ;;  %v5854_v32 = vshll.u32 %v7387_v40, 16  ;;  %v10966_v53 = vsel %vm5233_vm10, 1.0, %v11767_v39  ;;  %v10968_v48 = vmul.f32 0.9, %v5201_v46 }
 0x1c7   : > { %11800 = vst [vmem:[#allocation63_spill] sm:$0xff] %v10966_v53  ;;  %v10971_v14 = vsel %vm6082_vm11, 1.0, %v11767_v39  ;;  %v10973_v35 = vmul.f32 0.9, %v6050_v41  ;;  %vm5236_vm12 = vcmp.gt.f32.partialorder %v5204_v31, 1.0  ;;  %vm6085_vm13 = vcmp.gt.f32.partialorder %v6053_v5, 1.0 }
 0x1c8   : > { %11801 = vst [vmem:[#allocation64_spill] sm:$0xff] %v10968_v48  ;;  %11802 = vst [vmem:[#allocation65_spill] sm:$0xff] %v10971_v14  ;;  %v10977_v37 = vmul.f32 0.9, %v5204_v31  ;;  %v7384_v0 = vld [vmem:[%s8863_s13 + $0x84] sm:$0xf]  ;;  %v5791_v60 = vsel %vm8990_vm2, %v5786_v56, %v5790_v50  ;;  %v5795_v53 = vor.u32 %v5794_v24, %v5790_v50 }
 0x1c9   : > { %11803 = vst [vmem:[#allocation66_spill] sm:$0xff] %v10973_v35  ;;  %v5820_v40 = vrot.slane %v5819_v12, 4  ;;  %v5824_v61 = vrot.slane %v5822_v44, 5  ;;  %vm5234_vm14 = vcmp.gt.f32.partialorder %v5202_v29, 1.0  ;;  %v7388_v46 = vld [vmem:[%s8863_s13 + $0x94] sm:$0xf]  ;;  %v10994_v24 = vunpack.c.l.bf16 %v5791_v60 }
 0x1ca   : > { %11804 = vst [vmem:[#allocation67_spill] sm:$0xff] %v10977_v37  ;;  %v5798_v48 = vshll.u32 %v7380_v23, 16  ;;  %v5853_v41 = vrot.slane %v5851_v62, 4  ;;  %v5856_v14 = vrot.slane %v5854_v32, 5  ;;  %v10984_v35 = vsel %vm5236_vm12, 1.0, %v11767_v39  ;;  %v6051_v12 = vld [vmem:[#allocation3 + $0x88] sm:$0xff] }
 0x1cb   : > { %11805 = vst [vmem:[#allocation68_spill] sm:$0xff] %v10984_v35  ;;  %v10986_v1 = vmul.f32 0.9, %v6053_v5  ;;  %v5827_v20 = vshrl.u32 %v7384_v0, 16  ;;  %v5830_v31 = vshll.u32 %v7384_v0, 16  ;;  %v10988_v37 = vunpack.c.l.bf16 %v5815_v7  ;;  %11809 = vst [vmem:[#allocation72_spill] sm:$0xff] %v10994_v24 }
 0x1cc   : > { %v10992_v56 = vsel %vm6085_vm13, 1.0, %v11767_v39  ;;  %v5860_v44 = vshll.u32 %v7388_v46, 16  ;;  %v5864_v50 = vshrl.u32 %v7388_v46, 16  ;;  %v10998_v23 = vsel %vm5234_vm14, 1.0, %v11767_v39  ;;  %v7385_v62 = vld [vmem:[%s8863_s13 + $0x88] sm:$0xf] }
 0x1cd   : > { %11806 = vst [vmem:[#allocation69_spill] sm:$0xff] %v10986_v1  ;;  %11807 = vst [vmem:[#allocation70_spill] sm:$0xff] %v10988_v37  ;;  %v11000_v32 = vmul.f32 0.9, %v5202_v29  ;;  %vm6083_vm15 = vcmp.gt.f32.partialorder %v6051_v12, 1.0  ;;  %v5825_v7 = vsel %vm8990_vm2, %v5820_v40, %v5824_v61  ;;  %v5796_v5 = vrot.slane %v5795_v53, 4 }
 0x1ce   : > { %11808 = vst [vmem:[#allocation71_spill] sm:$0xff] %v10992_v56  ;;  %11810 = vst [vmem:[#allocation73_spill] sm:$0xff] %v10998_v23  ;;  %v5800_v0 = vrot.slane %v5798_v48, 5  ;;  %v5207_v56 = vld [vmem:[#allocation2 + $0xb0] sm:$0xff]  ;;  %v5857_v1 = vor.u32 %v5856_v14, %v5853_v41  ;;  %v5205_v60 = vld [vmem:[#allocation2 + $0xa0] sm:$0xff]  ;;  %v5829_v46 = vrot.slane %v5827_v20, 4  ;;  %v11006_v6 = vunpack.c.l.bf16 %v5825_v7 }
 0x1cf   : > { %11811 = vst [vmem:[#allocation74_spill] sm:$0xff] %v11000_v32  ;;  %v6056_v35 = vld [vmem:[#allocation3 + $0xb0] sm:$0xff]  ;;  %vm5239_vm0 = vcmp.gt.f32.partialorder %v5207_v56, 1.0  ;;  %v5832_v24 = vrot.slane %v5830_v31, 5  ;;  %v5862_v37 = vrot.slane %v5860_v44, 5  ;;  %v5836_v23 = vshll.u32 %v7385_v62, 16 }
 0x1d0   : > { %vm6088_vm1 = vcmp.gt.f32.partialorder %v6056_v35, 1.0  ;;  %v5840_v29 = vshrl.u32 %v7385_v62, 16  ;;  %v7389_v32 = vld [vmem:[%s8863_s13 + $0x98] sm:$0x1]  ;;  %v5866_v58 = vrot.slane %v5864_v50, 4  ;;  %11812 = vst [vmem:[#allocation75_spill] sm:$0xff] %v11006_v6  ;;  %v5801_v40 = vsel %vm8990_vm2, %v5796_v5, %v5800_v0 }
 0x1d1   : > { %v11010_v61 = vsel %vm6083_vm15, 1.0, %v11767_v39  ;;  %v11012_v53 = vmul.f32 0.9, %v6051_v12  ;;  %v11014_v48 = vmul.f32 0.9, %v5207_v56  ;;  %v6054_v14 = vld [vmem:[#allocation3 + $0xa0] sm:$0xff]  ;;  %v5833_v44 = vor.u32 %v5832_v24, %v5829_v46 }
 0x1d2   : > { %11813 = vst [vmem:[#allocation76_spill] sm:$0xff] %v11010_v61  ;;  %v5858_v41 = vrot.slane %v5857_v1, 4  ;;  %vm5237_vm3 = vcmp.gt.f32.partialorder %v5205_v60, 1.0  ;;  %vm6086_vm4 = vcmp.gt.f32.partialorder %v6054_v14, 1.0  ;;  %v11020_v20 = vsel %vm5239_vm0, 1.0, %v11767_v39  ;;  %v5208_v50 = vld [vmem:[#allocation2 + $0xb8] sm:$0xff] }
 0x1d3   : > { %11814 = vst [vmem:[#allocation77_spill] sm:$0xff] %v11012_v53  ;;  %11815 = vst [vmem:[#allocation78_spill] sm:$0xff] %v11014_v48  ;;  %v11024_v31 = vsel %vm6088_vm1, 1.0, %v11767_v39  ;;  %v11026_v12 = vmul.f32 0.9, %v6056_v35  ;;  %v5838_v5 = vrot.slane %v5836_v23, 5  ;;  %v5867_v1 = vor.u32 %v5866_v58, %v5862_v37 }
 0x1d4   : > { %11816 = vst [vmem:[#allocation79_spill] sm:$0xff] %v11020_v20  ;;  %11817 = vst [vmem:[#allocation80_spill] sm:$0xff] %v11024_v31  ;;  %v7386_v62 = vld [vmem:[%s8863_s13 + $0x8c] sm:$0x1]  ;;  %v7393_v7 = vld [vmem:[%s8863_s13 + $0xa8] sm:$0xf]  ;;  %v11035_v20 = vunpack.c.l.bf16 %v5801_v40  ;;  %v5863_v58 = vsel %vm8990_vm2, %v5858_v41, %v5862_v37 }
 0x1d5   : > { %11818 = vst [vmem:[#allocation81_spill] sm:$0xff] %v11026_v12  ;;  %v5870_v0 = vshll.u32 %v7389_v32, 16  ;;  %v5842_v53 = vrot.slane %v5840_v29, 4  ;;  %v7390_v48 = vld [vmem:[%s8863_s13 + $0x9c] sm:$0xf]  ;;  %v11039_v31 = vsel %vm5237_vm3, 1.0, %v11767_v39  ;;  %v11060_v49 = vunpack.c.l.bf16 %v5863_v58 }
 0x1d6   : > { %11819 = vst [vmem:[#allocation82_spill] sm:$0xff] %v11035_v20  ;;  %11820 = vst [vmem:[#allocation83_spill] sm:$0xff] %v11039_v31  ;;  %v11041_v35 = vmul.f32 0.9, %v5205_v60  ;;  %v11045_v24 = vsel %vm6086_vm4, 1.0, %v11767_v39  ;;  %v6057_v46 = vld [vmem:[#allocation3 + $0xb8] sm:$0xff] }
 0x1d7   : > { %11822 = vst [vmem:[#allocation85_spill] sm:$0xff] %v11045_v24  ;;  %v11051_v32 = vmul.f32 0.9, %v6054_v14  ;;  %vm5240_vm5 = vcmp.gt.f32.partialorder %v5208_v50, 1.0  ;;  %vm6089_vm6 = vcmp.gt.f32.partialorder %v6057_v46, 1.0  ;;  %v5206_v29 = vld [vmem:[#allocation2 + $0xa8] sm:$0xff] }
 0x1d8   : > { %11821 = vst [vmem:[#allocation84_spill] sm:$0xff] %v11041_v35  ;;  %v5834_v12 = vrot.slane %v5833_v44, 4  ;;  %vm5238_vm7 = vcmp.gt.f32.partialorder %v5206_v29, 1.0  ;;  %v5899_v60 = vshrl.u32 %v7393_v7, 16  ;;  %v5902_v31 = vshll.u32 %v7393_v7, 16  ;;  %v6055_v14 = vld [vmem:[#allocation3 + $0xa8] sm:$0xff] }
 0x1d9   : > { %11823 = vst [vmem:[#allocation86_spill] sm:$0xff] %v11051_v32  ;;  %v5868_v20 = vrot.slane %v5867_v1, 4  ;;  %v5872_v24 = vrot.slane %v5870_v0, 5  ;;  %v5843_v35 = vor.u32 %v5842_v53, %v5838_v5  ;;  %v5846_v6 = vshll.u32 %v7386_v62, 16  ;;  %11826 = vst [vmem:[#allocation89_spill] sm:$0xff] %v11060_v49 }
 0x1da   : > { %v11056_v54 = vsel %vm5240_vm5, 1.0, %v11767_v39  ;;  %v11058_v37 = vmul.f32 0.9, %v5208_v50  ;;  %v5875_v41 = vshrl.u32 %v7390_v48, 16  ;;  %v5878_v32 = vshll.u32 %v7390_v48, 16 }
 0x1db   : > { %11824 = vst [vmem:[#allocation87_spill] sm:$0xff] %v11056_v54  ;;  %v11064_v44 = vsel %vm6089_vm6, 1.0, %v11767_v39  ;;  %v11066_v7 = vmul.f32 0.9, %v6057_v46  ;;  %v11069_v53 = vsel %vm5238_vm7, 1.0, %v11767_v39  ;;  %v5839_v1 = vsel %vm8990_vm2, %v5834_v12, %v5838_v5 }
 0x1dc   : > { %11825 = vst [vmem:[#allocation88_spill] sm:$0xff] %v11058_v37  ;;  %11827 = vst [vmem:[#allocation90_spill] sm:$0xff] %v11064_v44  ;;  %v7394_v62 = vld [vmem:[%s8863_s13 + $0xac] sm:$0xf]  ;;  %vm6087_vm8 = vcmp.gt.f32.partialorder %v6055_v14, 1.0  ;;  %v5901_v50 = vrot.slane %v5899_v60, 4  ;;  %v5873_v58 = vsel %vm8990_vm2, %v5868_v20, %v5872_v24 }
 0x1dd   : > { %11828 = vst [vmem:[#allocation91_spill] sm:$0xff] %v11066_v7  ;;  %11829 = vst [vmem:[#allocation92_spill] sm:$0xff] %v11069_v53  ;;  %v5904_v0 = vrot.slane %v5902_v31, 5  ;;  %v7391_v54 = vld [vmem:[%s8863_s13 + $0xa0] sm:$0xf]  ;;  %v5844_v46 = vrot.slane %v5843_v35, 4  ;;  %v11085_v31 = vunpack.c.l.bf16 %v5839_v1 }
 0x1de   : > { %v11079_v49 = vmul.f32 0.9, %v5206_v29  ;;  %v5848_v44 = vrot.slane %v5846_v6, 5  ;;  %v5211_v53 = vld [vmem:[#allocation2 + $0xd0] sm:$0xff]  ;;  %v5908_v37 = vshll.u32 %v7394_v62, 16  ;;  %v5912_v13 = vshrl.u32 %v7394_v62, 16 }
 0x1df   : > { %v5877_v36 = vrot.slane %v5875_v41, 4  ;;  %v5880_v12 = vrot.slane %v5878_v32, 5  ;;  %11831 = vst [vmem:[#allocation94_spill] sm:$0xff] %v11085_v31  ;;  %v11089_v60 = vsel %vm6087_vm8, 1.0, %v11767_v39  ;;  %v6060_v20 = vld [vmem:[#allocation3 + $0xd0] sm:$0xff]  ;;  %v5884_v24 = vshll.u32 %v7391_v54, 16 }
 0x1e0   : > { %11830 = vst [vmem:[#allocation93_spill] sm:$0xff] %v11079_v49  ;;  %11832 = vst [vmem:[#allocation95_spill] sm:$0xff] %v11089_v60  ;;  %v5888_v35 = vshrl.u32 %v7391_v54, 16  ;;  %v11093_v29 = vmul.f32 0.9, %v6055_v14  ;;  %vm5243_vm9 = vcmp.gt.f32.partialorder %v5211_v53, 1.0  ;;  %v5905_v41 = vor.u32 %v5904_v0, %v5901_v50 }
 0x1e1   : > { %vm6092_vm10 = vcmp.gt.f32.partialorder %v6060_v20, 1.0  ;;  %v5209_v32 = vld [vmem:[#allocation2 + $0xc0] sm:$0xff]  ;;  %v11095_v62 = vunpack.c.l.bf16 %v5873_v58  ;;  %v5849_v1 = vsel %vm8990_vm2, %v5844_v46, %v5848_v44  ;;  %v11099_v31 = vmul.f32 0.9, %v5211_v53  ;;  %v7395_v54 = vld [vmem:[%s8863_s13 + $0xb0] sm:$0x1] }
 0x1e2   : > { %11833 = vst [vmem:[#allocation96_spill] sm:$0xff] %v11093_v29  ;;  %vm5241_vm11 = vcmp.gt.f32.partialorder %v5209_v32, 1.0  ;;  %v6058_v60 = vld [vmem:[#allocation3 + $0xc0] sm:$0xff]  ;;  %v5910_v49 = vrot.slane %v5908_v37, 5  ;;  %v5881_v14 = vor.u32 %v5880_v12, %v5877_v36  ;;  %v5212_v29 = vld [vmem:[#allocation2 + $0xd8] sm:$0xff]  ;;  %v5914_v8 = vrot.slane %v5912_v13, 4 }
 0x1e3   : > { %11834 = vst [vmem:[#allocation97_spill] sm:$0xff] %v11095_v62  ;;  %11835 = vst [vmem:[#allocation98_spill] sm:$0xff] %v11099_v31  ;;  %vm6090_vm12 = vcmp.gt.f32.partialorder %v6058_v60, 1.0  ;;  %v7392_v50 = vld [vmem:[%s8863_s13 + $0xa4] sm:$0x1]  ;;  %v11105_v0 = vsel %vm5243_vm9, 1.0, %v11767_v39  ;;  %v11111_v62 = vunpack.c.l.bf16 %v5849_v1 }
 0x1e4   : > { %11836 = vst [vmem:[#allocation99_spill] sm:$0xff] %v11105_v0  ;;  %v11108_v58 = vsel %vm6092_vm10, 1.0, %v11767_v39  ;;  %v5886_v44 = vrot.slane %v5884_v24, 5  ;;  %v5890_v46 = vrot.slane %v5888_v35, 4  ;;  %v7399_v31 = vld [vmem:[%s8863_s13 + $0xc0] sm:$0xf] }
 0x1e5   : > { %11837 = vst [vmem:[#allocation100_spill] sm:$0xff] %v11108_v58  ;;  %11838 = vst [vmem:[#allocation101_spill] sm:$0xff] %v11111_v62  ;;  %v5906_v52 = vrot.slane %v5905_v41, 4  ;;  %v11113_v55 = vmul.f32 0.9, %v6060_v20  ;;  %v11117_v36 = vsel %vm5241_vm11, 1.0, %v11767_v39  ;;  %v5915_v41 = vor.u32 %v5914_v8, %v5910_v49 }
 0x1e6   : > { %11840 = vst [vmem:[#allocation103_spill] sm:$0xff] %v11117_v36  ;;  %v7396_v13 = vld [vmem:[%s8863_s13 + $0xb4] sm:$0xf]  ;;  %v11122_v53 = vmul.f32 0.9, %v5209_v32  ;;  %v11126_v12 = vsel %vm6090_vm12, 1.0, %v11767_v39 }
 0x1e7   : > { %11839 = vst [vmem:[#allocation102_spill] sm:$0xff] %v11113_v55  ;;  %11843 = vst [vmem:[#allocation106_spill] sm:$0xff] %v11126_v12  ;;  %vm5244_vm13 = vcmp.gt.f32.partialorder %v5212_v29, 1.0  ;;  %v5918_v24 = vshll.u32 %v7395_v54, 16  ;;  %v5882_v20 = vrot.slane %v5881_v14, 4  ;;  %v6061_v1 = vld [vmem:[#allocation3 + $0xd8] sm:$0xff]  ;;  %v5911_v54 = vsel %vm8990_vm2, %v5906_v52, %v5910_v49 }
 0x1e8   : > { %11842 = vst [vmem:[#allocation105_spill] sm:$0xff] %v11122_v53  ;;  %v5210_v58 = vld [vmem:[#allocation2 + $0xc8] sm:$0xff]  ;;  %v5947_v55 = vshrl.u32 %v7399_v31, 16  ;;  %v5950_v36 = vshll.u32 %v7399_v31, 16  ;;  %v11132_v0 = vmul.f32 0.9, %v6058_v60  ;;  %v5891_v53 = vor.u32 %v5890_v46, %v5886_v44 }
 0x1e9   : > { %v11134_v32 = vmul.f32 0.9, %v5212_v29  ;;  %v11142_v8 = vsel %vm5244_vm13, 1.0, %v11767_v39  ;;  %v7400_v14 = vld [vmem:[%s8863_s13 + $0xc4] sm:$0xf]  ;;  %v5926_v31 = vshll.u32 %v7396_v13, 16  ;;  %v11149_v52 = vunpack.c.l.bf16 %v5911_v54 }
 0x1ea   : > { %11846 = vst [vmem:[#allocation109_spill] sm:$0xff] %v11132_v0  ;;  %11849 = vst [vmem:[#allocation112_spill] sm:$0xff] %v11142_v8  ;;  %v5920_v43 = vrot.slane %v5918_v24, 5  ;;  %vm6093_vm14 = vcmp.gt.f32.partialorder %v6061_v1, 1.0  ;;  %v11145_v60 = vmul.f32 0.9, %v6061_v1 }
 0x1eb   : > { %11847 = vst [vmem:[#allocation110_spill] sm:$0xff] %v11134_v32  ;;  %vm5242_vm15 = vcmp.gt.f32.partialorder %v5210_v58, 1.0  ;;  %v5916_v46 = vrot.slane %v5915_v41, 4  ;;  %v6059_v0 = vld [vmem:[#allocation3 + $0xc8] sm:$0xff]  ;;  %v5949_v32 = vrot.slane %v5947_v55, 4  ;;  %v5952_v49 = vrot.slane %v5950_v36, 5 }
 0x1ec   : > { %11850 = vst [vmem:[#allocation113_spill] sm:$0xff] %v11145_v60  ;;  %v5892_v29 = vrot.slane %v5891_v53, 4  ;;  %vm6091_vm0 = vcmp.gt.f32.partialorder %v6059_v0, 1.0  ;;  %v5960_v24 = vshrl.u32 %v7400_v14, 16  ;;  %v5928_v11 = vrot.slane %v5926_v31, 5  ;;  %v5213_v53 = vld [vmem:[#allocation2 + $0xe0] sm:$0xff] }
 0x1ed   : > { %v11160_v55 = vsel %vm6093_vm14, 1.0, %v11767_v39  ;;  %v11164_v36 = vsel %vm5242_vm15, 1.0, %v11767_v39  ;;  %v11173_v41 = vsel %vm6091_vm0, 1.0, %v11767_v39  ;;  %v5953_v54 = vor.u32 %v5952_v49, %v5949_v32  ;;  %v6064_v1 = vld [vmem:[#allocation3 + $0xf0] sm:$0xff] }
 0x1ee   : > { %11852 = vst [vmem:[#allocation115_spill] sm:$0xff] %v11160_v55  ;;  %11853 = vst [vmem:[#allocation116_spill] sm:$0xff] %v11164_v36  ;;  %vm6096_vm3 = vcmp.gt.f32.partialorder %v6064_v1, 1.0  ;;  %vm5245_vm4 = vcmp.gt.f32.partialorder %v5213_v53, 1.0 }
 0x1ef   : > { %11854 = vst [vmem:[#allocation117_spill] sm:$0xff] %v11173_v41  ;;  %v6062_v41 = vld [vmem:[#allocation3 + $0xe0] sm:$0xff] }
 0x1f0   : > { %vm6094_vm5 = vcmp.gt.f32.partialorder %v6062_v41, 1.0 }
 0x1f6   : > { %v11985_v38 = vld [vmem:[#allocation117_spill] sm:$0xff] }
 0x20f   : > { %v11030_v61 = vpop.f32.mrb[0].mxu1 }
 0x210   : > { %v11033_v56 = vpop.f32.mrb[1].mxu1 }
 0x211   : > { %v11047_v23 = vpop.f32.mrb[2].mxu1 }
 0x212   : > { %v11053_v40 = vpop.f32.mrb[3].mxu1 }
 0x217   : > { %v11075_v48 = vpop.f32.mrb[4].mxu1 }
 0x218   : > { %v11081_v7 = vpop.f32.mrb[5].mxu1 }
 0x219   : > { %v11083_v5 = vpop.f32.mrb[6].mxu1 }
 0x21a   : > { %v11091_v6 = vpop.f32.mrb[7].mxu1 }
 0x21f   : > { %v11120_v37 = vpop.f32.mrb[8].mxu1 }
 0x220   : > { %11841 = vst [vmem:[#allocation104_spill] sm:$0xff] %v11120_v37  ;;  %v11128_v35 = vpop.f32.mrb[9].mxu1  ;;  %v5894_v37 = vshll.u32 %v7392_v50, 16  ;;  %v5887_v50 = vsel %vm8990_vm2, %v5882_v20, %v5886_v44 }
 0x221   : > { %11844 = vst [vmem:[#allocation107_spill] sm:$0xff] %v11128_v35  ;;  %v11130_v62 = vpop.f32.mrb[10].mxu1  ;;  %v5923_v35 = vshrl.u32 %v7396_v13, 16  ;;  %v5956_v13 = vshll.u32 %v7400_v14, 16  ;;  %v11156_v44 = vunpack.c.l.bf16 %v5887_v50  ;;  %v7401_v14 = vld [vmem:[%s8863_s13 + $0xc8] sm:$0x1] }
 0x222   : > { %11845 = vst [vmem:[#allocation108_spill] sm:$0xff] %v11130_v62  ;;  %v11136_v12 = vpop.f32.mrb[11].mxu1  ;;  %v5896_v8 = vrot.slane %v5894_v37, 5  ;;  %v11152_v62 = vld [vmem:[%s8863_s13 + $0xb8] sm:$0xf] }
 0x223   : > { %11848 = vst [vmem:[#allocation111_spill] sm:$0xff] %v11136_v12  ;;  %v5215_v12 = vld [vmem:[#allocation2 + $0xf0] sm:$0xff]  ;;  %v5925_v60 = vrot.slane %v5923_v35, 4  ;;  %11851 = vst [vmem:[#allocation114_spill] sm:$0xff] %v11156_v44  ;;  %v11166_v37 = vmul.f32 0.9, %v5210_v58  ;;  %v5921_v35 = vsel %vm8990_vm2, %v5916_v46, %v5920_v43 }
 0x224   : > { %vm5247_vm1 = vcmp.gt.f32.partialorder %v5215_v12, 1.0  ;;  %v5897_v50 = vsel %vm8990_vm2, %v5892_v29, %v5896_v8  ;;  %v11180_v58 = vmul.f32 0.9, %v6059_v0  ;;  %v11182_v55 = vmul.f32 0.9, %v5215_v12 }
 0x225   : > { %v5958_v43 = vrot.slane %v5956_v13, 5  ;;  %v5929_v46 = vor.u32 %v5928_v11, %v5925_v60  ;;  %v5962_v44 = vrot.slane %v5960_v24, 4  ;;  %v11186_v32 = vunpack.c.l.bf16 %v5921_v35  ;;  %v5216_v11 = vld [vmem:[#allocation2 + $0xf8] sm:$0xff]  ;;  %v11203_v60 = vld [vmem:[%s11670_s3] ss:$0 sm:$0xff] }
 0x226   : > { %11855 = vst [vmem:[#allocation118_spill] sm:$0xff] %v11180_v58  ;;  %11856 = vst [vmem:[#allocation119_spill] sm:$0xff] %v11182_v55  ;;  %v11190_v49 = vsel %vm5247_vm1, 1.0, %v11767_v39  ;;  %v5932_v8 = vshll.u32 %v11152_v62, 16  ;;  %v11193_v0 = vunpack.c.l.bf16 %v5897_v50  ;;  %v5954_v29 = vrot.slane %v5953_v54, 4 }
 0x227   : > { %v11154_v28 = vpop.f32.mrb[12].mxu1  ;;  %11857 = vst [vmem:[#allocation120_spill] sm:$0xff] %v11186_v32  ;;  %11858 = vst [vmem:[#allocation121_spill] sm:$0xff] %v11190_v49  ;;  %v11196_v58 = vsel %vm6096_vm3, 1.0, %v11767_v39  ;;  %v11198_v13 = vmul.f32 0.9, %v6064_v1 }
 0x228   : > { %v11168_v20 = vpop.f32.mrb[13].mxu1  ;;  %11859 = vst [vmem:[#allocation122_spill] sm:$0xff] %v11193_v0  ;;  %11860 = vst [vmem:[#allocation123_spill] sm:$0xff] %v11196_v58  ;;  %v11206_v12 = vsel %vm5245_vm4, 1.0, %v11767_v39  ;;  %v5936_v24 = vshrl.u32 %v11152_v62, 16  ;;  %vm5248_vm6 = vcmp.gt.f32.partialorder %v5216_v11, 1.0 }
 0x229   : > { %v11176_v31 = vpop.f32.mrb[14].mxu1  ;;  %11861 = vst [vmem:[#allocation124_spill] sm:$0xff] %v11198_v13  ;;  %11862 = vst [vmem:[#allocation125_spill] sm:$0xff] %v11206_v12  ;;  %v5966_v35 = vshll.u32 %v7401_v14, 16  ;;  %v11209_v54 = vmul.f32 0.9, %v5213_v53  ;;  %v5963_v13 = vor.u32 %v5962_v44, %v5958_v43 }
 0x22a   : > { %v11184_v36 = vpop.f32.mrb[15].mxu1  ;;  %v5930_v58 = vrot.slane %v5929_v46, 4  ;;  %v11212_v1 = vsel %vm6094_vm5, 1.0, %v11767_v39  ;;  %v5214_v0 = vld [vmem:[#allocation2 + $0xe8] sm:$0xff]  ;;  %v11215_v55 = vrot.slane %v5932_v8, 5  ;;  %v5959_v46 = vsel %vm8990_vm2, %v5954_v29, %v5958_v43  ;;  %v11228_v44 = vld [vmem:[#allocation3 + $0xf8] sm:$0xff] }
 0x22b   : > { %11863 = vst [vmem:[#allocation126_spill] sm:$0xff] %v11212_v1  ;;  %v11217_v12 = vmul.f32 0.9, %v6062_v41  ;;  %v11219_v62 = vmul.f32 0.9, %v5216_v11  ;;  %v11226_v1 = vsel %vm5248_vm6, 1.0, %v11767_v39 }
 0x22c   : > { %11865 = vst [vmem:[#allocation128_spill] sm:$0xff] %v11226_v1  ;;  %vm5246_vm7 = vcmp.gt.f32.partialorder %v5214_v0, 1.0  ;;  %v5935_v29 = vsel %vm8990_vm2, %v5930_v58, %v11215_v55  ;;  %v11242_v11 = vrot.slane %v5963_v13, 4 }
 0x22d   : > { %11864 = vst [vmem:[#allocation127_spill] sm:$0xff] %v11217_v12  ;;  %v11233_v12 = vrot.slane %v5966_v35, 5  ;;  %v11259_v13 = vunpack.c.l.bf16 %v5935_v29 }
 0x22e   : > { %v8213_v50 = vpop.f32.mrb[0].mxu0 }
 0x22f   : > { %v8259_v49 = vadd.f32 %v8213_v50, %v11030_v61  ;;  %v4987_v32 = vpop.f32.mrb[1].mxu0  ;;  %v7398_v61 = vld [vmem:[%s8863_s13 + $0xbc] sm:$0x1] }
 0x230   : > { %v8260_v14 = vadd.f32 %v4987_v32, %v11033_v56  ;;  %v8214_v53 = vpop.f32.mrb[2].mxu0  ;;  %v11235_v56 = vrot.slane %v5936_v24, 4  ;;  %v5942_v35 = vshll.u32 %v7398_v61, 16 }
 0x231   : > { %v5155_v8 = vadd.f32 %v8259_v49, %v11203_v60  ;;  %v8261_v41 = vadd.f32 %v8214_v53, %v11047_v23  ;;  %v4990_v50 = vpop.f32.mrb[3].mxu0  ;;  %v11247_v23 = vmul.f32 0.9, %v11228_v44  ;;  %v11251_v53 = vunpack.c.l.bf16 %v5959_v46 }
 0x232   : > { %v5153_v32 = vadd.f32 %v8260_v14, %v11203_v60  ;;  %v8262_v43 = vadd.f32 %v4990_v50, %v11053_v40  ;;  %v11255_v40 = vsel %vm5246_vm7, 1.0, %v11767_v39  ;;  %v5969_v46 = vsel %vm8990_vm2, %v11242_v11, %v11233_v12 }
 0x233   : > { %v5347_v1 = vadd.f32 %v10694_v27, %v5155_v8  ;;  %v5156_v49 = vadd.f32 %v8261_v41, %v11203_v60  ;;  %v11261_v8 = vmul.f32 0.9, %v5214_v0  ;;  %v5939_v50 = vor.u32 %v11235_v56, %v11215_v55 }
 0x234   : > { %v5345_v24 = vadd.f32 %v10696_v19, %v5153_v32  ;;  %v5154_v14 = vadd.f32 %v8262_v43, %v11203_v60 }
 0x235   : > { %v5379_v58 = vsub.f32 %v5347_v1, %v10692_v10  ;;  %v5348_v27 = vadd.f32 %v10698_v34, %v5156_v49  ;;  %v11273_v1 = vrot.slane %v5942_v35, 5 }
 0x236   : > { %v5377_v61 = vsub.f32 %v5345_v24, %v10702_v4  ;;  %v5346_v19 = vadd.f32 %v10708_v16, %v5154_v14  ;;  %v8217_v41 = vpop.f32.mrb[4].mxu0 }
 0x237   : > { %5411 = vst [vmem:[#allocation2 + $0x10] sm:$0xff] %v5379_v58  ;;  %vm5443_vm8 = vcmp.gt.f32.partialorder %v5379_v58, 1.0  ;;  %v5380_v10 = vsub.f32 %v5348_v27, %v10713_v2  ;;  %v8263_v34 = vadd.f32 %v8217_v41, %v11075_v48  ;;  %v5003_v0 = vpop.f32.mrb[5].mxu0 }
 0x238   : > { %v7324_v4 = vsel %vm5443_vm8, 1.0, %v11767_v39  ;;  %5409 = vst [vmem:[#allocation2] sm:$0xff] %v5377_v61  ;;  %vm5441_vm9 = vcmp.gt.f32.partialorder %v5377_v61, 1.0  ;;  %v5378_v16 = vsub.f32 %v5346_v19, %v10725_v26  ;;  %v8264_v32 = vadd.f32 %v5003_v0, %v11081_v7  ;;  %v8218_v43 = vpop.f32.mrb[6].mxu0 }
 0x239   : > { %v6196_v29 = vadd.f32 %v7324_v4, %v10715_v30  ;;  %v7322_v49 = vsel %vm5441_vm9, 1.0, %v11767_v39  ;;  %5412 = vst [vmem:[#allocation2 + $0x18] sm:$0xff] %v5380_v10  ;;  %vm5444_vm10 = vcmp.gt.f32.partialorder %v5380_v10, 1.0  ;;  %v5159_v2 = vadd.f32 %v8263_v34, %v11203_v60  ;;  %v5006_v48 = vpop.f32.mrb[7].mxu0 }
 0x23a   : > { %v6194_v35 = vadd.f32 %v7322_v49, %v10745_v63  ;;  %v7325_v24 = vsel %vm5444_vm10, 1.0, %v11767_v39  ;;  %5410 = vst [vmem:[#allocation2 + $0x8] sm:$0xff] %v5378_v16  ;;  %vm5442_vm11 = vcmp.gt.f32.partialorder %v5378_v16, 1.0  ;;  %v5157_v26 = vadd.f32 %v8264_v32, %v11203_v60  ;;  %v11866_v16 = vld [vmem:[#allocation9_spill] sm:$0xff] }
 0x23b   : > { %v6228_v7 = vadd.f32 %v6196_v29, %v10710_v57  ;;  %v6197_v14 = vadd.f32 %v7325_v24, %v10756_v51  ;;  %v7323_v30 = vsel %vm5442_vm11, 1.0, %v11767_v39  ;;  %v5351_v58 = vadd.f32 %v10743_v9, %v5159_v2  ;;  %v11867_v49 = vld [vmem:[#allocation5_spill] sm:$0xff]  ;;  %v11869_v24 = vld [vmem:[#allocation8_spill] sm:$0xff] }
 0x23c   : > { %v6226_v27 = vadd.f32 %v6194_v35, %v10727_v47  ;;  %v6195_v61 = vadd.f32 %v7323_v30, %v10763_v21  ;;  %v5349_v63 = vadd.f32 %v10760_v59, %v5157_v26  ;;  %v8265_v19 = vadd.f32 %v8218_v43, %v11083_v5  ;;  %v11871_v30 = vld [vmem:[#allocation104_spill] sm:$0xff] }
 0x23d   : > { %v6260_v41 = vsub.f32 %v6228_v7, %v10718_v45  ;;  %v6229_v10 = vadd.f32 %v6197_v14, %v10729_v3  ;;  %v5383_v57 = vsub.f32 %v5351_v58, %v10736_v25  ;;  %v8266_v51 = vadd.f32 %v5006_v48, %v11091_v6  ;;  %v11868_v48 = vld [vmem:[#allocation12_spill] sm:$0xff]  ;;  %v11870_v7 = vld [vmem:[#allocation11_spill] sm:$0xff] }
 0x23e   : > { %v6258_v34 = vsub.f32 %v6226_v27, %v10741_v22  ;;  %v6227_v9 = vadd.f32 %v6195_v61, %v10733_v18  ;;  %v5381_v47 = vsub.f32 %v5349_v63, %v10773_v17  ;;  %v5160_v21 = vadd.f32 %v8265_v19, %v11203_v60  ;;  %v8221_v0 = vpop.f32.mrb[8].mxu0  ;;  %v11872_v27 = vld [vmem:[#allocation7_spill] sm:$0xff]  ;;  %v11873_v63 = vld [vmem:[#allocation6_spill] sm:$0xff] }
 0x23f   : > { %6292 = vst [vmem:[#allocation3 + $0x10] sm:$0xff] %v6260_v41  ;;  %vm6324_vm12 = vcmp.gt.f32.partialorder %v6260_v41, 1.0  ;;  %v6261_v59 = vsub.f32 %v6229_v10, %v10748_v42  ;;  %5415 = vst [vmem:[#allocation2 + $0x30] sm:$0xff] %v5383_v57  ;;  %vm5447_vm13 = vcmp.gt.f32.partialorder %v5383_v57, 1.0  ;;  %v5158_v45 = vadd.f32 %v8266_v51, %v11203_v60  ;;  %v5019_v3 = vpop.f32.mrb[9].mxu0  ;;  %v11874_v41 = vld [vmem:[#allocation107_spill] sm:$0xff] }
 0x240   : > { %v7436_v25 = vsel %vm6324_vm12, 1.0, %v11767_v39  ;;  %6290 = vst [vmem:[#allocation3] sm:$0xff] %v6258_v34  ;;  %vm6322_vm14 = vcmp.gt.f32.partialorder %v6258_v34, 1.0  ;;  %v6259_v18 = vsub.f32 %v6227_v9, %v10751_v15  ;;  %v7328_v22 = vsel %vm5447_vm13, 1.0, %v11767_v39  ;;  %5413 = vst [vmem:[#allocation2 + $0x20] sm:$0xff] %v5381_v47  ;;  %v8222_v17 = vpop.f32.mrb[10].mxu0 }
 0x241   : > { %v7434_v5 = vsel %vm6322_vm14, 1.0, %v11767_v39  ;;  %6293 = vst [vmem:[#allocation3 + $0x18] sm:$0xff] %v6261_v59  ;;  %vm6325_vm15 = vcmp.gt.f32.partialorder %v6261_v59, 1.0  ;;  %v6200_v42 = vadd.f32 %v7328_v22, %v10795_v33  ;;  %vm5445_vm0 = vcmp.gt.f32.partialorder %v5381_v47, 1.0  ;;  %v5022_v6 = vpop.f32.mrb[11].mxu0  ;;  %v11875_v57 = vld [vmem:[#allocation108_spill] sm:$0xff] }
 0x242   : > { %v7437_v4 = vsel %vm6325_vm15, 1.0, %v11767_v39  ;;  %6291 = vst [vmem:[#allocation3 + $0x8] sm:$0xff] %v6259_v18  ;;  %vm6323_vm1 = vcmp.gt.f32.partialorder %v6259_v18, 1.0  ;;  %v7326_v15 = vsel %vm5445_vm0, 1.0, %v11767_v39  ;;  %v5352_v32 = vadd.f32 %v11866_v16, %v5160_v21  ;;  %v11876_v34 = vld [vmem:[#allocation4_spill] sm:$0xff]  ;;  %v11877_v21 = vld [vmem:[#allocation111_spill] sm:$0xff] }
 0x243   : > { %v7536_v43 = vpack.c.bf16 %v7437_v4, %v7436_v25  ;;  %v7435_v29 = vsel %vm6323_vm1, 1.0, %v11767_v39  ;;  %v6232_v2 = vadd.f32 %v6200_v42, %v11867_v49  ;;  %v6198_v35 = vadd.f32 %v7326_v15, %v11868_v48  ;;  %v11880_v4 = vld [vmem:[#allocation18_spill] sm:$0xff]  ;;  %v11882_v48 = vld [vmem:[#allocation13_spill] sm:$0xff] }
 0x244   : > { %v7533_v33 = vpack.c.bf16 %v7435_v29, %v7434_v5  ;;  %v5384_v26 = vsub.f32 %v5352_v32, %v11869_v24  ;;  %v5350_v14 = vadd.f32 %v11870_v7, %v5158_v45  ;;  %v8267_v58 = vadd.f32 %v8221_v0, %v11871_v30  ;;  %v11878_v0 = vld [vmem:[#allocation10_spill] sm:$0xff]  ;;  %v11879_v5 = vld [vmem:[#allocation16_spill] sm:$0xff]  ;;  %v11881_v32 = vld [vmem:[#allocation21_spill] sm:$0xff] }
 0x245   : > { %7580 = vst [vmem:[%s8853_s7 + $0x8] sm:$0xff] %v7536_v43   ;;  %v6264_v61 = vsub.f32 %v6232_v2, %v11872_v27  ;;  %v6230_v19 = vadd.f32 %v6198_v35, %v11873_v63  ;;  %v8268_v10 = vadd.f32 %v5019_v3, %v11874_v41  ;;  %v8269_v51 = vadd.f32 %v8222_v17, %v11875_v57 }
 0x246   : > { %7534 = vst [vmem:[%s8853_s7] sm:$0xff] %v7533_v33   ;;  %5416 = vst [vmem:[#allocation2 + $0x38] sm:$0xff] %v5384_v26  ;;  %vm5448_vm3 = vcmp.gt.f32.partialorder %v5384_v26, 1.0  ;;  %v5382_v9 = vsub.f32 %v5350_v14, %v11876_v34  ;;  %v5163_v47 = vadd.f32 %v8267_v58, %v11203_v60  ;;  %v8270_v59 = vadd.f32 %v5022_v6, %v11877_v21  ;;  %v8225_v45 = vpop.f32.mrb[12].mxu0  ;;  %v11883_v33 = vld [vmem:[#allocation22_spill] sm:$0xff]  ;;  %v11884_v26 = vld [vmem:[#allocation19_spill] sm:$0xff] }
 0x247   : > { %6296 = vst [vmem:[#allocation3 + $0x30] sm:$0xff] %v6264_v61  ;;  %vm6328_vm4 = vcmp.gt.f32.partialorder %v6264_v61, 1.0  ;;  %v6262_v25 = vsub.f32 %v6230_v19, %v11878_v0  ;;  %v7329_v18 = vsel %vm5448_vm3, 1.0, %v11767_v39  ;;  %v5161_v3 = vadd.f32 %v8268_v10, %v11203_v60  ;;  %v5035_v22 = vpop.f32.mrb[13].mxu0  ;;  %v11885_v14 = vld [vmem:[#allocation24_spill] sm:$0xff]  ;;  %v11887_v19 = vld [vmem:[#allocation14_spill] sm:$0xff] }
 0x248   : > { %v7440_v17 = vsel %vm6328_vm4, 1.0, %v11767_v39  ;;  %v6201_v42 = vadd.f32 %v7329_v18, %v11879_v5  ;;  %5414 = vst [vmem:[#allocation2 + $0x28] sm:$0xff] %v5382_v9  ;;  %vm5446_vm5 = vcmp.gt.f32.partialorder %v5382_v9, 1.0  ;;  %v5355_v15 = vadd.f32 %v11880_v4, %v5163_v47  ;;  %v11331_v16 = vpop.f32.mrb[14].mxu0  ;;  %v11886_v58 = vld [vmem:[#allocation28_spill] sm:$0xff]  ;;  %v11888_v10 = vld [vmem:[#allocation17_spill] sm:$0xff] }
 0x249   : > { %6294 = vst [vmem:[#allocation3 + $0x20] sm:$0xff] %v6262_v25  ;;  %vm6326_vm6 = vcmp.gt.f32.partialorder %v6262_v25, 1.0  ;;  %v7327_v6 = vsel %vm5446_vm5, 1.0, %v11767_v39  ;;  %v5353_v43 = vadd.f32 %v11881_v32, %v5161_v3  ;;  %v5164_v29 = vadd.f32 %v8269_v51, %v11203_v60  ;;  %v5038_v49 = vpop.f32.mrb[15].mxu0  ;;  %v11889_v9 = vld [vmem:[#allocation27_spill] sm:$0xff]  ;;  %v11890_v21 = vld [vmem:[#allocation33_spill] sm:$0xff] }
 0x24a   : > { %v7438_v2 = vsel %vm6326_vm6, 1.0, %v11767_v39  ;;  %v6233_v35 = vadd.f32 %v6201_v42, %v11882_v48  ;;  %v6199_v24 = vadd.f32 %v7327_v6, %v11883_v33  ;;  %v5387_v7 = vsub.f32 %v5355_v15, %v11884_v26  ;;  %v11894_v42 = vld [vmem:[#allocation32_spill] sm:$0xff]  ;;  %v11896_v26 = vld [vmem:[#allocation26_spill] sm:$0xff] }
 0x24b   : > { %v5385_v30 = vsub.f32 %v5353_v43, %v11885_v14  ;;  %v5356_v27 = vadd.f32 %v11886_v58, %v5164_v29  ;;  %v5162_v61 = vadd.f32 %v8270_v59, %v11203_v60  ;;  %v8271_v63 = vadd.f32 %v8225_v45, %v11154_v28  ;;  %v11891_v59 = vld [vmem:[#allocation15_spill] sm:$0xff]  ;;  %v11892_v45 = vld [vmem:[#allocation29_spill] sm:$0xff]  ;;  %v11895_v43 = vld [vmem:[#allocation20_spill] sm:$0xff] }
 0x24c   : > { %v6265_v41 = vsub.f32 %v6233_v35, %v11887_v19  ;;  %v6231_v57 = vadd.f32 %v6199_v24, %v11888_v10  ;;  %5419 = vst [vmem:[#allocation2 + $0x50] sm:$0xff] %v5387_v7  ;;  %vm5451_vm7 = vcmp.gt.f32.partialorder %v5387_v7, 1.0  ;;  %v8272_v51 = vadd.f32 %v5035_v22, %v11168_v20  ;;  %v11893_v20 = vld [vmem:[#allocation34_spill] sm:$0xff]  ;;  %v11897_v14 = vld [vmem:[#allocation36_spill] sm:$0xff] }
 0x24d   : > { %v7332_v34 = vsel %vm5451_vm7, 1.0, %v11767_v39  ;;  %5417 = vst [vmem:[#allocation2 + $0x40] sm:$0xff] %v5385_v30  ;;  %vm5449_vm8 = vcmp.gt.f32.partialorder %v5385_v30, 1.0  ;;  %v5388_v47 = vsub.f32 %v5356_v27, %v11889_v9  ;;  %v5354_v0 = vadd.f32 %v11890_v21, %v5162_v61  ;;  %v11898_v61 = vld [vmem:[#allocation23_spill] sm:$0xff] }
 0x24e   : > { %6297 = vst [vmem:[#allocation3 + $0x38] sm:$0xff] %v6265_v41  ;;  %vm6329_vm9 = vcmp.gt.f32.partialorder %v6265_v41, 1.0  ;;  %v6263_v28 = vsub.f32 %v6231_v57, %v11891_v59  ;;  %v6204_v25 = vadd.f32 %v7332_v34, %v11892_v45  ;;  %v7330_v18 = vsel %vm5449_vm8, 1.0, %v11767_v39  ;;  %v8229_v3 = vpop.f32.mrb[16].mxu0  ;;  %v11899_v34 = vld [vmem:[#allocation25_spill] sm:$0xff] }
 0x24f   : > { %v7441_v5 = vsel %vm6329_vm9, 1.0, %v11767_v39  ;;  %v6202_v22 = vadd.f32 %v7330_v18, %v11893_v20  ;;  %5420 = vst [vmem:[#allocation2 + $0x58] sm:$0xff] %v5388_v47  ;;  %vm5452_vm10 = vcmp.gt.f32.partialorder %v5388_v47, 1.0  ;;  %v5386_v4 = vsub.f32 %v5354_v0, %v11894_v42  ;;  %v8037_v15 = vpop.f32.mrb[16].mxu1  ;;  %v11356_v6 = vpop.f32.mrb[17].mxu0  ;;  %v11900_v47 = vld [vmem:[#allocation30_spill] sm:$0xff] }
 0x250   : > { %v7542_v32 = vpack.c.bf16 %v7441_v5, %v7440_v17  ;;  %6295 = vst [vmem:[#allocation3 + $0x28] sm:$0xff] %v6263_v28  ;;  %vm6327_vm11 = vcmp.gt.f32.partialorder %v6263_v28, 1.0  ;;  %v6236_v29 = vadd.f32 %v6204_v25, %v11895_v43  ;;  %v7333_v48 = vsel %vm5452_vm10, 1.0, %v11767_v39  ;;  %v11360_v35 = vpop.f32.mrb[17].mxu1  ;;  %v11362_v33 = vpop.f32.mrb[18].mxu0  ;;  %v11901_v0 = vld [vmem:[#allocation39_spill] sm:$0xff] }
 0x251   : > { %v7439_v24 = vsel %vm6327_vm11, 1.0, %v11767_v39  ;;  %v6234_v7 = vadd.f32 %v6202_v22, %v11896_v26  ;;  %v6205_v30 = vadd.f32 %v7333_v48, %v11897_v14  ;;  %5418 = vst [vmem:[#allocation2 + $0x48] sm:$0xff] %v5386_v4  ;;  %vm5450_vm12 = vcmp.gt.f32.partialorder %v5386_v4, 1.0  ;;  %v11367_v17 = vpop.f32.mrb[18].mxu1  ;;  %v11369_v58 = vpop.f32.mrb[19].mxu0  ;;  %v11903_v5 = vld [vmem:[#allocation31_spill] sm:$0xff] }
 0x252   : > { %7582 = vst [vmem:[%s8853_s7 + $0x18] sm:$0xff] %v7542_v32   ;;  %v7539_v27 = vpack.c.bf16 %v7439_v24, %v7438_v2  ;;  %v6268_v19 = vsub.f32 %v6236_v29, %v11898_v61  ;;  %v7331_v41 = vsel %vm5450_vm12, 1.0, %v11767_v39  ;;  %v5167_v10 = vadd.f32 %v8271_v63, %v11203_v60  ;;  %v11375_v57 = vpop.f32.mrb[19].mxu1  ;;  %v11902_v2 = vld [vmem:[#allocation38_spill] sm:$0xff]  ;;  %v11904_v22 = vld [vmem:[#allocation37_spill] sm:$0xff]  ;;  %v11905_v4 = vld [vmem:[#allocation40_spill] sm:$0xff] }
 0x253   : > { %v6266_v9 = vsub.f32 %v6234_v7, %v11899_v34  ;;  %v6237_v21 = vadd.f32 %v6205_v30, %v11900_v47  ;;  %v6203_v59 = vadd.f32 %v7331_v41, %v11901_v0  ;;  %v5165_v28 = vadd.f32 %v8272_v51, %v11203_v60  ;;  %v11906_v43 = vld [vmem:[#allocation44_spill] sm:$0xff]  ;;  %v11908_v30 = vld [vmem:[#allocation43_spill] sm:$0xff] }
 0x254   : > { %7581 = vst [vmem:[%s8853_s7 + $0x10] sm:$0xff] %v7539_v27   ;;  %6300 = vst [vmem:[#allocation3 + $0x50] sm:$0xff] %v6268_v19  ;;  %vm6332_vm13 = vcmp.gt.f32.partialorder %v6268_v19, 1.0  ;;  %v5359_v45 = vadd.f32 %v11902_v2, %v5167_v10  ;;  %v8273_v25 = vadd.f32 %v11331_v16, %v11176_v31  ;;  %v8274_v63 = vadd.f32 %v5038_v49, %v11184_v36  ;;  %v11907_v36 = vld [vmem:[#allocation35_spill] sm:$0xff]  ;;  %v11912_v2 = vld [vmem:[#allocation48_spill] sm:$0xff] }
 0x255   : > { %v7444_v18 = vsel %vm6332_vm13, 1.0, %v11767_v39  ;;  %6298 = vst [vmem:[#allocation3 + $0x40] sm:$0xff] %v6266_v9  ;;  %vm6330_vm14 = vcmp.gt.f32.partialorder %v6266_v9, 1.0  ;;  %v6269_v20 = vsub.f32 %v6237_v21, %v11903_v5  ;;  %v6235_v42 = vadd.f32 %v6203_v59, %v11904_v22  ;;  %v11909_v61 = vld [vmem:[#allocation47_spill] sm:$0xff]  ;;  %v11911_v59 = vld [vmem:[#allocation50_spill] sm:$0xff]  ;;  %v11913_v5 = vld [vmem:[#allocation53_spill] sm:$0xff] }
 0x256   : > { %v7442_v51 = vsel %vm6330_vm14, 1.0, %v11767_v39  ;;  %v5391_v32 = vsub.f32 %v5359_v45, %v11905_v4  ;;  %v5357_v29 = vadd.f32 %v11906_v43, %v5165_v28  ;;  %v5168_v48 = vadd.f32 %v8273_v25, %v11203_v60  ;;  %v11393_v24 = vpop.f32.mrb[20].mxu0 }
 0x257   : > { %6301 = vst [vmem:[#allocation3 + $0x58] sm:$0xff] %v6269_v20  ;;  %vm6333_vm15 = vcmp.gt.f32.partialorder %v6269_v20, 1.0  ;;  %v6267_v31 = vsub.f32 %v6235_v42, %v11907_v36  ;;  %v5166_v16 = vadd.f32 %v8274_v63, %v11203_v60  ;;  %v8275_v49 = vadd.f32 %v8229_v3, %v8037_v15  ;;  %v11397_v26 = vpop.f32.mrb[20].mxu1  ;;  %v11399_v7 = vpop.f32.mrb[21].mxu0  ;;  %v11910_v15 = vld [vmem:[#allocation54_spill] sm:$0xff] }
 0x258   : > { %v7445_v14 = vsel %vm6333_vm15, 1.0, %v11767_v39  ;;  %5423 = vst [vmem:[#allocation2 + $0x70] sm:$0xff] %v5391_v32  ;;  %vm5455_vm0 = vcmp.gt.f32.partialorder %v5391_v32, 1.0  ;;  %v5389_v27 = vsub.f32 %v5357_v29, %v11908_v30  ;;  %v5360_v19 = vadd.f32 %v11909_v61, %v5168_v48  ;;  %v11404_v41 = vpop.f32.mrb[21].mxu1  ;;  %v11406_v10 = vpop.f32.mrb[22].mxu0  ;;  %v11914_v42 = vld [vmem:[#allocation42_spill] sm:$0xff] }
 0x259   : > { %v7548_v34 = vpack.c.bf16 %v7445_v14, %v7444_v18  ;;  %6299 = vst [vmem:[#allocation3 + $0x48] sm:$0xff] %v6267_v31  ;;  %vm6331_vm1 = vcmp.gt.f32.partialorder %v6267_v31, 1.0  ;;  %v7336_v3 = vsel %vm5455_vm0, 1.0, %v11767_v39  ;;  %v5358_v9 = vadd.f32 %v11910_v15, %v5166_v16  ;;  %v11410_v47 = vpop.f32.mrb[22].mxu1  ;;  %v11412_v21 = vpop.f32.mrb[23].mxu0  ;;  %v11915_v32 = vld [vmem:[#allocation51_spill] sm:$0xff] }
 0x25a   : > { %v7443_v0 = vsel %vm6331_vm1, 1.0, %v11767_v39  ;;  %v6208_v28 = vadd.f32 %v7336_v3, %v11911_v59  ;;  %5421 = vst [vmem:[#allocation2 + $0x60] sm:$0xff] %v5389_v27  ;;  %vm5453_vm3 = vcmp.gt.f32.partialorder %v5389_v27, 1.0  ;;  %v5392_v45 = vsub.f32 %v5360_v19, %v11912_v2  ;;  %v11417_v25 = vpop.f32.mrb[23].mxu1  ;;  %v11917_v16 = vld [vmem:[#allocation41_spill] sm:$0xff]  ;;  %v11918_v14 = vld [vmem:[#allocation46_spill] sm:$0xff] }
 0x25b   : > { %7584 = vst [vmem:[%s8853_s7 + $0x28] sm:$0xff] %v7548_v34   ;;  %v7545_v63 = vpack.c.bf16 %v7443_v0, %v7442_v51  ;;  %v7334_v18 = vsel %vm5453_vm3, 1.0, %v11767_v39  ;;  %v5390_v20 = vsub.f32 %v5358_v9, %v11913_v5  ;;  %v5171_v22 = vadd.f32 %v8275_v49, %v11203_v60  ;;  %v11916_v51 = vld [vmem:[#allocation59_spill] sm:$0xff]  ;;  %v11919_v27 = vld [vmem:[#allocation57_spill] sm:$0xff]  ;;  %v11921_v3 = vld [vmem:[#allocation58_spill] sm:$0xff] }
 0x25c   : > { %v6240_v4 = vadd.f32 %v6208_v28, %v11914_v42  ;;  %v6206_v43 = vadd.f32 %v7334_v18, %v11915_v32  ;;  %5424 = vst [vmem:[#allocation2 + $0x78] sm:$0xff] %v5392_v45  ;;  %vm5456_vm4 = vcmp.gt.f32.partialorder %v5392_v45, 1.0  ;;  %v8276_v29 = vadd.f32 %v11356_v6, %v11360_v35  ;;  %v11920_v6 = vld [vmem:[#allocation62_spill] sm:$0xff]  ;;  %v11923_v2 = vld [vmem:[#allocation49_spill] sm:$0xff] }
 0x25d   : > { %7583 = vst [vmem:[%s8853_s7 + $0x20] sm:$0xff] %v7545_v63   ;;  %v7337_v48 = vsel %vm5456_vm4, 1.0, %v11767_v39  ;;  %5422 = vst [vmem:[#allocation2 + $0x68] sm:$0xff] %v5390_v20  ;;  %vm5454_vm5 = vcmp.gt.f32.partialorder %v5390_v20, 1.0  ;;  %v5363_v36 = vadd.f32 %v11916_v51, %v5171_v22  ;;  %v8277_v31 = vadd.f32 %v11362_v33, %v11367_v17  ;;  %v11922_v17 = vld [vmem:[#allocation45_spill] sm:$0xff]  ;;  %v11924_v22 = vld [vmem:[#allocation56_spill] sm:$0xff] }
 0x25e   : > { %v6272_v49 = vsub.f32 %v6240_v4, %v11917_v16  ;;  %v6238_v30 = vadd.f32 %v6206_v43, %v11918_v14  ;;  %v6209_v61 = vadd.f32 %v7337_v48, %v11919_v27  ;;  %v7335_v19 = vsel %vm5454_vm5, 1.0, %v11767_v39  ;;  %v11436_v34 = vpop.f32.mrb[24].mxu0  ;;  %v11925_v4 = vld [vmem:[#allocation64_spill] sm:$0xff]  ;;  %v11927_v51 = vld [vmem:[#allocation67_spill] sm:$0xff] }
 0x25f   : > { %v6207_v35 = vadd.f32 %v7335_v19, %v11920_v6  ;;  %v5395_v15 = vsub.f32 %v5363_v36, %v11921_v3  ;;  %v5169_v9 = vadd.f32 %v8276_v29, %v11203_v60  ;;  %v5172_v0 = vadd.f32 %v8277_v31, %v11203_v60  ;;  %v11442_v59 = vpop.f32.mrb[24].mxu1  ;;  %v11444_v33 = vpop.f32.mrb[25].mxu0  ;;  %v11926_v48 = vld [vmem:[#allocation52_spill] sm:$0xff] }
 0x260   : > { %6304 = vst [vmem:[#allocation3 + $0x70] sm:$0xff] %v6272_v49  ;;  %vm6336_vm6 = vcmp.gt.f32.partialorder %v6272_v49, 1.0  ;;  %v6270_v28 = vsub.f32 %v6238_v30, %v11922_v17  ;;  %v6241_v45 = vadd.f32 %v6209_v61, %v11923_v2  ;;  %v8278_v63 = vadd.f32 %v11369_v58, %v11375_v57  ;;  %v11450_v18 = vpop.f32.mrb[25].mxu1  ;;  %v11452_v5 = vpop.f32.mrb[26].mxu0  ;;  %v11928_v49 = vld [vmem:[#allocation55_spill] sm:$0xff]  ;;  %v11929_v30 = vld [vmem:[#allocation70_spill] sm:$0xff] }
 0x261   : > { %v7448_v20 = vsel %vm6336_vm6, 1.0, %v11767_v39  ;;  %v6239_v42 = vadd.f32 %v6207_v35, %v11924_v22  ;;  %5427 = vst [vmem:[#allocation2 + $0x90] sm:$0xff] %v5395_v15  ;;  %vm5459_vm7 = vcmp.gt.f32.partialorder %v5395_v15, 1.0  ;;  %v5361_v32 = vadd.f32 %v11925_v4, %v5169_v9  ;;  %v11457_v43 = vpop.f32.mrb[26].mxu1  ;;  %v11459_v29 = vpop.f32.mrb[27].mxu0  ;;  %v11930_v61 = vld [vmem:[#allocation63_spill] sm:$0xff] }
 0x262   : > { %6302 = vst [vmem:[#allocation3 + $0x60] sm:$0xff] %v6270_v28  ;;  %vm6334_vm8 = vcmp.gt.f32.partialorder %v6270_v28, 1.0  ;;  %v6273_v58 = vsub.f32 %v6241_v45, %v11926_v48  ;;  %v7340_v57 = vsel %vm5459_vm7, 1.0, %v11767_v39  ;;  %v5364_v36 = vadd.f32 %v11927_v51, %v5172_v0  ;;  %v11464_v31 = vpop.f32.mrb[27].mxu1  ;;  %v11931_v6 = vld [vmem:[#allocation68_spill] sm:$0xff]  ;;  %v11932_v0 = vld [vmem:[#allocation61_spill] sm:$0xff] }
 0x263   : > { %v7446_v16 = vsel %vm6334_vm8, 1.0, %v11767_v39  ;;  %v6271_v14 = vsub.f32 %v6239_v42, %v11928_v49  ;;  %v6212_v27 = vadd.f32 %v7340_v57, %v11929_v30  ;;  %v5393_v19 = vsub.f32 %v5361_v32, %v11930_v61  ;;  %v11934_v42 = vld [vmem:[#allocation72_spill] sm:$0xff]  ;;  %v11936_v51 = vld [vmem:[#allocation74_spill] sm:$0xff] }
 0x264   : > { %6305 = vst [vmem:[#allocation3 + $0x78] sm:$0xff] %v6273_v58  ;;  %vm6337_vm9 = vcmp.gt.f32.partialorder %v6273_v58, 1.0  ;;  %v5396_v35 = vsub.f32 %v5364_v36, %v11931_v6  ;;  %v5170_v3 = vadd.f32 %v8278_v63, %v11203_v60  ;;  %v8279_v15 = vadd.f32 %v11393_v24, %v11397_v26  ;;  %v11933_v26 = vld [vmem:[#allocation60_spill] sm:$0xff] }
 0x265   : > { %v7449_v9 = vsel %vm6337_vm9, 1.0, %v11767_v39  ;;  %6303 = vst [vmem:[#allocation3 + $0x68] sm:$0xff] %v6271_v14  ;;  %vm6335_vm10 = vcmp.gt.f32.partialorder %v6271_v14, 1.0  ;;  %v6244_v17 = vadd.f32 %v6212_v27, %v11932_v0  ;;  %5425 = vst [vmem:[#allocation2 + $0x80] sm:$0xff] %v5393_v19  ;;  %vm5457_vm11 = vcmp.gt.f32.partialorder %v5393_v19, 1.0  ;;  %v11937_v27 = vld [vmem:[#allocation66_spill] sm:$0xff] }
 0x266   : > { %v7554_v28 = vpack.c.bf16 %v7449_v9, %v7448_v20  ;;  %v7447_v2 = vsel %vm6335_vm10, 1.0, %v11767_v39  ;;  %v7338_v45 = vsel %vm5457_vm11, 1.0, %v11767_v39  ;;  %5428 = vst [vmem:[#allocation2 + $0x98] sm:$0xff] %v5396_v35  ;;  %vm5460_vm12 = vcmp.gt.f32.partialorder %v5396_v35, 1.0  ;;  %v11478_v63 = vpop.f32.mrb[28].mxu0  ;;  %v11935_v20 = vld [vmem:[#allocation75_spill] sm:$0xff] }
 0x267   : > { %v7551_v24 = vpack.c.bf16 %v7447_v2, %v7446_v16  ;;  %v6276_v22 = vsub.f32 %v6244_v17, %v11933_v26  ;;  %v6210_v4 = vadd.f32 %v7338_v45, %v11934_v42  ;;  %v7341_v32 = vsel %vm5460_vm12, 1.0, %v11767_v39  ;;  %v11483_v48 = vpop.f32.mrb[28].mxu1  ;;  %v11485_v58 = vpop.f32.mrb[29].mxu0  ;;  %v11939_v9 = vld [vmem:[#allocation73_spill] sm:$0xff]  ;;  %v11940_v17 = vld [vmem:[#allocation78_spill] sm:$0xff] }
 0x268   : > { %7586 = vst [vmem:[%s8853_s7 + $0x38] sm:$0xff] %v7554_v28   ;;  %v6213_v57 = vadd.f32 %v7341_v32, %v11935_v20  ;;  %v5362_v36 = vadd.f32 %v11936_v51, %v5170_v3  ;;  %v5175_v49 = vadd.f32 %v8279_v15, %v11203_v60  ;;  %v8280_v16 = vadd.f32 %v11399_v7, %v11404_v41  ;;  %v11493_v14 = vpop.f32.mrb[29].mxu1  ;;  %v11495_v30 = vpop.f32.mrb[30].mxu0  ;;  %v11938_v41 = vld [vmem:[#allocation69_spill] sm:$0xff]  ;;  %v11944_v20 = vld [vmem:[#allocation84_spill] sm:$0xff] }
 0x269   : > { %7585 = vst [vmem:[%s8853_s7 + $0x30] sm:$0xff] %v7551_v24   ;;  %6308 = vst [vmem:[#allocation3 + $0x90] sm:$0xff] %v6276_v22  ;;  %vm6340_vm13 = vcmp.gt.f32.partialorder %v6276_v22, 1.0  ;;  %v6242_v61 = vadd.f32 %v6210_v4, %v11937_v27  ;;  %v8281_v19 = vadd.f32 %v11406_v10, %v11410_v47  ;;  %v8282_v6 = vadd.f32 %v11412_v21, %v11417_v25  ;;  %v11503_v35 = vpop.f32.mrb[30].mxu1  ;;  %v11505_v3 = vpop.f32.mrb[31].mxu0  ;;  %v11941_v45 = vld [vmem:[#allocation65_spill] sm:$0xff] }
 0x26a   : > { %v7452_v7 = vsel %vm6340_vm13, 1.0, %v11767_v39  ;;  %v6245_v15 = vadd.f32 %v6213_v57, %v11938_v41  ;;  %v5394_v0 = vsub.f32 %v5362_v36, %v11939_v9  ;;  %v5367_v28 = vadd.f32 %v11940_v17, %v5175_v49  ;;  %v11511_v2 = vpop.f32.mrb[31].mxu1  ;;  %v11942_v25 = vld [vmem:[#allocation71_spill] sm:$0xff]  ;;  %v11945_v51 = vld [vmem:[#allocation88_spill] sm:$0xff]  ;;  %v11949_v9 = vld [vmem:[#allocation77_spill] sm:$0xff] }
 0x26b   : > { %v6274_v24 = vsub.f32 %v6242_v61, %v11941_v45  ;;  %v5173_v10 = vadd.f32 %v8280_v16, %v11203_v60  ;;  %v5176_v47 = vadd.f32 %v8281_v19, %v11203_v60  ;;  %v5174_v21 = vadd.f32 %v8282_v6, %v11203_v60  ;;  %v11943_v22 = vld [vmem:[#allocation79_spill] sm:$0xff]  ;;  %v11946_v16 = vld [vmem:[#allocation82_spill] sm:$0xff]  ;;  %v11950_v17 = vld [vmem:[#allocation89_spill] sm:$0xff] }
 0x26c   : > { %v6277_v26 = vsub.f32 %v6245_v15, %v11942_v25  ;;  %5426 = vst [vmem:[#allocation2 + $0x88] sm:$0xff] %v5394_v0  ;;  %vm5458_vm14 = vcmp.gt.f32.partialorder %v5394_v0, 1.0  ;;  %v5399_v42 = vsub.f32 %v5367_v28, %v11943_v22  ;;  %v8283_v4 = vadd.f32 %v11436_v34, %v11442_v59  ;;  %v11947_v59 = vld [vmem:[#allocation83_spill] sm:$0xff]  ;;  %v11951_v45 = vld [vmem:[#allocation93_spill] sm:$0xff]  ;;  %v11952_v25 = vld [vmem:[#allocation76_spill] sm:$0xff] }
 0x26d   : > { %6306 = vst [vmem:[#allocation3 + $0x80] sm:$0xff] %v6274_v24  ;;  %vm6338_vm15 = vcmp.gt.f32.partialorder %v6274_v24, 1.0  ;;  %v7339_v32 = vsel %vm5458_vm14, 1.0, %v11767_v39  ;;  %v5365_v57 = vadd.f32 %v11944_v20, %v5173_v10  ;;  %v5368_v36 = vadd.f32 %v11945_v51, %v5176_v47  ;;  %v11948_v6 = vld [vmem:[#allocation87_spill] sm:$0xff]  ;;  %v11953_v22 = vld [vmem:[#allocation81_spill] sm:$0xff]  ;;  %v11954_v20 = vld [vmem:[#allocation94_spill] sm:$0xff] }
 0x26e   : > { %v7450_v49 = vsel %vm6338_vm15, 1.0, %v11767_v39  ;;  %6309 = vst [vmem:[#allocation3 + $0x98] sm:$0xff] %v6277_v26  ;;  %vm6341_vm0 = vcmp.gt.f32.partialorder %v6277_v26, 1.0  ;;  %v6211_v27 = vadd.f32 %v7339_v32, %v11946_v16  ;;  %5431 = vst [vmem:[#allocation2 + $0xb0] sm:$0xff] %v5399_v42  ;;  %vm5463_vm1 = vcmp.gt.f32.partialorder %v5399_v42, 1.0 }
 0x26f   : > { %v7453_v61 = vsel %vm6341_vm0, 1.0, %v11767_v39  ;;  %v7344_v34 = vsel %vm5463_vm1, 1.0, %v11767_v39  ;;  %v5397_v19 = vsub.f32 %v5365_v57, %v11947_v59  ;;  %v5400_v41 = vsub.f32 %v5368_v36, %v11948_v6  ;;  %v11955_v57 = vld [vmem:[#allocation97_spill] sm:$0xff]  ;;  %v11956_v36 = vld [vmem:[#allocation92_spill] sm:$0xff] }
 0x270   : > { %v7560_v15 = vpack.c.bf16 %v7453_v61, %v7452_v7  ;;  %v6243_v0 = vadd.f32 %v6211_v27, %v11949_v9  ;;  %v6216_v28 = vadd.f32 %v7344_v34, %v11950_v17  ;;  %v5366_v24 = vadd.f32 %v11951_v45, %v5174_v21  ;;  %v11957_v27 = vld [vmem:[#allocation98_spill] sm:$0xff]  ;;  %v11961_v17 = vld [vmem:[#allocation99_spill] sm:$0xff] }
 0x271   : > { %5429 = vst [vmem:[#allocation2 + $0xa0] sm:$0xff] %v5397_v19  ;;  %vm5461_vm3 = vcmp.gt.f32.partialorder %v5397_v19, 1.0  ;;  %5432 = vst [vmem:[#allocation2 + $0xb8] sm:$0xff] %v5400_v41  ;;  %vm5464_vm4 = vcmp.gt.f32.partialorder %v5400_v41, 1.0  ;;  %v5179_v10 = vadd.f32 %v8283_v4, %v11203_v60  ;;  %v8284_v47 = vadd.f32 %v11444_v33, %v11450_v18  ;;  %v11958_v33 = vld [vmem:[#allocation80_spill] sm:$0xff]  ;;  %v11959_v19 = vld [vmem:[#allocation86_spill] sm:$0xff] }
 0x272   : > { %7588 = vst [vmem:[%s8853_s7 + $0x48] sm:$0xff] %v7560_v15   ;;  %v6275_v26 = vsub.f32 %v6243_v0, %v11952_v25  ;;  %v6248_v7 = vadd.f32 %v6216_v28, %v11953_v22  ;;  %v7342_v42 = vsel %vm5461_vm3, 1.0, %v11767_v39  ;;  %v7345_v32 = vsel %vm5464_vm4, 1.0, %v11767_v39  ;;  %v11960_v41 = vld [vmem:[#allocation91_spill] sm:$0xff] }
 0x273   : > { %v6214_v21 = vadd.f32 %v7342_v42, %v11954_v20  ;;  %v6217_v51 = vadd.f32 %v7345_v32, %v11955_v57  ;;  %v5398_v16 = vsub.f32 %v5366_v24, %v11956_v36  ;;  %v5371_v4 = vadd.f32 %v11957_v27, %v5179_v10  ;;  %v11962_v24 = vld [vmem:[#allocation85_spill] sm:$0xff]  ;;  %v11966_v42 = vld [vmem:[#allocation96_spill] sm:$0xff]  ;;  %v11967_v36 = vld [vmem:[#allocation103_spill] sm:$0xff] }
 0x274   : > { %6307 = vst [vmem:[#allocation3 + $0x88] sm:$0xff] %v6275_v26  ;;  %vm6339_vm5 = vcmp.gt.f32.partialorder %v6275_v26, 1.0  ;;  %v6280_v18 = vsub.f32 %v6248_v7, %v11958_v33  ;;  %v5177_v61 = vadd.f32 %v8284_v47, %v11203_v60  ;;  %v8285_v34 = vadd.f32 %v11452_v5, %v11457_v43  ;;  %v11963_v5 = vld [vmem:[#allocation90_spill] sm:$0xff]  ;;  %v11964_v47 = vld [vmem:[#allocation101_spill] sm:$0xff] }
 0x275   : > { %v7451_v59 = vsel %vm6339_vm5, 1.0, %v11767_v39  ;;  %v6246_v6 = vadd.f32 %v6214_v21, %v11959_v19  ;;  %v6249_v15 = vadd.f32 %v6217_v51, %v11960_v41  ;;  %5430 = vst [vmem:[#allocation2 + $0xa8] sm:$0xff] %v5398_v16  ;;  %vm5462_vm6 = vcmp.gt.f32.partialorder %v5398_v16, 1.0  ;;  %v11965_v26 = vld [vmem:[#allocation105_spill] sm:$0xff] }
 0x276   : > { %v7557_v9 = vpack.c.bf16 %v7451_v59, %v7450_v49  ;;  %6312 = vst [vmem:[#allocation3 + $0xb0] sm:$0xff] %v6280_v18  ;;  %vm6344_vm7 = vcmp.gt.f32.partialorder %v6280_v18, 1.0  ;;  %v7343_v0 = vsel %vm5462_vm6, 1.0, %v11767_v39  ;;  %v5403_v28 = vsub.f32 %v5371_v4, %v11961_v17  ;;  %v11968_v4 = vld [vmem:[#allocation95_spill] sm:$0xff] }
 0x277   : > { %v7456_v45 = vsel %vm6344_vm7, 1.0, %v11767_v39  ;;  %v6278_v10 = vsub.f32 %v6246_v6, %v11962_v24  ;;  %v6281_v43 = vsub.f32 %v6249_v15, %v11963_v5  ;;  %v6215_v25 = vadd.f32 %v7343_v0, %v11964_v47  ;;  %v11971_v6 = vld [vmem:[#allocation112_spill] sm:$0xff] }
 0x278   : > { %7587 = vst [vmem:[%s8853_s7 + $0x40] sm:$0xff] %v7557_v9   ;;  %5435 = vst [vmem:[#allocation2 + $0xd0] sm:$0xff] %v5403_v28  ;;  %vm5467_vm8 = vcmp.gt.f32.partialorder %v5403_v28, 1.0  ;;  %v5369_v22 = vadd.f32 %v11965_v26, %v5177_v61  ;;  %v5180_v49 = vadd.f32 %v8285_v34, %v11203_v60  ;;  %v8286_v7 = vadd.f32 %v11459_v29, %v11464_v31  ;;  %v11969_v31 = vld [vmem:[#allocation110_spill] sm:$0xff]  ;;  %v11972_v0 = vld [vmem:[#allocation100_spill] sm:$0xff] }
 0x279   : > { %6310 = vst [vmem:[#allocation3 + $0xa0] sm:$0xff] %v6278_v10  ;;  %vm6342_vm9 = vcmp.gt.f32.partialorder %v6278_v10, 1.0  ;;  %6313 = vst [vmem:[#allocation3 + $0xb8] sm:$0xff] %v6281_v43  ;;  %vm6345_vm10 = vcmp.gt.f32.partialorder %v6281_v43, 1.0  ;;  %v6247_v32 = vadd.f32 %v6215_v25, %v11966_v42  ;;  %v7348_v20 = vsel %vm5467_vm8, 1.0, %v11767_v39  ;;  %v11970_v61 = vld [vmem:[#allocation102_spill] sm:$0xff] }
 0x27a   : > { %v7454_v21 = vsel %vm6342_vm9, 1.0, %v11767_v39  ;;  %v7457_v57 = vsel %vm6345_vm10, 1.0, %v11767_v39  ;;  %v6220_v51 = vadd.f32 %v7348_v20, %v11149_v52  ;;  %v5401_v16 = vsub.f32 %v5369_v22, %v11967_v36  ;;  %v11973_v28 = vld [vmem:[#allocation114_spill] sm:$0xff]  ;;  %v11975_v10 = vld [vmem:[#allocation109_spill] sm:$0xff]  ;;  %v11976_v43 = vld [vmem:[#allocation119_spill] sm:$0xff] }
 0x27b   : > { %v7566_v27 = vpack.c.bf16 %v7457_v57, %v7456_v45  ;;  %v6279_v29 = vsub.f32 %v6247_v32, %v11968_v4  ;;  %v5372_v33 = vadd.f32 %v11969_v31, %v5180_v49  ;;  %v5178_v18 = vadd.f32 %v8286_v7, %v11203_v60  ;;  %v11977_v26 = vld [vmem:[#allocation120_spill] sm:$0xff]  ;;  %v11978_v42 = vld [vmem:[#allocation106_spill] sm:$0xff]  ;;  %v11982_v36 = vld [vmem:[#allocation125_spill] sm:$0xff] }
 0x27c   : > { %v6252_v34 = vadd.f32 %v6220_v51, %v11970_v61  ;;  %5433 = vst [vmem:[#allocation2 + $0xc0] sm:$0xff] %v5401_v16  ;;  %vm5465_vm11 = vcmp.gt.f32.partialorder %v5401_v16, 1.0  ;;  %v8287_v59 = vadd.f32 %v11478_v63, %v11483_v48  ;;  %v8288_v19 = vadd.f32 %v11485_v58, %v11493_v14  ;;  %v11974_v58 = vld [vmem:[#allocation116_spill] sm:$0xff] }
 0x27d   : > { %7590 = vst [vmem:[%s8853_s7 + $0x58] sm:$0xff] %v7566_v27   ;;  %6311 = vst [vmem:[#allocation3 + $0xa8] sm:$0xff] %v6279_v29  ;;  %vm6343_vm12 = vcmp.gt.f32.partialorder %v6279_v29, 1.0  ;;  %v7346_v52 = vsel %vm5465_vm11, 1.0, %v11767_v39  ;;  %v5404_v41 = vsub.f32 %v5372_v33, %v11971_v6  ;;  %v5370_v15 = vadd.f32 %v11166_v37, %v5178_v18  ;;  %v11984_v27 = vld [vmem:[#allocation118_spill] sm:$0xff] }
 0x27e   : > { %v7455_v9 = vsel %vm6343_vm12, 1.0, %v11767_v39  ;;  %v6284_v17 = vsub.f32 %v6252_v34, %v11972_v0  ;;  %v6218_v45 = vadd.f32 %v7346_v52, %v11973_v28  ;;  %v5183_v63 = vadd.f32 %v8287_v59, %v11203_v60  ;;  %v11986_v34 = vld [vmem:[#allocation124_spill] sm:$0xff]  ;;  %v11989_v0 = vld [vmem:[#allocation127_spill] sm:$0xff] }
 0x27f   : > { %v7563_v48 = vpack.c.bf16 %v7455_v9, %v7454_v21  ;;  %5436 = vst [vmem:[#allocation2 + $0xd8] sm:$0xff] %v5404_v41  ;;  %vm5468_vm13 = vcmp.gt.f32.partialorder %v5404_v41, 1.0  ;;  %v5402_v14 = vsub.f32 %v5370_v15, %v11974_v58  ;;  %v5181_v24 = vadd.f32 %v8288_v19, %v11203_v60  ;;  %v11979_v21 = vld [vmem:[#allocation121_spill] sm:$0xff]  ;;  %v11987_v19 = vld [vmem:[#allocation128_spill] sm:$0xff]  ;;  %v11988_v15 = vld [vmem:[#allocation123_spill] sm:$0xff] }
 0x280   : > { %6316 = vst [vmem:[#allocation3 + $0xd0] sm:$0xff] %v6284_v17  ;;  %v6250_v5 = vadd.f32 %v6218_v45, %v11975_v10  ;;  %v7349_v37 = vsel %vm5468_vm13, 1.0, %v11767_v39  ;;  %v5375_v47 = vadd.f32 %v11976_v43, %v5183_v63  ;;  %v5940_v25 = vrot.slane %v5939_v50, 4  ;;  %v11980_v50 = vld [vmem:[#allocation113_spill] sm:$0xff]  ;;  %v11990_v58 = vld [vmem:[#allocation126_spill] sm:$0xff] }
 0x281   : > { %7589 = vst [vmem:[%s8853_s7 + $0x50] sm:$0xff] %v7563_v48   ;;  %v6221_v22 = vadd.f32 %v7349_v37, %v11977_v26  ;;  %5434 = vst [vmem:[#allocation2 + $0xc8] sm:$0xff] %v5402_v14  ;;  %vm5466_vm14 = vcmp.gt.f32.partialorder %v5402_v14, 1.0  ;;  %v5373_v49 = vadd.f32 %v11209_v54, %v5181_v24  ;;  %v6033_v7 = vunpack.c.l.bf16 %v5969_v46  ;;  %v11981_v54 = vld [vmem:[#allocation122_spill] sm:$0xff] }
 0x282   : > { %v6282_v32 = vsub.f32 %v6250_v5, %v11978_v42  ;;  %v7347_v20 = vsel %vm5466_vm14, 1.0, %v11767_v39  ;;  %v5407_v55 = vsub.f32 %v5375_v47, %v11979_v21  ;;  %v8289_v56 = vadd.f32 %v11495_v30, %v11503_v35  ;;  %v11983_v30 = vld [vmem:[#allocation115_spill] sm:$0xff] }
 0x283   : > { %vm6097_vm15 = vcmp.gt.f32.partialorder %v11228_v44, 1.0  ;;  %v6253_v57 = vadd.f32 %v6221_v22, %v11980_v50  ;;  %v6219_v51 = vadd.f32 %v7347_v20, %v11981_v54  ;;  %v5405_v16 = vsub.f32 %v5373_v49, %v11982_v36 }
 0x284   : > { %v8290_v12 = vadd.f32 %v11505_v3, %v11511_v2  ;;  %vm6348_vm0 = vcmp.gt.f32.partialorder %v6284_v17, 1.0  ;;  %6314 = vst [vmem:[#allocation3 + $0xc0] sm:$0xff] %v6282_v32  ;;  %5439 = vst [vmem:[#allocation2 + $0xf0] sm:$0xff] %v5407_v55  ;;  %vm5471_vm1 = vcmp.gt.f32.partialorder %v5407_v55, 1.0  ;;  %v5184_v11 = vadd.f32 %v8289_v56, %v11203_v60 }
 0x285   : > { %v5945_v46 = vsel %vm8990_vm2, %v5940_v25, %v11273_v1  ;;  %vm6346_vm3 = vcmp.gt.f32.partialorder %v6282_v32, 1.0  ;;  %v6285_v35 = vsub.f32 %v6253_v57, %v11983_v30  ;;  %v6251_v4 = vadd.f32 %v6219_v51, %v11984_v27  ;;  %5437 = vst [vmem:[#allocation2 + $0xe0] sm:$0xff] %v5405_v16 }
 0x286   : > { %v7352_v29 = vsel %vm5471_vm1, 1.0, %v11767_v39  ;;  %vm5469_vm4 = vcmp.gt.f32.partialorder %v5405_v16, 1.0  ;;  %v5376_v2 = vadd.f32 %v11219_v62, %v5184_v11  ;;  %v5182_v31 = vadd.f32 %v8290_v12, %v11203_v60 }
 0x287   : > { %v6224_v3 = vadd.f32 %v7352_v29, %v11251_v53  ;;  %v7460_v33 = vsel %vm6348_vm0, 1.0, %v11767_v39  ;;  %6317 = vst [vmem:[#allocation3 + $0xd8] sm:$0xff] %v6285_v35  ;;  %vm6349_vm5 = vcmp.gt.f32.partialorder %v6285_v35, 1.0  ;;  %v6283_v1 = vsub.f32 %v6251_v4, %v11985_v38 }
 0x288   : > { %v7350_v18 = vsel %vm5469_vm4, 1.0, %v11767_v39  ;;  %v7461_v61 = vsel %vm6349_vm5, 1.0, %v11767_v39  ;;  %v5408_v52 = vsub.f32 %v5376_v2, %v11987_v19  ;;  %v7458_v60 = vsel %vm6346_vm3, 1.0, %v11767_v39 }
 0x289   : > { %v6256_v59 = vadd.f32 %v6224_v3, %v11986_v34  ;;  %v6222_v53 = vadd.f32 %v7350_v18, %v11259_v13  ;;  %v7572_v62 = vpack.c.bf16 %v7461_v61, %v7460_v33  ;;  %6315 = vst [vmem:[#allocation3 + $0xc8] sm:$0xff] %v6283_v1  ;;  %vm6347_vm2 = vcmp.gt.f32.partialorder %v6283_v1, 1.0  ;;  %v6063_v13 = vld [vmem:[#allocation3 + $0xe8] sm:$0xff] }
 0x28a   : > { %v5374_v6 = vadd.f32 %v11261_v8, %v5182_v31  ;;  %v7459_v41 = vsel %vm6347_vm2, 1.0, %v11767_v39  ;;  %5440 = vst [vmem:[#allocation2 + $0xf8] sm:$0xff] %v5408_v52  ;;  %vm5472_vm6 = vcmp.gt.f32.partialorder %v5408_v52, 1.0  ;;  %v6031_v48 = vunpack.c.l.bf16 %v5945_v46 }
 0x28b   : > { %v6288_v9 = vsub.f32 %v6256_v59, %v11988_v15  ;;  %v6254_v17 = vadd.f32 %v6222_v53, %v11989_v0  ;;  %7592 = vst [vmem:[%s8853_s7 + $0x68] sm:$0xff] %v7572_v62   ;;  %v7569_v28 = vpack.c.bf16 %v7459_v41, %v7458_v60  ;;  %v7353_v45 = vsel %vm5472_vm6, 1.0, %v11767_v39 }
 0x28c   : > { %v5406_v63 = vsub.f32 %v5374_v6, %v11255_v40  ;;  %v6225_v8 = vadd.f32 %v7353_v45, %v6033_v7  ;;  %v7433_v24 = vsel %vm6097_vm15, 1.0, %v11767_v39  ;;  %vm6095_vm8 = vcmp.gt.f32.partialorder %v6063_v13, 1.0 }
 0x28d   : > { %6320 = vst [vmem:[#allocation3 + $0xf0] sm:$0xff] %v6288_v9  ;;  %v6286_v14 = vsub.f32 %v6254_v17, %v11990_v58  ;;  %7591 = vst [vmem:[%s8853_s7 + $0x60] sm:$0xff] %v7569_v28   ;;  %v6191_v10 = vmul.f32 0.9, %v6063_v13  ;;  %vm6352_vm9 = vcmp.gt.f32.partialorder %v6288_v9, 1.0  ;;  %v7431_v47 = vsel %vm6095_vm8, 1.0, %v11767_v39 }
 0x28e   : > { %5438 = vst [vmem:[#allocation2 + $0xe8] sm:$0xff] %v5406_v63  ;;  %vm5470_vm7 = vcmp.gt.f32.partialorder %v5406_v63, 1.0  ;;  %v6257_v5 = vadd.f32 %v6225_v8, %v11247_v23  ;;  %v7464_v44 = vsel %vm6352_vm9, 1.0, %v11767_v39 }
 0x28f   : > { %6318 = vst [vmem:[#allocation3 + $0xe0] sm:$0xff] %v6286_v14  ;;  %v7351_v37 = vsel %vm5470_vm7, 1.0, %v11767_v39  ;;  %vm6350_vm11 = vcmp.gt.f32.partialorder %v6286_v14, 1.0 }
 0x290   : > { %v6223_v40 = vadd.f32 %v7351_v37, %v6031_v48  ;;  %v6289_v43 = vsub.f32 %v6257_v5, %v7433_v24  ;;  %v7462_v23 = vsel %vm6350_vm11, 1.0, %v11767_v39 }
 0x292   : > { %v6255_v25 = vadd.f32 %v6223_v40, %v6191_v10  ;;  %6321 = vst [vmem:[#allocation3 + $0xf8] sm:$0xff] %v6289_v43  ;;  %vm6353_vm10 = vcmp.gt.f32.partialorder %v6289_v43, 1.0 }
 0x293   : > { %v7465_v26 = vsel %vm6353_vm10, 1.0, %v11767_v39 }
 0x294   : > { %v6287_v22 = vsub.f32 %v6255_v25, %v7431_v47  ;;  %v7578_v49 = vpack.c.bf16 %v7465_v26, %v7464_v44 }
 0x296   : > { %6319 = vst [vmem:[#allocation3 + $0xe8] sm:$0xff] %v6287_v22  ;;  %vm6351_vm12 = vcmp.gt.f32.partialorder %v6287_v22, 1.0  ;;  %7594 = vst [vmem:[%s8853_s7 + $0x78] sm:$0xff] %v7578_v49  }
 0x297   : > { %v7463_v7 = vsel %vm6351_vm12, 1.0, %v11767_v39 }
 0x298   : > { %v7575_v42 = vpack.c.bf16 %v7463_v7, %v7462_v23 }
 0x29a   : > { %7593 = vst [vmem:[%s8853_s7 + $0x70] sm:$0xff] %v7575_v42  }
 0x29b PF: > { %s14_s19 = sadd.s32 1, %s8787_s19   ;;  %s11991_s15 = smov %s8779_s17 }
 0x29c   : > { %p11_p8 = scmp.ge.s32.totalorder %s14_s19, 10   ;;  %s11992_s16 = smov %s8783_s18 }
 0x29d   : > { %s11993_s17 = smov %s11996_s20  ;;  %s11994_s18 = smov %s12000_s21 }
 0x29e   :  { %13 = sbr.rel (!%p11_p8) target bundleno = 3 (0x3), region = 84 }

</bundles_post_ra>
